<compile_context>
chip_gen: v7x
topology: tpu7x:2x2x1
jax: 0.10.0
libtpu: 0.0.40
codegen_flags: <defaults>
</compile_context>

<pallas_src>
import functools

import jax
import jax.numpy as jnp
from jax.experimental import pallas as pl
from jax.experimental.pallas import tpu as pltpu

IMG_H = 32          # small stand-in for 224 (must be divisible by 32)
IMG_W = IMG_H
LATENT_DIM = 1000   # module default
OUT_CHANNELS = 128  # module default (required for the flatten-dim identity)
NEG_SLOPE = 0.01    # nn.LeakyReLU() default
BN_EPS = 1e-5       # nn.BatchNorm2d default


# ----------------------------- Pallas kernels --------------------------------
def _mm_kernel(x_ref, w_ref, b_ref, o_ref, *, apply_act):
    """o = [leaky](x @ w + b).  BN (if any) is pre-folded into w/b.

    Accumulates directly into the resident f32 output block (no VMEM scratch).
    Grid = (Mi, Nj, Kk) with the reduction axis last.
    """
    k = pl.program_id(2)

    @pl.when(k == 0)
    def _():
        o_ref[...] = jnp.zeros_like(o_ref)

    o_ref[...] += jnp.dot(x_ref[...], w_ref[...],
                          preferred_element_type=jnp.float32)

    @pl.when(k == pl.num_programs(2) - 1)
    def _():
        y = o_ref[...] + b_ref[...]
        if apply_act:
            y = jnp.where(y >= 0, y, NEG_SLOPE * y)
        o_ref[...] = y


def _mm_act_bn_kernel(x_ref, w_ref, b_ref, s_ref, t_ref, o_ref):
    """o = leaky(x @ w + b) * scale + shift   (conv -> act -> BN, last conv)."""
    k = pl.program_id(2)

    @pl.when(k == 0)
    def _():
        o_ref[...] = jnp.zeros_like(o_ref)

    o_ref[...] += jnp.dot(x_ref[...], w_ref[...],
                          preferred_element_type=jnp.float32)

    @pl.when(k == pl.num_programs(2) - 1)
    def _():
        y = o_ref[...] + b_ref[...]
        y = jnp.where(y >= 0, y, NEG_SLOPE * y)
        o_ref[...] = y * s_ref[...] + t_ref[...]


def _first_conv_kernel(x_ref, w_ref, b_ref, o_ref):
    """Layer 0 (Ci=1, K=4): 4 rank-1 VPU FMAs + bias + LeakyReLU (no MXU)."""
    acc = jnp.zeros(o_ref.shape, jnp.float32) + b_ref[...]          # (tm, Co)
    for k in range(4):                                              # static unroll
        acc = acc + x_ref[:, k:k + 1] * w_ref[k:k + 1, :]           # (tm,1)*(1,Co)
    o_ref[...] = jnp.where(acc >= 0, acc, NEG_SLOPE * acc)


# ------------------------------ Pallas wrappers -------------------------------
def _pick_tile(dim, candidates):
    for c in candidates:
        if dim % c == 0:
            return c
    return dim  # fallback: full (block dim == array dim is always legal)


def fused_matmul(x, w, bias, *, scale=None, shift=None, apply_act=True):
    """x: (M, K) bf16, w: (K, N) bf16, bias/scale/shift: (N,) f32 -> (M, N) f32."""
    M, K = x.shape
    K2, N = w.shape
    assert K == K2
    assert N % 128 == 0, f"output dim must be lane-dense, got N={N}"

    tm = _pick_tile(M, (512, 256, 128, 64, 32, 16, 8))
    tk = _pick_tile(K, (1024, 512, 256, 128))
    tn = _pick_tile(N, (512, 256, 128))
    grid = (M // tm, N // tn, K // tk)

    in_specs = [
        pl.BlockSpec((tm, tk), lambda i, j, k: (i, k)),    # activations
        pl.BlockSpec((tk, tn), lambda i, j, k: (k, j)),    # weights
        pl.BlockSpec((1, tn), lambda i, j, k: (0, j)),     # bias
    ]
    args = [x, w, bias.reshape(1, N)]
    if scale is not None:
        in_specs += [pl.BlockSpec((1, tn), lambda i, j, k: (0, j)),
                     pl.BlockSpec((1, tn), lambda i, j, k: (0, j))]
        args += [scale.reshape(1, N), shift.reshape(1, N)]
        kernel = _mm_act_bn_kernel
    else:
        kernel = functools.partial(_mm_kernel, apply_act=apply_act)

    return pl.pallas_call(
        kernel,
        out_shape=jax.ShapeDtypeStruct((M, N), jnp.float32),
        grid_spec=pltpu.PrefetchScalarGridSpec(
            num_scalar_prefetch=0,
            grid=grid,
            in_specs=in_specs,
            out_specs=pl.BlockSpec((tm, tn), lambda i, j, k: (i, j)),
        ),
        compiler_params=pltpu.CompilerParams(
            dimension_semantics=("parallel", "parallel", "arbitrary")),
    )(*args)


def first_conv(patches, w, bias):
    """patches: (M, 4) f32, w: (4, Co) f32 (BN folded), bias: (Co,) f32."""
    M, K = patches.shape
    assert K == 4
    _, N = w.shape
    tm = _pick_tile(M, (1024, 512, 256, 128, 64, 32, 16, 8))
    return pl.pallas_call(
        _first_conv_kernel,
        out_shape=jax.ShapeDtypeStruct((M, N), jnp.float32),
        grid_spec=pltpu.PrefetchScalarGridSpec(
            num_scalar_prefetch=0,
            grid=(M // tm,),
            in_specs=[
                pl.BlockSpec((tm, K), lambda i: (i, 0)),
                pl.BlockSpec((K, N), lambda i: (0, 0)),
                pl.BlockSpec((1, N), lambda i: (0, 0)),
            ],
            out_specs=pl.BlockSpec((tm, N), lambda i: (i, 0)),
        ),
        compiler_params=pltpu.CompilerParams(
            dimension_semantics=("parallel",)),
    )(patches, w, bias.reshape(1, N))


# ------------------------------- glue (JAX) -----------------------------------
def _space_to_depth(x_nhwc, k=2):
    """Non-overlapping k x k patches (stride==kernel==k, no padding)."""
    B, H, W, C = x_nhwc.shape
    x = x_nhwc.reshape(B, H // k, k, W // k, k, C)
    x = x.transpose(0, 1, 3, 2, 4, 5)              # (B, Ho, Wo, kh, kw, C)
    return x.reshape(B * (H // k) * (W // k), k * k * C), (B, H // k, W // k)


def prepare_params(params):
    """One-time weight prep: matmul layout, BN folding, bf16 cast, lane padding,
    and folding the NCHW-flatten permutation + transpose into the linear weight."""
    conv_prepared = []
    n_conv = len(params["conv"])
    for i, (w, b, gamma, beta, mean, var) in enumerate(params["conv"]):
        Co, Ci, kh, kw = w.shape
        w_mat = jnp.transpose(w, (2, 3, 1, 0)).reshape(kh * kw * Ci, Co)
        scale = gamma / jnp.sqrt(var + BN_EPS)     # eval-mode BatchNorm
        shift = beta - mean * scale
        if i < n_conv - 1:
            # conv -> BN -> (dropout=id) -> act : fold BN into weights/bias.
            w_mat = w_mat * scale[None, :]
            b_eff = b * scale + shift
            if i == 0:                              # VPU path stays f32
                conv_prepared.append((w_mat, b_eff))
            else:
                conv_prepared.append((w_mat.astype(jnp.bfloat16), b_eff))
        else:
            # conv -> act -> BN : BN must stay after the activation.
            conv_prepared.append((w_mat.astype(jnp.bfloat16), b, scale, shift))

    w_lin, b_lin = params["linear"]                 # (latent, Co*Ho*Wo), NCHW order
    latent, in_dim = w_lin.shape
    Co = OUT_CHANNELS * 8
    Ho = Wo = IMG_H // 32
    assert in_dim == Co * Ho * Wo == IMG_H * IMG_W
    # Fold transpose + NCHW-flatten permutation into the weight rows so the
    # NHWC conv output can be flattened with a pure reshape.
    w_t = (w_lin.reshape(latent, Co, Ho, Wo)
                .transpose(2, 3, 1, 0)
                .reshape(Ho * Wo * Co, latent))
    # Pad latent 1000 -> 1024 so output stores are lane-dense.
    n_pad = (-latent) % 128
    w_t = jnp.pad(w_t, ((0, 0), (0, n_pad))).astype(jnp.bfloat16)
    b_pad = jnp.pad(b_lin, (0, n_pad))
    return {"conv": conv_prepared, "linear": (w_t, b_pad)}


def encoder_forward(x_nchw, prepared):
    B = x_nchw.shape[0]
    x = x_nchw.reshape(B, 1, IMG_H, IMG_W)          # matches x.view(-1, 1, H, W)
    x = x.transpose(0, 2, 3, 1)                     # NCHW -> NHWC
    n_conv = len(prepared["conv"])
    for i, p in enumerate(prepared["conv"]):
        patches, (Bp, Ho, Wo) = _space_to_depth(x)
        if i == 0:
            y = first_conv(patches, p[0], p[1])                       # VPU path
        elif i < n_conv - 1:
            y = fused_matmul(patches.astype(jnp.bfloat16), p[0], p[1],
                             apply_act=True)                          # bn folded
        else:
            y = fused_matmul(patches.astype(jnp.bfloat16), p[0], p[1],
                             scale=p[2], shift=p[3])                  # act -> BN
        x = y.reshape(Bp, Ho, Wo, -1)
    # NHWC flatten; NCHW permutation is already folded into the linear weight.
    x = x.reshape(B, -1)
    w_lin, b_lin = prepared["linear"]
    out = fused_matmul(x.astype(jnp.bfloat16), w_lin, b_lin, apply_act=False)
    return out[:, :LATENT_DIM]


def encoder_reference(x_nchw, params):
    """Pure-JAX f32 reference matching eval-mode PyTorch semantics."""
    B = x_nchw.shape[0]
    x = x_nchw.reshape(B, 1, IMG_H, IMG_W).transpose(0, 2, 3, 1)
    n_conv = len(params["conv"])
    for i, (w, b, gamma, beta, mean, var) in enumerate(params["conv"]):
        Co, Ci, kh, kw = w.shape
        w_mat = jnp.transpose(w, (2, 3, 1, 0)).reshape(kh * kw * Ci, Co)
        scale = gamma / jnp.sqrt(var + BN_EPS)
        shift = beta - mean * scale
        patches, (Bp, Ho, Wo) = _space_to_depth(x)
        y = patches @ w_mat + b
        if i < n_conv - 1:
            y = y * scale + shift
            y = jnp.where(y >= 0, y, NEG_SLOPE * y)
        else:
            y = jnp.where(y >= 0, y, NEG_SLOPE * y)
            y = y * scale + shift
        x = y.reshape(Bp, Ho, Wo, Co)
    x = x.transpose(0, 3, 1, 2).reshape(B, -1)      # NCHW flatten
    w_lin, b_lin = params["linear"]
    return x @ w_lin.T + b_lin


def init_params(key):
    chans = [1, OUT_CHANNELS, OUT_CHANNELS * 2, OUT_CHANNELS * 4,
             OUT_CHANNELS * 8, OUT_CHANNELS * 8]
    conv_params = []
    for i in range(5):
        ci, co = chans[i], chans[i + 1]
        key, kw_, kb_, kg_, kbt_, km_, kv_ = jax.random.split(key, 7)
        fan_in = ci * 4
        w = jax.random.normal(kw_, (co, ci, 2, 2), jnp.float32) / jnp.sqrt(fan_in)
        b = 0.01 * jax.random.normal(kb_, (co,), jnp.float32)
        gamma = 1.0 + 0.1 * jax.random.normal(kg_, (co,), jnp.float32)
        beta = 0.1 * jax.random.normal(kbt_, (co,), jnp.float32)
        mean = 0.01 * jax.random.normal(km_, (co,), jnp.float32)
        var = jnp.abs(1.0 + 0.1 * jax.random.normal(kv_, (co,), jnp.float32))
        conv_params.append((w, b, gamma, beta, mean, var))
    key, kw_, kb_ = jax.random.split(key, 3)
    w_lin = jax.random.normal(kw_, (LATENT_DIM, IMG_H * IMG_W), jnp.float32) \
        / jnp.sqrt(IMG_H * IMG_W)
    b_lin = 0.01 * jax.random.normal(kb_, (LATENT_DIM,), jnp.float32)
    return {"conv": conv_params, "linear": (w_lin, b_lin)}


if __name__ == "__main__":
    key = jax.random.PRNGKey(0)
    key, kx = jax.random.split(key)
    params = init_params(key)
    prepared = prepare_params(params)

    # Input in PyTorch NCHW layout, batch=2, 1 channel, 32x32.
    x = jax.random.normal(kx, (2, 1, IMG_H, IMG_W), jnp.float32)

    out = jax.jit(encoder_forward)(x, prepared)
    out = jax.block_until_ready(out)

    assert out.shape == (2, LATENT_DIM), out.shape
    assert out.dtype == jnp.float32
    assert bool(jnp.all(jnp.isfinite(out)))

    # Numerical check vs. f32 reference (bf16 weights -> loose tolerance).
    ref = encoder_reference(x, params)
    rel_err = float(jnp.linalg.norm(out - ref) / (jnp.linalg.norm(ref) + 1e-12))
    assert rel_err < 0.1, f"relative L2 error too large: {rel_err}"

    print("KERNEL_OK")
</pallas_src>

<mosaic_0001>
module attributes {stable_mosaic.version = 11 : i64} {
  func.func @_first_conv_kernel(%arg0: i32, %arg1: memref<512x4xf32, #tpu.memory_space<vmem>>, %arg2: memref<4x128xf32, #tpu.memory_space<vmem>>, %arg3: memref<1x128xf32, #tpu.memory_space<vmem>>, %arg4: memref<512x128xf32, #tpu.memory_space<vmem>>) attributes {dimension_semantics = [#tpu.dimension_semantics<parallel>], iteration_bounds = array<i64: 1>, scalar_prefetch = 0 : i64, scratch_operands = 0 : i64, tpu.core_type = #tpu.core_type<tc>, window_params = [{transform_indices = @transform_0, window_bounds = array<i64: 512, 4>}, {pipeline_mode = #tpu.pipeline_mode<synchronous>, transform_indices = @transform_1, window_bounds = array<i64: 4, 128>}, {pipeline_mode = #tpu.pipeline_mode<synchronous>, transform_indices = @transform_2, window_bounds = array<i64: 1, 128>}, {transform_indices = @transform_3, window_bounds = array<i64: 512, 128>}]} {
    %cst = arith.constant 0.000000e+00 : f32
    %0 = vector.broadcast %cst : f32 to vector<512x128xf32>
    %c0 = arith.constant 0 : index
    %c0_0 = arith.constant 0 : index
    %1 = vector.load %arg3[%c0, %c0_0] : memref<1x128xf32, #tpu.memory_space<vmem>>, vector<1x128xf32>
    %2 = vector.broadcast %1 : vector<1x128xf32> to vector<512x128xf32>
    %3 = arith.addf %0, %2 : vector<512x128xf32>
    %c0_1 = arith.constant 0 : index
    %c0_2 = arith.constant 0 : index
    %4 = vector.load %arg1[%c0_1, %c0_2] : memref<512x4xf32, #tpu.memory_space<vmem>>, vector<512x1xf32>
    %c0_3 = arith.constant 0 : index
    %c0_4 = arith.constant 0 : index
    %5 = vector.load %arg2[%c0_3, %c0_4] : memref<4x128xf32, #tpu.memory_space<vmem>>, vector<1x128xf32>
    %6 = vector.broadcast %4 : vector<512x1xf32> to vector<512x128xf32>
    %7 = vector.broadcast %5 : vector<1x128xf32> to vector<512x128xf32>
    %8 = arith.mulf %6, %7 : vector<512x128xf32>
    %9 = arith.addf %3, %8 : vector<512x128xf32>
    %c0_5 = arith.constant 0 : index
    %c1 = arith.constant 1 : index
    %10 = vector.load %arg1[%c0_5, %c1] : memref<512x4xf32, #tpu.memory_space<vmem>>, vector<512x1xf32>
    %c1_6 = arith.constant 1 : index
    %c0_7 = arith.constant 0 : index
    %11 = vector.load %arg2[%c1_6, %c0_7] : memref<4x128xf32, #tpu.memory_space<vmem>>, vector<1x128xf32>
    %12 = vector.broadcast %10 : vector<512x1xf32> to vector<512x128xf32>
    %13 = vector.broadcast %11 : vector<1x128xf32> to vector<512x128xf32>
    %14 = arith.mulf %12, %13 : vector<512x128xf32>
    %15 = arith.addf %9, %14 : vector<512x128xf32>
    %c0_8 = arith.constant 0 : index
    %c2 = arith.constant 2 : index
    %16 = vector.load %arg1[%c0_8, %c2] : memref<512x4xf32, #tpu.memory_space<vmem>>, vector<512x1xf32>
    %c2_9 = arith.constant 2 : index
    %c0_10 = arith.constant 0 : index
    %17 = vector.load %arg2[%c2_9, %c0_10] : memref<4x128xf32, #tpu.memory_space<vmem>>, vector<1x128xf32>
    %18 = vector.broadcast %16 : vector<512x1xf32> to vector<512x128xf32>
    %19 = vector.broadcast %17 : vector<1x128xf32> to vector<512x128xf32>
    %20 = arith.mulf %18, %19 : vector<512x128xf32>
    %21 = arith.addf %15, %20 : vector<512x128xf32>
    %c0_11 = arith.constant 0 : index
    %c3 = arith.constant 3 : index
    %22 = vector.load %arg1[%c0_11, %c3] : memref<512x4xf32, #tpu.memory_space<vmem>>, vector<512x1xf32>
    %c3_12 = arith.constant 3 : index
    %c0_13 = arith.constant 0 : index
    %23 = vector.load %arg2[%c3_12, %c0_13] : memref<4x128xf32, #tpu.memory_space<vmem>>, vector<1x128xf32>
    %24 = vector.broadcast %22 : vector<512x1xf32> to vector<512x128xf32>
    %25 = vector.broadcast %23 : vector<1x128xf32> to vector<512x128xf32>
    %26 = arith.mulf %24, %25 : vector<512x128xf32>
    %27 = arith.addf %21, %26 : vector<512x128xf32>
    %cst_14 = arith.constant 0.000000e+00 : f32
    %28 = vector.broadcast %cst_14 : f32 to vector<512x128xf32>
    %29 = arith.cmpf oge, %27, %28 : vector<512x128xf32>
    %cst_15 = arith.constant 0.00999999977 : f32
    %30 = vector.broadcast %cst_15 : f32 to vector<512x128xf32>
    %31 = arith.mulf %30, %27 : vector<512x128xf32>
    %32 = arith.select %29, %27, %31 : vector<512x128xi1>, vector<512x128xf32>
    %c0_16 = arith.constant 0 : index
    %c0_17 = arith.constant 0 : index
    %33 = vector.load %arg4[%c0_16, %c0_17] : memref<512x128xf32, #tpu.memory_space<vmem>>, vector<512x128xf32>
    tpu.vector_store %arg4[%c0_16, %c0_17], %32 {strides = array<i32>} : memref<512x128xf32, #tpu.memory_space<vmem>>, vector<512x128xf32>,
    return
  }
  func.func @transform_0(%arg0: i32) -> (i32, i32) {
    %c0_i32 = arith.constant 0 : i32
    %c0_i32_0 = arith.constant 0 : i32
    return %arg0, %c0_i32 : i32, i32
  }
  func.func @transform_1(%arg0: i32) -> (i32, i32) {
    %c0_i32 = arith.constant 0 : i32
    %c0_i32_0 = arith.constant 0 : i32
    %c0_i32_1 = arith.constant 0 : i32
    return %c0_i32, %c0_i32_0 : i32, i32
  }
  func.func @transform_2(%arg0: i32) -> (i32, i32) {
    %c0_i32 = arith.constant 0 : i32
    %c0_i32_0 = arith.constant 0 : i32
    %c0_i32_1 = arith.constant 0 : i32
    return %c0_i32, %c0_i32_0 : i32, i32
  }
  func.func @transform_3(%arg0: i32) -> (i32, i32) {
    %c0_i32 = arith.constant 0 : i32
    %c0_i32_0 = arith.constant 0 : i32
    return %arg0, %c0_i32 : i32, i32
  }
}

module attributes {stable_mosaic.version = 11 : i64} {
  func.func @_mm_kernel(%arg0: i32, %arg1: i32, %arg2: i32, %arg3: memref<128x512xbf16, #tpu.memory_space<vmem>>, %arg4: memref<512x256xbf16, #tpu.memory_space<vmem>>, %arg5: memref<1x256xf32, #tpu.memory_space<vmem>>, %arg6: memref<128x256xf32, #tpu.memory_space<vmem>>) attributes {dimension_semantics = [#tpu.dimension_semantics<parallel>, #tpu.dimension_semantics<parallel>, #tpu.dimension_semantics<arbitrary>], iteration_bounds = array<i64: 1, 1, 1>, scalar_prefetch = 0 : i64, scratch_operands = 0 : i64, tpu.core_type = #tpu.core_type<tc>, window_params = [{transform_indices = @transform_0, window_bounds = array<i64: 128, 512>}, {transform_indices = @transform_1, window_bounds = array<i64: 512, 256>}, {transform_indices = @transform_2, window_bounds = array<i64: 1, 256>}, {transform_indices = @transform_3, window_bounds = array<i64: 128, 256>}]} {
    %c0_i32 = arith.constant 0 : i32
    %0 = arith.cmpi eq, %arg2, %c0_i32 : i32
    %1 = arith.extui %0 : i1 to i32
    %c0_i32_0 = arith.constant 0 : i32
    %2 = arith.cmpi ne, %1, %c0_i32_0 : i32
    scf.if %2 {
      %cst_10 = arith.constant 0.000000e+00 : f32
      %12 = vector.broadcast %cst_10 : f32 to vector<128x256xf32>
      %c0_11 = arith.constant 0 : index
      %c0_12 = arith.constant 0 : index
      %13 = vector.load %arg6[%c0_11, %c0_12] : memref<128x256xf32, #tpu.memory_space<vmem>>, vector<128x256xf32>
      tpu.vector_store %arg6[%c0_11, %c0_12], %12 {strides = array<i32>} : memref<128x256xf32, #tpu.memory_space<vmem>>, vector<128x256xf32>,
    } else {
    }
    %c0 = arith.constant 0 : index
    %c0_1 = arith.constant 0 : index
    %3 = vector.load %arg6[%c0, %c0_1] : memref<128x256xf32, #tpu.memory_space<vmem>>, vector<128x256xf32>
    %c0_2 = arith.constant 0 : index
    %c0_3 = arith.constant 0 : index
    %4 = vector.load %arg3[%c0_2, %c0_3] : memref<128x512xbf16, #tpu.memory_space<vmem>>, vector<128x512xbf16>
    %c0_4 = arith.constant 0 : index
    %c0_5 = arith.constant 0 : index
    %5 = vector.load %arg4[%c0_4, %c0_5] : memref<512x256xbf16, #tpu.memory_space<vmem>>, vector<512x256xbf16>
    %cst = arith.constant dense<0.000000e+00> : vector<128x256xf32>
    %6 = tpu.matmul %4, %5, %cst {dimension_numbers = #tpu.dot_dimension_numbers<[1], [0], [0], [1], [0, 0, 1, 1], [], []>} : vector<128x512xbf16>, vector<512x256xbf16>, vector<128x256xf32> -> vector<128x256xf32>
    %7 = arith.addf %3, %6 : vector<128x256xf32>
    %c0_6 = arith.constant 0 : index
    %c0_7 = arith.constant 0 : index
    %8 = vector.load %arg6[%c0_6, %c0_7] : memref<128x256xf32, #tpu.memory_space<vmem>>, vector<128x256xf32>
    tpu.vector_store %arg6[%c0_6, %c0_7], %7 {strides = array<i32>} : memref<128x256xf32, #tpu.memory_space<vmem>>, vector<128x256xf32>,
    %c0_i32_8 = arith.constant 0 : i32
    %9 = arith.cmpi eq, %arg2, %c0_i32_8 : i32
    %10 = arith.extui %9 : i1 to i32
    %c0_i32_9 = arith.constant 0 : i32
    %11 = arith.cmpi ne, %10, %c0_i32_9 : i32
    scf.if %11 {
      %c0_10 = arith.constant 0 : index
      %c0_11 = arith.constant 0 : index
      %12 = vector.load %arg6[%c0_10, %c0_11] : memref<128x256xf32, #tpu.memory_space<vmem>>, vector<128x256xf32>
      %c0_12 = arith.constant 0 : index
      %c0_13 = arith.constant 0 : index
      %13 = vector.load %arg5[%c0_12, %c0_13] : memref<1x256xf32, #tpu.memory_space<vmem>>, vector<1x256xf32>
      %14 = vector.broadcast %13 : vector<1x256xf32> to vector<128x256xf32>
      %15 = arith.addf %12, %14 : vector<128x256xf32>
      %cst_14 = arith.constant 0.000000e+00 : f32
      %16 = vector.broadcast %cst_14 : f32 to vector<128x256xf32>
      %17 = arith.cmpf oge, %15, %16 : vector<128x256xf32>
      %cst_15 = arith.constant 0.00999999977 : f32
      %18 = vector.broadcast %cst_15 : f32 to vector<128x256xf32>
      %19 = arith.mulf %18, %15 : vector<128x256xf32>
      %20 = arith.select %17, %15, %19 : vector<128x256xi1>, vector<128x256xf32>
      %c0_16 = arith.constant 0 : index
      %c0_17 = arith.constant 0 : index
      %21 = vector.load %arg6[%c0_16, %c0_17] : memref<128x256xf32, #tpu.memory_space<vmem>>, vector<128x256xf32>
      tpu.vector_store %arg6[%c0_16, %c0_17], %20 {strides = array<i32>} : memref<128x256xf32, #tpu.memory_space<vmem>>, vector<128x256xf32>,
    } else {
    }
    return
  }
  func.func @transform_0(%arg0: i32, %arg1: i32, %arg2: i32) -> (i32, i32) {
    %c0_i32 = arith.constant 0 : i32
    return %arg0, %arg2 : i32, i32
  }
  func.func @transform_1(%arg0: i32, %arg1: i32, %arg2: i32) -> (i32, i32) {
    %c0_i32 = arith.constant 0 : i32
    return %arg2, %arg1 : i32, i32
  }
  func.func @transform_2(%arg0: i32, %arg1: i32, %arg2: i32) -> (i32, i32) {
    %c0_i32 = arith.constant 0 : i32
    %c0_i32_0 = arith.constant 0 : i32
    return %c0_i32, %arg1 : i32, i32
  }
  func.func @transform_3(%arg0: i32, %arg1: i32, %arg2: i32) -> (i32, i32) {
    %c0_i32 = arith.constant 0 : i32
    return %arg0, %arg1 : i32, i32
  }
}

module attributes {stable_mosaic.version = 11 : i64} {
  func.func @_mm_kernel(%arg0: i32, %arg1: i32, %arg2: i32, %arg3: memref<32x1024xbf16, #tpu.memory_space<vmem>>, %arg4: memref<1024x512xbf16, #tpu.memory_space<vmem>>, %arg5: memref<1x512xf32, #tpu.memory_space<vmem>>, %arg6: memref<32x512xf32, #tpu.memory_space<vmem>>) attributes {dimension_semantics = [#tpu.dimension_semantics<parallel>, #tpu.dimension_semantics<parallel>, #tpu.dimension_semantics<arbitrary>], iteration_bounds = array<i64: 1, 1, 1>, scalar_prefetch = 0 : i64, scratch_operands = 0 : i64, tpu.core_type = #tpu.core_type<tc>, window_params = [{transform_indices = @transform_0, window_bounds = array<i64: 32, 1024>}, {transform_indices = @transform_1, window_bounds = array<i64: 1024, 512>}, {transform_indices = @transform_2, window_bounds = array<i64: 1, 512>}, {transform_indices = @transform_3, window_bounds = array<i64: 32, 512>}]} {
    %c0_i32 = arith.constant 0 : i32
    %0 = arith.cmpi eq, %arg2, %c0_i32 : i32
    %1 = arith.extui %0 : i1 to i32
    %c0_i32_0 = arith.constant 0 : i32
    %2 = arith.cmpi ne, %1, %c0_i32_0 : i32
    scf.if %2 {
      %cst_10 = arith.constant 0.000000e+00 : f32
      %12 = vector.broadcast %cst_10 : f32 to vector<32x512xf32>
      %c0_11 = arith.constant 0 : index
      %c0_12 = arith.constant 0 : index
      %13 = vector.load %arg6[%c0_11, %c0_12] : memref<32x512xf32, #tpu.memory_space<vmem>>, vector<32x512xf32>
      tpu.vector_store %arg6[%c0_11, %c0_12], %12 {strides = array<i32>} : memref<32x512xf32, #tpu.memory_space<vmem>>, vector<32x512xf32>,
    } else {
    }
    %c0 = arith.constant 0 : index
    %c0_1 = arith.constant 0 : index
    %3 = vector.load %arg6[%c0, %c0_1] : memref<32x512xf32, #tpu.memory_space<vmem>>, vector<32x512xf32>
    %c0_2 = arith.constant 0 : index
    %c0_3 = arith.constant 0 : index
    %4 = vector.load %arg3[%c0_2, %c0_3] : memref<32x1024xbf16, #tpu.memory_space<vmem>>, vector<32x1024xbf16>
    %c0_4 = arith.constant 0 : index
    %c0_5 = arith.constant 0 : index
    %5 = vector.load %arg4[%c0_4, %c0_5] : memref<1024x512xbf16, #tpu.memory_space<vmem>>, vector<1024x512xbf16>
    %cst = arith.constant dense<0.000000e+00> : vector<32x512xf32>
    %6 = tpu.matmul %4, %5, %cst {dimension_numbers = #tpu.dot_dimension_numbers<[1], [0], [0], [1], [0, 0, 1, 1], [], []>} : vector<32x1024xbf16>, vector<1024x512xbf16>, vector<32x512xf32> -> vector<32x512xf32>
    %7 = arith.addf %3, %6 : vector<32x512xf32>
    %c0_6 = arith.constant 0 : index
    %c0_7 = arith.constant 0 : index
    %8 = vector.load %arg6[%c0_6, %c0_7] : memref<32x512xf32, #tpu.memory_space<vmem>>, vector<32x512xf32>
    tpu.vector_store %arg6[%c0_6, %c0_7], %7 {strides = array<i32>} : memref<32x512xf32, #tpu.memory_space<vmem>>, vector<32x512xf32>,
    %c0_i32_8 = arith.constant 0 : i32
    %9 = arith.cmpi eq, %arg2, %c0_i32_8 : i32
    %10 = arith.extui %9 : i1 to i32
    %c0_i32_9 = arith.constant 0 : i32
    %11 = arith.cmpi ne, %10, %c0_i32_9 : i32
    scf.if %11 {
      %c0_10 = arith.constant 0 : index
      %c0_11 = arith.constant 0 : index
      %12 = vector.load %arg6[%c0_10, %c0_11] : memref<32x512xf32, #tpu.memory_space<vmem>>, vector<32x512xf32>
      %c0_12 = arith.constant 0 : index
      %c0_13 = arith.constant 0 : index
      %13 = vector.load %arg5[%c0_12, %c0_13] : memref<1x512xf32, #tpu.memory_space<vmem>>, vector<1x512xf32>
      %14 = vector.broadcast %13 : vector<1x512xf32> to vector<32x512xf32>
      %15 = arith.addf %12, %14 : vector<32x512xf32>
      %cst_14 = arith.constant 0.000000e+00 : f32
      %16 = vector.broadcast %cst_14 : f32 to vector<32x512xf32>
      %17 = arith.cmpf oge, %15, %16 : vector<32x512xf32>
      %cst_15 = arith.constant 0.00999999977 : f32
      %18 = vector.broadcast %cst_15 : f32 to vector<32x512xf32>
      %19 = arith.mulf %18, %15 : vector<32x512xf32>
      %20 = arith.select %17, %15, %19 : vector<32x512xi1>, vector<32x512xf32>
      %c0_16 = arith.constant 0 : index
      %c0_17 = arith.constant 0 : index
      %21 = vector.load %arg6[%c0_16, %c0_17] : memref<32x512xf32, #tpu.memory_space<vmem>>, vector<32x512xf32>
      tpu.vector_store %arg6[%c0_16, %c0_17], %20 {strides = array<i32>} : memref<32x512xf32, #tpu.memory_space<vmem>>, vector<32x512xf32>,
    } else {
    }
    return
  }
  func.func @transform_0(%arg0: i32, %arg1: i32, %arg2: i32) -> (i32, i32) {
    %c0_i32 = arith.constant 0 : i32
    return %arg0, %arg2 : i32, i32
  }
  func.func @transform_1(%arg0: i32, %arg1: i32, %arg2: i32) -> (i32, i32) {
    %c0_i32 = arith.constant 0 : i32
    return %arg2, %arg1 : i32, i32
  }
  func.func @transform_2(%arg0: i32, %arg1: i32, %arg2: i32) -> (i32, i32) {
    %c0_i32 = arith.constant 0 : i32
    %c0_i32_0 = arith.constant 0 : i32
    return %c0_i32, %arg1 : i32, i32
  }
  func.func @transform_3(%arg0: i32, %arg1: i32, %arg2: i32) -> (i32, i32) {
    %c0_i32 = arith.constant 0 : i32
    return %arg0, %arg1 : i32, i32
  }
}

module attributes {stable_mosaic.version = 11 : i64} {
  func.func @_mm_kernel(%arg0: i32, %arg1: i32, %arg2: i32, %arg3: memref<8x1024xbf16, #tpu.memory_space<vmem>>, %arg4: memref<1024x512xbf16, #tpu.memory_space<vmem>>, %arg5: memref<1x512xf32, #tpu.memory_space<vmem>>, %arg6: memref<8x512xf32, #tpu.memory_space<vmem>>) attributes {dimension_semantics = [#tpu.dimension_semantics<parallel>, #tpu.dimension_semantics<parallel>, #tpu.dimension_semantics<arbitrary>], iteration_bounds = array<i64: 1, 2, 2>, scalar_prefetch = 0 : i64, scratch_operands = 0 : i64, tpu.core_type = #tpu.core_type<tc>, window_params = [{transform_indices = @transform_0, window_bounds = array<i64: 8, 1024>}, {transform_indices = @transform_1, window_bounds = array<i64: 1024, 512>}, {transform_indices = @transform_2, window_bounds = array<i64: 1, 512>}, {transform_indices = @transform_3, window_bounds = array<i64: 8, 512>}]} {
    %c0_i32 = arith.constant 0 : i32
    %0 = arith.cmpi eq, %arg2, %c0_i32 : i32
    %1 = arith.extui %0 : i1 to i32
    %c0_i32_0 = arith.constant 0 : i32
    %2 = arith.cmpi ne, %1, %c0_i32_0 : i32
    scf.if %2 {
      %cst_9 = arith.constant 0.000000e+00 : f32
      %12 = vector.broadcast %cst_9 : f32 to vector<8x512xf32>
      %c0_10 = arith.constant 0 : index
      %c0_11 = arith.constant 0 : index
      %13 = vector.load %arg6[%c0_10, %c0_11] : memref<8x512xf32, #tpu.memory_space<vmem>>, vector<8x512xf32>
      tpu.vector_store %arg6[%c0_10, %c0_11], %12 {strides = array<i32>} : memref<8x512xf32, #tpu.memory_space<vmem>>, vector<8x512xf32>,
    } else {
    }
    %c0 = arith.constant 0 : index
    %c0_1 = arith.constant 0 : index
    %3 = vector.load %arg6[%c0, %c0_1] : memref<8x512xf32, #tpu.memory_space<vmem>>, vector<8x512xf32>
    %c0_2 = arith.constant 0 : index
    %c0_3 = arith.constant 0 : index
    %4 = vector.load %arg3[%c0_2, %c0_3] : memref<8x1024xbf16, #tpu.memory_space<vmem>>, vector<8x1024xbf16>
    %c0_4 = arith.constant 0 : index
    %c0_5 = arith.constant 0 : index
    %5 = vector.load %arg4[%c0_4, %c0_5] : memref<1024x512xbf16, #tpu.memory_space<vmem>>, vector<1024x512xbf16>
    %cst = arith.constant dense<0.000000e+00> : vector<8x512xf32>
    %6 = tpu.matmul %4, %5, %cst {dimension_numbers = #tpu.dot_dimension_numbers<[1], [0], [0], [1], [0, 0, 1, 1], [], []>} : vector<8x1024xbf16>, vector<1024x512xbf16>, vector<8x512xf32> -> vector<8x512xf32>
    %7 = arith.addf %3, %6 : vector<8x512xf32>
    %c0_6 = arith.constant 0 : index
    %c0_7 = arith.constant 0 : index
    %8 = vector.load %arg6[%c0_6, %c0_7] : memref<8x512xf32, #tpu.memory_space<vmem>>, vector<8x512xf32>
    tpu.vector_store %arg6[%c0_6, %c0_7], %7 {strides = array<i32>} : memref<8x512xf32, #tpu.memory_space<vmem>>, vector<8x512xf32>,
    %c1_i32 = arith.constant 1 : i32
    %9 = arith.cmpi eq, %arg2, %c1_i32 : i32
    %10 = arith.extui %9 : i1 to i32
    %c0_i32_8 = arith.constant 0 : i32
    %11 = arith.cmpi ne, %10, %c0_i32_8 : i32
    scf.if %11 {
      %c0_9 = arith.constant 0 : index
      %c0_10 = arith.constant 0 : index
      %12 = vector.load %arg6[%c0_9, %c0_10] : memref<8x512xf32, #tpu.memory_space<vmem>>, vector<8x512xf32>
      %c0_11 = arith.constant 0 : index
      %c0_12 = arith.constant 0 : index
      %13 = vector.load %arg5[%c0_11, %c0_12] : memref<1x512xf32, #tpu.memory_space<vmem>>, vector<1x512xf32>
      %14 = vector.broadcast %13 : vector<1x512xf32> to vector<8x512xf32>
      %15 = arith.addf %12, %14 : vector<8x512xf32>
      %cst_13 = arith.constant 0.000000e+00 : f32
      %16 = vector.broadcast %cst_13 : f32 to vector<8x512xf32>
      %17 = arith.cmpf oge, %15, %16 : vector<8x512xf32>
      %cst_14 = arith.constant 0.00999999977 : f32
      %18 = vector.broadcast %cst_14 : f32 to vector<8x512xf32>
      %19 = arith.mulf %18, %15 : vector<8x512xf32>
      %20 = arith.select %17, %15, %19 : vector<8x512xi1>, vector<8x512xf32>
      %c0_15 = arith.constant 0 : index
      %c0_16 = arith.constant 0 : index
      %21 = vector.load %arg6[%c0_15, %c0_16] : memref<8x512xf32, #tpu.memory_space<vmem>>, vector<8x512xf32>
      tpu.vector_store %arg6[%c0_15, %c0_16], %20 {strides = array<i32>} : memref<8x512xf32, #tpu.memory_space<vmem>>, vector<8x512xf32>,
    } else {
    }
    return
  }
  func.func @transform_0(%arg0: i32, %arg1: i32, %arg2: i32) -> (i32, i32) {
    %c0_i32 = arith.constant 0 : i32
    return %arg0, %arg2 : i32, i32
  }
  func.func @transform_1(%arg0: i32, %arg1: i32, %arg2: i32) -> (i32, i32) {
    %c0_i32 = arith.constant 0 : i32
    return %arg2, %arg1 : i32, i32
  }
  func.func @transform_2(%arg0: i32, %arg1: i32, %arg2: i32) -> (i32, i32) {
    %c0_i32 = arith.constant 0 : i32
    %c0_i32_0 = arith.constant 0 : i32
    return %c0_i32, %arg1 : i32, i32
  }
  func.func @transform_3(%arg0: i32, %arg1: i32, %arg2: i32) -> (i32, i32) {
    %c0_i32 = arith.constant 0 : i32
    return %arg0, %arg1 : i32, i32
  }
}

module attributes {stable_mosaic.version = 11 : i64} {
  func.func @_mm_act_bn_kernel(%arg0: i32, %arg1: i32, %arg2: i32, %arg3: memref<2x1024xbf16, #tpu.memory_space<vmem>>, %arg4: memref<1024x512xbf16, #tpu.memory_space<vmem>>, %arg5: memref<1x512xf32, #tpu.memory_space<vmem>>, %arg6: memref<1x512xf32, #tpu.memory_space<vmem>>, %arg7: memref<1x512xf32, #tpu.memory_space<vmem>>, %arg8: memref<2x512xf32, #tpu.memory_space<vmem>>) attributes {dimension_semantics = [#tpu.dimension_semantics<parallel>, #tpu.dimension_semantics<parallel>, #tpu.dimension_semantics<arbitrary>], iteration_bounds = array<i64: 1, 2, 4>, scalar_prefetch = 0 : i64, scratch_operands = 0 : i64, tpu.core_type = #tpu.core_type<tc>, window_params = [{transform_indices = @transform_0, window_bounds = array<i64: 2, 1024>}, {transform_indices = @transform_1, window_bounds = array<i64: 1024, 512>}, {transform_indices = @transform_2, window_bounds = array<i64: 1, 512>}, {transform_indices = @transform_3, window_bounds = array<i64: 1, 512>}, {transform_indices = @transform_4, window_bounds = array<i64: 1, 512>}, {transform_indices = @transform_5, window_bounds = array<i64: 2, 512>}]} {
    %c0_i32 = arith.constant 0 : i32
    %0 = arith.cmpi eq, %arg2, %c0_i32 : i32
    %1 = arith.extui %0 : i1 to i32
    %c0_i32_0 = arith.constant 0 : i32
    %2 = arith.cmpi ne, %1, %c0_i32_0 : i32
    scf.if %2 {
      %cst_9 = arith.constant 0.000000e+00 : f32
      %12 = vector.broadcast %cst_9 : f32 to vector<2x512xf32>
      %c0_10 = arith.constant 0 : index
      %c0_11 = arith.constant 0 : index
      %13 = vector.load %arg8[%c0_10, %c0_11] : memref<2x512xf32, #tpu.memory_space<vmem>>, vector<2x512xf32>
      tpu.vector_store %arg8[%c0_10, %c0_11], %12 {strides = array<i32>} : memref<2x512xf32, #tpu.memory_space<vmem>>, vector<2x512xf32>,
    } else {
    }
    %c0 = arith.constant 0 : index
    %c0_1 = arith.constant 0 : index
    %3 = vector.load %arg8[%c0, %c0_1] : memref<2x512xf32, #tpu.memory_space<vmem>>, vector<2x512xf32>
    %c0_2 = arith.constant 0 : index
    %c0_3 = arith.constant 0 : index
    %4 = vector.load %arg3[%c0_2, %c0_3] : memref<2x1024xbf16, #tpu.memory_space<vmem>>, vector<2x1024xbf16>
    %c0_4 = arith.constant 0 : index
    %c0_5 = arith.constant 0 : index
    %5 = vector.load %arg4[%c0_4, %c0_5] : memref<1024x512xbf16, #tpu.memory_space<vmem>>, vector<1024x512xbf16>
    %cst = arith.constant dense<0.000000e+00> : vector<2x512xf32>
    %6 = tpu.matmul %4, %5, %cst {dimension_numbers = #tpu.dot_dimension_numbers<[1], [0], [0], [1], [0, 0, 1, 1], [], []>} : vector<2x1024xbf16>, vector<1024x512xbf16>, vector<2x512xf32> -> vector<2x512xf32>
    %7 = arith.addf %3, %6 : vector<2x512xf32>
    %c0_6 = arith.constant 0 : index
    %c0_7 = arith.constant 0 : index
    %8 = vector.load %arg8[%c0_6, %c0_7] : memref<2x512xf32, #tpu.memory_space<vmem>>, vector<2x512xf32>
    tpu.vector_store %arg8[%c0_6, %c0_7], %7 {strides = array<i32>} : memref<2x512xf32, #tpu.memory_space<vmem>>, vector<2x512xf32>,
    %c3_i32 = arith.constant 3 : i32
    %9 = arith.cmpi eq, %arg2, %c3_i32 : i32
    %10 = arith.extui %9 : i1 to i32
    %c0_i32_8 = arith.constant 0 : i32
    %11 = arith.cmpi ne, %10, %c0_i32_8 : i32
    scf.if %11 {
      %c0_9 = arith.constant 0 : index
      %c0_10 = arith.constant 0 : index
      %12 = vector.load %arg8[%c0_9, %c0_10] : memref<2x512xf32, #tpu.memory_space<vmem>>, vector<2x512xf32>
      %c0_11 = arith.constant 0 : index
      %c0_12 = arith.constant 0 : index
      %13 = vector.load %arg5[%c0_11, %c0_12] : memref<1x512xf32, #tpu.memory_space<vmem>>, vector<1x512xf32>
      %14 = vector.broadcast %13 : vector<1x512xf32> to vector<2x512xf32>
      %15 = arith.addf %12, %14 : vector<2x512xf32>
      %cst_13 = arith.constant 0.000000e+00 : f32
      %16 = vector.broadcast %cst_13 : f32 to vector<2x512xf32>
      %17 = arith.cmpf oge, %15, %16 : vector<2x512xf32>
      %cst_14 = arith.constant 0.00999999977 : f32
      %18 = vector.broadcast %cst_14 : f32 to vector<2x512xf32>
      %19 = arith.mulf %18, %15 : vector<2x512xf32>
      %20 = arith.select %17, %15, %19 : vector<2x512xi1>, vector<2x512xf32>
      %c0_15 = arith.constant 0 : index
      %c0_16 = arith.constant 0 : index
      %21 = vector.load %arg6[%c0_15, %c0_16] : memref<1x512xf32, #tpu.memory_space<vmem>>, vector<1x512xf32>
      %22 = vector.broadcast %21 : vector<1x512xf32> to vector<2x512xf32>
      %23 = arith.mulf %20, %22 : vector<2x512xf32>
      %c0_17 = arith.constant 0 : index
      %c0_18 = arith.constant 0 : index
      %24 = vector.load %arg7[%c0_17, %c0_18] : memref<1x512xf32, #tpu.memory_space<vmem>>, vector<1x512xf32>
      %25 = vector.broadcast %24 : vector<1x512xf32> to vector<2x512xf32>
      %26 = arith.addf %23, %25 : vector<2x512xf32>
      %c0_19 = arith.constant 0 : index
      %c0_20 = arith.constant 0 : index
      %27 = vector.load %arg8[%c0_19, %c0_20] : memref<2x512xf32, #tpu.memory_space<vmem>>, vector<2x512xf32>
      tpu.vector_store %arg8[%c0_19, %c0_20], %26 {strides = array<i32>} : memref<2x512xf32, #tpu.memory_space<vmem>>, vector<2x512xf32>,
    } else {
    }
    return
  }
  func.func @transform_0(%arg0: i32, %arg1: i32, %arg2: i32) -> (i32, i32) {
    %c0_i32 = arith.constant 0 : i32
    return %arg0, %arg2 : i32, i32
  }
  func.func @transform_1(%arg0: i32, %arg1: i32, %arg2: i32) -> (i32, i32) {
    %c0_i32 = arith.constant 0 : i32
    return %arg2, %arg1 : i32, i32
  }
  func.func @transform_2(%arg0: i32, %arg1: i32, %arg2: i32) -> (i32, i32) {
    %c0_i32 = arith.constant 0 : i32
    %c0_i32_0 = arith.constant 0 : i32
    return %c0_i32, %arg1 : i32, i32
  }
  func.func @transform_3(%arg0: i32, %arg1: i32, %arg2: i32) -> (i32, i32) {
    %c0_i32 = arith.constant 0 : i32
    %c0_i32_0 = arith.constant 0 : i32
    return %c0_i32, %arg1 : i32, i32
  }
  func.func @transform_4(%arg0: i32, %arg1: i32, %arg2: i32) -> (i32, i32) {
    %c0_i32 = arith.constant 0 : i32
    %c0_i32_0 = arith.constant 0 : i32
    return %c0_i32, %arg1 : i32, i32
  }
  func.func @transform_5(%arg0: i32, %arg1: i32, %arg2: i32) -> (i32, i32) {
    %c0_i32 = arith.constant 0 : i32
    return %arg0, %arg1 : i32, i32
  }
}

module attributes {stable_mosaic.version = 11 : i64} {
  func.func @_mm_kernel(%arg0: i32, %arg1: i32, %arg2: i32, %arg3: memref<2x1024xbf16, #tpu.memory_space<vmem>>, %arg4: memref<1024x512xbf16, #tpu.memory_space<vmem>>, %arg5: memref<1x512xf32, #tpu.memory_space<vmem>>, %arg6: memref<2x512xf32, #tpu.memory_space<vmem>>) attributes {dimension_semantics = [#tpu.dimension_semantics<parallel>, #tpu.dimension_semantics<parallel>, #tpu.dimension_semantics<arbitrary>], iteration_bounds = array<i64: 1, 2, 1>, scalar_prefetch = 0 : i64, scratch_operands = 0 : i64, tpu.core_type = #tpu.core_type<tc>, window_params = [{transform_indices = @transform_0, window_bounds = array<i64: 2, 1024>}, {transform_indices = @transform_1, window_bounds = array<i64: 1024, 512>}, {transform_indices = @transform_2, window_bounds = array<i64: 1, 512>}, {transform_indices = @transform_3, window_bounds = array<i64: 2, 512>}]} {
    %c0_i32 = arith.constant 0 : i32
    %0 = arith.cmpi eq, %arg2, %c0_i32 : i32
    %1 = arith.extui %0 : i1 to i32
    %c0_i32_0 = arith.constant 0 : i32
    %2 = arith.cmpi ne, %1, %c0_i32_0 : i32
    scf.if %2 {
      %cst_10 = arith.constant 0.000000e+00 : f32
      %12 = vector.broadcast %cst_10 : f32 to vector<2x512xf32>
      %c0_11 = arith.constant 0 : index
      %c0_12 = arith.constant 0 : index
      %13 = vector.load %arg6[%c0_11, %c0_12] : memref<2x512xf32, #tpu.memory_space<vmem>>, vector<2x512xf32>
      tpu.vector_store %arg6[%c0_11, %c0_12], %12 {strides = array<i32>} : memref<2x512xf32, #tpu.memory_space<vmem>>, vector<2x512xf32>,
    } else {
    }
    %c0 = arith.constant 0 : index
    %c0_1 = arith.constant 0 : index
    %3 = vector.load %arg6[%c0, %c0_1] : memref<2x512xf32, #tpu.memory_space<vmem>>, vector<2x512xf32>
    %c0_2 = arith.constant 0 : index
    %c0_3 = arith.constant 0 : index
    %4 = vector.load %arg3[%c0_2, %c0_3] : memref<2x1024xbf16, #tpu.memory_space<vmem>>, vector<2x1024xbf16>
    %c0_4 = arith.constant 0 : index
    %c0_5 = arith.constant 0 : index
    %5 = vector.load %arg4[%c0_4, %c0_5] : memref<1024x512xbf16, #tpu.memory_space<vmem>>, vector<1024x512xbf16>
    %cst = arith.constant dense<0.000000e+00> : vector<2x512xf32>
    %6 = tpu.matmul %4, %5, %cst {dimension_numbers = #tpu.dot_dimension_numbers<[1], [0], [0], [1], [0, 0, 1, 1], [], []>} : vector<2x1024xbf16>, vector<1024x512xbf16>, vector<2x512xf32> -> vector<2x512xf32>
    %7 = arith.addf %3, %6 : vector<2x512xf32>
    %c0_6 = arith.constant 0 : index
    %c0_7 = arith.constant 0 : index
    %8 = vector.load %arg6[%c0_6, %c0_7] : memref<2x512xf32, #tpu.memory_space<vmem>>, vector<2x512xf32>
    tpu.vector_store %arg6[%c0_6, %c0_7], %7 {strides = array<i32>} : memref<2x512xf32, #tpu.memory_space<vmem>>, vector<2x512xf32>,
    %c0_i32_8 = arith.constant 0 : i32
    %9 = arith.cmpi eq, %arg2, %c0_i32_8 : i32
    %10 = arith.extui %9 : i1 to i32
    %c0_i32_9 = arith.constant 0 : i32
    %11 = arith.cmpi ne, %10, %c0_i32_9 : i32
    scf.if %11 {
      %c0_10 = arith.constant 0 : index
      %c0_11 = arith.constant 0 : index
      %12 = vector.load %arg6[%c0_10, %c0_11] : memref<2x512xf32, #tpu.memory_space<vmem>>, vector<2x512xf32>
      %c0_12 = arith.constant 0 : index
      %c0_13 = arith.constant 0 : index
      %13 = vector.load %arg5[%c0_12, %c0_13] : memref<1x512xf32, #tpu.memory_space<vmem>>, vector<1x512xf32>
      %14 = vector.broadcast %13 : vector<1x512xf32> to vector<2x512xf32>
      %15 = arith.addf %12, %14 : vector<2x512xf32>
      %c0_14 = arith.constant 0 : index
      %c0_15 = arith.constant 0 : index
      %16 = vector.load %arg6[%c0_14, %c0_15] : memref<2x512xf32, #tpu.memory_space<vmem>>, vector<2x512xf32>
      tpu.vector_store %arg6[%c0_14, %c0_15], %15 {strides = array<i32>} : memref<2x512xf32, #tpu.memory_space<vmem>>, vector<2x512xf32>,
    } else {
    }
    return
  }
  func.func @transform_0(%arg0: i32, %arg1: i32, %arg2: i32) -> (i32, i32) {
    %c0_i32 = arith.constant 0 : i32
    return %arg0, %arg2 : i32, i32
  }
  func.func @transform_1(%arg0: i32, %arg1: i32, %arg2: i32) -> (i32, i32) {
    %c0_i32 = arith.constant 0 : i32
    return %arg2, %arg1 : i32, i32
  }
  func.func @transform_2(%arg0: i32, %arg1: i32, %arg2: i32) -> (i32, i32) {
    %c0_i32 = arith.constant 0 : i32
    %c0_i32_0 = arith.constant 0 : i32
    return %c0_i32, %arg1 : i32, i32
  }
  func.func @transform_3(%arg0: i32, %arg1: i32, %arg2: i32) -> (i32, i32) {
    %c0_i32 = arith.constant 0 : i32
    return %arg0, %arg1 : i32, i32
  }
}

</mosaic_0001>

<bundles_post_ra>
// kernel: encoder_forward.6
= control target key start
LH: loop header
LB: loop body
LE: loop exit
PB: predicated region body
PF: predicated region fallthrough
CT: control target
= control target key end

     0   :  { %8 = vsyncpa [#allocation3], 0  ;;  %s4176_s0 = inlined_call_operand.vmem [shape: f32[512,4], index: 0, kind: input, shape index: {}]   ;;  %s4177_s1 = inlined_call_operand.hbm [shape: f32[4,128], index: 1, kind: input, shape index: {}]   ;;  %s4178_s2 = inlined_call_operand.hbm [shape: f32[1,128], index: 2, kind: input, shape index: {}]   ;;  %s4179_s3 = inlined_call_operand.vmem [shape: f32[512,128], index: 3, kind: output, shape index: {}]  }
   0x1   :  { %9 = vsyncpa [#allocation5], 0  ;;  %s2072_s12 = smov [#allocation2]   ;;  %s2073_s14 = smov [#allocation4]  }
   0x2   :  { %s18_s13 = sshll.u32 %s2072_s12, 4  ;;  %s28_s15 = sshll.u32 %s2073_s14, 4  ;;  %s19_s13 = int_to_ptr.vmem [resolvable:$true] %s18_s13  ;;  %s29_s15 = int_to_ptr.vmem [resolvable:$true] %s28_s15 }
   0x3   :  { %s2024_s18 = scalar_lea.hbm %s4177_s1, 64 }
   0x4   :  { %p2025_p0 = scmp.ne.s32.totalorder %s4177_s1, %s2024_s18  ;;  %p2028_p1 = scmp.lt.u32.totalorder %s2024_s18, %s4177_s1 }
   0x6   :  { %p2030_p2 = pnand %p2028_p1, %p2025_p0 }
   0x8   :  { %2033 = shalt.err (!%p2030_p2)
}
   0x9   :  { %s2034_s23 = scalar_lea.vmem %s19_s13, 64  ;;  %p2039_p4 = scmp.lt.s32.totalorder %s19_s13, %s19_s13 }
   0xa   :  { %p2035_p3 = scmp.ne.s32.totalorder %s19_s13, %s2034_s23  ;;  %p2040_p5 = scmp.lt.s32.totalorder %s2034_s23, %s2034_s23 }
   0xc   :  { %p2041_p6 = por %p2040_p5, %p2039_p4 }
   0xe   :  { %p2042_p7 = pnand %p2041_p6, %p2035_p3 }
  0x10   :  { %2045 = shalt.err (!%p2042_p7)
}
  0x11   :  { %21 = dma.hbm_to_vmem [thread:$0]  %s4177_s1, 64, %s19_s13, [#allocation3]  }
  0x12   :  { %s2046_s28 = scalar_lea.hbm %s4178_s2, 16 }
  0x13   :  { %p2047_p8 = scmp.ne.s32.totalorder %s4178_s2, %s2046_s28  ;;  %p2050_p9 = scmp.lt.u32.totalorder %s2046_s28, %s4178_s2 }
  0x15   :  { %p2052_p10 = pnand %p2050_p9, %p2047_p8 }
  0x17   :  { %2055 = shalt.err (!%p2052_p10)
}
  0x18   :  { %s2056_s6 = scalar_lea.vmem %s29_s15, 16  ;;  %s2060_s7 = scalar_lea.vmem %s29_s15, 32 }
  0x19   :  { %p2057_p11 = scmp.ne.s32.totalorder %s29_s15, %s2056_s6  ;;  %p2061_p12 = scmp.lt.s32.totalorder %s29_s15, %s29_s15 }
  0x1a   :  { %p2062_p13 = scmp.lt.s32.totalorder %s2060_s7, %s2056_s6 }
  0x1c   :  { %p2063_p0 = por %p2062_p13, %p2061_p12 }
  0x1e   :  { %p2064_p1 = pnand %p2063_p0, %p2057_p11 }
  0x20   :  { %2067 = shalt.err (!%p2064_p1)
}
  0x21   :  { %31 = dma.hbm_to_vmem [thread:$0]  %s4178_s2, 16, %s29_s15, [#allocation5]  }
  0x22   :  { %2068 = dma.done.wait [#allocation3], 64  }
  0x23   :  { %2069 = vsyncadd [#allocation3], 4294967232 }
  0x24   :  { %2070 = dma.done.wait [#allocation5], 16  }
  0x25   :  { %2071 = vsyncadd [#allocation5], 4294967280  ;;  %v2074_v0 = vmov 0   ;;  %v2125_v1 = vld [vmem:[%s4176_s0 + $0x10] sm:$0xff]  ;;  %v2130_v2 = vld [vmem:[%s4176_s0] sm:$0xff] }
  0x26   :  { %2004 = vset.pattern.permute.xlu1 %v2074_v0  ;;  %2003 = vset.pattern.permute.xlu0 %v2074_v0  ;;  %v2137_v3 = vld [vmem:[%s4176_s0 + $0x18] sm:$0xff]  ;;  %v2142_v4 = vld [vmem:[%s4176_s0 + $0x8] sm:$0xff]  ;;  %v2154_v6 = vld [vmem:[%s4176_s0 + $0x20] sm:$0xff] }
  0x27   :  { %123 = vperm.xlu1 %2004, %v2125_v1   ;;  %113 = vperm.xlu0 %2003, %v2130_v2   ;;  %v2149_v5 = vld [vmem:[%s4176_s0 + $0x28] sm:$0xff]  ;;  %v2161_v7 = vld [vmem:[%s4176_s0 + $0x38] sm:$0xff]  ;;  %v2166_v8 = vld [vmem:[%s4176_s0 + $0x30] sm:$0xff] }
  0x28   :  { %v2173_v9 = vld [vmem:[%s4176_s0 + $0x48] sm:$0xff]  ;;  %v2178_v10 = vld [vmem:[%s4176_s0 + $0x40] sm:$0xff]  ;;  %v2185_v11 = vld [vmem:[%s4176_s0 + $0x58] sm:$0xff] }
  0x29   :  { %v2190_v12 = vld [vmem:[%s4176_s0 + $0x50] sm:$0xff]  ;;  %v2197_v13 = vld [vmem:[%s4176_s0 + $0x68] sm:$0xff]  ;;  %v2202_v14 = vld [vmem:[%s4176_s0 + $0x60] sm:$0xff] }
  0x2a   :  { %v2209_v15 = vld [vmem:[%s4176_s0 + $0x78] sm:$0xff]  ;;  %v2214_v16 = vld [vmem:[%s4176_s0 + $0x70] sm:$0xff]  ;;  %v2221_v17 = vld [vmem:[%s4176_s0 + $0x88] sm:$0xff] }
  0x2b   :  { %128 = vperm.xlu1 %2004, %v2137_v3   ;;  %118 = vperm.xlu0 %2003, %v2142_v4   ;;  %v2226_v18 = vld [vmem:[%s4176_s0 + $0x80] sm:$0xff]  ;;  %v2233_v19 = vld [vmem:[%s4176_s0 + $0x98] sm:$0xff]  ;;  %v2238_v20 = vld [vmem:[%s4176_s0 + $0x90] sm:$0xff] }
  0x2c   :  { %v2245_v21 = vld [vmem:[%s4176_s0 + $0xa8] sm:$0xff]  ;;  %v2250_v22 = vld [vmem:[%s4176_s0 + $0xa0] sm:$0xff]  ;;  %v2257_v23 = vld [vmem:[%s4176_s0 + $0xb8] sm:$0xff] }
  0x2d   :  { %v2262_v24 = vld [vmem:[%s4176_s0 + $0xb0] sm:$0xff]  ;;  %v2269_v25 = vld [vmem:[%s4176_s0 + $0xc8] sm:$0xff]  ;;  %v2274_v26 = vld [vmem:[%s4176_s0 + $0xc0] sm:$0xff] }
  0x2e   :  { %v2281_v27 = vld [vmem:[%s4176_s0 + $0xd8] sm:$0xff]  ;;  %v2286_v28 = vld [vmem:[%s4176_s0 + $0xd0] sm:$0xff]  ;;  %v2293_v29 = vld [vmem:[%s4176_s0 + $0xe8] sm:$0xff] }
  0x2f   :  { %138 = vperm.xlu1 %2004, %v2149_v5   ;;  %133 = vperm.xlu0 %2003, %v2154_v6   ;;  %v2298_v30 = vld [vmem:[%s4176_s0 + $0xe0] sm:$0xff]  ;;  %v2305_v31 = vld [vmem:[%s4176_s0 + $0xf8] sm:$0xff]  ;;  %v2310_v32 = vld [vmem:[%s4176_s0 + $0xf0] sm:$0xff] }
  0x30   :  { %v2317_v33 = vld [vmem:[%s4176_s0 + $0x108] sm:$0xff]  ;;  %v2322_v34 = vld [vmem:[%s4176_s0 + $0x100] sm:$0xff]  ;;  %v2329_v35 = vld [vmem:[%s4176_s0 + $0x118] sm:$0xff] }
  0x31   :  { %v2334_v36 = vld [vmem:[%s4176_s0 + $0x110] sm:$0xff]  ;;  %v2341_v37 = vld [vmem:[%s4176_s0 + $0x128] sm:$0xff]  ;;  %v2346_v38 = vld [vmem:[%s4176_s0 + $0x120] sm:$0xff] }
  0x32   :  { %v2353_v39 = vld [vmem:[%s4176_s0 + $0x138] sm:$0xff]  ;;  %v2358_v40 = vld [vmem:[%s4176_s0 + $0x130] sm:$0xff]  ;;  %v2365_v41 = vld [vmem:[%s4176_s0 + $0x148] sm:$0xff] }
  0x33   :  { %148 = vperm.xlu1 %2004, %v2161_v7   ;;  %143 = vperm.xlu0 %2003, %v2166_v8   ;;  %v2370_v42 = vld [vmem:[%s4176_s0 + $0x140] sm:$0xff]  ;;  %v2377_v43 = vld [vmem:[%s4176_s0 + $0x158] sm:$0xff]  ;;  %v2382_v44 = vld [vmem:[%s4176_s0 + $0x150] sm:$0xff] }
  0x34   :  { %v2389_v45 = vld [vmem:[%s4176_s0 + $0x168] sm:$0xff]  ;;  %v2394_v46 = vld [vmem:[%s4176_s0 + $0x160] sm:$0xff]  ;;  %v2401_v47 = vld [vmem:[%s4176_s0 + $0x178] sm:$0xff] }
  0x35   :  { %v2406_v48 = vld [vmem:[%s4176_s0 + $0x170] sm:$0xff]  ;;  %v2413_v49 = vld [vmem:[%s4176_s0 + $0x188] sm:$0xff]  ;;  %v2418_v50 = vld [vmem:[%s4176_s0 + $0x180] sm:$0xff] }
  0x36   :  { %4203 = vst [vmem:[#allocation8_spill] sm:$0xff] %v2406_v48  ;;  %4204 = vst [vmem:[#allocation9_spill] sm:$0xff] %v2418_v50  ;;  %v2425_v51 = vld [vmem:[%s4176_s0 + $0x198] sm:$0xff]  ;;  %v2430_v52 = vld [vmem:[%s4176_s0 + $0x190] sm:$0xff] }
  0x37   :  { %158 = vperm.xlu1 %2004, %v2173_v9   ;;  %153 = vperm.xlu0 %2003, %v2178_v10   ;;  %4205 = vst [vmem:[#allocation10_spill] sm:$0xff] %v2425_v51  ;;  %4206 = vst [vmem:[#allocation11_spill] sm:$0xff] %v2430_v52  ;;  %v2437_v53 = vld [vmem:[%s4176_s0 + $0x1a8] sm:$0xff]  ;;  %v2442_v54 = vld [vmem:[%s4176_s0 + $0x1a0] sm:$0xff] }
  0x38   :  { %4207 = vst [vmem:[#allocation12_spill] sm:$0xff] %v2437_v53  ;;  %v2449_v55 = vld [vmem:[%s4176_s0 + $0x1b8] sm:$0xff]  ;;  %v2454_v56 = vld [vmem:[%s4176_s0 + $0x1b0] sm:$0xff]  ;;  %v2461_v57 = vld [vmem:[%s4176_s0 + $0x1c8] sm:$0xff] }
  0x39   :  { %4208 = vst [vmem:[#allocation13_spill] sm:$0xff] %v2449_v55  ;;  %4209 = vst [vmem:[#allocation14_spill] sm:$0xff] %v2454_v56  ;;  %v2466_v58 = vld [vmem:[%s4176_s0 + $0x1c0] sm:$0xff]  ;;  %v2473_v59 = vld [vmem:[%s4176_s0 + $0x1d8] sm:$0xff] }
  0x3a   :  { %4210 = vst [vmem:[#allocation15_spill] sm:$0xff] %v2461_v57  ;;  %4211 = vst [vmem:[#allocation16_spill] sm:$0xff] %v2466_v58  ;;  %v2478_v60 = vld [vmem:[%s4176_s0 + $0x1d0] sm:$0xff]  ;;  %v2485_v61 = vld [vmem:[%s4176_s0 + $0x1e8] sm:$0xff] }
  0x3b   :  { %168 = vperm.xlu1 %2004, %v2185_v11   ;;  %163 = vperm.xlu0 %2003, %v2190_v12   ;;  %4212 = vst [vmem:[#allocation17_spill] sm:$0xff] %v2473_v59  ;;  %4213 = vst [vmem:[#allocation18_spill] sm:$0xff] %v2478_v60  ;;  %v2490_v62 = vld [vmem:[%s4176_s0 + $0x1e0] sm:$0xff]  ;;  %v2497_v63 = vld [vmem:[%s4176_s0 + $0x1f8] sm:$0xff] }
  0x3c   :  { %4214 = vst [vmem:[#allocation19_spill] sm:$0xff] %v2485_v61  ;;  %4215 = vst [vmem:[#allocation20_spill] sm:$0xff] %v2490_v62  ;;  %v2502_v0 = vld [vmem:[%s4176_s0 + $0x1f0] sm:$0xff] }
  0x3d   :  { %4216 = vst [vmem:[#allocation21_spill] sm:$0xff] %v2497_v63 }
  0x3f   :  { %178 = vperm.xlu1 %2004, %v2197_v13   ;;  %173 = vperm.xlu0 %2003, %v2202_v14  }
  0x43   :  { %188 = vperm.xlu1 %2004, %v2209_v15   ;;  %183 = vperm.xlu0 %2003, %v2214_v16  }
  0x47   :  { %198 = vperm.xlu1 %2004, %v2221_v17   ;;  %193 = vperm.xlu0 %2003, %v2226_v18  }
  0x4b   :  { %208 = vperm.xlu1 %2004, %v2233_v19   ;;  %203 = vperm.xlu0 %2003, %v2238_v20  }
  0x4f   :  { %218 = vperm.xlu1 %2004, %v2245_v21   ;;  %213 = vperm.xlu0 %2003, %v2250_v22  }
  0x53   :  { %228 = vperm.xlu1 %2004, %v2257_v23   ;;  %223 = vperm.xlu0 %2003, %v2262_v24  }
  0x57   :  { %238 = vperm.xlu1 %2004, %v2269_v25   ;;  %233 = vperm.xlu0 %2003, %v2274_v26  }
  0x5b   :  { %248 = vperm.xlu1 %2004, %v2281_v27   ;;  %243 = vperm.xlu0 %2003, %v2286_v28  }
  0x5f   :  { %258 = vperm.xlu1 %2004, %v2293_v29   ;;  %253 = vperm.xlu0 %2003, %v2298_v30  }
  0x63   :  { %268 = vperm.xlu1 %2004, %v2305_v31   ;;  %263 = vperm.xlu0 %2003, %v2310_v32  }
  0x67   :  { %278 = vperm.xlu1 %2004, %v2317_v33   ;;  %273 = vperm.xlu0 %2003, %v2322_v34  }
  0x6b   :  { %288 = vperm.xlu1 %2004, %v2329_v35   ;;  %283 = vperm.xlu0 %2003, %v2334_v36  }
  0x6f   :  { %298 = vperm.xlu1 %2004, %v2341_v37   ;;  %293 = vperm.xlu0 %2003, %v2346_v38  }
  0x73   :  { %308 = vperm.xlu1 %2004, %v2353_v39   ;;  %303 = vperm.xlu0 %2003, %v2358_v40  }
  0x77   :  { %318 = vperm.xlu1 %2004, %v2365_v41   ;;  %313 = vperm.xlu0 %2003, %v2370_v42  }
  0x7b   :  { %328 = vperm.xlu1 %2004, %v2377_v43   ;;  %323 = vperm.xlu0 %2003, %v2382_v44  }
  0x7f   :  { %338 = vperm.xlu1 %2004, %v2389_v45   ;;  %333 = vperm.xlu0 %2003, %v2394_v46  }
  0x83   :  { %348 = vperm.xlu1 %2004, %v2401_v47   ;;  %343 = vperm.xlu0 %2003, %v2406_v48  }
  0x87   :  { %358 = vperm.xlu1 %2004, %v2413_v49   ;;  %353 = vperm.xlu0 %2003, %v2418_v50  }
  0x8b   :  { %368 = vperm.xlu1 %2004, %v2425_v51   ;;  %363 = vperm.xlu0 %2003, %v2430_v52  }
  0x8f   :  { %378 = vperm.xlu1 %2004, %v2437_v53   ;;  %373 = vperm.xlu0 %2003, %v2442_v54  }
  0x93   :  { %388 = vperm.xlu1 %2004, %v2449_v55   ;;  %383 = vperm.xlu0 %2003, %v2454_v56  }
  0x97   :  { %398 = vperm.xlu1 %2004, %v2461_v57   ;;  %393 = vperm.xlu0 %2003, %v2466_v58  }
  0x9b   :  { %408 = vperm.xlu1 %2004, %v2473_v59   ;;  %403 = vperm.xlu0 %2003, %v2478_v60  }
  0x9f   :  { %418 = vperm.xlu1 %2004, %v2485_v61   ;;  %413 = vperm.xlu0 %2003, %v2490_v62   ;;  %v2075_v61 = vmov 1  }
  0xa3   :  { %428 = vperm.xlu1 %2004, %v2497_v63   ;;  %423 = vperm.xlu0 %2003, %v2502_v0  }
  0xa6   :  { %v2506_v59 = vpop.permute.xlu1 %123  ;;  %v2508_v60 = vpop.permute.xlu0 %113 }
  0xa7   :  { %4217 = vst [vmem:[#allocation22_spill] sm:$0xff] %v2506_v59  ;;  %4218 = vst [vmem:[#allocation23_spill] sm:$0xff] %v2508_v60  ;;  %2006 = vset.pattern.permute.xlu1 %v2075_v61  ;;  %2005 = vset.pattern.permute.xlu0 %v2075_v61 }
  0xa8   :  { %569 = vperm.xlu1 %2006, %v2142_v4   ;;  %565 = vperm.xlu0 %2005, %v2130_v2  }
  0xaa   :  { %v2512_v62 = vpop.permute.xlu1 %128  ;;  %v2514_v57 = vpop.permute.xlu0 %118 }
  0xab   :  { %4219 = vst [vmem:[#allocation24_spill] sm:$0xff] %v2512_v62  ;;  %4220 = vst [vmem:[#allocation25_spill] sm:$0xff] %v2514_v57 }
  0xac   :  { %573 = vperm.xlu1 %2006, %v2125_v1   ;;  %577 = vperm.xlu0 %2005, %v2137_v3  }
  0xae   :  { %v2518_v63 = vpop.permute.xlu1 %138  ;;  %v2520_v59 = vpop.permute.xlu0 %133 }
  0xaf   :  { %4221 = vst [vmem:[#allocation26_spill] sm:$0xff] %v2518_v63  ;;  %4222 = vst [vmem:[#allocation27_spill] sm:$0xff] %v2520_v59 }
  0xb0   :  { %581 = vperm.xlu1 %2006, %v2154_v6   ;;  %585 = vperm.xlu0 %2005, %v2149_v5  }
  0xb2   :  { %v2524_v61 = vpop.permute.xlu1 %148  ;;  %v2526_v60 = vpop.permute.xlu0 %143 }
  0xb3   :  { %4223 = vst [vmem:[#allocation28_spill] sm:$0xff] %v2524_v61  ;;  %4224 = vst [vmem:[#allocation29_spill] sm:$0xff] %v2526_v60 }
  0xb4   :  { %589 = vperm.xlu1 %2006, %v2166_v8   ;;  %593 = vperm.xlu0 %2005, %v2161_v7  }
  0xb6   :  { %v2530_v57 = vpop.permute.xlu1 %158  ;;  %v2532_v62 = vpop.permute.xlu0 %153 }
  0xb7   :  { %4225 = vst [vmem:[#allocation30_spill] sm:$0xff] %v2530_v57  ;;  %4226 = vst [vmem:[#allocation31_spill] sm:$0xff] %v2532_v62 }
  0xb8   :  { %597 = vperm.xlu1 %2006, %v2178_v10   ;;  %601 = vperm.xlu0 %2005, %v2173_v9  }
  0xba   :  { %v2536_v59 = vpop.permute.xlu1 %168  ;;  %v2538_v63 = vpop.permute.xlu0 %163 }
  0xbb   :  { %4227 = vst [vmem:[#allocation32_spill] sm:$0xff] %v2536_v59  ;;  %4228 = vst [vmem:[#allocation33_spill] sm:$0xff] %v2538_v63 }
  0xbc   :  { %605 = vperm.xlu1 %2006, %v2190_v12   ;;  %609 = vperm.xlu0 %2005, %v2185_v11  }
  0xbe   :  { %v2542_v60 = vpop.permute.xlu1 %178  ;;  %v2544_v61 = vpop.permute.xlu0 %173 }
  0xbf   :  { %4229 = vst [vmem:[#allocation34_spill] sm:$0xff] %v2542_v60  ;;  %4230 = vst [vmem:[#allocation35_spill] sm:$0xff] %v2544_v61 }
  0xc0   :  { %613 = vperm.xlu1 %2006, %v2202_v14   ;;  %617 = vperm.xlu0 %2005, %v2197_v13  }
  0xc2   :  { %v2548_v62 = vpop.permute.xlu1 %188  ;;  %v2550_v57 = vpop.permute.xlu0 %183 }
  0xc3   :  { %4231 = vst [vmem:[#allocation36_spill] sm:$0xff] %v2548_v62  ;;  %4232 = vst [vmem:[#allocation37_spill] sm:$0xff] %v2550_v57 }
  0xc4   :  { %621 = vperm.xlu1 %2006, %v2214_v16   ;;  %625 = vperm.xlu0 %2005, %v2209_v15  }
  0xc6   :  { %v2554_v63 = vpop.permute.xlu1 %198  ;;  %v2556_v59 = vpop.permute.xlu0 %193 }
  0xc7   :  { %4233 = vst [vmem:[#allocation38_spill] sm:$0xff] %v2554_v63  ;;  %4234 = vst [vmem:[#allocation39_spill] sm:$0xff] %v2556_v59 }
  0xc8   :  { %629 = vperm.xlu1 %2006, %v2226_v18   ;;  %633 = vperm.xlu0 %2005, %v2221_v17  }
  0xca   :  { %v2560_v61 = vpop.permute.xlu1 %208  ;;  %v2562_v60 = vpop.permute.xlu0 %203 }
  0xcb   :  { %4235 = vst [vmem:[#allocation40_spill] sm:$0xff] %v2560_v61  ;;  %4236 = vst [vmem:[#allocation41_spill] sm:$0xff] %v2562_v60 }
  0xcc   :  { %637 = vperm.xlu1 %2006, %v2238_v20   ;;  %641 = vperm.xlu0 %2005, %v2233_v19  }
  0xce   :  { %v2566_v57 = vpop.permute.xlu1 %218  ;;  %v2568_v62 = vpop.permute.xlu0 %213 }
  0xcf   :  { %4237 = vst [vmem:[#allocation42_spill] sm:$0xff] %v2566_v57  ;;  %4238 = vst [vmem:[#allocation43_spill] sm:$0xff] %v2568_v62 }
  0xd0   :  { %645 = vperm.xlu1 %2006, %v2250_v22   ;;  %649 = vperm.xlu0 %2005, %v2245_v21  }
  0xd2   :  { %v2572_v59 = vpop.permute.xlu1 %228  ;;  %v2574_v63 = vpop.permute.xlu0 %223 }
  0xd3   :  { %4239 = vst [vmem:[#allocation44_spill] sm:$0xff] %v2572_v59  ;;  %4240 = vst [vmem:[#allocation45_spill] sm:$0xff] %v2574_v63 }
  0xd4   :  { %653 = vperm.xlu1 %2006, %v2262_v24   ;;  %657 = vperm.xlu0 %2005, %v2257_v23  }
  0xd6   :  { %v2578_v60 = vpop.permute.xlu1 %238  ;;  %v2580_v61 = vpop.permute.xlu0 %233 }
  0xd7   :  { %4241 = vst [vmem:[#allocation46_spill] sm:$0xff] %v2578_v60  ;;  %4242 = vst [vmem:[#allocation47_spill] sm:$0xff] %v2580_v61 }
  0xd8   :  { %661 = vperm.xlu1 %2006, %v2274_v26   ;;  %665 = vperm.xlu0 %2005, %v2269_v25  }
  0xda   :  { %v2584_v62 = vpop.permute.xlu1 %248  ;;  %v2586_v57 = vpop.permute.xlu0 %243 }
  0xdb   :  { %4243 = vst [vmem:[#allocation48_spill] sm:$0xff] %v2584_v62  ;;  %4244 = vst [vmem:[#allocation49_spill] sm:$0xff] %v2586_v57 }
  0xdc   :  { %669 = vperm.xlu1 %2006, %v2286_v28   ;;  %673 = vperm.xlu0 %2005, %v2281_v27  }
  0xde   :  { %v2590_v63 = vpop.permute.xlu1 %258  ;;  %v2592_v59 = vpop.permute.xlu0 %253 }
  0xdf   :  { %4245 = vst [vmem:[#allocation50_spill] sm:$0xff] %v2590_v63  ;;  %4246 = vst [vmem:[#allocation51_spill] sm:$0xff] %v2592_v59 }
  0xe0   :  { %677 = vperm.xlu1 %2006, %v2298_v30   ;;  %681 = vperm.xlu0 %2005, %v2293_v29  }
  0xe2   :  { %v2596_v61 = vpop.permute.xlu1 %268  ;;  %v2598_v60 = vpop.permute.xlu0 %263 }
  0xe3   :  { %4247 = vst [vmem:[#allocation52_spill] sm:$0xff] %v2596_v61  ;;  %4248 = vst [vmem:[#allocation53_spill] sm:$0xff] %v2598_v60 }
  0xe4   :  { %685 = vperm.xlu1 %2006, %v2310_v32   ;;  %689 = vperm.xlu0 %2005, %v2305_v31  }
  0xe6   :  { %v2602_v57 = vpop.permute.xlu1 %278  ;;  %v2604_v62 = vpop.permute.xlu0 %273 }
  0xe7   :  { %4249 = vst [vmem:[#allocation54_spill] sm:$0xff] %v2602_v57  ;;  %4250 = vst [vmem:[#allocation55_spill] sm:$0xff] %v2604_v62 }
  0xe8   :  { %693 = vperm.xlu1 %2006, %v2322_v34   ;;  %697 = vperm.xlu0 %2005, %v2317_v33  }
  0xea   :  { %v2608_v59 = vpop.permute.xlu1 %288  ;;  %v2610_v63 = vpop.permute.xlu0 %283 }
  0xeb   :  { %4251 = vst [vmem:[#allocation56_spill] sm:$0xff] %v2608_v59  ;;  %4252 = vst [vmem:[#allocation57_spill] sm:$0xff] %v2610_v63 }
  0xec   :  { %701 = vperm.xlu1 %2006, %v2334_v36   ;;  %705 = vperm.xlu0 %2005, %v2329_v35  }
  0xee   :  { %v2614_v60 = vpop.permute.xlu1 %298  ;;  %v2616_v61 = vpop.permute.xlu0 %293 }
  0xef   :  { %4253 = vst [vmem:[#allocation58_spill] sm:$0xff] %v2614_v60  ;;  %4254 = vst [vmem:[#allocation59_spill] sm:$0xff] %v2616_v61 }
  0xf0   :  { %709 = vperm.xlu1 %2006, %v2346_v38   ;;  %713 = vperm.xlu0 %2005, %v2341_v37  }
  0xf2   :  { %v2620_v62 = vpop.permute.xlu1 %308  ;;  %v2622_v57 = vpop.permute.xlu0 %303 }
  0xf3   :  { %4255 = vst [vmem:[#allocation60_spill] sm:$0xff] %v2620_v62  ;;  %4256 = vst [vmem:[#allocation61_spill] sm:$0xff] %v2622_v57 }
  0xf4   :  { %717 = vperm.xlu1 %2006, %v2358_v40   ;;  %721 = vperm.xlu0 %2005, %v2353_v39  }
  0xf6   :  { %v2626_v63 = vpop.permute.xlu1 %318  ;;  %v2628_v59 = vpop.permute.xlu0 %313 }
  0xf7   :  { %4257 = vst [vmem:[#allocation62_spill] sm:$0xff] %v2626_v63  ;;  %4258 = vst [vmem:[#allocation63_spill] sm:$0xff] %v2628_v59 }
  0xf8   :  { %725 = vperm.xlu1 %2006, %v2370_v42   ;;  %729 = vperm.xlu0 %2005, %v2365_v41  }
  0xfa   :  { %v2632_v61 = vpop.permute.xlu1 %328  ;;  %v2634_v60 = vpop.permute.xlu0 %323 }
  0xfb   :  { %4259 = vst [vmem:[#allocation64_spill] sm:$0xff] %v2632_v61  ;;  %4260 = vst [vmem:[#allocation65_spill] sm:$0xff] %v2634_v60 }
  0xfc   :  { %733 = vperm.xlu1 %2006, %v2382_v44   ;;  %737 = vperm.xlu0 %2005, %v2377_v43  }
  0xfe   :  { %v2638_v57 = vpop.permute.xlu1 %338  ;;  %v2640_v62 = vpop.permute.xlu0 %333 }
  0xff   :  { %4261 = vst [vmem:[#allocation66_spill] sm:$0xff] %v2638_v57  ;;  %4262 = vst [vmem:[#allocation67_spill] sm:$0xff] %v2640_v62 }
 0x100   :  { %741 = vperm.xlu1 %2006, %v2394_v46   ;;  %745 = vperm.xlu0 %2005, %v2389_v45  }
 0x102   :  { %v2644_v59 = vpop.permute.xlu1 %348  ;;  %v2646_v63 = vpop.permute.xlu0 %343 }
 0x103   :  { %4263 = vst [vmem:[#allocation68_spill] sm:$0xff] %v2644_v59  ;;  %4264 = vst [vmem:[#allocation69_spill] sm:$0xff] %v2646_v63 }
 0x104   :  { %749 = vperm.xlu1 %2006, %v2406_v48   ;;  %753 = vperm.xlu0 %2005, %v2401_v47  }
 0x106   :  { %v2650_v60 = vpop.permute.xlu1 %358  ;;  %v2652_v61 = vpop.permute.xlu0 %353 }
 0x107   :  { %4265 = vst [vmem:[#allocation70_spill] sm:$0xff] %v2650_v60  ;;  %4266 = vst [vmem:[#allocation71_spill] sm:$0xff] %v2652_v61 }
 0x108   :  { %757 = vperm.xlu1 %2006, %v2418_v50   ;;  %761 = vperm.xlu0 %2005, %v2413_v49  }
 0x10a   :  { %v2656_v62 = vpop.permute.xlu1 %368  ;;  %v2658_v57 = vpop.permute.xlu0 %363 }
 0x10b   :  { %4267 = vst [vmem:[#allocation72_spill] sm:$0xff] %v2656_v62  ;;  %4268 = vst [vmem:[#allocation73_spill] sm:$0xff] %v2658_v57 }
 0x10c   :  { %765 = vperm.xlu1 %2006, %v2430_v52   ;;  %769 = vperm.xlu0 %2005, %v2425_v51  }
 0x10e   :  { %v2662_v63 = vpop.permute.xlu1 %378  ;;  %v2664_v59 = vpop.permute.xlu0 %373 }
 0x10f   :  { %4269 = vst [vmem:[#allocation74_spill] sm:$0xff] %v2662_v63  ;;  %4270 = vst [vmem:[#allocation75_spill] sm:$0xff] %v2664_v59  ;;  %v4275_v63 = vld [vmem:[#allocation15_spill] sm:$0xff] }
 0x110   :  { %773 = vperm.xlu1 %2006, %v2442_v54   ;;  %777 = vperm.xlu0 %2005, %v2437_v53   ;;  %v4278_v53 = vld [vmem:[#allocation18_spill] sm:$0xff] }
 0x112   :  { %v2668_v61 = vpop.permute.xlu1 %388  ;;  %v2670_v60 = vpop.permute.xlu0 %383 }
 0x113   :  { %4271 = vst [vmem:[#allocation76_spill] sm:$0xff] %v2668_v61  ;;  %4272 = vst [vmem:[#allocation77_spill] sm:$0xff] %v2670_v60  ;;  %v4279_v61 = vld [vmem:[#allocation17_spill] sm:$0xff] }
 0x114   :  { %781 = vperm.xlu1 %2006, %v2454_v56   ;;  %785 = vperm.xlu0 %2005, %v2449_v55   ;;  %v4282_v55 = vld [vmem:[#allocation20_spill] sm:$0xff] }
 0x116   :  { %v2674_v57 = vpop.permute.xlu1 %398  ;;  %v2676_v62 = vpop.permute.xlu0 %393 }
 0x117   :  { %4273 = vst [vmem:[#allocation78_spill] sm:$0xff] %v2674_v57  ;;  %4274 = vst [vmem:[#allocation79_spill] sm:$0xff] %v2676_v62  ;;  %v4283_v57 = vld [vmem:[#allocation19_spill] sm:$0xff] }
 0x118   :  { %789 = vperm.xlu1 %2006, %v2466_v58   ;;  %793 = vperm.xlu0 %2005, %v4275_v63  }
 0x11a   :  { %v2680_v59 = vpop.permute.xlu1 %408  ;;  %v2682_v51 = vpop.permute.xlu0 %403 }
 0x11b   :  { %4276 = vst [vmem:[#allocation80_spill] sm:$0xff] %v2680_v59  ;;  %4277 = vst [vmem:[#allocation81_spill] sm:$0xff] %v2682_v51  ;;  %v4286_v59 = vld [vmem:[#allocation21_spill] sm:$0xff] }
 0x11c   :  { %797 = vperm.xlu1 %2006, %v4278_v53   ;;  %801 = vperm.xlu0 %2005, %v4279_v61   ;;  %v2076_v61 = vmov 2  }
 0x11e   :  { %v2686_v60 = vpop.permute.xlu1 %418  ;;  %v2688_v56 = vpop.permute.xlu0 %413 }
 0x11f   :  { %4280 = vst [vmem:[#allocation18_spill] sm:$0xff] %v2686_v60  ;;  %4281 = vst [vmem:[#allocation82_spill] sm:$0xff] %v2688_v56  ;;  %v4341_v60 = vld [vmem:[#allocation10_spill] sm:$0xff] }
 0x120   :  { %805 = vperm.xlu1 %2006, %v4282_v55   ;;  %809 = vperm.xlu0 %2005, %v4283_v57  }
 0x122   :  { %v2692_v62 = vpop.permute.xlu1 %428  ;;  %v2694_v58 = vpop.permute.xlu0 %423 }
 0x123   :  { %4284 = vst [vmem:[#allocation20_spill] sm:$0xff] %v2692_v62  ;;  %4285 = vst [vmem:[#allocation19_spill] sm:$0xff] %v2694_v58 }
 0x124   :  { %813 = vperm.xlu1 %2006, %v2502_v0   ;;  %817 = vperm.xlu0 %2005, %v4286_v59  }
 0x127   :  { %v2698_v51 = vpop.permute.xlu1 %569  ;;  %v2700_v63 = vpop.permute.xlu0 %565 }
 0x128   :  { %4287 = vst [vmem:[#allocation21_spill] sm:$0xff] %v2698_v51  ;;  %4288 = vst [vmem:[#allocation83_spill] sm:$0xff] %v2700_v63  ;;  %2007 = vset.pattern.permute.xlu1 %v2076_v61  ;;  %2008 = vset.pattern.permute.xlu0 %v2076_v61 }
 0x129   :  { %954 = vperm.xlu1 %2007, %v2130_v2   ;;  %958 = vperm.xlu0 %2008, %v2142_v4  }
 0x12b   :  { %v2704_v56 = vpop.permute.xlu1 %573  ;;  %v2706_v62 = vpop.permute.xlu0 %577 }
 0x12c   :  { %4289 = vst [vmem:[#allocation84_spill] sm:$0xff] %v2704_v56  ;;  %4290 = vst [vmem:[#allocation85_spill] sm:$0xff] %v2706_v62 }
 0x12d   :  { %962 = vperm.xlu1 %2007, %v2125_v1   ;;  %970 = vperm.xlu0 %2008, %v2154_v6  }
 0x12f   :  { %v2710_v58 = vpop.permute.xlu1 %581  ;;  %v2712_v51 = vpop.permute.xlu0 %585 }
 0x130   :  { %4291 = vst [vmem:[#allocation86_spill] sm:$0xff] %v2710_v58  ;;  %4292 = vst [vmem:[#allocation87_spill] sm:$0xff] %v2712_v51 }
 0x131   :  { %966 = vperm.xlu1 %2007, %v2137_v3   ;;  %978 = vperm.xlu0 %2008, %v2166_v8  }
 0x133   :  { %v2716_v61 = vpop.permute.xlu1 %589  ;;  %v2718_v63 = vpop.permute.xlu0 %593 }
 0x134   :  { %4293 = vst [vmem:[#allocation88_spill] sm:$0xff] %v2716_v61  ;;  %4294 = vst [vmem:[#allocation89_spill] sm:$0xff] %v2718_v63 }
 0x135   :  { %974 = vperm.xlu1 %2007, %v2149_v5   ;;  %986 = vperm.xlu0 %2008, %v2178_v10  }
 0x137   :  { %v2722_v62 = vpop.permute.xlu1 %597  ;;  %v2724_v56 = vpop.permute.xlu0 %601 }
 0x138   :  { %4295 = vst [vmem:[#allocation90_spill] sm:$0xff] %v2722_v62  ;;  %4296 = vst [vmem:[#allocation91_spill] sm:$0xff] %v2724_v56 }
 0x139   :  { %982 = vperm.xlu1 %2007, %v2161_v7   ;;  %994 = vperm.xlu0 %2008, %v2190_v12  }
 0x13b   :  { %v2728_v51 = vpop.permute.xlu1 %605  ;;  %v2730_v58 = vpop.permute.xlu0 %609 }
 0x13c   :  { %4297 = vst [vmem:[#allocation92_spill] sm:$0xff] %v2728_v51  ;;  %4298 = vst [vmem:[#allocation93_spill] sm:$0xff] %v2730_v58 }
 0x13d   :  { %990 = vperm.xlu1 %2007, %v2173_v9   ;;  %1002 = vperm.xlu0 %2008, %v2202_v14  }
 0x13f   :  { %v2734_v63 = vpop.permute.xlu1 %613  ;;  %v2736_v61 = vpop.permute.xlu0 %617 }
 0x140   :  { %4299 = vst [vmem:[#allocation94_spill] sm:$0xff] %v2734_v63  ;;  %4300 = vst [vmem:[#allocation95_spill] sm:$0xff] %v2736_v61 }
 0x141   :  { %998 = vperm.xlu1 %2007, %v2185_v11   ;;  %1010 = vperm.xlu0 %2008, %v2214_v16  }
 0x143   :  { %v2740_v56 = vpop.permute.xlu1 %621  ;;  %v2742_v62 = vpop.permute.xlu0 %625 }
 0x144   :  { %4301 = vst [vmem:[#allocation96_spill] sm:$0xff] %v2740_v56  ;;  %4302 = vst [vmem:[#allocation97_spill] sm:$0xff] %v2742_v62 }
 0x145   :  { %1006 = vperm.xlu1 %2007, %v2197_v13   ;;  %1018 = vperm.xlu0 %2008, %v2226_v18  }
 0x147   :  { %v2746_v58 = vpop.permute.xlu1 %629  ;;  %v2748_v51 = vpop.permute.xlu0 %633 }
 0x148   :  { %4303 = vst [vmem:[#allocation98_spill] sm:$0xff] %v2746_v58  ;;  %4304 = vst [vmem:[#allocation99_spill] sm:$0xff] %v2748_v51 }
 0x149   :  { %1014 = vperm.xlu1 %2007, %v2209_v15   ;;  %1026 = vperm.xlu0 %2008, %v2238_v20  }
 0x14b   :  { %v2752_v61 = vpop.permute.xlu1 %637  ;;  %v2754_v63 = vpop.permute.xlu0 %641 }
 0x14c   :  { %4305 = vst [vmem:[#allocation100_spill] sm:$0xff] %v2752_v61  ;;  %4306 = vst [vmem:[#allocation101_spill] sm:$0xff] %v2754_v63 }
 0x14d   :  { %1022 = vperm.xlu1 %2007, %v2221_v17   ;;  %1034 = vperm.xlu0 %2008, %v2250_v22  }
 0x14f   :  { %v2758_v62 = vpop.permute.xlu1 %645  ;;  %v2760_v56 = vpop.permute.xlu0 %649 }
 0x150   :  { %4307 = vst [vmem:[#allocation102_spill] sm:$0xff] %v2758_v62  ;;  %4308 = vst [vmem:[#allocation103_spill] sm:$0xff] %v2760_v56 }
 0x151   :  { %1030 = vperm.xlu1 %2007, %v2233_v19   ;;  %1042 = vperm.xlu0 %2008, %v2262_v24  }
 0x153   :  { %v2764_v51 = vpop.permute.xlu1 %653  ;;  %v2766_v58 = vpop.permute.xlu0 %657 }
 0x154   :  { %4309 = vst [vmem:[#allocation104_spill] sm:$0xff] %v2764_v51  ;;  %4310 = vst [vmem:[#allocation105_spill] sm:$0xff] %v2766_v58 }
 0x155   :  { %1038 = vperm.xlu1 %2007, %v2245_v21   ;;  %1050 = vperm.xlu0 %2008, %v2274_v26  }
 0x157   :  { %v2770_v63 = vpop.permute.xlu1 %661  ;;  %v2772_v61 = vpop.permute.xlu0 %665 }
 0x158   :  { %4311 = vst [vmem:[#allocation106_spill] sm:$0xff] %v2770_v63  ;;  %4312 = vst [vmem:[#allocation107_spill] sm:$0xff] %v2772_v61 }
 0x159   :  { %1046 = vperm.xlu1 %2007, %v2257_v23   ;;  %1058 = vperm.xlu0 %2008, %v2286_v28  }
 0x15b   :  { %v2776_v56 = vpop.permute.xlu1 %669  ;;  %v2778_v62 = vpop.permute.xlu0 %673 }
 0x15c   :  { %4313 = vst [vmem:[#allocation108_spill] sm:$0xff] %v2776_v56  ;;  %4314 = vst [vmem:[#allocation109_spill] sm:$0xff] %v2778_v62 }
 0x15d   :  { %1054 = vperm.xlu1 %2007, %v2269_v25   ;;  %1066 = vperm.xlu0 %2008, %v2298_v30  }
 0x15f   :  { %v2782_v58 = vpop.permute.xlu1 %677  ;;  %v2784_v51 = vpop.permute.xlu0 %681 }
 0x160   :  { %4315 = vst [vmem:[#allocation110_spill] sm:$0xff] %v2782_v58  ;;  %4316 = vst [vmem:[#allocation111_spill] sm:$0xff] %v2784_v51 }
 0x161   :  { %1062 = vperm.xlu1 %2007, %v2281_v27   ;;  %1074 = vperm.xlu0 %2008, %v2310_v32  }
 0x163   :  { %v2788_v61 = vpop.permute.xlu1 %685  ;;  %v2790_v63 = vpop.permute.xlu0 %689 }
 0x164   :  { %4317 = vst [vmem:[#allocation112_spill] sm:$0xff] %v2788_v61  ;;  %4318 = vst [vmem:[#allocation113_spill] sm:$0xff] %v2790_v63 }
 0x165   :  { %1070 = vperm.xlu1 %2007, %v2293_v29   ;;  %1082 = vperm.xlu0 %2008, %v2322_v34  }
 0x167   :  { %v2794_v62 = vpop.permute.xlu1 %693  ;;  %v2796_v56 = vpop.permute.xlu0 %697 }
 0x168   :  { %4319 = vst [vmem:[#allocation114_spill] sm:$0xff] %v2794_v62  ;;  %4320 = vst [vmem:[#allocation115_spill] sm:$0xff] %v2796_v56 }
 0x169   :  { %1078 = vperm.xlu1 %2007, %v2305_v31   ;;  %1090 = vperm.xlu0 %2008, %v2334_v36  }
 0x16b   :  { %v2800_v51 = vpop.permute.xlu1 %701  ;;  %v2802_v58 = vpop.permute.xlu0 %705 }
 0x16c   :  { %4321 = vst [vmem:[#allocation116_spill] sm:$0xff] %v2800_v51  ;;  %4322 = vst [vmem:[#allocation117_spill] sm:$0xff] %v2802_v58 }
 0x16d   :  { %1086 = vperm.xlu1 %2007, %v2317_v33   ;;  %1098 = vperm.xlu0 %2008, %v2346_v38  }
 0x16f   :  { %v2806_v63 = vpop.permute.xlu1 %709  ;;  %v2808_v61 = vpop.permute.xlu0 %713 }
 0x170   :  { %4323 = vst [vmem:[#allocation118_spill] sm:$0xff] %v2806_v63  ;;  %4324 = vst [vmem:[#allocation119_spill] sm:$0xff] %v2808_v61 }
 0x171   :  { %1094 = vperm.xlu1 %2007, %v2329_v35   ;;  %1106 = vperm.xlu0 %2008, %v2358_v40  }
 0x173   :  { %v2812_v56 = vpop.permute.xlu1 %717  ;;  %v2814_v62 = vpop.permute.xlu0 %721 }
 0x174   :  { %4325 = vst [vmem:[#allocation120_spill] sm:$0xff] %v2812_v56  ;;  %4326 = vst [vmem:[#allocation121_spill] sm:$0xff] %v2814_v62 }
 0x175   :  { %1102 = vperm.xlu1 %2007, %v2341_v37   ;;  %1114 = vperm.xlu0 %2008, %v2370_v42  }
 0x177   :  { %v2818_v58 = vpop.permute.xlu1 %725  ;;  %v2820_v51 = vpop.permute.xlu0 %729 }
 0x178   :  { %4327 = vst [vmem:[#allocation122_spill] sm:$0xff] %v2818_v58  ;;  %4328 = vst [vmem:[#allocation123_spill] sm:$0xff] %v2820_v51 }
 0x179   :  { %1110 = vperm.xlu1 %2007, %v2353_v39   ;;  %1122 = vperm.xlu0 %2008, %v2382_v44  }
 0x17b   :  { %v2824_v61 = vpop.permute.xlu1 %733  ;;  %v2826_v63 = vpop.permute.xlu0 %737 }
 0x17c   :  { %4329 = vst [vmem:[#allocation124_spill] sm:$0xff] %v2824_v61  ;;  %4330 = vst [vmem:[#allocation125_spill] sm:$0xff] %v2826_v63 }
 0x17d   :  { %1118 = vperm.xlu1 %2007, %v2365_v41   ;;  %1130 = vperm.xlu0 %2008, %v2394_v46  }
 0x17f   :  { %v2830_v62 = vpop.permute.xlu1 %741  ;;  %v2832_v56 = vpop.permute.xlu0 %745 }
 0x180   :  { %4331 = vst [vmem:[#allocation126_spill] sm:$0xff] %v2830_v62  ;;  %4332 = vst [vmem:[#allocation127_spill] sm:$0xff] %v2832_v56 }
 0x181   :  { %1126 = vperm.xlu1 %2007, %v2377_v43   ;;  %1138 = vperm.xlu0 %2008, %v2406_v48  }
 0x183   :  { %v2836_v51 = vpop.permute.xlu1 %749  ;;  %v2838_v58 = vpop.permute.xlu0 %753 }
 0x184   :  { %4333 = vst [vmem:[#allocation128_spill] sm:$0xff] %v2836_v51  ;;  %4334 = vst [vmem:[#allocation129_spill] sm:$0xff] %v2838_v58 }
 0x185   :  { %1134 = vperm.xlu1 %2007, %v2389_v45   ;;  %1146 = vperm.xlu0 %2008, %v2418_v50  }
 0x187   :  { %v2842_v63 = vpop.permute.xlu1 %757  ;;  %v2844_v61 = vpop.permute.xlu0 %761 }
 0x188   :  { %4335 = vst [vmem:[#allocation130_spill] sm:$0xff] %v2842_v63  ;;  %4336 = vst [vmem:[#allocation131_spill] sm:$0xff] %v2844_v61  ;;  %v4342_v63 = vld [vmem:[#allocation14_spill] sm:$0xff] }
 0x189   :  { %1142 = vperm.xlu1 %2007, %v2401_v47   ;;  %1154 = vperm.xlu0 %2008, %v2430_v52   ;;  %v4345_v52 = vld [vmem:[#allocation12_spill] sm:$0xff] }
 0x18b   :  { %v2848_v56 = vpop.permute.xlu1 %765  ;;  %v2850_v62 = vpop.permute.xlu0 %769 }
 0x18c   :  { %4337 = vst [vmem:[#allocation132_spill] sm:$0xff] %v2848_v56  ;;  %4338 = vst [vmem:[#allocation133_spill] sm:$0xff] %v2850_v62  ;;  %v4346_v56 = vld [vmem:[#allocation16_spill] sm:$0xff] }
 0x18d   :  { %1150 = vperm.xlu1 %2007, %v2413_v49   ;;  %1162 = vperm.xlu0 %2008, %v2442_v54   ;;  %v4349_v54 = vld [vmem:[#allocation13_spill] sm:$0xff] }
 0x18f   :  { %v2854_v58 = vpop.permute.xlu1 %773  ;;  %v2856_v51 = vpop.permute.xlu0 %777 }
 0x190   :  { %4339 = vst [vmem:[#allocation134_spill] sm:$0xff] %v2854_v58  ;;  %4340 = vst [vmem:[#allocation135_spill] sm:$0xff] %v2856_v51 }
 0x191   :  { %1158 = vperm.xlu1 %2007, %v4341_v60   ;;  %1170 = vperm.xlu0 %2008, %v4342_v63   ;;  %v4352_v63 = vld [vmem:[#allocation15_spill] sm:$0xff] }
 0x193   :  { %v2860_v61 = vpop.permute.xlu1 %781  ;;  %v2862_v50 = vpop.permute.xlu0 %785 }
 0x194   :  { %4343 = vst [vmem:[#allocation10_spill] sm:$0xff] %v2860_v61  ;;  %4344 = vst [vmem:[#allocation14_spill] sm:$0xff] %v2862_v50 }
 0x195   :  { %1166 = vperm.xlu1 %2007, %v4345_v52   ;;  %1178 = vperm.xlu0 %2008, %v4346_v56   ;;  %v4355_v56 = vld [vmem:[#allocation17_spill] sm:$0xff] }
 0x197   :  { %v2866_v62 = vpop.permute.xlu1 %789  ;;  %v2868_v48 = vpop.permute.xlu0 %793 }
 0x198   :  { %4347 = vst [vmem:[#allocation12_spill] sm:$0xff] %v2866_v62  ;;  %4348 = vst [vmem:[#allocation16_spill] sm:$0xff] %v2868_v48 }
 0x199   :  { %1174 = vperm.xlu1 %2007, %v4349_v54   ;;  %1186 = vperm.xlu0 %2008, %v4278_v53   ;;  %v2077_v53 = vmov 3  }
 0x19b   :  { %v2872_v51 = vpop.permute.xlu1 %797  ;;  %v2874_v58 = vpop.permute.xlu0 %801 }
 0x19c   :  { %4350 = vst [vmem:[#allocation13_spill] sm:$0xff] %v2872_v51  ;;  %4351 = vst [vmem:[#allocation136_spill] sm:$0xff] %v2874_v58 }
 0x19d   :  { %1182 = vperm.xlu1 %2007, %v4352_v63   ;;  %1194 = vperm.xlu0 %2008, %v4282_v55  }
 0x19f   :  { %v2878_v50 = vpop.permute.xlu1 %805  ;;  %v2880_v61 = vpop.permute.xlu0 %809 }
 0x1a0   :  { %4353 = vst [vmem:[#allocation15_spill] sm:$0xff] %v2878_v50  ;;  %4354 = vst [vmem:[#allocation137_spill] sm:$0xff] %v2880_v61  ;;  %v4394_v61 = vld [vmem:[#allocation24_spill] sm:$0xff] }
 0x1a1   :  { %1190 = vperm.xlu1 %2007, %v4355_v56   ;;  %1202 = vperm.xlu0 %2008, %v2502_v0  }
 0x1a3   :  { %v2884_v48 = vpop.permute.xlu1 %813  ;;  %v2886_v62 = vpop.permute.xlu0 %817 }
 0x1a4   :  { %4356 = vst [vmem:[#allocation17_spill] sm:$0xff] %v2884_v48  ;;  %4357 = vst [vmem:[#allocation138_spill] sm:$0xff] %v2886_v62  ;;  %v4392_v48 = vld [vmem:[#allocation22_spill] sm:$0xff] }
 0x1a5   :  { %1198 = vperm.xlu1 %2007, %v4283_v57   ;;  %2009 = vset.pattern.permute.xlu0 %v2077_v53 }
 0x1a6   :  { %1343 = vperm.xlu0 %2009, %v2130_v2  }
 0x1a8   :  { %v2890_v58 = vpop.permute.xlu1 %954  ;;  %v2892_v55 = vpop.permute.xlu0 %958 }
 0x1a9   :  { %1206 = vperm.xlu1 %2007, %v4286_v59  }
 0x1aa   :  { %1355 = vperm.xlu0 %2009, %v2137_v3  }
 0x1ac   :  { %v2896_v56 = vpop.permute.xlu1 %962  ;;  %v2898_v0 = vpop.permute.xlu0 %970 }
 0x1ad   :  { %4358 = vst [vmem:[#allocation139_spill] sm:$0xff] %v2898_v0  ;;  %2010 = vset.pattern.permute.xlu1 %v2077_v53 }
 0x1ae   :  { %1347 = vperm.xlu1 %2010, %v2142_v4   ;;  %1363 = vperm.xlu0 %2009, %v2149_v5  }
 0x1b0   :  { %v2902_v57 = vpop.permute.xlu1 %966  ;;  %v2904_v2 = vpop.permute.xlu0 %978 }
 0x1b1   :  { %4359 = vst [vmem:[#allocation140_spill] sm:$0xff] %v2904_v2 }
 0x1b2   :  { %1351 = vperm.xlu1 %2010, %v2125_v1   ;;  %1371 = vperm.xlu0 %2009, %v2161_v7  }
 0x1b4   :  { %v2908_v59 = vpop.permute.xlu1 %974  ;;  %v2910_v3 = vpop.permute.xlu0 %986 }
 0x1b5   :  { %4360 = vst [vmem:[#allocation141_spill] sm:$0xff] %v2910_v3  ;;  %v4444_v3 = vld [vmem:[#allocation63_spill] sm:$0xff] }
 0x1b6   :  { %1359 = vperm.xlu1 %2010, %v2154_v6   ;;  %1379 = vperm.xlu0 %2009, %v2173_v9  }
 0x1b8   :  { %v2914_v53 = vpop.permute.xlu1 %982  ;;  %v2916_v4 = vpop.permute.xlu0 %994 }
 0x1b9   :  { %4361 = vst [vmem:[#allocation142_spill] sm:$0xff] %v2916_v4  ;;  %v4440_v4 = vld [vmem:[#allocation60_spill] sm:$0xff] }
 0x1ba   :  { %1367 = vperm.xlu1 %2010, %v2166_v8   ;;  %1387 = vperm.xlu0 %2009, %v2185_v11  }
 0x1bc   :  { %v2920_v5 = vpop.permute.xlu1 %990  ;;  %v2922_v1 = vpop.permute.xlu0 %1002 }
 0x1bd   :  { %4362 = vst [vmem:[#allocation143_spill] sm:$0xff] %v2920_v5  ;;  %4363 = vst [vmem:[#allocation144_spill] sm:$0xff] %v2922_v1  ;;  %v4438_v1 = vld [vmem:[#allocation58_spill] sm:$0xff] }
 0x1be   :  { %1375 = vperm.xlu1 %2010, %v2178_v10   ;;  %1395 = vperm.xlu0 %2009, %v2197_v13  }
 0x1c0   :  { %v2926_v7 = vpop.permute.xlu1 %998  ;;  %v2928_v6 = vpop.permute.xlu0 %1010 }
 0x1c1   :  { %4364 = vst [vmem:[#allocation145_spill] sm:$0xff] %v2926_v7  ;;  %4365 = vst [vmem:[#allocation146_spill] sm:$0xff] %v2928_v6 }
 0x1c2   :  { %1383 = vperm.xlu1 %2010, %v2190_v12   ;;  %1403 = vperm.xlu0 %2009, %v2209_v15  }
 0x1c4   :  { %v2932_v9 = vpop.permute.xlu1 %1006  ;;  %v2934_v8 = vpop.permute.xlu0 %1018 }
 0x1c5   :  { %4366 = vst [vmem:[#allocation147_spill] sm:$0xff] %v2932_v9  ;;  %4367 = vst [vmem:[#allocation148_spill] sm:$0xff] %v2934_v8  ;;  %v4430_v8 = vld [vmem:[#allocation52_spill] sm:$0xff] }
 0x1c6   :  { %1391 = vperm.xlu1 %2010, %v2202_v14   ;;  %1411 = vperm.xlu0 %2009, %v2221_v17  }
 0x1c8   :  { %v2938_v11 = vpop.permute.xlu1 %1014  ;;  %v2940_v10 = vpop.permute.xlu0 %1026 }
 0x1c9   :  { %4368 = vst [vmem:[#allocation149_spill] sm:$0xff] %v2938_v11  ;;  %4369 = vst [vmem:[#allocation150_spill] sm:$0xff] %v2940_v10 }
 0x1ca   :  { %1399 = vperm.xlu1 %2010, %v2214_v16   ;;  %1419 = vperm.xlu0 %2009, %v2233_v19  }
 0x1cc   :  { %v2944_v13 = vpop.permute.xlu1 %1022  ;;  %v2946_v12 = vpop.permute.xlu0 %1034 }
 0x1cd   :  { %4370 = vst [vmem:[#allocation151_spill] sm:$0xff] %v2944_v13  ;;  %4371 = vst [vmem:[#allocation152_spill] sm:$0xff] %v2946_v12  ;;  %v4424_v12 = vld [vmem:[#allocation48_spill] sm:$0xff] }
 0x1ce   :  { %1407 = vperm.xlu1 %2010, %v2226_v18   ;;  %1427 = vperm.xlu0 %2009, %v2245_v21  }
 0x1d0   :  { %v2950_v15 = vpop.permute.xlu1 %1030  ;;  %v2952_v14 = vpop.permute.xlu0 %1042 }
 0x1d1   :  { %4372 = vst [vmem:[#allocation153_spill] sm:$0xff] %v2950_v15  ;;  %4373 = vst [vmem:[#allocation154_spill] sm:$0xff] %v2952_v14 }
 0x1d2   :  { %1415 = vperm.xlu1 %2010, %v2238_v20   ;;  %1435 = vperm.xlu0 %2009, %v2257_v23  }
 0x1d4   :  { %v2956_v17 = vpop.permute.xlu1 %1038  ;;  %v2958_v16 = vpop.permute.xlu0 %1050 }
 0x1d5   :  { %4374 = vst [vmem:[#allocation155_spill] sm:$0xff] %v2956_v17  ;;  %4375 = vst [vmem:[#allocation156_spill] sm:$0xff] %v2958_v16 }
 0x1d6   :  { %1423 = vperm.xlu1 %2010, %v2250_v22   ;;  %1443 = vperm.xlu0 %2009, %v2269_v25  }
 0x1d8   :  { %v2962_v19 = vpop.permute.xlu1 %1046  ;;  %v2964_v18 = vpop.permute.xlu0 %1058 }
 0x1d9   :  { %4376 = vst [vmem:[#allocation157_spill] sm:$0xff] %v2962_v19  ;;  %4377 = vst [vmem:[#allocation158_spill] sm:$0xff] %v2964_v18 }
 0x1da   :  { %1431 = vperm.xlu1 %2010, %v2262_v24   ;;  %1451 = vperm.xlu0 %2009, %v2281_v27  }
 0x1dc   :  { %v2968_v21 = vpop.permute.xlu1 %1054  ;;  %v2970_v20 = vpop.permute.xlu0 %1066 }
 0x1dd   :  { %4378 = vst [vmem:[#allocation159_spill] sm:$0xff] %v2968_v21  ;;  %4379 = vst [vmem:[#allocation160_spill] sm:$0xff] %v2970_v20  ;;  %v4421_v21 = vld [vmem:[#allocation45_spill] sm:$0xff] }
 0x1de   :  { %1439 = vperm.xlu1 %2010, %v2274_v26   ;;  %1459 = vperm.xlu0 %2009, %v2293_v29  }
 0x1e0   :  { %v2974_v23 = vpop.permute.xlu1 %1062  ;;  %v2976_v22 = vpop.permute.xlu0 %1074 }
 0x1e1   :  { %4380 = vst [vmem:[#allocation161_spill] sm:$0xff] %v2974_v23  ;;  %4381 = vst [vmem:[#allocation162_spill] sm:$0xff] %v2976_v22  ;;  %v4419_v23 = vld [vmem:[#allocation43_spill] sm:$0xff] }
 0x1e2   :  { %1447 = vperm.xlu1 %2010, %v2286_v28   ;;  %1467 = vperm.xlu0 %2009, %v2305_v31  }
 0x1e4   :  { %v2980_v25 = vpop.permute.xlu1 %1070  ;;  %v2982_v24 = vpop.permute.xlu0 %1082 }
 0x1e5   :  { %4382 = vst [vmem:[#allocation163_spill] sm:$0xff] %v2980_v25  ;;  %4383 = vst [vmem:[#allocation164_spill] sm:$0xff] %v2982_v24 }
 0x1e6   :  { %1455 = vperm.xlu1 %2010, %v2298_v30   ;;  %1475 = vperm.xlu0 %2009, %v2317_v33   ;;  %v3002_v33 = vld [vmem:[#allocation2] ss:$0 sm:$0xff] }
 0x1e7   :  { %v437_v50 = vmul.f32 %v3002_v33, %v4392_v48  ;;  %v455_v14 = vmul.f32 %v3002_v33, %v4419_v23  ;;  %v4423_v23 = vld [vmem:[#allocation47_spill] sm:$0xff]  ;;  %v462_v19 = vmul.f32 %v3002_v33, %v4424_v12  ;;  %v466_v15 = vmul.f32 %v3002_v33, %v4430_v8 }
 0x1e8   :  { %v2986_v27 = vpop.permute.xlu1 %1078  ;;  %v2988_v26 = vpop.permute.xlu0 %1090  ;;  %v472_v11 = vmul.f32 %v3002_v33, %v4438_v1  ;;  %v4443_v1 = vld [vmem:[#allocation62_spill] sm:$0xff]  ;;  %v475_v7 = vmul.f32 %v3002_v33, %v4444_v3 }
 0x1e9   :  { %4384 = vst [vmem:[#allocation165_spill] sm:$0xff] %v2986_v27  ;;  %4385 = vst [vmem:[#allocation166_spill] sm:$0xff] %v2988_v26  ;;  %v4411_v27 = vld [vmem:[#allocation37_spill] sm:$0xff] }
 0x1ea   :  { %1463 = vperm.xlu1 %2010, %v2310_v32   ;;  %1483 = vperm.xlu0 %2009, %v2329_v35   ;;  %v449_v18 = vmul.f32 %v3002_v33, %v4411_v27 }
 0x1ec   :  { %v2992_v29 = vpop.permute.xlu1 %1086  ;;  %v2994_v28 = vpop.permute.xlu0 %1098 }
 0x1ed   :  { %4386 = vst [vmem:[#allocation167_spill] sm:$0xff] %v2992_v29  ;;  %4387 = vst [vmem:[#allocation168_spill] sm:$0xff] %v2994_v28 }
 0x1ee   :  { %1471 = vperm.xlu1 %2010, %v2322_v34   ;;  %1491 = vperm.xlu0 %2009, %v2341_v37   ;;  %v3012_v34 = vld [vmem:[#allocation4] ss:$0 sm:$0xff] }
 0x1ef   :  { %v4393_v37 = vld [vmem:[#allocation23_spill] sm:$0xff]  ;;  %v3029_v26 = vadd.f32 %v3012_v34, %v437_v50  ;;  %v3158_v12 = vadd.f32 %v3012_v34, %v455_v14  ;;  %v3181_v8 = vadd.f32 %v3012_v34, %v462_v19  ;;  %v3245_v3 = vadd.f32 %v3012_v34, %v472_v11 }
 0x1f0   :  { %v2998_v31 = vpop.permute.xlu1 %1094  ;;  %v3000_v30 = vpop.permute.xlu0 %1106  ;;  %v435_v62 = vmul.f32 %v3002_v33, %v4393_v37  ;;  %v4399_v37 = vld [vmem:[#allocation27_spill] sm:$0xff] }
 0x1f1   :  { %4388 = vst [vmem:[#allocation169_spill] sm:$0xff] %v2998_v31  ;;  %4389 = vst [vmem:[#allocation170_spill] sm:$0xff] %v3000_v30  ;;  %v4396_v30 = vld [vmem:[#allocation26_spill] sm:$0xff]  ;;  %v4405_v31 = vld [vmem:[#allocation33_spill] sm:$0xff] }
 0x1f2   :  { %1479 = vperm.xlu1 %2010, %v2334_v36   ;;  %1499 = vperm.xlu0 %2009, %v2353_v39   ;;  %v438_v36 = vmul.f32 %v3002_v33, %v4394_v61  ;;  %v4395_v39 = vld [vmem:[#allocation25_spill] sm:$0xff]  ;;  %v3036_v61 = vadd.f32 %v3012_v34, %v435_v62  ;;  %v445_v22 = vmul.f32 %v3002_v33, %v4405_v31 }
 0x1f3   :  { %v436_v51 = vmul.f32 %v3002_v33, %v4395_v39  ;;  %v4401_v39 = vld [vmem:[#allocation29_spill] sm:$0xff] }
 0x1f4   :  { %v3006_v32 = vpop.permute.xlu1 %1102  ;;  %v3008_v35 = vpop.permute.xlu0 %1114  ;;  %v441_v24 = vmul.f32 %v3002_v33, %v4401_v39  ;;  %v3045_v50 = vadd.f32 %v3012_v34, %v438_v36  ;;  %v4407_v36 = vld [vmem:[#allocation35_spill] sm:$0xff]  ;;  %v3094_v27 = vadd.f32 %v3012_v34, %v445_v22 }
 0x1f5   :  { %4390 = vst [vmem:[#allocation171_spill] sm:$0xff] %v3006_v32  ;;  %4391 = vst [vmem:[#allocation172_spill] sm:$0xff] %v3008_v35  ;;  %v440_v35 = vmul.f32 %v3002_v33, %v4396_v30  ;;  %v4402_v30 = vld [vmem:[#allocation30_spill] sm:$0xff]  ;;  %v3054_v39 = vadd.f32 %v3012_v34, %v436_v51  ;;  %v447_v29 = vmul.f32 %v3002_v33, %v4407_v36  ;;  %v4410_v51 = vld [vmem:[#allocation36_spill] sm:$0xff] }
 0x1f6   :  { %1487 = vperm.xlu1 %2010, %v2346_v38   ;;  %1507 = vperm.xlu0 %2009, %v2365_v41   ;;  %v439_v38 = vmul.f32 %v3002_v33, %v4399_v37  ;;  %v4400_v41 = vld [vmem:[#allocation28_spill] sm:$0xff]  ;;  %v4403_v37 = vld [vmem:[#allocation31_spill] sm:$0xff]  ;;  %4450 = vst [vmem:[#allocation35_spill] sm:$0xff] %v3245_v3 }
 0x1f7   :  { %v442_v32 = vmul.f32 %v3002_v33, %v4400_v41  ;;  %v4404_v41 = vld [vmem:[#allocation32_spill] sm:$0xff] }
 0x1f8   :  { %v3024_v28 = vpop.permute.xlu1 %1110  ;;  %v3026_v48 = vpop.permute.xlu0 %1122  ;;  %v446_v62 = vmul.f32 %v3002_v33, %v4404_v41  ;;  %v3068_v41 = vadd.f32 %v3012_v34, %v439_v38 }
 0x1f9   :  { %4397 = vst [vmem:[#allocation22_spill] sm:$0xff] %v3024_v28  ;;  %4398 = vst [vmem:[#allocation23_spill] sm:$0xff] %v3026_v48  ;;  %v444_v28 = vmul.f32 %v3002_v33, %v4402_v30  ;;  %v443_v48 = vmul.f32 %v3002_v33, %v4403_v37  ;;  %v3057_v30 = vadd.f32 %v3012_v34, %v440_v35 }
 0x1fa   :  { %1495 = vperm.xlu1 %2010, %v2358_v40   ;;  %1515 = vperm.xlu0 %2009, %v2377_v43   ;;  %v4406_v40 = vld [vmem:[#allocation34_spill] sm:$0xff]  ;;  %v3071_v31 = vadd.f32 %v3012_v34, %v442_v32  ;;  %v450_v35 = vmul.f32 %v3002_v33, %v4410_v51  ;;  %v3091_v38 = vadd.f32 %v3012_v34, %v446_v62 }
 0x1fb   :  { %v448_v43 = vmul.f32 %v3002_v33, %v4406_v40  ;;  %v3078_v40 = vadd.f32 %v3012_v34, %v441_v24  ;;  %v3081_v36 = vadd.f32 %v3012_v34, %v444_v28  ;;  %v3088_v32 = vadd.f32 %v3012_v34, %v443_v48  ;;  %v4413_v24 = vld [vmem:[#allocation39_spill] sm:$0xff]  ;;  %v4415_v48 = vld [vmem:[#allocation41_spill] sm:$0xff] }
 0x1fc   :  { %v3063_v20 = vpop.permute.xlu1 %1118  ;;  %v3065_v37 = vpop.permute.xlu0 %1130  ;;  %v451_v28 = vmul.f32 %v3002_v33, %v4413_v24  ;;  %v453_v25 = vmul.f32 %v3002_v33, %v4415_v48  ;;  %v3113_v22 = vadd.f32 %v3012_v34, %v450_v35  ;;  %v3116_v24 = vadd.f32 %v3012_v34, %v449_v18  ;;  %v4420_v48 = vld [vmem:[#allocation44_spill] sm:$0xff]  ;;  %v4422_v35 = vld [vmem:[#allocation46_spill] sm:$0xff] }
 0x1fd   :  { %4408 = vst [vmem:[#allocation24_spill] sm:$0xff] %v3063_v20  ;;  %4409 = vst [vmem:[#allocation25_spill] sm:$0xff] %v3065_v37  ;;  %v4412_v20 = vld [vmem:[#allocation38_spill] sm:$0xff]  ;;  %v3099_v51 = vadd.f32 %v3012_v34, %v448_v43 }
 0x1fe   :  { %v452_v37 = vmul.f32 %v3002_v33, %v4412_v20  ;;  %1503 = vperm.xlu1 %2010, %v2370_v42   ;;  %1523 = vperm.xlu0 %2009, %v2389_v45   ;;  %v3102_v20 = vadd.f32 %v3012_v34, %v447_v29  ;;  %v4414_v42 = vld [vmem:[#allocation40_spill] sm:$0xff]  ;;  %v4418_v43 = vld [vmem:[#allocation42_spill] sm:$0xff]  ;;  %v3132_v18 = vadd.f32 %v3012_v34, %v451_v28 }
 0x1ff   :  { %v454_v45 = vmul.f32 %v3002_v33, %v4414_v42  ;;  %v456_v29 = vmul.f32 %v3002_v33, %v4418_v43  ;;  %v460_v43 = vmul.f32 %v3002_v33, %v4422_v35  ;;  %v4426_v28 = vld [vmem:[#allocation50_spill] sm:$0xff] }
 0x200   :  { %v3108_v62 = vpop.permute.xlu1 %1126  ;;  %v3110_v16 = vpop.permute.xlu0 %1138  ;;  %v3123_v42 = vadd.f32 %v3012_v34, %v452_v37  ;;  %v459_v37 = vmul.f32 %v3002_v33, %v4423_v23  ;;  %v464_v10 = vmul.f32 %v3002_v33, %v4426_v28 }
 0x201   :  { %4416 = vst [vmem:[#allocation26_spill] sm:$0xff] %v3108_v62  ;;  %4417 = vst [vmem:[#allocation27_spill] sm:$0xff] %v3110_v16  ;;  %v458_v62 = vmul.f32 %v3002_v33, %v4420_v48  ;;  %v457_v16 = vmul.f32 %v3002_v33, %v4421_v21  ;;  %v3141_v48 = vadd.f32 %v3012_v34, %v454_v45  ;;  %v4429_v45 = vld [vmem:[#allocation51_spill] sm:$0xff] }
 0x202   :  { %1511 = vperm.xlu1 %2010, %v2382_v44   ;;  %1531 = vperm.xlu0 %2009, %v2401_v47   ;;  %v3144_v21 = vadd.f32 %v3012_v34, %v453_v25  ;;  %v4425_v44 = vld [vmem:[#allocation49_spill] sm:$0xff]  ;;  %v3155_v23 = vadd.f32 %v3012_v34, %v456_v29  ;;  %v463_v25 = vmul.f32 %v3002_v33, %v4429_v45 }
 0x203   :  { %v461_v47 = vmul.f32 %v3002_v33, %v4425_v44  ;;  %v3165_v44 = vadd.f32 %v3012_v34, %v458_v62  ;;  %v3168_v28 = vadd.f32 %v3012_v34, %v457_v16  ;;  %v3175_v14 = vadd.f32 %v3012_v34, %v460_v43  ;;  %v4432_v62 = vld [vmem:[#allocation54_spill] sm:$0xff]  ;;  %v4434_v43 = vld [vmem:[#allocation56_spill] sm:$0xff] }
 0x204   :  { %v3150_v17 = vpop.permute.xlu1 %1134  ;;  %v3152_v35 = vpop.permute.xlu0 %1146  ;;  %v3178_v29 = vadd.f32 %v3012_v34, %v459_v37  ;;  %v468_v16 = vmul.f32 %v3002_v33, %v4432_v62  ;;  %v470_v6 = vmul.f32 %v3002_v33, %v4434_v43  ;;  %v3200_v19 = vadd.f32 %v3012_v34, %v463_v25  ;;  %v4439_v43 = vld [vmem:[#allocation59_spill] sm:$0xff]  ;;  %v4441_v25 = vld [vmem:[#allocation8_spill] sm:$0xff] }
 0x205   :  { %4427 = vst [vmem:[#allocation28_spill] sm:$0xff] %v3150_v17  ;;  %4428 = vst [vmem:[#allocation29_spill] sm:$0xff] %v3152_v35  ;;  %v4431_v17 = vld [vmem:[#allocation53_spill] sm:$0xff]  ;;  %v3186_v45 = vadd.f32 %v3012_v34, %v461_v47  ;;  %v3203_v62 = vadd.f32 %v3012_v34, %v466_v15 }
 0x206   :  { %v465_v35 = vmul.f32 %v3002_v33, %v4431_v17  ;;  %1519 = vperm.xlu1 %2010, %v2394_v46   ;;  %1539 = vperm.xlu0 %2009, %v2413_v49   ;;  %v3189_v17 = vadd.f32 %v3012_v34, %v464_v10  ;;  %v4433_v46 = vld [vmem:[#allocation55_spill] sm:$0xff]  ;;  %v4437_v47 = vld [vmem:[#allocation57_spill] sm:$0xff]  ;;  %v3219_v15 = vadd.f32 %v3012_v34, %v468_v16 }
 0x207   :  { %v467_v49 = vmul.f32 %v3002_v33, %v4433_v46  ;;  %v469_v10 = vmul.f32 %v3002_v33, %v4437_v47  ;;  %v4442_v47 = vld [vmem:[#allocation61_spill] sm:$0xff] }
 0x208   :  { %v3195_v37 = vpop.permute.xlu1 %1142  ;;  %v3197_v13 = vpop.permute.xlu0 %1154  ;;  %v3210_v46 = vadd.f32 %v3012_v34, %v465_v35  ;;  %v473_v9 = vmul.f32 %v3002_v33, %v4442_v47  ;;  %v476_v35 = vmul.f32 %v3002_v33, %v4443_v1  ;;  %v4447_v16 = vld [vmem:[#allocation65_spill] sm:$0xff] }
 0x209   :  { %4435 = vst [vmem:[#allocation30_spill] sm:$0xff] %v3195_v37  ;;  %4436 = vst [vmem:[#allocation31_spill] sm:$0xff] %v3197_v13  ;;  %v471_v37 = vmul.f32 %v3002_v33, %v4439_v43  ;;  %v474_v13 = vmul.f32 %v3002_v33, %v4440_v4  ;;  %v3228_v43 = vadd.f32 %v3012_v34, %v467_v49  ;;  %v4451_v49 = vld [vmem:[#allocation66_spill] sm:$0xff] }
 0x20a   :  { %1527 = vperm.xlu1 %2010, %v4441_v25   ;;  %1547 = vperm.xlu0 %2009, %v4341_v60   ;;  %v3231_v4 = vadd.f32 %v3012_v34, %v470_v6  ;;  %v4446_v25 = vld [vmem:[#allocation64_spill] sm:$0xff]  ;;  %v477_v2 = vmul.f32 %v3002_v33, %v4447_v16  ;;  %v3242_v1 = vadd.f32 %v3012_v34, %v469_v10  ;;  %v4455_v10 = vld [vmem:[#allocation9_spill] sm:$0xff] }
 0x20b   :  { %v478_v60 = vmul.f32 %v3002_v33, %v4446_v25  ;;  %v480_v6 = vmul.f32 %v3002_v33, %v4451_v49  ;;  %v3252_v25 = vadd.f32 %v3012_v34, %v471_v37  ;;  %v3255_v16 = vadd.f32 %v3012_v34, %v474_v13  ;;  %v4459_v37 = vld [vmem:[#allocation69_spill] sm:$0xff] }
 0x20c   :  { %4445 = vst [vmem:[#allocation32_spill] sm:$0xff] %v3231_v4  ;;  %v3237_v5 = vpop.permute.xlu1 %1150  ;;  %v3239_v47 = vpop.permute.xlu0 %1162  ;;  %v4452_v4 = vld [vmem:[#allocation67_spill] sm:$0xff]  ;;  %v3262_v11 = vadd.f32 %v3012_v34, %v473_v9  ;;  %v3265_v49 = vadd.f32 %v3012_v34, %v476_v35  ;;  %v481_v13 = vmul.f32 %v3002_v33, %v4459_v37 }
 0x20d   :  { %4448 = vst [vmem:[#allocation33_spill] sm:$0xff] %v3237_v5  ;;  %4449 = vst [vmem:[#allocation34_spill] sm:$0xff] %v3239_v47  ;;  %v479_v0 = vmul.f32 %v3002_v33, %v4452_v4  ;;  %v4454_v5 = vld [vmem:[#allocation68_spill] sm:$0xff]  ;;  %v3268_v4 = vadd.f32 %v3012_v34, %v475_v7  ;;  %v4463_v9 = vld [vmem:[#allocation71_spill] sm:$0xff]  ;;  %v3287_v7 = vadd.f32 %v3012_v34, %v480_v6 }
 0x20e   :  { %4453 = vst [vmem:[#allocation36_spill] sm:$0xff] %v3255_v16  ;;  %v482_v47 = vmul.f32 %v3002_v33, %v4454_v5  ;;  %1535 = vperm.xlu1 %2010, %v4455_v10   ;;  %1555 = vperm.xlu0 %2009, %v4345_v52   ;;  %4456 = vst [vmem:[#allocation37_spill] sm:$0xff] %v3262_v11  ;;  %v3273_v16 = vadd.f32 %v3012_v34, %v478_v60  ;;  %v4462_v10 = vld [vmem:[#allocation70_spill] sm:$0xff]  ;;  %v4468_v60 = vld [vmem:[#allocation72_spill] sm:$0xff] }
 0x20f   :  { %4457 = vst [vmem:[#allocation38_spill] sm:$0xff] %v3265_v49  ;;  %4458 = vst [vmem:[#allocation39_spill] sm:$0xff] %v3268_v4  ;;  %v3276_v5 = vadd.f32 %v3012_v34, %v477_v2  ;;  %v484_v52 = vmul.f32 %v3002_v33, %v4462_v10  ;;  %v483_v11 = vmul.f32 %v3002_v33, %v4463_v9  ;;  %v4471_v9 = vld [vmem:[#allocation74_spill] sm:$0xff]  ;;  %v4472_v4 = vld [vmem:[#allocation75_spill] sm:$0xff] }
 0x210   :  { %4460 = vst [vmem:[#allocation40_spill] sm:$0xff] %v3273_v16  ;;  %v3282_v35 = vpop.permute.xlu1 %1158  ;;  %v3284_v49 = vpop.permute.xlu0 %1170  ;;  %4466 = vst [vmem:[#allocation44_spill] sm:$0xff] %v3287_v7  ;;  %v3290_v37 = vadd.f32 %v3012_v34, %v479_v0  ;;  %v486_v2 = vmul.f32 %v3002_v33, %v4468_v60  ;;  %v4469_v16 = vld [vmem:[#allocation73_spill] sm:$0xff]  ;;  %v3297_v10 = vadd.f32 %v3012_v34, %v482_v47  ;;  %v4473_v6 = vld [vmem:[#allocation11_spill] sm:$0xff] }
 0x211   :  { %4461 = vst [vmem:[#allocation41_spill] sm:$0xff] %v3276_v5  ;;  %4464 = vst [vmem:[#allocation42_spill] sm:$0xff] %v3282_v35  ;;  %v485_v5 = vmul.f32 %v3002_v33, %v4469_v16  ;;  %v488_v35 = vmul.f32 %v3002_v33, %v4471_v9  ;;  %v3306_v0 = vadd.f32 %v3012_v34, %v481_v13  ;;  %v4475_v60 = vld [vmem:[#allocation76_spill] sm:$0xff]  ;;  %v4476_v16 = vld [vmem:[#allocation77_spill] sm:$0xff] }
 0x212   :  { %4465 = vst [vmem:[#allocation43_spill] sm:$0xff] %v3284_v49  ;;  %4467 = vst [vmem:[#allocation45_spill] sm:$0xff] %v3290_v37  ;;  %v487_v49 = vmul.f32 %v3002_v33, %v4472_v4  ;;  %1543 = vperm.xlu1 %2010, %v4473_v6   ;;  %1563 = vperm.xlu0 %2009, %v4349_v54   ;;  %v490_v7 = vmul.f32 %v3002_v33, %v4475_v60  ;;  %v4480_v6 = vld [vmem:[#allocation79_spill] sm:$0xff]  ;;  %v4481_v13 = vld [vmem:[#allocation80_spill] sm:$0xff] }
 0x213   :  { %4470 = vst [vmem:[#allocation46_spill] sm:$0xff] %v3297_v10  ;;  %4474 = vst [vmem:[#allocation47_spill] sm:$0xff] %v3306_v0  ;;  %v489_v47 = vmul.f32 %v3002_v33, %v4476_v16  ;;  %v4477_v10 = vld [vmem:[#allocation78_spill] sm:$0xff]  ;;  %v3315_v9 = vadd.f32 %v3012_v34, %v484_v52  ;;  %v3318_v4 = vadd.f32 %v3012_v34, %v483_v11  ;;  %v4485_v52 = vld [vmem:[#allocation81_spill] sm:$0xff] }
 0x214   :  { %v492_v37 = vmul.f32 %v3002_v33, %v4477_v10  ;;  %v491_v54 = vmul.f32 %v3002_v33, %v4480_v6  ;;  %v494_v0 = vmul.f32 %v3002_v33, %v4481_v13  ;;  %v3324_v3 = vpop.permute.xlu1 %1166  ;;  %v3326_v60 = vpop.permute.xlu0 %1178  ;;  %v3329_v16 = vadd.f32 %v3012_v34, %v486_v2  ;;  %v3338_v6 = vld [vmem:[#allocation2 + $0x1] ss:$0 sm:$0xff] }
 0x215   :  { %4478 = vst [vmem:[#allocation48_spill] sm:$0xff] %v3315_v9  ;;  %4479 = vst [vmem:[#allocation49_spill] sm:$0xff] %v3318_v4  ;;  %v3332_v10 = vadd.f32 %v3012_v34, %v485_v5  ;;  %v493_v11 = vmul.f32 %v3002_v33, %v4485_v52  ;;  %v4486_v9 = vld [vmem:[#allocation18_spill] sm:$0xff]  ;;  %v3341_v13 = vadd.f32 %v3012_v34, %v488_v35  ;;  %v2011_v5 = vld [vmem:[%s4176_s0 + $0x1a0] sm:$0xff] }
 0x216   :  { %4482 = vst [vmem:[#allocation50_spill] sm:$0xff] %v3324_v3  ;;  %4483 = vst [vmem:[#allocation51_spill] sm:$0xff] %v3326_v60  ;;  %v496_v4 = vmul.f32 %v3002_v33, %v4486_v9  ;;  %v3344_v3 = vadd.f32 %v3012_v34, %v487_v49  ;;  %v4489_v60 = vld [vmem:[#allocation82_spill] sm:$0xff]  ;;  %1551 = vperm.xlu1 %2010, %v2011_v5   ;;  %1571 = vperm.xlu0 %2009, %v4352_v63   ;;  %v4493_v49 = vld [vmem:[#allocation20_spill] sm:$0xff] }
 0x217   :  { %4484 = vst [vmem:[#allocation52_spill] sm:$0xff] %v3329_v16  ;;  %4487 = vst [vmem:[#allocation53_spill] sm:$0xff] %v3341_v13  ;;  %v495_v2 = vmul.f32 %v3002_v33, %v4489_v60  ;;  %v3353_v9 = vadd.f32 %v3012_v34, %v490_v7  ;;  %v3356_v52 = vadd.f32 %v3012_v34, %v489_v47  ;;  %v4496_v5 = vld [vmem:[#allocation21_spill] sm:$0xff]  ;;  %v4497_v7 = vld [vmem:[#allocation83_spill] sm:$0xff] }
 0x218   :  { %4488 = vst [vmem:[#allocation54_spill] sm:$0xff] %v3344_v3  ;;  %v3359_v35 = vadd.f32 %v3012_v34, %v492_v37  ;;  %v498_v13 = vmul.f32 %v3002_v33, %v4493_v49  ;;  %v3364_v60 = vadd.f32 %v3012_v34, %v491_v54  ;;  %v3367_v3 = vadd.f32 %v3012_v34, %v494_v0  ;;  %v3373_v47 = vpop.permute.xlu1 %1174  ;;  %v4502_v54 = vld [vmem:[#allocation84_spill] sm:$0xff]  ;;  %v4512_v16 = vld [vmem:[#allocation90_spill] sm:$0xff] }
 0x219   :  { %4490 = vst [vmem:[#allocation55_spill] sm:$0xff] %v3353_v9  ;;  %4491 = vst [vmem:[#allocation56_spill] sm:$0xff] %v3356_v52  ;;  %v825_v63 = vmul.f32 %v3338_v6, %v4496_v5  ;;  %v824_v9 = vmul.f32 %v3338_v6, %v4497_v7  ;;  %v3375_v52 = vpop.permute.xlu0 %1186  ;;  %v3378_v37 = vadd.f32 %v3012_v34, %v493_v11  ;;  %v4505_v7 = vld [vmem:[#allocation86_spill] sm:$0xff] }
 0x21a   :  { %4492 = vst [vmem:[#allocation57_spill] sm:$0xff] %v3359_v35  ;;  %4494 = vst [vmem:[#allocation58_spill] sm:$0xff] %v3364_v60  ;;  %v3381_v49 = vadd.f32 %v3012_v34, %v496_v4  ;;  %v826_v0 = vmul.f32 %v3338_v6, %v4502_v54  ;;  %v3388_v5 = vadd.f32 %v3012_v34, %v495_v2  ;;  %v2012_v4 = vld [vmem:[%s4176_s0 + $0x1b0] sm:$0xff]  ;;  %v2013_v11 = vld [vmem:[%s4176_s0 + $0x1d8] sm:$0xff] }
 0x21b   :  { %4495 = vst [vmem:[#allocation59_spill] sm:$0xff] %v3367_v3  ;;  %4498 = vst [vmem:[#allocation60_spill] sm:$0xff] %v3373_v47  ;;  %v4503_v3 = vld [vmem:[#allocation85_spill] sm:$0xff]  ;;  %v828_v60 = vmul.f32 %v3338_v6, %v4505_v7  ;;  %v4506_v47 = vld [vmem:[#allocation87_spill] sm:$0xff]  ;;  %1559 = vperm.xlu1 %2010, %v2012_v4   ;;  %1579 = vperm.xlu0 %2009, %v2013_v11   ;;  %v3412_v4 = vadd.f32 %v825_v63, %v3054_v39 }
 0x21c   :  { %4499 = vst [vmem:[#allocation8_spill] sm:$0xff] %v3375_v52  ;;  %4500 = vst [vmem:[#allocation61_spill] sm:$0xff] %v3378_v37  ;;  %v827_v35 = vmul.f32 %v3338_v6, %v4503_v3  ;;  %v829_v52 = vmul.f32 %v3338_v6, %v4506_v47  ;;  %v3401_v3 = vadd.f32 %v3012_v34, %v498_v13  ;;  %v4508_v2 = vld [vmem:[#allocation19_spill] sm:$0xff]  ;;  %v4510_v7 = vld [vmem:[#allocation88_spill] sm:$0xff] }
 0x21d   :  { %4501 = vst [vmem:[#allocation62_spill] sm:$0xff] %v3381_v49  ;;  %4504 = vst [vmem:[#allocation63_spill] sm:$0xff] %v3388_v5  ;;  %v3405_v54 = vmul.f32 %v3002_v33, %v4508_v2  ;;  %v830_v47 = vmul.f32 %v3338_v6, %v4510_v7  ;;  %v4511_v5 = vld [vmem:[#allocation89_spill] sm:$0xff]  ;;  %v888_v49 = vadd.f32 %v824_v9, %v3036_v61  ;;  %v4513_v34 = vld [vmem:[#allocation91_spill] sm:$0xff]  ;;  %v3421_v33 = vpop.permute.xlu0 %1194 }
 0x21e   :  { %4507 = vst [vmem:[#allocation64_spill] sm:$0xff] %v3401_v3  ;;  %v831_v37 = vmul.f32 %v3338_v6, %v4511_v5  ;;  %v832_v11 = vmul.f32 %v3338_v6, %v4512_v16  ;;  %v833_v13 = vmul.f32 %v3338_v6, %v4513_v34  ;;  %v3419_v3 = vpop.permute.xlu1 %1182  ;;  %4515 = vst [vmem:[#allocation67_spill] sm:$0xff] %v3421_v33  ;;  %v4516_v39 = vld [vmem:[#allocation92_spill] sm:$0xff]  ;;  %v4517_v61 = vld [vmem:[#allocation93_spill] sm:$0xff] }
 0x21f   :  { %4509 = vst [vmem:[#allocation65_spill] sm:$0xff] %v3405_v54  ;;  %4514 = vst [vmem:[#allocation66_spill] sm:$0xff] %v3419_v3  ;;  %v3424_v2 = vadd.f32 %v826_v0, %v3029_v26  ;;  %v3427_v5 = vadd.f32 %v827_v35, %v3045_v50  ;;  %v834_v63 = vmul.f32 %v3338_v6, %v4516_v39  ;;  %v4518_v34 = vld [vmem:[#allocation94_spill] sm:$0xff]  ;;  %v2014_v26 = vld [vmem:[%s4176_s0 + $0x1c0] sm:$0xff] }
 0x220   :  { %v835_v9 = vmul.f32 %v3338_v6, %v4517_v61  ;;  %v3434_v16 = vadd.f32 %v828_v60, %v3068_v41  ;;  %v3437_v7 = vadd.f32 %v829_v52, %v3057_v30  ;;  %v836_v54 = vmul.f32 %v3338_v6, %v4518_v34  ;;  %1567 = vperm.xlu1 %2010, %v2014_v26   ;;  %v2015_v50 = vld [vmem:[%s4176_s0 + $0x1e8] sm:$0xff]  ;;  %v4519_v30 = vld [vmem:[#allocation95_spill] sm:$0xff] }
 0x221   :  { %1587 = vperm.xlu0 %2009, %v2015_v50   ;;  %v3448_v35 = vadd.f32 %v830_v47, %v3078_v40  ;;  %v3451_v41 = vadd.f32 %v831_v37, %v3071_v31  ;;  %v837_v52 = vmul.f32 %v3338_v6, %v4519_v30  ;;  %v4520_v60 = vld [vmem:[#allocation96_spill] sm:$0xff]  ;;  %v3457_v39 = vld [vmem:[#allocation2 + $0x2] ss:$0 sm:$0xff]  ;;  %v3460_v61 = vadd.f32 %v832_v11, %v3088_v32  ;;  %v4521_v26 = vld [vmem:[#allocation97_spill] sm:$0xff]  ;;  %v3471_v50 = vpop.permute.xlu0 %1202 }
 0x222   :  { %v838_v0 = vmul.f32 %v3338_v6, %v4520_v60  ;;  %v3463_v34 = vadd.f32 %v833_v13, %v3081_v36  ;;  %v839_v40 = vmul.f32 %v3338_v6, %v4521_v26  ;;  %v4522_v47 = vld [vmem:[#allocation98_spill] sm:$0xff]  ;;  %v3469_v37 = vpop.permute.xlu1 %1190  ;;  %4524 = vst [vmem:[#allocation9_spill] sm:$0xff] %v3471_v50  ;;  %v3474_v30 = vadd.f32 %v834_v63, %v3094_v27  ;;  %v4525_v32 = vld [vmem:[#allocation99_spill] sm:$0xff]  ;;  %v4526_v11 = vld [vmem:[#allocation100_spill] sm:$0xff] }
 0x223   :  { %v840_v31 = vmul.f32 %v3338_v6, %v4522_v47  ;;  %4523 = vst [vmem:[#allocation68_spill] sm:$0xff] %v3469_v37  ;;  %v3477_v60 = vadd.f32 %v835_v9, %v3091_v38  ;;  %v841_v36 = vmul.f32 %v3338_v6, %v4525_v32  ;;  %v842_v13 = vmul.f32 %v3338_v6, %v4526_v11  ;;  %v4527_v47 = vld [vmem:[#allocation101_spill] sm:$0xff]  ;;  %v2017_v27 = vld [vmem:[%s4176_s0 + $0x1f8] sm:$0xff]  ;;  %v3506_v11 = vld [vmem:[#allocation2 + $0x3] ss:$0 sm:$0xff] }
 0x224   :  { %v3484_v26 = vadd.f32 %v836_v54, %v3102_v20  ;;  %v843_v33 = vmul.f32 %v3338_v6, %v4527_v47  ;;  %v1213_v50 = vmul.f32 %v3457_v39, %v2890_v58  ;;  %v2016_v38 = vld [vmem:[%s4176_s0 + $0x1d0] sm:$0xff]  ;;  %v3497_v63 = vadd.f32 %v837_v52, %v3099_v51  ;;  %v4529_v58 = vld [vmem:[#allocation103_spill] sm:$0xff] }
 0x225   :  { %1575 = vperm.xlu1 %2010, %v2016_v38   ;;  %1595 = vperm.xlu0 %2009, %v2017_v27   ;;  %v3500_v20 = vadd.f32 %v838_v0, %v3116_v24  ;;  %v4528_v54 = vld [vmem:[#allocation102_spill] sm:$0xff]  ;;  %v845_v32 = vmul.f32 %v3338_v6, %v4529_v58  ;;  %v3509_v47 = vadd.f32 %v839_v40, %v3113_v22  ;;  %v4530_v27 = vld [vmem:[#allocation104_spill] sm:$0xff]  ;;  %v4531_v52 = vld [vmem:[#allocation105_spill] sm:$0xff] }
 0x226   :  { %v844_v9 = vmul.f32 %v3338_v6, %v4528_v54  ;;  %v3512_v38 = vadd.f32 %v840_v31, %v3132_v18  ;;  %v846_v51 = vmul.f32 %v3338_v6, %v4530_v27  ;;  %v847_v24 = vmul.f32 %v3338_v6, %v4531_v52  ;;  %v3518_v0 = vpop.permute.xlu1 %1198  ;;  %v4532_v37 = vld [vmem:[#allocation106_spill] sm:$0xff]  ;;  %v4533_v40 = vld [vmem:[#allocation107_spill] sm:$0xff]  ;;  %v1344_v31 = vpop.permute.xlu0 %1343 }
 0x227   :  { %v3521_v54 = vadd.f32 %v841_v36, %v3123_v42  ;;  %v3524_v58 = vadd.f32 %v842_v13, %v3144_v21  ;;  %v848_v22 = vmul.f32 %v3338_v6, %v4532_v37  ;;  %v849_v18 = vmul.f32 %v3338_v6, %v4533_v40  ;;  %v2018_v21 = vld [vmem:[%s4176_s0 + $0x1e0] sm:$0xff]  ;;  %v4536_v40 = vld [vmem:[#allocation110_spill] sm:$0xff] }
 0x228   :  { %v3531_v27 = vadd.f32 %v843_v33, %v3141_v48  ;;  %v1277_v3 = vadd.f32 %v1213_v50, %v888_v49  ;;  %v1216_v52 = vmul.f32 %v3457_v39, %v2902_v57  ;;  %v1602_v42 = vmul.f32 %v3506_v11, %v1344_v31  ;;  %v4534_v13 = vld [vmem:[#allocation108_spill] sm:$0xff]  ;;  %v4535_v49 = vld [vmem:[#allocation109_spill] sm:$0xff] }
 0x229   :  { %1583 = vperm.xlu1 %2010, %v2018_v21   ;;  %v3540_v37 = vadd.f32 %v844_v9, %v3158_v12  ;;  %v3543_v36 = vadd.f32 %v845_v32, %v3155_v23  ;;  %v850_v48 = vmul.f32 %v3338_v6, %v4534_v13  ;;  %v851_v33 = vmul.f32 %v3338_v6, %v4535_v49 }
 0x22a   :  { %v3550_v57 = vadd.f32 %v846_v51, %v3168_v28  ;;  %v3553_v50 = vadd.f32 %v847_v24, %v3165_v44  ;;  %v852_v31 = vmul.f32 %v3338_v6, %v4536_v40  ;;  %v1666_v12 = vadd.f32 %v1602_v42, %v1277_v3  ;;  %v3557_v9 = vpop.permute.xlu1 %1206  ;;  %v1356_v44 = vpop.permute.xlu0 %1355  ;;  %v4539_v42 = vld [vmem:[#allocation113_spill] sm:$0xff] }
 0x22b   :  { %v3560_v23 = vadd.f32 %v848_v22, %v3178_v29  ;;  %v3563_v32 = vadd.f32 %v849_v18, %v3175_v14  ;;  %v1214_v21 = vmul.f32 %v3457_v39, %v2892_v55  ;;  %v1218_v28 = vmul.f32 %v3457_v39, %v2908_v59  ;;  %v2019_v29 = vld [vmem:[%s4176_s0 + $0x1f0] sm:$0xff]  ;;  %v4537_v22 = vld [vmem:[#allocation111_spill] sm:$0xff]  ;;  %v4538_v18 = vld [vmem:[#allocation112_spill] sm:$0xff] }
 0x22c   :  { %v1280_v51 = vadd.f32 %v1216_v52, %v3427_v5  ;;  %vm1730_vm0 = vcmp.ge.f32.partialorder %v1666_v12, 0.0  ;;  %v1794_v24 = vmul.f32 0.01, %v1666_v12  ;;  %v1605_v3 = vmul.f32 %v3506_v11, %v1356_v44  ;;  %v4540_v44 = vld [vmem:[#allocation114_spill] sm:$0xff] }
 0x22d   :  { %1591 = vperm.xlu1 %2010, %v2019_v29   ;;  %v3575_v14 = vadd.f32 %v850_v48, %v3186_v45  ;;  %v3578_v55 = vadd.f32 %v851_v33, %v3181_v8  ;;  %v853_v59 = vmul.f32 %v3338_v6, %v4537_v22  ;;  %v854_v5 = vmul.f32 %v3338_v6, %v4538_v18  ;;  %v4541_v48 = vld [vmem:[#allocation115_spill] sm:$0xff] }
 0x22e   :  { %v3585_v52 = vadd.f32 %v852_v31, %v3200_v19  ;;  %v855_v13 = vmul.f32 %v3338_v6, %v4539_v42  ;;  %v1858_v49 = vsel %vm1730_vm0, %v1666_v12, %v1794_v24  ;;  %v1669_v40 = vadd.f32 %v1605_v3, %v1280_v51  ;;  %v1348_v19 = vpop.permute.xlu1 %1347  ;;  %v1364_v31 = vpop.permute.xlu0 %1363 }
 0x22f   :  { %v856_v45 = vmul.f32 %v3338_v6, %v4540_v44  ;;  %v857_v8 = vmul.f32 %v3338_v6, %v4541_v48  ;;  %v1278_v33 = vadd.f32 %v1214_v21, %v3412_v4  ;;  %v1282_v29 = vadd.f32 %v1218_v28, %v3437_v7  ;;  %1922 = vst [vmem:[%s4179_s3] sm:$0xff] %v1858_v49  ;;  %v4544_v48 = vld [vmem:[#allocation116_spill] sm:$0xff] }
 0x230   :  { %vm1733_vm1 = vcmp.ge.f32.partialorder %v1669_v40, 0.0  ;;  %v1797_v22 = vmul.f32 0.01, %v1669_v40  ;;  %v1603_v12 = vmul.f32 %v3506_v11, %v1348_v19  ;;  %v1607_v51 = vmul.f32 %v3506_v11, %v1364_v31 }
 0x231   :  { %v3601_v24 = vadd.f32 %v853_v59, %v3189_v17  ;;  %v3604_v3 = vadd.f32 %v854_v5, %v3210_v46  ;;  %v1215_v4 = vmul.f32 %v3457_v39, %v2896_v56  ;;  %v1220_v7 = vmul.f32 %v3457_v39, %v2914_v53  ;;  %v4542_v46 = vld [vmem:[#allocation139_spill] sm:$0xff] }
 0x232   :  { %v3611_v21 = vadd.f32 %v855_v13, %v3203_v62  ;;  %v1861_v28 = vsel %vm1733_vm1, %v1669_v40, %v1797_v22  ;;  %v1667_v18 = vadd.f32 %v1603_v12, %v1278_v33  ;;  %v1671_v42 = vadd.f32 %v1607_v51, %v1282_v29  ;;  %v4543_v5 = vld [vmem:[#allocation143_spill] sm:$0xff]  ;;  %v1352_v53 = vpop.permute.xlu1 %1351  ;;  %v1372_v62 = vpop.permute.xlu0 %1371  ;;  %v4545_v33 = vld [vmem:[#allocation117_spill] sm:$0xff]  ;;  %v4546_v12 = vld [vmem:[#allocation140_spill] sm:$0xff] }
 0x233   :  { %v3614_v49 = vadd.f32 %v856_v45, %v3228_v43  ;;  %v3617_v17 = vadd.f32 %v857_v8, %v3219_v15  ;;  %v1217_v59 = vmul.f32 %v3457_v39, %v4542_v46  ;;  %v1222_v56 = vmul.f32 %v3457_v39, %v4543_v5  ;;  %1925 = vst [vmem:[%s4179_s3 + $0x18] sm:$0xff] %v1861_v28 }
 0x234   :  { %vm1731_vm2 = vcmp.ge.f32.partialorder %v1667_v18, 0.0  ;;  %v1795_v13 = vmul.f32 0.01, %v1667_v18  ;;  %vm1735_vm3 = vcmp.ge.f32.partialorder %v1671_v42, 0.0  ;;  %v1799_v43 = vmul.f32 0.01, %v1671_v42 }
 0x235   :  { %v1279_v40 = vadd.f32 %v1215_v4, %v3424_v2  ;;  %v1284_v15 = vadd.f32 %v1220_v7, %v3451_v41  ;;  %v1604_v44 = vmul.f32 %v3506_v11, %v1352_v53  ;;  %v1609_v45 = vmul.f32 %v3506_v11, %v1372_v62  ;;  %v4548_v62 = vld [vmem:[#allocation32_spill] sm:$0xff] }
 0x236   :  { %v858_v8 = vmul.f32 %v3338_v6, %v4544_v48  ;;  %v859_v29 = vmul.f32 %v3338_v6, %v4545_v33  ;;  %v1859_v19 = vsel %vm1731_vm2, %v1667_v18, %v1795_v13  ;;  %v1863_v31 = vsel %vm1735_vm3, %v1671_v42, %v1799_v43  ;;  %v1360_v4 = vpop.permute.xlu1 %1359  ;;  %v1380_v7 = vpop.permute.xlu0 %1379  ;;  %v4547_v18 = vld [vmem:[#allocation145_spill] sm:$0xff] }
 0x237   :  { %v1281_v22 = vadd.f32 %v1217_v59, %v3434_v16  ;;  %v1219_v51 = vmul.f32 %v3457_v39, %v4546_v12  ;;  %1923 = vst [vmem:[%s4179_s3 + $0x8] sm:$0xff] %v1859_v19  ;;  %1927 = vst [vmem:[%s4179_s3 + $0x28] sm:$0xff] %v1863_v31  ;;  %v1668_v2 = vadd.f32 %v1604_v44, %v1279_v40 }
 0x238   :  { %v1673_v41 = vadd.f32 %v1609_v45, %v1284_v15  ;;  %v1286_v28 = vadd.f32 %v1222_v56, %v3463_v34  ;;  %v1224_v16 = vmul.f32 %v3457_v39, %v4547_v18  ;;  %v1606_v42 = vmul.f32 %v3506_v11, %v1360_v4  ;;  %v4549_v34 = vld [vmem:[#allocation141_spill] sm:$0xff]  ;;  %v4550_v15 = vld [vmem:[#allocation147_spill] sm:$0xff] }
 0x239   :  { %v1611_v46 = vmul.f32 %v3506_v11, %v1380_v7  ;;  %vm1732_vm4 = vcmp.ge.f32.partialorder %v1668_v2, 0.0  ;;  %v1796_v59 = vmul.f32 0.01, %v1668_v2  ;;  %v3649_v53 = vadd.f32 %v858_v8, %v3242_v1  ;;  %v4552_v4 = vld [vmem:[#allocation119_spill] sm:$0xff] }
 0x23a   :  { %vm1737_vm5 = vcmp.ge.f32.partialorder %v1673_v41, 0.0  ;;  %v1801_v5 = vmul.f32 0.01, %v1673_v41  ;;  %v3652_v13 = vadd.f32 %v859_v29, %v4548_v62  ;;  %v1670_v43 = vadd.f32 %v1606_v42, %v1281_v22  ;;  %v1368_v33 = vpop.permute.xlu1 %1367  ;;  %v1388_v19 = vpop.permute.xlu0 %1387  ;;  %v4554_v62 = vld [vmem:[#allocation149_spill] sm:$0xff] }
 0x23b   :  { %v1675_v40 = vadd.f32 %v1611_v46, %v1286_v28  ;;  %v1221_v56 = vmul.f32 %v3457_v39, %v4549_v34  ;;  %v1226_v44 = vmul.f32 %v3457_v39, %v4550_v15  ;;  %v1860_v45 = vsel %vm1732_vm4, %v1668_v2, %v1796_v59  ;;  %v4551_v2 = vld [vmem:[#allocation118_spill] sm:$0xff] }
 0x23c   :  { %v1865_v48 = vsel %vm1737_vm5, %v1673_v41, %v1801_v5  ;;  %1924 = vst [vmem:[%s4179_s3 + $0x10] sm:$0xff] %v1860_v45  ;;  %vm1734_vm6 = vcmp.ge.f32.partialorder %v1670_v43, 0.0  ;;  %v1798_v1 = vmul.f32 0.01, %v1670_v43  ;;  %v1283_v29 = vadd.f32 %v1219_v51, %v3448_v35  ;;  %v4553_v46 = vld [vmem:[#allocation142_spill] sm:$0xff]  ;;  %v4555_v45 = vld [vmem:[#allocation35_spill] sm:$0xff] }
 0x23d   :  { %1929 = vst [vmem:[%s4179_s3 + $0x38] sm:$0xff] %v1865_v48  ;;  %vm1739_vm7 = vcmp.ge.f32.partialorder %v1675_v40, 0.0  ;;  %v1803_v8 = vmul.f32 0.01, %v1675_v40  ;;  %v1288_v31 = vadd.f32 %v1224_v16, %v3477_v60  ;;  %v1608_v22 = vmul.f32 %v3506_v11, %v1368_v33 }
 0x23e   :  { %v1613_v12 = vmul.f32 %v3506_v11, %v1388_v19  ;;  %v860_v41 = vmul.f32 %v3338_v6, %v4551_v2  ;;  %v861_v7 = vmul.f32 %v3338_v6, %v4552_v4  ;;  %v1862_v28 = vsel %vm1734_vm6, %v1670_v43, %v1798_v1  ;;  %v1376_v51 = vpop.permute.xlu1 %1375  ;;  %v1396_v16 = vpop.permute.xlu0 %1395  ;;  %v4557_v1 = vld [vmem:[#allocation151_spill] sm:$0xff] }
 0x23f   :  { %v1867_v18 = vsel %vm1739_vm7, %v1675_v40, %v1803_v8  ;;  %v1285_v42 = vadd.f32 %v1221_v56, %v3460_v61  ;;  %v1223_v59 = vmul.f32 %v3457_v39, %v4553_v46  ;;  %1926 = vst [vmem:[%s4179_s3 + $0x20] sm:$0xff] %v1862_v28  ;;  %v1672_v35 = vadd.f32 %v1608_v22, %v1283_v29  ;;  %v4559_v46 = vld [vmem:[#allocation121_spill] sm:$0xff] }
 0x240   :  { %1931 = vst [vmem:[%s4179_s3 + $0x48] sm:$0xff] %v1867_v18  ;;  %v1677_v60 = vadd.f32 %v1613_v12, %v1288_v31  ;;  %v1290_v5 = vadd.f32 %v1226_v44, %v3497_v63  ;;  %v1228_v61 = vmul.f32 %v3457_v39, %v4554_v62  ;;  %v1610_v43 = vmul.f32 %v3506_v11, %v1376_v51  ;;  %v4556_v63 = vld [vmem:[#allocation144_spill] sm:$0xff] }
 0x241   :  { %v1615_v40 = vmul.f32 %v3506_v11, %v1396_v16  ;;  %vm1736_vm8 = vcmp.ge.f32.partialorder %v1672_v35, 0.0  ;;  %v1800_v34 = vmul.f32 0.01, %v1672_v35  ;;  %v3687_v15 = vadd.f32 %v860_v41, %v3252_v25  ;;  %v4558_v18 = vld [vmem:[#allocation120_spill] sm:$0xff] }
 0x242   :  { %vm1741_vm9 = vcmp.ge.f32.partialorder %v1677_v60, 0.0  ;;  %v1805_v56 = vmul.f32 0.01, %v1677_v60  ;;  %v3690_v48 = vadd.f32 %v861_v7, %v4555_v45  ;;  %v1674_v33 = vadd.f32 %v1610_v43, %v1285_v42  ;;  %v1384_v22 = vpop.permute.xlu1 %1383  ;;  %v1404_v12 = vpop.permute.xlu0 %1403 }
 0x243   :  { %v1679_v19 = vadd.f32 %v1615_v40, %v1290_v5  ;;  %v1225_v44 = vmul.f32 %v3457_v39, %v4556_v63  ;;  %v1230_v8 = vmul.f32 %v3457_v39, %v4557_v1  ;;  %v1864_v29 = vsel %vm1736_vm8, %v1672_v35, %v1800_v34  ;;  %v4560_v5 = vld [vmem:[#allocation146_spill] sm:$0xff]  ;;  %v4561_v40 = vld [vmem:[#allocation153_spill] sm:$0xff] }
 0x244   :  { %v1869_v31 = vsel %vm1741_vm9, %v1677_v60, %v1805_v56  ;;  %1928 = vst [vmem:[%s4179_s3 + $0x30] sm:$0xff] %v1864_v29  ;;  %vm1738_vm10 = vcmp.ge.f32.partialorder %v1674_v33, 0.0  ;;  %v1802_v25 = vmul.f32 0.01, %v1674_v33  ;;  %v1287_v41 = vadd.f32 %v1223_v59, %v3474_v30 }
 0x245   :  { %1933 = vst [vmem:[%s4179_s3 + $0x58] sm:$0xff] %v1869_v31  ;;  %vm1743_vm11 = vcmp.ge.f32.partialorder %v1679_v19, 0.0  ;;  %v1807_v2 = vmul.f32 0.01, %v1679_v19  ;;  %v1292_v4 = vadd.f32 %v1228_v61, %v3509_v47  ;;  %v1612_v7 = vmul.f32 %v3506_v11, %v1384_v22  ;;  %v4565_v22 = vld [vmem:[#allocation155_spill] sm:$0xff] }
 0x246   :  { %v1617_v28 = vmul.f32 %v3506_v11, %v1404_v12  ;;  %v862_v42 = vmul.f32 %v3338_v6, %v4558_v18  ;;  %v863_v35 = vmul.f32 %v3338_v6, %v4559_v46  ;;  %v1866_v60 = vsel %vm1738_vm10, %v1674_v33, %v1802_v25  ;;  %v1392_v59 = vpop.permute.xlu1 %1391  ;;  %v1412_v61 = vpop.permute.xlu0 %1411 }
 0x247   :  { %v1871_v51 = vsel %vm1743_vm11, %v1679_v19, %v1807_v2  ;;  %v1289_v16 = vadd.f32 %v1225_v44, %v3484_v26  ;;  %v1227_v62 = vmul.f32 %v3457_v39, %v4560_v5  ;;  %1930 = vst [vmem:[%s4179_s3 + $0x40] sm:$0xff] %v1866_v60  ;;  %v1676_v30 = vadd.f32 %v1612_v7, %v1287_v41  ;;  %v4562_v19 = vld [vmem:[#allocation37_spill] sm:$0xff]  ;;  %v4563_v44 = vld [vmem:[#allocation36_spill] sm:$0xff]  ;;  %v4566_v60 = vld [vmem:[#allocation122_spill] sm:$0xff] }
 0x248   :  { %1935 = vst [vmem:[%s4179_s3 + $0x68] sm:$0xff] %v1871_v51  ;;  %v1681_v47 = vadd.f32 %v1617_v28, %v1292_v4  ;;  %v1294_v43 = vadd.f32 %v1230_v8, %v3521_v54  ;;  %v1232_v26 = vmul.f32 %v3457_v39, %v4561_v40  ;;  %v1614_v34 = vmul.f32 %v3506_v11, %v1392_v59  ;;  %v4564_v54 = vld [vmem:[#allocation148_spill] sm:$0xff] }
 0x249   :  { %v1619_v56 = vmul.f32 %v3506_v11, %v1412_v61  ;;  %vm1740_vm12 = vcmp.ge.f32.partialorder %v1676_v30, 0.0  ;;  %v1804_v45 = vmul.f32 0.01, %v1676_v30  ;;  %v3725_v63 = vadd.f32 %v862_v42, %v4562_v19  ;;  %v4568_v61 = vld [vmem:[#allocation150_spill] sm:$0xff] }
 0x24a   :  { %vm1745_vm13 = vcmp.ge.f32.partialorder %v1681_v47, 0.0  ;;  %v1809_v33 = vmul.f32 0.01, %v1681_v47  ;;  %v3728_v1 = vadd.f32 %v863_v35, %v4563_v44  ;;  %v1678_v29 = vadd.f32 %v1614_v34, %v1289_v16  ;;  %v1400_v41 = vpop.permute.xlu1 %1399  ;;  %v1420_v4 = vpop.permute.xlu0 %1419  ;;  %v4567_v16 = vld [vmem:[#allocation123_spill] sm:$0xff]  ;;  %v4569_v34 = vld [vmem:[#allocation157_spill] sm:$0xff] }
 0x24b   :  { %v1683_v31 = vadd.f32 %v1619_v56, %v1294_v43  ;;  %v1229_v8 = vmul.f32 %v3457_v39, %v4564_v54  ;;  %v1234_v12 = vmul.f32 %v3457_v39, %v4565_v22  ;;  %v1868_v25 = vsel %vm1740_vm12, %v1676_v30, %v1804_v45  ;;  %v4570_v44 = vld [vmem:[#allocation39_spill] sm:$0xff] }
 0x24c   :  { %v1873_v2 = vsel %vm1745_vm13, %v1681_v47, %v1809_v33  ;;  %1932 = vst [vmem:[%s4179_s3 + $0x50] sm:$0xff] %v1868_v25  ;;  %vm1742_vm14 = vcmp.ge.f32.partialorder %v1678_v29, 0.0  ;;  %v1806_v7 = vmul.f32 0.01, %v1678_v29  ;;  %v1291_v18 = vadd.f32 %v1227_v62, %v3500_v20  ;;  %v4573_v25 = vld [vmem:[#allocation159_spill] sm:$0xff] }
 0x24d   :  { %1937 = vst [vmem:[%s4179_s3 + $0x78] sm:$0xff] %v1873_v2  ;;  %vm1747_vm15 = vcmp.ge.f32.partialorder %v1683_v31, 0.0  ;;  %v1811_v28 = vmul.f32 0.01, %v1683_v31  ;;  %v1296_v42 = vadd.f32 %v1232_v26, %v3531_v27  ;;  %v1616_v46 = vmul.f32 %v3506_v11, %v1400_v41 }
 0x24e   :  { %v1621_v35 = vmul.f32 %v3506_v11, %v1420_v4  ;;  %v864_v51 = vmul.f32 %v3338_v6, %v4566_v60  ;;  %v865_v5 = vmul.f32 %v3338_v6, %v4567_v16  ;;  %v1870_v30 = vsel %vm1742_vm14, %v1678_v29, %v1806_v7  ;;  %v1408_v62 = vpop.permute.xlu1 %1407  ;;  %v1428_v40 = vpop.permute.xlu0 %1427  ;;  %v4574_v16 = vld [vmem:[#allocation124_spill] sm:$0xff] }
 0x24f   :  { %v1875_v47 = vsel %vm1747_vm15, %v1683_v31, %v1811_v28  ;;  %v1293_v59 = vadd.f32 %v1229_v8, %v3512_v38  ;;  %v1231_v43 = vmul.f32 %v3457_v39, %v4568_v61  ;;  %1934 = vst [vmem:[%s4179_s3 + $0x60] sm:$0xff] %v1870_v30  ;;  %v1680_v20 = vadd.f32 %v1616_v46, %v1291_v18  ;;  %v4571_v31 = vld [vmem:[#allocation38_spill] sm:$0xff]  ;;  %v4575_v30 = vld [vmem:[#allocation125_spill] sm:$0xff] }
 0x250   :  { %1939 = vst [vmem:[%s4179_s3 + $0x88] sm:$0xff] %v1875_v47  ;;  %v1685_v27 = vadd.f32 %v1621_v35, %v1296_v42  ;;  %v1298_v26 = vadd.f32 %v1234_v12, %v3543_v36  ;;  %v1236_v38 = vmul.f32 %v3457_v39, %v4569_v34  ;;  %v1618_v56 = vmul.f32 %v3506_v11, %v1408_v62  ;;  %v4572_v36 = vld [vmem:[#allocation152_spill] sm:$0xff]  ;;  %v4577_v34 = vld [vmem:[#allocation161_spill] sm:$0xff] }
 0x251   :  { %v1623_v45 = vmul.f32 %v3506_v11, %v1428_v40  ;;  %vm1744_vm0 = vcmp.ge.f32.partialorder %v1680_v20, 0.0  ;;  %v1808_v33 = vmul.f32 0.01, %v1680_v20  ;;  %v3763_v29 = vadd.f32 %v864_v51, %v4570_v44 }
 0x252   :  { %vm1749_vm1 = vcmp.ge.f32.partialorder %v1685_v27, 0.0  ;;  %v1813_v19 = vmul.f32 0.01, %v1685_v27  ;;  %v3766_v54 = vadd.f32 %v865_v5, %v4571_v31  ;;  %v1682_v8 = vadd.f32 %v1618_v56, %v1293_v59  ;;  %v1416_v7 = vpop.permute.xlu1 %1415  ;;  %v1436_v28 = vpop.permute.xlu0 %1435  ;;  %v4579_v31 = vld [vmem:[#allocation40_spill] sm:$0xff] }
 0x253   :  { %v1687_v22 = vadd.f32 %v1623_v45, %v1298_v26  ;;  %v1233_v12 = vmul.f32 %v3457_v39, %v4572_v36  ;;  %v1238_v2 = vmul.f32 %v3457_v39, %v4573_v25  ;;  %v1872_v41 = vsel %vm1744_vm0, %v1680_v20, %v1808_v33  ;;  %v4581_v25 = vld [vmem:[#allocation163_spill] sm:$0xff] }
 0x254   :  { %v1877_v4 = vsel %vm1749_vm1, %v1685_v27, %v1813_v19  ;;  %1936 = vst [vmem:[%s4179_s3 + $0x70] sm:$0xff] %v1872_v41  ;;  %vm1746_vm2 = vcmp.ge.f32.partialorder %v1682_v8, 0.0  ;;  %v1810_v18 = vmul.f32 0.01, %v1682_v8  ;;  %v1295_v46 = vadd.f32 %v1231_v43, %v3524_v58  ;;  %v4576_v27 = vld [vmem:[#allocation154_spill] sm:$0xff]  ;;  %v4578_v19 = vld [vmem:[#allocation41_spill] sm:$0xff] }
 0x255   :  { %1941 = vst [vmem:[%s4179_s3 + $0x98] sm:$0xff] %v1877_v4  ;;  %vm1751_vm3 = vcmp.ge.f32.partialorder %v1687_v22, 0.0  ;;  %v1815_v42 = vmul.f32 0.01, %v1687_v22  ;;  %v1300_v35 = vadd.f32 %v1236_v38, %v3553_v50  ;;  %v1620_v60 = vmul.f32 %v3506_v11, %v1416_v7 }
 0x256   :  { %v1625_v51 = vmul.f32 %v3506_v11, %v1436_v28  ;;  %v866_v5 = vmul.f32 %v3338_v6, %v4574_v16  ;;  %v867_v47 = vmul.f32 %v3338_v6, %v4575_v30  ;;  %v1874_v59 = vsel %vm1746_vm2, %v1682_v8, %v1810_v18  ;;  %v1424_v43 = vpop.permute.xlu1 %1423  ;;  %v1444_v40 = vpop.permute.xlu0 %1443  ;;  %v4582_v16 = vld [vmem:[#allocation126_spill] sm:$0xff]  ;;  %v4583_v30 = vld [vmem:[#allocation127_spill] sm:$0xff] }
 0x257   :  { %v1879_v61 = vsel %vm1751_vm3, %v1687_v22, %v1815_v42  ;;  %v1297_v20 = vadd.f32 %v1233_v12, %v3540_v37  ;;  %v1235_v62 = vmul.f32 %v3457_v39, %v4576_v27  ;;  %1938 = vst [vmem:[%s4179_s3 + $0x80] sm:$0xff] %v1874_v59  ;;  %v1684_v58 = vadd.f32 %v1620_v60, %v1295_v46  ;;  %v4584_v27 = vld [vmem:[#allocation158_spill] sm:$0xff] }
 0x258   :  { %1943 = vst [vmem:[%s4179_s3 + $0xa8] sm:$0xff] %v1879_v61  ;;  %v1689_v50 = vadd.f32 %v1625_v51, %v1300_v35  ;;  %v1302_v26 = vadd.f32 %v1238_v2, %v3563_v32  ;;  %v1240_v37 = vmul.f32 %v3457_v39, %v4577_v34  ;;  %v1622_v38 = vmul.f32 %v3506_v11, %v1424_v43  ;;  %v4580_v32 = vld [vmem:[#allocation156_spill] sm:$0xff] }
 0x259   :  { %v1627_v56 = vmul.f32 %v3506_v11, %v1444_v40  ;;  %vm1748_vm4 = vcmp.ge.f32.partialorder %v1684_v58, 0.0  ;;  %v1812_v45 = vmul.f32 0.01, %v1684_v58  ;;  %v3801_v44 = vadd.f32 %v866_v5, %v4578_v19  ;;  %v4585_v40 = vld [vmem:[#allocation165_spill] sm:$0xff] }
 0x25a   :  { %vm1753_vm5 = vcmp.ge.f32.partialorder %v1689_v50, 0.0  ;;  %v1817_v33 = vmul.f32 0.01, %v1689_v50  ;;  %v3804_v8 = vadd.f32 %v867_v47, %v4579_v31  ;;  %v1686_v22 = vadd.f32 %v1622_v38, %v1297_v20  ;;  %v1432_v7 = vpop.permute.xlu1 %1431  ;;  %v1452_v28 = vpop.permute.xlu0 %1451 }
 0x25b   :  { %v1691_v36 = vadd.f32 %v1627_v56, %v1302_v26  ;;  %v1237_v12 = vmul.f32 %v3457_v39, %v4580_v32  ;;  %v1242_v2 = vmul.f32 %v3457_v39, %v4581_v25  ;;  %v1876_v41 = vsel %vm1748_vm4, %v1684_v58, %v1812_v45  ;;  %v4586_v56 = vld [vmem:[#allocation45_spill] sm:$0xff]  ;;  %v4589_v32 = vld [vmem:[#allocation167_spill] sm:$0xff] }
 0x25c   :  { %v1881_v4 = vsel %vm1753_vm5, %v1689_v50, %v1817_v33  ;;  %1940 = vst [vmem:[%s4179_s3 + $0x90] sm:$0xff] %v1876_v41  ;;  %vm1750_vm6 = vcmp.ge.f32.partialorder %v1686_v22, 0.0  ;;  %v1814_v18 = vmul.f32 0.01, %v1686_v22  ;;  %v1299_v46 = vadd.f32 %v1235_v62, %v3550_v57  ;;  %v4587_v33 = vld [vmem:[#allocation44_spill] sm:$0xff] }
 0x25d   :  { %1945 = vst [vmem:[%s4179_s3 + $0xb8] sm:$0xff] %v1881_v4  ;;  %vm1755_vm7 = vcmp.ge.f32.partialorder %v1691_v36, 0.0  ;;  %v1819_v42 = vmul.f32 0.01, %v1691_v36  ;;  %v1304_v35 = vadd.f32 %v1240_v37, %v3578_v55  ;;  %v1624_v60 = vmul.f32 %v3506_v11, %v1432_v7 }
 0x25e   :  { %v1629_v51 = vmul.f32 %v3506_v11, %v1452_v28  ;;  %v868_v5 = vmul.f32 %v3338_v6, %v4582_v16  ;;  %v869_v47 = vmul.f32 %v3338_v6, %v4583_v30  ;;  %v1878_v59 = vsel %vm1750_vm6, %v1686_v22, %v1814_v18  ;;  %v1440_v62 = vpop.permute.xlu1 %1439  ;;  %v1460_v50 = vpop.permute.xlu0 %1459  ;;  %v4591_v16 = vld [vmem:[#allocation129_spill] sm:$0xff] }
 0x25f   :  { %v1883_v61 = vsel %vm1755_vm7, %v1691_v36, %v1819_v42  ;;  %v1301_v20 = vadd.f32 %v1237_v12, %v3560_v23  ;;  %v1239_v58 = vmul.f32 %v3457_v39, %v4584_v27  ;;  %1942 = vst [vmem:[%s4179_s3 + $0xa0] sm:$0xff] %v1878_v59  ;;  %v1688_v57 = vadd.f32 %v1624_v60, %v1299_v46  ;;  %v4590_v60 = vld [vmem:[#allocation128_spill] sm:$0xff] }
 0x260   :  { %1947 = vst [vmem:[%s4179_s3 + $0xc8] sm:$0xff] %v1883_v61  ;;  %v1693_v55 = vadd.f32 %v1629_v51, %v1304_v35  ;;  %v1306_v43 = vadd.f32 %v1242_v2, %v3601_v24  ;;  %v1244_v23 = vmul.f32 %v3457_v39, %v4585_v40  ;;  %v1626_v26 = vmul.f32 %v3506_v11, %v1440_v62  ;;  %v4588_v24 = vld [vmem:[#allocation160_spill] sm:$0xff]  ;;  %v4592_v61 = vld [vmem:[#allocation162_spill] sm:$0xff] }
 0x261   :  { %v1631_v34 = vmul.f32 %v3506_v11, %v1460_v50  ;;  %vm1752_vm8 = vcmp.ge.f32.partialorder %v1688_v57, 0.0  ;;  %v1816_v37 = vmul.f32 0.01, %v1688_v57  ;;  %v3839_v45 = vadd.f32 %v868_v5, %v4586_v56 }
 0x262   :  { %vm1757_vm9 = vcmp.ge.f32.partialorder %v1693_v55, 0.0  ;;  %v1821_v38 = vmul.f32 0.01, %v1693_v55  ;;  %v3842_v19 = vadd.f32 %v869_v47, %v4587_v33  ;;  %v1690_v31 = vadd.f32 %v1626_v26, %v1301_v20  ;;  %v1448_v41 = vpop.permute.xlu1 %1447  ;;  %v1468_v4 = vpop.permute.xlu0 %1467 }
 0x263   :  { %v1695_v22 = vadd.f32 %v1631_v34, %v1306_v43  ;;  %v1241_v36 = vmul.f32 %v3457_v39, %v4588_v24  ;;  %v1246_v12 = vmul.f32 %v3457_v39, %v4589_v32  ;;  %v1880_v25 = vsel %vm1752_vm8, %v1688_v57, %v1816_v37  ;;  %v4595_v34 = vld [vmem:[#allocation46_spill] sm:$0xff] }
 0x264   :  { %v1885_v2 = vsel %vm1757_vm9, %v1693_v55, %v1821_v38  ;;  %1944 = vst [vmem:[%s4179_s3 + $0xb0] sm:$0xff] %v1880_v25  ;;  %vm1754_vm10 = vcmp.ge.f32.partialorder %v1690_v31, 0.0  ;;  %v1818_v7 = vmul.f32 0.01, %v1690_v31  ;;  %v1303_v18 = vadd.f32 %v1239_v58, %v3575_v14  ;;  %v4593_v55 = vld [vmem:[#allocation169_spill] sm:$0xff] }
 0x265   :  { %1949 = vst [vmem:[%s4179_s3 + $0xd8] sm:$0xff] %v1885_v2  ;;  %vm1759_vm11 = vcmp.ge.f32.partialorder %v1695_v22, 0.0  ;;  %v1823_v28 = vmul.f32 0.01, %v1695_v22  ;;  %v1308_v42 = vadd.f32 %v1244_v23, %v3611_v21  ;;  %v1628_v46 = vmul.f32 %v3506_v11, %v1448_v41  ;;  %v4594_v23 = vld [vmem:[#allocation47_spill] sm:$0xff] }
 0x266   :  { %v1633_v35 = vmul.f32 %v3506_v11, %v1468_v4  ;;  %v870_v51 = vmul.f32 %v3338_v6, %v4590_v60  ;;  %v871_v5 = vmul.f32 %v3338_v6, %v4591_v16  ;;  %v1882_v30 = vsel %vm1754_vm10, %v1690_v31, %v1818_v7  ;;  %v1456_v27 = vpop.permute.xlu1 %1455  ;;  %v1476_v58 = vpop.permute.xlu0 %1475  ;;  %v4597_v31 = vld [vmem:[#allocation171_spill] sm:$0xff] }
 0x267   :  { %v1887_v47 = vsel %vm1759_vm11, %v1695_v22, %v1823_v28  ;;  %v1305_v59 = vadd.f32 %v1241_v36, %v3585_v52  ;;  %v1243_v20 = vmul.f32 %v3457_v39, %v4592_v61  ;;  %1946 = vst [vmem:[%s4179_s3 + $0xc0] sm:$0xff] %v1882_v30  ;;  %v1692_v14 = vadd.f32 %v1628_v46, %v1303_v18  ;;  %v4598_v18 = vld [vmem:[#allocation130_spill] sm:$0xff]  ;;  %v4599_v46 = vld [vmem:[#allocation131_spill] sm:$0xff] }
 0x268   :  { %1951 = vst [vmem:[%s4179_s3 + $0xe8] sm:$0xff] %v1887_v47  ;;  %v1697_v21 = vadd.f32 %v1633_v35, %v1308_v42  ;;  %v1310_v57 = vadd.f32 %v1246_v12, %v3617_v17  ;;  %v1248_v52 = vmul.f32 %v3457_v39, %v4593_v55  ;;  %v1630_v62 = vmul.f32 %v3506_v11, %v1456_v27  ;;  %v4596_v17 = vld [vmem:[#allocation164_spill] sm:$0xff] }
 0x269   :  { %v1635_v50 = vmul.f32 %v3506_v11, %v1476_v58  ;;  %vm1756_vm12 = vcmp.ge.f32.partialorder %v1692_v14, 0.0  ;;  %v1820_v43 = vmul.f32 0.01, %v1692_v14  ;;  %v3877_v26 = vadd.f32 %v870_v51, %v4594_v23  ;;  %v4605_v23 = vld [vmem:[#allocation24_spill] sm:$0xff] }
 0x26a   :  { %vm1761_vm13 = vcmp.ge.f32.partialorder %v1697_v21, 0.0  ;;  %v1825_v40 = vmul.f32 0.01, %v1697_v21  ;;  %v3880_v37 = vadd.f32 %v871_v5, %v4595_v34  ;;  %v1694_v38 = vadd.f32 %v1630_v62, %v1305_v59  ;;  %v1464_v32 = vpop.permute.xlu1 %1463  ;;  %v1484_v12 = vpop.permute.xlu0 %1483  ;;  %v4600_v5 = vld [vmem:[#allocation166_spill] sm:$0xff] }
 0x26b   :  { %v1699_v56 = vadd.f32 %v1635_v50, %v1310_v57  ;;  %v1245_v33 = vmul.f32 %v3457_v39, %v4596_v17  ;;  %v1250_v22 = vmul.f32 %v3457_v39, %v4597_v31  ;;  %v1884_v24 = vsel %vm1756_vm12, %v1692_v14, %v1820_v43  ;;  %v4602_v57 = vld [vmem:[#allocation49_spill] sm:$0xff] }
 0x26c   :  { %v1889_v36 = vsel %vm1761_vm13, %v1697_v21, %v1825_v40  ;;  %1948 = vst [vmem:[%s4179_s3 + $0xd0] sm:$0xff] %v1884_v24  ;;  %vm1758_vm14 = vcmp.ge.f32.partialorder %v1694_v38, 0.0  ;;  %v1822_v25 = vmul.f32 0.01, %v1694_v38  ;;  %v1307_v41 = vadd.f32 %v1243_v20, %v3604_v3  ;;  %v4601_v20 = vld [vmem:[#allocation22_spill] sm:$0xff] }
 0x26d   :  { %1953 = vst [vmem:[%s4179_s3 + $0xf8] sm:$0xff] %v1889_v36  ;;  %vm1763_vm15 = vcmp.ge.f32.partialorder %v1699_v56, 0.0  ;;  %v1827_v2 = vmul.f32 0.01, %v1699_v56  ;;  %v1312_v4 = vadd.f32 %v1248_v52, %v3652_v13  ;;  %v1632_v7 = vmul.f32 %v3506_v11, %v1464_v32  ;;  %v4603_v52 = vld [vmem:[#allocation48_spill] sm:$0xff] }
 0x26e   :  { %v1637_v28 = vmul.f32 %v3506_v11, %v1484_v12  ;;  %v872_v42 = vmul.f32 %v3338_v6, %v4598_v18  ;;  %v873_v35 = vmul.f32 %v3338_v6, %v4599_v46  ;;  %v1886_v60 = vsel %vm1758_vm14, %v1694_v38, %v1822_v25  ;;  %v1472_v47 = vpop.permute.xlu1 %1471  ;;  %v1492_v59 = vpop.permute.xlu0 %1491  ;;  %v4606_v25 = vld [vmem:[#allocation132_spill] sm:$0xff] }
 0x26f   :  { %v1891_v51 = vsel %vm1763_vm15, %v1699_v56, %v1827_v2  ;;  %v1309_v16 = vadd.f32 %v1245_v33, %v3614_v49  ;;  %v1247_v30 = vmul.f32 %v3457_v39, %v4600_v5  ;;  %1950 = vst [vmem:[%s4179_s3 + $0xe0] sm:$0xff] %v1886_v60  ;;  %v1696_v3 = vadd.f32 %v1632_v7, %v1307_v41  ;;  %v4607_v41 = vld [vmem:[#allocation133_spill] sm:$0xff] }
 0x270   :  { %1955 = vst [vmem:[%s4179_s3 + $0x108] sm:$0xff] %v1891_v51  ;;  %v1701_v13 = vadd.f32 %v1637_v28, %v1312_v4  ;;  %v1314_v61 = vadd.f32 %v1250_v22, %v3690_v48  ;;  %v1252_v49 = vmul.f32 %v3457_v39, %v4601_v20  ;;  %v1634_v14 = vmul.f32 %v3506_v11, %v1472_v47  ;;  %v4604_v48 = vld [vmem:[#allocation168_spill] sm:$0xff] }
 0x271   :  { %v1639_v21 = vmul.f32 %v3506_v11, %v1492_v59  ;;  %vm1760_vm0 = vcmp.ge.f32.partialorder %v1696_v3, 0.0  ;;  %v1824_v27 = vmul.f32 0.01, %v1696_v3  ;;  %v3915_v55 = vadd.f32 %v872_v42, %v4602_v57  ;;  %v4608_v42 = vld [vmem:[#allocation170_spill] sm:$0xff]  ;;  %v4610_v59 = vld [vmem:[#allocation52_spill] sm:$0xff] }
 0x272   :  { %vm1765_vm1 = vcmp.ge.f32.partialorder %v1701_v13, 0.0  ;;  %v1829_v58 = vmul.f32 0.01, %v1701_v13  ;;  %v3918_v62 = vadd.f32 %v873_v35, %v4603_v52  ;;  %v1698_v50 = vadd.f32 %v1634_v14, %v1309_v16  ;;  %v1480_v17 = vpop.permute.xlu1 %1479  ;;  %v1500_v33 = vpop.permute.xlu0 %1499  ;;  %v4609_v16 = vld [vmem:[#allocation26_spill] sm:$0xff] }
 0x273   :  { %v1703_v43 = vadd.f32 %v1639_v21, %v1314_v61  ;;  %v1249_v40 = vmul.f32 %v3457_v39, %v4604_v48  ;;  %v1254_v34 = vmul.f32 %v3457_v39, %v4605_v23  ;;  %v1888_v38 = vsel %vm1760_vm0, %v1696_v3, %v1824_v27  ;;  %v4612_v21 = vld [vmem:[#allocation28_spill] sm:$0xff] }
 0x274   :  { %v1893_v56 = vsel %vm1765_vm1, %v1701_v13, %v1829_v58  ;;  %1952 = vst [vmem:[%s4179_s3 + $0xf0] sm:$0xff] %v1888_v38  ;;  %vm1762_vm2 = vcmp.ge.f32.partialorder %v1698_v50, 0.0  ;;  %v1826_v31 = vmul.f32 0.01, %v1698_v50  ;;  %v1311_v24 = vadd.f32 %v1247_v30, %v3649_v53  ;;  %v4613_v38 = vld [vmem:[#allocation134_spill] sm:$0xff] }
 0x275   :  { %1957 = vst [vmem:[%s4179_s3 + $0x118] sm:$0xff] %v1893_v56  ;;  %vm1767_vm3 = vcmp.ge.f32.partialorder %v1703_v43, 0.0  ;;  %v1831_v22 = vmul.f32 0.01, %v1703_v43  ;;  %v1316_v36 = vadd.f32 %v1252_v49, %v3728_v1  ;;  %v1636_v32 = vmul.f32 %v3506_v11, %v1480_v17  ;;  %v4614_v17 = vld [vmem:[#allocation135_spill] sm:$0xff] }
 0x276   :  { %v1641_v12 = vmul.f32 %v3506_v11, %v1500_v33  ;;  %v874_v2 = vmul.f32 %v3338_v6, %v4606_v25  ;;  %v875_v4 = vmul.f32 %v3338_v6, %v4607_v41  ;;  %v1890_v7 = vsel %vm1762_vm2, %v1698_v50, %v1826_v31  ;;  %v1488_v35 = vpop.permute.xlu1 %1487  ;;  %v1508_v60 = vpop.permute.xlu0 %1507 }
 0x277   :  { %v1895_v28 = vsel %vm1767_vm3, %v1703_v43, %v1831_v22  ;;  %v1313_v18 = vadd.f32 %v1249_v40, %v3687_v15  ;;  %v1251_v46 = vmul.f32 %v3457_v39, %v4608_v42  ;;  %1954 = vst [vmem:[%s4179_s3 + $0x100] sm:$0xff] %v1890_v7  ;;  %v1700_v53 = vadd.f32 %v1636_v32, %v1311_v24 }
 0x278   :  { %1959 = vst [vmem:[%s4179_s3 + $0x128] sm:$0xff] %v1895_v28  ;;  %v1705_v1 = vadd.f32 %v1641_v12, %v1316_v36  ;;  %v1318_v51 = vadd.f32 %v1254_v34, %v3766_v54  ;;  %v1256_v15 = vmul.f32 %v3457_v39, %v4609_v16  ;;  %v1638_v5 = vmul.f32 %v3506_v11, %v1488_v35  ;;  %v4611_v54 = vld [vmem:[#allocation172_spill] sm:$0xff]  ;;  %v4615_v36 = vld [vmem:[#allocation23_spill] sm:$0xff] }
 0x279   :  { %v1643_v30 = vmul.f32 %v3506_v11, %v1508_v60  ;;  %vm1764_vm4 = vcmp.ge.f32.partialorder %v1700_v53, 0.0  ;;  %v1828_v3 = vmul.f32 0.01, %v1700_v53  ;;  %v3953_v47 = vadd.f32 %v874_v2, %v3332_v10  ;;  %v4616_v2 = vld [vmem:[#allocation30_spill] sm:$0xff] }
 0x27a   :  { %vm1769_vm5 = vcmp.ge.f32.partialorder %v1705_v1, 0.0  ;;  %v1833_v13 = vmul.f32 0.01, %v1705_v1  ;;  %v3956_v61 = vadd.f32 %v875_v4, %v4610_v59  ;;  %v1702_v20 = vadd.f32 %v1638_v5, %v1313_v18  ;;  %v1496_v52 = vpop.permute.xlu1 %1495  ;;  %v1516_v50 = vpop.permute.xlu0 %1515  ;;  %v4617_v18 = vld [vmem:[#allocation54_spill] sm:$0xff] }
 0x27b   :  { %v1707_v49 = vadd.f32 %v1643_v30, %v1318_v51  ;;  %v1253_v14 = vmul.f32 %v3457_v39, %v4611_v54  ;;  %v1258_v27 = vmul.f32 %v3457_v39, %v4612_v21  ;;  %v1892_v58 = vsel %vm1764_vm4, %v1700_v53, %v1828_v3  ;;  %v4620_v51 = vld [vmem:[#allocation33_spill] sm:$0xff]  ;;  %v4010_v21 = vld [vmem:[#allocation2 + $0x1] ss:$0 sm:$0xff] }
 0x27c   :  { %v1897_v57 = vsel %vm1769_vm5, %v1705_v1, %v1833_v13  ;;  %1956 = vst [vmem:[%s4179_s3 + $0x110] sm:$0xff] %v1892_v58  ;;  %vm1766_vm6 = vcmp.ge.f32.partialorder %v1702_v20, 0.0  ;;  %v1830_v10 = vmul.f32 0.01, %v1702_v20  ;;  %v1315_v48 = vadd.f32 %v1251_v46, %v3725_v63  ;;  %v4618_v46 = vld [vmem:[#allocation53_spill] sm:$0xff] }
 0x27d   :  { %1961 = vst [vmem:[%s4179_s3 + $0x138] sm:$0xff] %v1897_v57  ;;  %vm1771_vm7 = vcmp.ge.f32.partialorder %v1707_v49, 0.0  ;;  %v1835_v43 = vmul.f32 0.01, %v1707_v49  ;;  %v1320_v40 = vadd.f32 %v1256_v15, %v3804_v8  ;;  %v1640_v23 = vmul.f32 %v3506_v11, %v1496_v52  ;;  %v4622_v57 = vld [vmem:[#allocation14_spill] sm:$0xff] }
 0x27e   :  { %v1645_v34 = vmul.f32 %v3506_v11, %v1516_v50  ;;  %v876_v56 = vmul.f32 %v3338_v6, %v4613_v38  ;;  %v877_v33 = vmul.f32 %v3338_v6, %v4614_v17  ;;  %v1894_v31 = vsel %vm1766_vm6, %v1702_v20, %v1830_v10  ;;  %v1504_v12 = vpop.permute.xlu1 %1503  ;;  %v1524_v25 = vpop.permute.xlu0 %1523 }
 0x27f   :  { %v1899_v22 = vsel %vm1771_vm7, %v1707_v49, %v1835_v43  ;;  %v1317_v24 = vadd.f32 %v1253_v14, %v3763_v29  ;;  %v1255_v32 = vmul.f32 %v3457_v39, %v4615_v36  ;;  %1958 = vst [vmem:[%s4179_s3 + $0x120] sm:$0xff] %v1894_v31  ;;  %v1704_v63 = vadd.f32 %v1640_v23, %v1315_v48  ;;  %v4623_v48 = vld [vmem:[#allocation27_spill] sm:$0xff] }
 0x280   :  { %1963 = vst [vmem:[%s4179_s3 + $0x148] sm:$0xff] %v1899_v22  ;;  %v1709_v8 = vadd.f32 %v1645_v34, %v1320_v40  ;;  %v1322_v6 = vadd.f32 %v1258_v27, %v3842_v19  ;;  %v1260_v29 = vmul.f32 %v3457_v39, %v4616_v2  ;;  %v1642_v41 = vmul.f32 %v3506_v11, %v1504_v12  ;;  %v4619_v19 = vld [vmem:[#allocation25_spill] sm:$0xff]  ;;  %v4621_v27 = vld [vmem:[#allocation10_spill] sm:$0xff] }
 0x281   :  { %v1647_v4 = vmul.f32 %v3506_v11, %v1524_v25  ;;  %vm1768_vm8 = vcmp.ge.f32.partialorder %v1704_v63, 0.0  ;;  %v1832_v7 = vmul.f32 0.01, %v1704_v63  ;;  %v3991_v42 = vadd.f32 %v876_v56, %v4617_v18  ;;  %v4624_v56 = vld [vmem:[#allocation42_spill] sm:$0xff]  ;;  %v4034_v25 = vld [vmem:[#allocation2 + $0x2] ss:$0 sm:$0xff] }
 0x282   :  { %vm1773_vm9 = vcmp.ge.f32.partialorder %v1709_v8, 0.0  ;;  %v1837_v28 = vmul.f32 0.01, %v1709_v8  ;;  %v3994_v53 = vadd.f32 %v877_v33, %v4618_v46  ;;  %v1706_v1 = vadd.f32 %v1642_v41, %v1317_v24  ;;  %v1512_v30 = vpop.permute.xlu1 %1511  ;;  %v1532_v3 = vpop.permute.xlu0 %1531  ;;  %v4625_v24 = vld [vmem:[#allocation56_spill] sm:$0xff] }
 0x283   :  { %v1711_v35 = vadd.f32 %v1647_v4, %v1322_v6  ;;  %v1257_v60 = vmul.f32 %v3457_v39, %v4619_v19  ;;  %v1262_v16 = vmul.f32 %v3457_v39, %v4620_v51  ;;  %v1896_v15 = vsel %vm1768_vm8, %v1704_v63, %v1832_v7  ;;  %v4628_v6 = vld [vmem:[#allocation50_spill] sm:$0xff] }
 0x284   :  { %v1901_v5 = vsel %vm1773_vm9, %v1709_v8, %v1837_v28  ;;  %1960 = vst [vmem:[%s4179_s3 + $0x130] sm:$0xff] %v1896_v15  ;;  %vm1770_vm10 = vcmp.ge.f32.partialorder %v1706_v1, 0.0  ;;  %v1834_v13 = vmul.f32 0.01, %v1706_v1  ;;  %v1319_v20 = vadd.f32 %v1255_v32, %v3801_v44  ;;  %v4626_v32 = vld [vmem:[#allocation55_spill] sm:$0xff] }
 0x285   :  { %1965 = vst [vmem:[%s4179_s3 + $0x158] sm:$0xff] %v1901_v5  ;;  %vm1775_vm11 = vcmp.ge.f32.partialorder %v1711_v35, 0.0  ;;  %v1839_v59 = vmul.f32 0.01, %v1711_v35  ;;  %v1324_v49 = vadd.f32 %v1260_v29, %v3880_v37  ;;  %v1644_v54 = vmul.f32 %v3506_v11, %v1512_v30 }
 0x286   :  { %v1649_v14 = vmul.f32 %v3506_v11, %v1532_v3  ;;  %v878_v58 = vmul.f32 %v4010_v21, %v4621_v27  ;;  %v879_v52 = vmul.f32 %v4010_v21, %v4622_v57  ;;  %v1898_v50 = vsel %vm1770_vm10, %v1706_v1, %v1834_v13  ;;  %v1520_v23 = vpop.permute.xlu1 %1519  ;;  %v1540_v34 = vpop.permute.xlu0 %1539  ;;  %v4048_v1 = vld [vmem:[#allocation2 + $0x3] ss:$0 sm:$0xff] }
 0x287   :  { %v1903_v10 = vsel %vm1775_vm11, %v1711_v35, %v1839_v59  ;;  %v1321_v43 = vadd.f32 %v1257_v60, %v3839_v45  ;;  %v1259_v44 = vmul.f32 %v3457_v39, %v4623_v48  ;;  %1962 = vst [vmem:[%s4179_s3 + $0x140] sm:$0xff] %v1898_v50  ;;  %v1708_v37 = vadd.f32 %v1644_v54, %v1319_v20  ;;  %v4629_v60 = vld [vmem:[#allocation12_spill] sm:$0xff]  ;;  %v4631_v13 = vld [vmem:[#allocation31_spill] sm:$0xff]  ;;  %v4633_v50 = vld [vmem:[#allocation58_spill] sm:$0xff] }
 0x288   :  { %1967 = vst [vmem:[%s4179_s3 + $0x168] sm:$0xff] %v1903_v10  ;;  %v1713_v40 = vadd.f32 %v1649_v14, %v1324_v49  ;;  %v1326_v38 = vadd.f32 %v1262_v16, %v3918_v62  ;;  %v1264_v45 = vmul.f32 %v3457_v39, %v4624_v56  ;;  %v1646_v17 = vmul.f32 %v3506_v11, %v1520_v23  ;;  %v4627_v62 = vld [vmem:[#allocation29_spill] sm:$0xff]  ;;  %v4630_v16 = vld [vmem:[#allocation16_spill] sm:$0xff]  ;;  %v4636_v23 = vld [vmem:[#allocation66_spill] sm:$0xff] }
 0x289   :  { %v1651_v33 = vmul.f32 %v3506_v11, %v1540_v34  ;;  %vm1772_vm12 = vcmp.ge.f32.partialorder %v1708_v37, 0.0  ;;  %v1836_v31 = vmul.f32 0.01, %v1708_v37  ;;  %v4031_v36 = vadd.f32 %v878_v58, %v4625_v24  ;;  %v4632_v14 = vld [vmem:[#allocation60_spill] sm:$0xff] }
 0x28a   :  { %vm1777_vm13 = vcmp.ge.f32.partialorder %v1713_v40, 0.0  ;;  %v1841_v22 = vmul.f32 0.01, %v1713_v40  ;;  %v943_v63 = vadd.f32 %v879_v52, %v4626_v32  ;;  %v1710_v8 = vadd.f32 %v1646_v17, %v1321_v43  ;;  %v1528_v41 = vpop.permute.xlu1 %1527  ;;  %v1548_v4 = vpop.permute.xlu0 %1547  ;;  %v4634_v43 = vld [vmem:[#allocation57_spill] sm:$0xff] }
 0x28b   :  { %v1715_v12 = vadd.f32 %v1651_v33, %v1326_v38  ;;  %v1261_v39 = vmul.f32 %v4034_v25, %v4627_v62  ;;  %v1266_v2 = vmul.f32 %v4034_v25, %v4628_v6  ;;  %v1900_v11 = vsel %vm1772_vm12, %v1708_v37, %v1836_v31 }
 0x28c   :  { %v1905_v29 = vsel %vm1777_vm13, %v1713_v40, %v1841_v22  ;;  %1964 = vst [vmem:[%s4179_s3 + $0x150] sm:$0xff] %v1900_v11  ;;  %vm1774_vm14 = vcmp.ge.f32.partialorder %v1710_v8, 0.0  ;;  %v1838_v7 = vmul.f32 0.01, %v1710_v8  ;;  %v1323_v18 = vadd.f32 %v1259_v44, %v3877_v26  ;;  %v4635_v40 = vld [vmem:[#allocation34_spill] sm:$0xff] }
 0x28d   :  { %1969 = vst [vmem:[%s4179_s3 + $0x178] sm:$0xff] %v1905_v29  ;;  %vm1779_vm15 = vcmp.ge.f32.partialorder %v1715_v12, 0.0  ;;  %v1843_v28 = vmul.f32 0.01, %v1715_v12  ;;  %v1328_v46 = vadd.f32 %v1264_v45, %v3956_v61  ;;  %v1648_v35 = vmul.f32 %v4048_v1, %v1528_v41  ;;  %v4639_v41 = vld [vmem:[#allocation43_spill] sm:$0xff] }
 0x28e   :  { %v1653_v19 = vmul.f32 %v4048_v1, %v1548_v4  ;;  %v880_v51 = vmul.f32 %v4010_v21, %v4629_v60  ;;  %v881_v15 = vmul.f32 %v4010_v21, %v4630_v16  ;;  %v1902_v5 = vsel %vm1774_vm14, %v1710_v8, %v1838_v7  ;;  %v1536_v20 = vpop.permute.xlu1 %1535  ;;  %v1556_v49 = vpop.permute.xlu0 %1555  ;;  %v4641_v16 = vld [vmem:[#allocation59_spill] sm:$0xff] }
 0x28f   :  { %v1907_v30 = vsel %vm1779_vm15, %v1715_v12, %v1843_v28  ;;  %v1325_v3 = vadd.f32 %v1261_v39, %v3915_v55  ;;  %v1263_v26 = vmul.f32 %v4034_v25, %v4631_v13  ;;  %1966 = vst [vmem:[%s4179_s3 + $0x160] sm:$0xff] %v1902_v5  ;;  %v1712_v61 = vadd.f32 %v1648_v35, %v1323_v18  ;;  %v4637_v12 = vld [vmem:[#allocation13_spill] sm:$0xff]  ;;  %v4638_v39 = vld [vmem:[#allocation136_spill] sm:$0xff] }
 0x290   :  { %1971 = vst [vmem:[%s4179_s3 + $0x188] sm:$0xff] %v1907_v30  ;;  %v1717_v59 = vadd.f32 %v1653_v19, %v1328_v46  ;;  %v1330_v54 = vadd.f32 %v1266_v2, %v3994_v53  ;;  %v1268_v55 = vmul.f32 %v4034_v25, %v4632_v14  ;;  %v1650_v27 = vmul.f32 %v4048_v1, %v1536_v20  ;;  %v4640_v46 = vld [vmem:[#allocation68_spill] sm:$0xff]  ;;  %v4642_v5 = vld [vmem:[#allocation137_spill] sm:$0xff] }
 0x291   :  { %v1655_v58 = vmul.f32 %v4048_v1, %v1556_v49  ;;  %vm1776_vm0 = vcmp.ge.f32.partialorder %v1712_v61, 0.0  ;;  %v1840_v57 = vmul.f32 0.01, %v1712_v61  ;;  %v4071_v10 = vadd.f32 %v880_v51, %v4633_v50  ;;  %v4644_v50 = vld [vmem:[#allocation62_spill] sm:$0xff] }
 0x292   :  { %vm1781_vm1 = vcmp.ge.f32.partialorder %v1717_v59, 0.0  ;;  %v1845_v52 = vmul.f32 0.01, %v1717_v59  ;;  %v945_v48 = vadd.f32 %v881_v15, %v4634_v43  ;;  %v1714_v44 = vadd.f32 %v1650_v27, %v1325_v3  ;;  %v1544_v45 = vpop.permute.xlu1 %1543  ;;  %v1564_v17 = vpop.permute.xlu0 %1563 }
 0x293   :  { %v1719_v37 = vadd.f32 %v1655_v58, %v1330_v54  ;;  %v1265_v53 = vmul.f32 %v4034_v25, %v4635_v40  ;;  %v1270_v34 = vmul.f32 %v4034_v25, %v4636_v23  ;;  %v1904_v38 = vsel %vm1776_vm0, %v1712_v61, %v1840_v57  ;;  %v4646_v23 = vld [vmem:[#allocation8_spill] sm:$0xff] }
 0x294   :  { %v1909_v56 = vsel %vm1781_vm1, %v1717_v59, %v1845_v52  ;;  %1968 = vst [vmem:[%s4179_s3 + $0x170] sm:$0xff] %v1904_v38  ;;  %vm1778_vm2 = vcmp.ge.f32.partialorder %v1714_v44, 0.0  ;;  %v1842_v33 = vmul.f32 0.01, %v1714_v44  ;;  %v1327_v22 = vadd.f32 %v1263_v26, %v3953_v47  ;;  %v4643_v26 = vld [vmem:[#allocation51_spill] sm:$0xff] }
 0x295   :  { %1973 = vst [vmem:[%s4179_s3 + $0x198] sm:$0xff] %v1909_v56  ;;  %vm1783_vm3 = vcmp.ge.f32.partialorder %v1719_v37, 0.0  ;;  %v1847_v31 = vmul.f32 0.01, %v1719_v37  ;;  %v1332_v24 = vadd.f32 %v1268_v55, %v943_v63  ;;  %v1652_v32 = vmul.f32 %v4048_v1, %v1544_v45 }
 0x296   :  { %v1657_v8 = vmul.f32 %v4048_v1, %v1564_v17  ;;  %v882_v62 = vmul.f32 %v4010_v21, %v4637_v12  ;;  %v883_v6 = vmul.f32 %v4010_v21, %v4638_v39  ;;  %v1906_v2 = vsel %vm1778_vm2, %v1714_v44, %v1842_v33  ;;  %v1552_v7 = vpop.permute.xlu1 %1551  ;;  %v1572_v28 = vpop.permute.xlu0 %1571  ;;  %v4648_v12 = vld [vmem:[#allocation15_spill] sm:$0xff] }
 0x297   :  { %v1911_v11 = vsel %vm1783_vm3, %v1719_v37, %v1847_v31  ;;  %v1329_v29 = vadd.f32 %v1265_v53, %v3991_v42  ;;  %v1267_v4 = vmul.f32 %v4034_v25, %v4639_v41  ;;  %1970 = vst [vmem:[%s4179_s3 + $0x180] sm:$0xff] %v1906_v2  ;;  %v1716_v47 = vadd.f32 %v1652_v32, %v1327_v22  ;;  %v4647_v32 = vld [vmem:[#allocation61_spill] sm:$0xff]  ;;  %v4650_v41 = vld [vmem:[#allocation67_spill] sm:$0xff] }
 0x298   :  { %1975 = vst [vmem:[%s4179_s3 + $0x1a8] sm:$0xff] %v1911_v11  ;;  %v1721_v63 = vadd.f32 %v1657_v8, %v1332_v24  ;;  %v1334_v18 = vadd.f32 %v1270_v34, %v945_v48  ;;  %v1272_v35 = vmul.f32 %v4034_v25, %v4640_v46  ;;  %v1654_v42 = vmul.f32 %v4048_v1, %v1552_v7  ;;  %v4645_v48 = vld [vmem:[#allocation138_spill] sm:$0xff]  ;;  %v4649_v11 = vld [vmem:[#allocation64_spill] sm:$0xff] }
 0x299   :  { %v1659_v19 = vmul.f32 %v4048_v1, %v1572_v28  ;;  %vm1780_vm4 = vcmp.ge.f32.partialorder %v1716_v47, 0.0  ;;  %v1844_v60 = vmul.f32 0.01, %v1716_v47  ;;  %v947_v15 = vadd.f32 %v883_v6, %v4641_v16 }
 0x29a   :  { %vm1785_vm5 = vcmp.ge.f32.partialorder %v1721_v63, 0.0  ;;  %v1849_v51 = vmul.f32 0.01, %v1721_v63  ;;  %v885_v30 = vmul.f32 %v4010_v21, %v4642_v5  ;;  %v1718_v3 = vadd.f32 %v1654_v42, %v1329_v29  ;;  %v1560_v54 = vpop.permute.xlu1 %1559  ;;  %v1580_v14 = vpop.permute.xlu0 %1579 }
 0x29b   :  { %v1723_v13 = vadd.f32 %v1659_v19, %v1334_v18  ;;  %v1269_v61 = vmul.f32 %v4034_v25, %v4643_v26  ;;  %v1274_v59 = vmul.f32 %v4034_v25, %v3518_v0  ;;  %v1908_v20 = vsel %vm1780_vm4, %v1716_v47, %v1844_v60  ;;  %v4651_v19 = vld [vmem:[#allocation63_spill] sm:$0xff] }
 0x29c   :  { %v1913_v49 = vsel %vm1785_vm5, %v1721_v63, %v1849_v51  ;;  %1972 = vst [vmem:[%s4179_s3 + $0x190] sm:$0xff] %v1908_v20  ;;  %vm1782_vm6 = vcmp.ge.f32.partialorder %v1718_v3, 0.0  ;;  %v1846_v55 = vmul.f32 0.01, %v1718_v3  ;;  %v1331_v58 = vadd.f32 %v1267_v4, %v4031_v36  ;;  %v4652_v51 = vld [vmem:[#allocation17_spill] sm:$0xff] }
 0x29d   :  { %1977 = vst [vmem:[%s4179_s3 + $0x1b8] sm:$0xff] %v1913_v49  ;;  %vm1787_vm7 = vcmp.ge.f32.partialorder %v1723_v13, 0.0  ;;  %v1851_v27 = vmul.f32 0.01, %v1723_v13  ;;  %v1336_v57 = vadd.f32 %v1272_v35, %v947_v15  ;;  %v1656_v0 = vmul.f32 %v4048_v1, %v1560_v54  ;;  %v2023_v26 = vld [vmem:[#allocation4] ss:$0 sm:$0xff] }
 0x29e   :  { %v1661_v52 = vmul.f32 %v4048_v1, %v1580_v14  ;;  %v949_v43 = vadd.f32 %v885_v30, %v4644_v50  ;;  %v887_v44 = vmul.f32 %v4010_v21, %v4645_v48  ;;  %v1910_v37 = vsel %vm1782_vm6, %v1718_v3, %v1846_v55  ;;  %v4654_v49 = vld [vmem:[#allocation9_spill] sm:$0xff] }
 0x29f   :  { %v1915_v40 = vsel %vm1787_vm7, %v1723_v13, %v1851_v27  ;;  %v1333_v53 = vadd.f32 %v1269_v61, %v4071_v10  ;;  %v1271_v34 = vmul.f32 %v4034_v25, %v4646_v23  ;;  %1974 = vst [vmem:[%s4179_s3 + $0x1a0] sm:$0xff] %v1910_v37  ;;  %v1720_v36 = vadd.f32 %v1656_v0, %v1331_v58  ;;  %v1568_v56 = vpop.permute.xlu1 %1567  ;;  %v4653_v61 = vld [vmem:[#allocation65_spill] sm:$0xff] }
 0x2a0   :  { %1979 = vst [vmem:[%s4179_s3 + $0x1c8] sm:$0xff] %v1915_v40  ;;  %v1725_v38 = vadd.f32 %v1661_v52, %v1336_v57  ;;  %v1588_v45 = vpop.permute.xlu0 %1587  ;;  %v1338_v17 = vadd.f32 %v1274_v59, %v949_v43  ;;  %v1276_v33 = vmul.f32 %v4034_v25, %v3557_v9  ;;  %v1658_v10 = vmul.f32 %v4048_v1, %v1568_v56 }
 0x2a1   :  { %v1663_v31 = vmul.f32 %v4048_v1, %v1588_v45  ;;  %vm1784_vm8 = vcmp.ge.f32.partialorder %v1720_v36, 0.0  ;;  %v1848_v22 = vmul.f32 0.01, %v1720_v36  ;;  %v946_v8 = vadd.f32 %v882_v62, %v4647_v32 }
 0x2a2   :  { %vm1789_vm9 = vcmp.ge.f32.partialorder %v1725_v38, 0.0  ;;  %v1853_v24 = vmul.f32 0.01, %v1725_v38  ;;  %v884_v39 = vmul.f32 %v4010_v21, %v4648_v12  ;;  %v1722_v6 = vadd.f32 %v1658_v10, %v1333_v53 }
 0x2a3   :  { %v1727_v2 = vadd.f32 %v1663_v31, %v1338_v17  ;;  %v951_v29 = vadd.f32 %v887_v44, %v4649_v11  ;;  %v1273_v9 = vmul.f32 %v4034_v25, %v4650_v41  ;;  %v1912_v4 = vsel %vm1784_vm8, %v1720_v36, %v1848_v22 }
 0x2a4   :  { %v1917_v47 = vsel %vm1789_vm9, %v1725_v38, %v1853_v24  ;;  %v1576_v63 = vpop.permute.xlu1 %1575  ;;  %v1596_v7 = vpop.permute.xlu0 %1595  ;;  %1976 = vst [vmem:[%s4179_s3 + $0x1b0] sm:$0xff] %v1912_v4  ;;  %vm1786_vm10 = vcmp.ge.f32.partialorder %v1722_v6, 0.0  ;;  %v1850_v62 = vmul.f32 0.01, %v1722_v6  ;;  %v1335_v18 = vadd.f32 %v1271_v34, %v946_v8 }
 0x2a5   :  { %1981 = vst [vmem:[%s4179_s3 + $0x1d8] sm:$0xff] %v1917_v47  ;;  %vm1791_vm11 = vcmp.ge.f32.partialorder %v1727_v2, 0.0  ;;  %v1855_v28 = vmul.f32 0.01, %v1727_v2  ;;  %v1340_v46 = vadd.f32 %v1276_v33, %v951_v29  ;;  %v1660_v35 = vmul.f32 %v4048_v1, %v1576_v63 }
 0x2a6   :  { %v1665_v42 = vmul.f32 %v4048_v1, %v1596_v7  ;;  %v948_v60 = vadd.f32 %v884_v39, %v4651_v19  ;;  %v886_v16 = vmul.f32 %v4010_v21, %v4652_v51  ;;  %v1914_v15 = vsel %vm1786_vm10, %v1722_v6, %v1850_v62 }
 0x2a7   :  { %v1919_v5 = vsel %vm1791_vm11, %v1727_v2, %v1855_v28  ;;  %1978 = vst [vmem:[%s4179_s3 + $0x1c0] sm:$0xff] %v1914_v15  ;;  %v1724_v30 = vadd.f32 %v1660_v35, %v1335_v18  ;;  %v561_v59 = vadd.f32 %v2023_v26, %v4653_v61  ;;  %v1275_v21 = vmul.f32 %v4034_v25, %v4654_v49 }
 0x2a8   :  { %1983 = vst [vmem:[%s4179_s3 + $0x1e8] sm:$0xff] %v1919_v5  ;;  %v1729_v3 = vadd.f32 %v1665_v42, %v1340_v46  ;;  %v1584_v13 = vpop.permute.xlu1 %1583  ;;  %v1337_v20 = vadd.f32 %v1273_v9, %v948_v60 }
 0x2a9   :  { %v1662_v54 = vmul.f32 %v4048_v1, %v1584_v13  ;;  %vm1788_vm12 = vcmp.ge.f32.partialorder %v1724_v30, 0.0  ;;  %v1852_v14 = vmul.f32 0.01, %v1724_v30  ;;  %v950_v27 = vadd.f32 %v886_v16, %v561_v59 }
 0x2aa   :  { %vm1793_vm13 = vcmp.ge.f32.partialorder %v1729_v3, 0.0  ;;  %v1857_v55 = vmul.f32 0.01, %v1729_v3 }
 0x2ab   :  { %v1726_v58 = vadd.f32 %v1662_v54, %v1337_v20  ;;  %v1916_v57 = vsel %vm1788_vm12, %v1724_v30, %v1852_v14  ;;  %v1339_v50 = vadd.f32 %v1275_v21, %v950_v27 }
 0x2ac   :  { %v1921_v0 = vsel %vm1793_vm13, %v1729_v3, %v1857_v55  ;;  %v1592_v52 = vpop.permute.xlu1 %1591  ;;  %1980 = vst [vmem:[%s4179_s3 + $0x1d0] sm:$0xff] %v1916_v57 }
 0x2ad   :  { %1985 = vst [vmem:[%s4179_s3 + $0x1f8] sm:$0xff] %v1921_v0  ;;  %vm1790_vm14 = vcmp.ge.f32.partialorder %v1726_v58, 0.0  ;;  %v1854_v25 = vmul.f32 0.01, %v1726_v58  ;;  %v1664_v43 = vmul.f32 %v4048_v1, %v1592_v52 }
 0x2af   :  { %v1918_v48 = vsel %vm1790_vm14, %v1726_v58, %v1854_v25  ;;  %v1728_v44 = vadd.f32 %v1664_v43, %v1339_v50 }
 0x2b0   :  { %1982 = vst [vmem:[%s4179_s3 + $0x1e0] sm:$0xff] %v1918_v48 }
 0x2b1   :  { %vm1792_vm15 = vcmp.ge.f32.partialorder %v1728_v44, 0.0  ;;  %v1856_v37 = vmul.f32 0.01, %v1728_v44 }
 0x2b3   :  { %v1920_v40 = vsel %vm1792_vm15, %v1728_v44, %v1856_v37 }
 0x2b4   :  { %1984 = vst [vmem:[%s4179_s3 + $0x1f0] sm:$0xff] %v1920_v40 }
 0x2b5   :  { %1990 = vsyncpa [#allocation3], 1 }
 0x2b6   :  { %1991 = vsyncpa [#allocation5], 1 }

// kernel: encoder_forward.7
= control target key start
LH: loop header
LB: loop body
LE: loop exit
PB: predicated region body
PF: predicated region fallthrough
CT: control target
= control target key end

     0   :  { %8 = vsyncpa [#allocation3], 0  ;;  %s1788_s0 = inlined_call_operand.vmem [shape: bf16[128,512], index: 0, kind: input, shape index: {}]   ;;  %s1789_s1 = inlined_call_operand.hbm [shape: bf16[512,256], index: 1, kind: input, shape index: {}]   ;;  %s1790_s2 = inlined_call_operand.hbm [shape: f32[1,256], index: 2, kind: input, shape index: {}]   ;;  %s1791_s3 = inlined_call_operand.vmem [shape: f32[128,256], index: 3, kind: output, shape index: {}]  }
   0x1   :  { %9 = vsyncpa [#allocation5], 0  ;;  %s1512_s12 = smov [#allocation2]   ;;  %s1464_s16 = scalar_lea.hbm %s1789_s1, 8192 }
   0x2   :  { %s17_s13 = sshll.u32 %s1512_s12, 4  ;;  %p1465_p0 = scmp.ne.s32.totalorder %s1789_s1, %s1464_s16  ;;  %s18_s13 = int_to_ptr.vmem [resolvable:$true] %s17_s13 }
   0x3   :  { %p1468_p1 = scmp.lt.u32.totalorder %s1464_s16, %s1789_s1 }
   0x5   :  { %p1470_p2 = pnand %p1468_p1, %p1465_p0 }
   0x7   :  { %1473 = shalt.err (!%p1470_p2)
}
   0x8   :  { %s1474_s21 = scalar_lea.vmem %s18_s13, 8192  ;;  %p1479_p4 = scmp.lt.s32.totalorder %s18_s13, %s18_s13 }
   0x9   :  { %p1475_p3 = scmp.ne.s32.totalorder %s18_s13, %s1474_s21  ;;  %p1480_p5 = scmp.lt.s32.totalorder %s1474_s21, %s1474_s21 }
   0xb   :  { %p1481_p6 = por %p1480_p5, %p1479_p4 }
   0xd   :  { %p1482_p7 = pnand %p1481_p6, %p1475_p3 }
   0xf   :  { %1485 = shalt.err (!%p1482_p7)
}
  0x10   :  { %s1513_s22 = smov 128   ;;  %s1514_s23 = smov 8  }
  0x11   :  { %23 = dma.hbm_to_vmem [thread:$0]  %s1789_s1, 8192, %s18_s13, [#allocation3], %s1513_s22, %s1513_s22, %s1514_s23  }
  0x12   :  { %s1515_s26 = smov [#allocation4]   ;;  %s1486_s30 = scalar_lea.hbm %s1790_s2, 32 }
  0x13   :  { %s30_s27 = sshll.u32 %s1515_s26, 4  ;;  %p1487_p8 = scmp.ne.s32.totalorder %s1790_s2, %s1486_s30  ;;  %s31_s27 = int_to_ptr.vmem [resolvable:$true] %s30_s27 }
  0x14   :  { %p1490_p9 = scmp.lt.u32.totalorder %s1486_s30, %s1790_s2 }
  0x16   :  { %p1492_p10 = pnand %p1490_p9, %p1487_p8 }
  0x18   :  { %1495 = shalt.err (!%p1492_p10)
}
  0x19   :  { %s1496_s8 = scalar_lea.vmem %s31_s27, 32  ;;  %p1501_p12 = scmp.lt.s32.totalorder %s31_s27, %s31_s27 }
  0x1a   :  { %p1497_p11 = scmp.ne.s32.totalorder %s31_s27, %s1496_s8  ;;  %p1502_p13 = scmp.lt.s32.totalorder %s1496_s8, %s1496_s8 }
  0x1c   :  { %p1503_p0 = por %p1502_p13, %p1501_p12 }
  0x1e   :  { %p1504_p1 = pnand %p1503_p0, %p1497_p11 }
  0x20   :  { %1507 = shalt.err (!%p1504_p1)
}
  0x21   :  { %33 = dma.hbm_to_vmem [thread:$0]  %s1790_s2, 32, %s31_s27, [#allocation5]  }
  0x22   :  { %1508 = dma.done.wait [#allocation3], 8192  }
  0x23   :  { %1509 = vsyncadd [#allocation3], 4294959104 }
  0x24   :  { %1510 = dma.done.wait [#allocation5], 32  }
  0x25   :  { %1511 = vsyncadd [#allocation5], 4294967264  ;;  %v1320_v0 = vld [vmem:[#allocation2 + $0x4] ss:$8 sps:$4 sm:$0xff]   ;;  %v1324_v2 = vld [vmem:[#allocation2] ss:$8 sps:$4 sm:$0xff]  }
  0x26   :  { %v1322_v1 = vld [vmem:[#allocation2 + $0x104] ss:$8 sps:$4 sm:$0xff]   ;;  %684 = vmatprep.subr.bf16.mxu1 %v1320_v0  ;;  %v1325_v3 = vld [vmem:[#allocation2 + $0x100] ss:$8 sps:$4 sm:$0xff]   ;;  %v1326_v4 = vld [vmem:[#allocation2 + $0x14] ss:$8 sps:$4 sm:$0xff]  }
  0x27   :  { %797 = vmatprep.subr.bf16.mxu0 %v1322_v1  ;;  %685 = vmatpush1.bf16.msra.mxu1 %v1324_v2  ;;  %v1328_v5 = vld [vmem:[#allocation2 + $0x114] ss:$8 sps:$4 sm:$0xff]   ;;  %v1330_v6 = vld [vmem:[#allocation2 + $0x10] ss:$8 sps:$4 sm:$0xff]   ;;  %v1332_v8 = vld [vmem:[#allocation2 + $0x24] ss:$8 sps:$4 sm:$0xff]  }
  0x28   :  { %798 = vmatpush1.bf16.msra.mxu0 %v1325_v3  ;;  %686 = vmatprep.subr.bf16.mxu1 %v1326_v4  ;;  %v1331_v7 = vld [vmem:[#allocation2 + $0x110] ss:$8 sps:$4 sm:$0xff]   ;;  %v1334_v9 = vld [vmem:[#allocation2 + $0x124] ss:$8 sps:$4 sm:$0xff]   ;;  %v1336_v10 = vld [vmem:[#allocation2 + $0x20] ss:$8 sps:$4 sm:$0xff]  }
  0x29   :  { %799 = vmatprep.subr.bf16.mxu0 %v1328_v5  ;;  %v1337_v11 = vld [vmem:[#allocation2 + $0x120] ss:$8 sps:$4 sm:$0xff]   ;;  %v1338_v12 = vld [vmem:[#allocation2 + $0x34] ss:$8 sps:$4 sm:$0xff]   ;;  %v1342_v14 = vld [vmem:[#allocation2 + $0x30] ss:$8 sps:$4 sm:$0xff]  }
  0x2a   :  { %v1340_v13 = vld [vmem:[#allocation2 + $0x134] ss:$8 sps:$4 sm:$0xff]   ;;  %v1343_v15 = vld [vmem:[#allocation2 + $0x130] ss:$8 sps:$4 sm:$0xff]   ;;  %v1344_v16 = vld [vmem:[#allocation2 + $0x44] ss:$8 sps:$4 sm:$0xff]  }
  0x2b   :  { %687 = vmatpush1.bf16.msra.mxu1 %v1330_v6  ;;  %v1346_v17 = vld [vmem:[#allocation2 + $0x144] ss:$8 sps:$4 sm:$0xff]   ;;  %v1348_v18 = vld [vmem:[#allocation2 + $0x40] ss:$8 sps:$4 sm:$0xff]   ;;  %v1350_v20 = vld [vmem:[#allocation2 + $0x54] ss:$8 sps:$4 sm:$0xff]  }
  0x2c   :  { %800 = vmatpush1.bf16.msra.mxu0 %v1331_v7  ;;  %688 = vmatprep.subr.bf16.mxu1 %v1332_v8  ;;  %v1349_v19 = vld [vmem:[#allocation2 + $0x140] ss:$8 sps:$4 sm:$0xff]   ;;  %v1352_v21 = vld [vmem:[#allocation2 + $0x154] ss:$8 sps:$4 sm:$0xff]   ;;  %v1354_v22 = vld [vmem:[#allocation2 + $0x50] ss:$8 sps:$4 sm:$0xff]  }
  0x2d   :  { %801 = vmatprep.subr.bf16.mxu0 %v1334_v9  ;;  %v1355_v23 = vld [vmem:[#allocation2 + $0x150] ss:$8 sps:$4 sm:$0xff]   ;;  %v1356_v24 = vld [vmem:[#allocation2 + $0x64] ss:$8 sps:$4 sm:$0xff]   ;;  %v1360_v26 = vld [vmem:[#allocation2 + $0x60] ss:$8 sps:$4 sm:$0xff]  }
  0x2e   :  { %v1358_v25 = vld [vmem:[#allocation2 + $0x164] ss:$8 sps:$4 sm:$0xff]   ;;  %v1361_v27 = vld [vmem:[#allocation2 + $0x160] ss:$8 sps:$4 sm:$0xff]   ;;  %v1362_v28 = vld [vmem:[#allocation2 + $0x74] ss:$8 sps:$4 sm:$0xff]  }
  0x2f   :  { %689 = vmatpush1.bf16.msra.mxu1 %v1336_v10  ;;  %v1364_v29 = vld [vmem:[#allocation2 + $0x174] ss:$8 sps:$4 sm:$0xff]   ;;  %v1366_v30 = vld [vmem:[#allocation2 + $0x70] ss:$8 sps:$4 sm:$0xff]   ;;  %v1368_v32 = vld [vmem:[#allocation2 + $0x84] ss:$8 sps:$4 sm:$0xff]  }
  0x30   :  { %802 = vmatpush1.bf16.msra.mxu0 %v1337_v11  ;;  %690 = vmatprep.subr.bf16.mxu1 %v1338_v12  ;;  %v1367_v31 = vld [vmem:[#allocation2 + $0x170] ss:$8 sps:$4 sm:$0xff]   ;;  %v1370_v33 = vld [vmem:[#allocation2 + $0x184] ss:$8 sps:$4 sm:$0xff]   ;;  %v1372_v34 = vld [vmem:[#allocation2 + $0x80] ss:$8 sps:$4 sm:$0xff]  }
  0x31   :  { %803 = vmatprep.subr.bf16.mxu0 %v1340_v13  ;;  %v1373_v35 = vld [vmem:[#allocation2 + $0x180] ss:$8 sps:$4 sm:$0xff]   ;;  %v1374_v36 = vld [vmem:[#allocation2 + $0x94] ss:$8 sps:$4 sm:$0xff]   ;;  %v1378_v38 = vld [vmem:[#allocation2 + $0x90] ss:$8 sps:$4 sm:$0xff]  }
  0x32   :  { %v1376_v37 = vld [vmem:[#allocation2 + $0x194] ss:$8 sps:$4 sm:$0xff]   ;;  %v1379_v39 = vld [vmem:[#allocation2 + $0x190] ss:$8 sps:$4 sm:$0xff]   ;;  %v1380_v40 = vld [vmem:[#allocation2 + $0xa4] ss:$8 sps:$4 sm:$0xff]  }
  0x33   :  { %691 = vmatpush1.bf16.msra.mxu1 %v1342_v14  ;;  %v1382_v41 = vld [vmem:[#allocation2 + $0x1a4] ss:$8 sps:$4 sm:$0xff]   ;;  %v1384_v42 = vld [vmem:[#allocation2 + $0xa0] ss:$8 sps:$4 sm:$0xff]   ;;  %v1386_v44 = vld [vmem:[#allocation2 + $0xb4] ss:$8 sps:$4 sm:$0xff]  }
  0x34   :  { %804 = vmatpush1.bf16.msra.mxu0 %v1343_v15  ;;  %692 = vmatprep.subr.bf16.mxu1 %v1344_v16  ;;  %v1385_v43 = vld [vmem:[#allocation2 + $0x1a0] ss:$8 sps:$4 sm:$0xff]   ;;  %v1388_v45 = vld [vmem:[#allocation2 + $0x1b4] ss:$8 sps:$4 sm:$0xff]   ;;  %v1390_v46 = vld [vmem:[#allocation2 + $0xb0] ss:$8 sps:$4 sm:$0xff]  }
  0x35   :  { %805 = vmatprep.subr.bf16.mxu0 %v1346_v17  ;;  %v1391_v47 = vld [vmem:[#allocation2 + $0x1b0] ss:$8 sps:$4 sm:$0xff]   ;;  %v1392_v48 = vld [vmem:[#allocation2 + $0xc4] ss:$8 sps:$4 sm:$0xff]   ;;  %v1396_v52 = vld [vmem:[#allocation2 + $0xc0] ss:$8 sps:$4 sm:$0xff]  }
  0x36   :  { %v1418_v49 = vld [vmem:[%s1788_s0 + $0x4] ss:$16 sps:$4 sm:$0xff]   ;;  %v1421_v51 = vld [vmem:[%s1788_s0 + $0xc] ss:$16 sps:$4 sm:$0xff]   ;;  %v1397_v53 = vld [vmem:[#allocation2 + $0x1c0] ss:$8 sps:$4 sm:$0xff]  }
  0x37   :  { %693 = vmatpush1.bf16.msra.mxu1 %v1348_v18  ;;  %v1394_v50 = vld [vmem:[#allocation2 + $0x1c4] ss:$8 sps:$4 sm:$0xff]   ;;  %716 = vmatprep.mubr.bf16.mxu1 %v1418_v49  ;;  %v1398_v54 = vld [vmem:[#allocation2 + $0xd4] ss:$8 sps:$4 sm:$0xff]   ;;  %v1402_v56 = vld [vmem:[#allocation2 + $0xd0] ss:$8 sps:$4 sm:$0xff]  }
  0x38   :  { %806 = vmatpush1.bf16.msra.mxu0 %v1349_v19  ;;  %694 = vmatprep.subr.bf16.mxu1 %v1350_v20  ;;  %v1400_v55 = vld [vmem:[#allocation2 + $0x1d4] ss:$8 sps:$4 sm:$0xff]   ;;  %v1403_v57 = vld [vmem:[#allocation2 + $0x1d0] ss:$8 sps:$4 sm:$0xff]   ;;  %v1404_v58 = vld [vmem:[#allocation2 + $0xe4] ss:$8 sps:$4 sm:$0xff]  }
  0x39   :  { %807 = vmatprep.subr.bf16.mxu0 %v1352_v21  ;;  %829 = vmatprep.mubr.bf16.mxu0 %v1421_v51  ;;  %v1406_v59 = vld [vmem:[#allocation2 + $0x1e4] ss:$8 sps:$4 sm:$0xff]   ;;  %v1408_v60 = vld [vmem:[#allocation2 + $0xe0] ss:$8 sps:$4 sm:$0xff]   ;;  %v1410_v62 = vld [vmem:[#allocation2 + $0xf4] ss:$8 sps:$4 sm:$0xff]  }
  0x3a   :  { %v1409_v61 = vld [vmem:[#allocation2 + $0x1e0] ss:$8 sps:$4 sm:$0xff]   ;;  %v1412_v63 = vld [vmem:[#allocation2 + $0x1f4] ss:$8 sps:$4 sm:$0xff]   ;;  %v1414_v0 = vld [vmem:[#allocation2 + $0xf0] ss:$8 sps:$4 sm:$0xff]  }
  0x3b   :  { %695 = vmatpush1.bf16.msra.mxu1 %v1354_v22  ;;  %v1415_v1 = vld [vmem:[#allocation2 + $0x1f0] ss:$8 sps:$4 sm:$0xff]   ;;  %v1422_v4 = vld [vmem:[%s1788_s0 + $0x24] ss:$16 sps:$4 sm:$0xff]   ;;  %v1424_v5 = vld [vmem:[%s1788_s0 + $0x2c] ss:$16 sps:$4 sm:$0xff]  }
  0x3c   :  { %808 = vmatpush1.bf16.msra.mxu0 %v1355_v23  ;;  %696 = vmatprep.subr.bf16.mxu1 %v1356_v24  ;;  %v1416_v2 = vld [vmem:[%s1788_s0] ss:$16 sps:$4 sm:$0xff]   ;;  %v1419_v3 = vld [vmem:[%s1788_s0 + $0x8] ss:$16 sps:$4 sm:$0xff]   ;;  %v1428_v8 = vld [vmem:[%s1788_s0 + $0x44] ss:$16 sps:$4 sm:$0xff]  }
  0x3d   :  { %809 = vmatprep.subr.bf16.mxu0 %v1358_v25  ;;  %v1426_v6 = vld [vmem:[%s1788_s0 + $0x20] ss:$16 sps:$4 sm:$0xff]   ;;  %v1427_v7 = vld [vmem:[%s1788_s0 + $0x28] ss:$16 sps:$4 sm:$0xff]   ;;  %v1430_v9 = vld [vmem:[%s1788_s0 + $0x4c] ss:$16 sps:$4 sm:$0xff]  }
  0x3e   :  { %v1432_v10 = vld [vmem:[%s1788_s0 + $0x40] ss:$16 sps:$4 sm:$0xff]   ;;  %v1433_v11 = vld [vmem:[%s1788_s0 + $0x48] ss:$16 sps:$4 sm:$0xff]   ;;  %v1434_v12 = vld [vmem:[%s1788_s0 + $0x64] ss:$16 sps:$4 sm:$0xff]  }
  0x3f   :  { %697 = vmatpush1.bf16.msra.mxu1 %v1360_v26  ;;  %v1436_v13 = vld [vmem:[%s1788_s0 + $0x6c] ss:$16 sps:$4 sm:$0xff]   ;;  %v1438_v14 = vld [vmem:[%s1788_s0 + $0x60] ss:$16 sps:$4 sm:$0xff]   ;;  %v1439_v15 = vld [vmem:[%s1788_s0 + $0x68] ss:$16 sps:$4 sm:$0xff]  }
  0x40   :  { %810 = vmatpush1.bf16.msra.mxu0 %v1361_v27  ;;  %698 = vmatprep.subr.bf16.mxu1 %v1362_v28  ;;  %v1440_v16 = vld [vmem:[%s1788_s0 + $0x84] ss:$16 sps:$4 sm:$0xff]   ;;  %v1442_v17 = vld [vmem:[%s1788_s0 + $0x8c] ss:$16 sps:$4 sm:$0xff]   ;;  %v1444_v18 = vld [vmem:[%s1788_s0 + $0x80] ss:$16 sps:$4 sm:$0xff]  }
  0x41   :  { %811 = vmatprep.subr.bf16.mxu0 %v1364_v29  ;;  %v1445_v19 = vld [vmem:[%s1788_s0 + $0x88] ss:$16 sps:$4 sm:$0xff]   ;;  %v1446_v20 = vld [vmem:[%s1788_s0 + $0xa4] ss:$16 sps:$4 sm:$0xff]   ;;  %v1448_v21 = vld [vmem:[%s1788_s0 + $0xac] ss:$16 sps:$4 sm:$0xff]  }
  0x42   :  { %v1450_v22 = vld [vmem:[%s1788_s0 + $0xa0] ss:$16 sps:$4 sm:$0xff]   ;;  %v1451_v23 = vld [vmem:[%s1788_s0 + $0xa8] ss:$16 sps:$4 sm:$0xff]   ;;  %v1452_v24 = vld [vmem:[%s1788_s0 + $0xc4] ss:$16 sps:$4 sm:$0xff]  }
  0x43   :  { %699 = vmatpush1.bf16.msra.mxu1 %v1366_v30  ;;  %v1454_v25 = vld [vmem:[%s1788_s0 + $0xcc] ss:$16 sps:$4 sm:$0xff]   ;;  %v1456_v26 = vld [vmem:[%s1788_s0 + $0xc0] ss:$16 sps:$4 sm:$0xff]   ;;  %v1457_v27 = vld [vmem:[%s1788_s0 + $0xc8] ss:$16 sps:$4 sm:$0xff]  }
  0x44   :  { %812 = vmatpush1.bf16.msra.mxu0 %v1367_v31  ;;  %700 = vmatprep.subr.bf16.mxu1 %v1368_v32  ;;  %v1458_v28 = vld [vmem:[%s1788_s0 + $0xe4] ss:$16 sps:$4 sm:$0xff]   ;;  %v1460_v29 = vld [vmem:[%s1788_s0 + $0xec] ss:$16 sps:$4 sm:$0xff]   ;;  %v1462_v30 = vld [vmem:[%s1788_s0 + $0xe0] ss:$16 sps:$4 sm:$0xff]   ;;  %v1011_v32 = vlaneseq }
  0x45   :  { %813 = vmatprep.subr.bf16.mxu0 %v1370_v33  ;;  %v1463_v31 = vld [vmem:[%s1788_s0 + $0xe8] ss:$16 sps:$4 sm:$0xff]  }
  0x46   :  { %v1012_v33 = vshrl.u32 %v1011_v32, 7 }
  0x47   :  { %701 = vmatpush1.bf16.msra.mxu1 %v1372_v34 }
  0x48   :  { %814 = vmatpush1.bf16.msra.mxu0 %v1373_v35  ;;  %702 = vmatprep.subr.bf16.mxu1 %v1374_v36  ;;  %v1013_v34 = vsub.s32 0, %v1012_v33  ;;  %v1009_v35 = vld [vmem:[#allocation4] sm:$0x3]  ;;  %v1017_v36 = vsub.s32 1, %v1012_v33 }
  0x49   :  { %815 = vmatprep.subr.bf16.mxu0 %v1376_v37 }
  0x4b   :  { %703 = vmatpush1.bf16.msra.mxu1 %v1378_v38 }
  0x4c   :  { %816 = vmatpush1.bf16.msra.mxu0 %v1379_v39  ;;  %704 = vmatprep.subr.bf16.mxu1 %v1380_v40  ;;  %v1656_v40 = vrot.slane %v1009_v35, %v1013_v34 }
  0x4d   :  { %817 = vmatprep.subr.bf16.mxu0 %v1382_v41 }
  0x4f   :  { %705 = vmatpush1.bf16.msra.mxu1 %v1384_v42 }
  0x50   :  { %818 = vmatpush1.bf16.msra.mxu0 %v1385_v43  ;;  %706 = vmatprep.subr.bf16.mxu1 %v1386_v44  ;;  %v1658_v44 = vrot.slane %v1009_v35, %v1017_v36 }
  0x51   :  { %819 = vmatprep.subr.bf16.mxu0 %v1388_v45 }
  0x53   :  { %707 = vmatpush1.bf16.msra.mxu1 %v1390_v46 }
  0x54   :  { %820 = vmatpush1.bf16.msra.mxu0 %v1391_v47  ;;  %708 = vmatprep.subr.bf16.mxu1 %v1392_v48 }
  0x55   :  { %821 = vmatprep.subr.bf16.mxu0 %v1394_v50 }
  0x57   :  { %709 = vmatpush1.bf16.msra.mxu1 %v1396_v52 }
  0x58   :  { %822 = vmatpush1.bf16.msra.mxu0 %v1397_v53  ;;  %710 = vmatprep.subr.bf16.mxu1 %v1398_v54 }
  0x59   :  { %823 = vmatprep.subr.bf16.mxu0 %v1400_v55 }
  0x5b   :  { %711 = vmatpush1.bf16.msra.mxu1 %v1402_v56 }
  0x5c   :  { %824 = vmatpush1.bf16.msra.mxu0 %v1403_v57  ;;  %712 = vmatprep.subr.bf16.mxu1 %v1404_v58 }
  0x5d   :  { %825 = vmatprep.subr.bf16.mxu0 %v1406_v59 }
  0x5f   :  { %713 = vmatpush1.bf16.msra.mxu1 %v1408_v60 }
  0x60   :  { %826 = vmatpush1.bf16.msra.mxu0 %v1409_v61  ;;  %714 = vmatprep.subr.bf16.mxu1 %v1410_v62 }
  0x61   :  { %827 = vmatprep.subr.bf16.mxu0 %v1412_v63 }
  0x63   :  { %715 = vmatpush1.bf16.msra.mxu1 %v1414_v0 }
  0x64   :  { %828 = vmatpush1.bf16.msra.mxu0 %v1415_v1 }
  0x66   :  { %717 = vmatmul.mubr.bf16.vlgmr.msra.gmra.mrb[0].mxu1 %v1416_v2 }
  0x67   :  { %830 = vmatmul.mubr.bf16.vlgmr.msra.gmra.mrb[0].mxu0 %v1419_v3  ;;  %726 = vmatprep.mubr.bf16.mxu1 %v1422_v4 }
  0x68   :  { %839 = vmatprep.mubr.bf16.mxu0 %v1424_v5 }
  0x6e   :  { %727 = vmatmul.mubr.bf16.gmra.mrb[4].mxu1 %v1426_v6 }
  0x6f   :  { %840 = vmatmul.mubr.bf16.gmra.mrb[4].mxu0 %v1427_v7  ;;  %736 = vmatprep.mubr.bf16.mxu1 %v1428_v8 }
  0x70   :  { %849 = vmatprep.mubr.bf16.mxu0 %v1430_v9 }
  0x76   :  { %737 = vmatmul.mubr.bf16.gmra.mrb[8].mxu1 %v1432_v10 }
  0x77   :  { %850 = vmatmul.mubr.bf16.gmra.mrb[8].mxu0 %v1433_v11  ;;  %746 = vmatprep.mubr.bf16.mxu1 %v1434_v12 }
  0x78   :  { %859 = vmatprep.mubr.bf16.mxu0 %v1436_v13 }
  0x7e   :  { %747 = vmatmul.mubr.bf16.gmra.mrb[12].mxu1 %v1438_v14 }
  0x7f   :  { %860 = vmatmul.mubr.bf16.gmra.mrb[12].mxu0 %v1439_v15  ;;  %756 = vmatprep.mubr.bf16.mxu1 %v1440_v16 }
  0x80   :  { %869 = vmatprep.mubr.bf16.mxu0 %v1442_v17 }
  0x86   :  { %757 = vmatmul.mubr.bf16.gmra.mrb[16].mxu1 %v1444_v18 }
  0x87   :  { %870 = vmatmul.mubr.bf16.gmra.mrb[16].mxu0 %v1445_v19  ;;  %766 = vmatprep.mubr.bf16.mxu1 %v1446_v20 }
  0x88   :  { %879 = vmatprep.mubr.bf16.mxu0 %v1448_v21 }
  0x8e   :  { %767 = vmatmul.mubr.bf16.gmra.mrb[20].mxu1 %v1450_v22 }
  0x8f   :  { %880 = vmatmul.mubr.bf16.gmra.mrb[20].mxu0 %v1451_v23  ;;  %776 = vmatprep.mubr.bf16.mxu1 %v1452_v24 }
  0x90   :  { %889 = vmatprep.mubr.bf16.mxu0 %v1454_v25 }
  0x96   :  { %777 = vmatmul.mubr.bf16.gmra.mrb[24].mxu1 %v1456_v26 }
  0x97   :  { %890 = vmatmul.mubr.bf16.gmra.mrb[24].mxu0 %v1457_v27  ;;  %786 = vmatprep.mubr.bf16.mxu1 %v1458_v28 }
  0x98   :  { %899 = vmatprep.mubr.bf16.mxu0 %v1460_v29 }
  0x9e   :  { %787 = vmatmul.mubr.bf16.gmra.mrb[28].mxu1 %v1462_v30 }
  0x9f   :  { %900 = vmatmul.mubr.bf16.gmra.mrb[28].mxu0 %v1463_v31 }
 0x139   :  { %v718_v37 = vpop.f32.mrb[0].mxu1 }
 0x13a   :  { %v831_v38 = vpop.f32.mrb[0].mxu0  ;;  %v720_v41 = vpop.f32.mrb[1].mxu1 }
 0x13b   :  { %v832_v39 = vadd.f32 %v831_v38, %v718_v37  ;;  %v833_v42 = vpop.f32.mrb[1].mxu0  ;;  %v722_v45 = vpop.f32.mrb[2].mxu1 }
 0x13c   :  { %v834_v43 = vadd.f32 %v833_v42, %v720_v41  ;;  %v835_v46 = vpop.f32.mrb[2].mxu0  ;;  %v724_v48 = vpop.f32.mrb[3].mxu1 }
 0x13d   :  { %v836_v47 = vadd.f32 %v835_v46, %v722_v45  ;;  %v837_v49 = vpop.f32.mrb[3].mxu0  ;;  %v1021_v51 = vadd.f32 %v1656_v40, %v832_v39 }
 0x13e   :  { %v838_v50 = vadd.f32 %v837_v49, %v724_v48  ;;  %v1022_v52 = vadd.f32 %v1658_v44, %v834_v43 }
 0x13f   :  { %vm1053_vm0 = vcmp.ge.f32.partialorder %v1021_v51, 0.0  ;;  %v1085_v53 = vmul.f32 0.01, %v1021_v51  ;;  %v1023_v54 = vadd.f32 %v1656_v40, %v836_v47 }
 0x140   :  { %vm1054_vm1 = vcmp.ge.f32.partialorder %v1022_v52, 0.0  ;;  %v1086_v55 = vmul.f32 0.01, %v1022_v52  ;;  %v1024_v56 = vadd.f32 %v1658_v44, %v838_v50 }
 0x141   :  { %v728_v57 = vpop.f32.mrb[4].mxu1  ;;  %v1117_v59 = vsel %vm1053_vm0, %v1021_v51, %v1085_v53  ;;  %vm1055_vm2 = vcmp.ge.f32.partialorder %v1023_v54, 0.0  ;;  %v1087_v60 = vmul.f32 0.01, %v1023_v54 }
 0x142   :  { %v841_v58 = vpop.f32.mrb[4].mxu0  ;;  %v730_v62 = vpop.f32.mrb[5].mxu1  ;;  %1149 = vst [vmem:[%s1791_s3] sm:$0xff] %v1117_v59  ;;  %v1118_v0 = vsel %vm1054_vm1, %v1022_v52, %v1086_v55  ;;  %vm1056_vm3 = vcmp.ge.f32.partialorder %v1024_v56, 0.0  ;;  %v1088_v1 = vmul.f32 0.01, %v1024_v56 }
 0x143   :  { %v842_v61 = vadd.f32 %v841_v58, %v728_v57  ;;  %v843_v63 = vpop.f32.mrb[5].mxu0  ;;  %v732_v3 = vpop.f32.mrb[6].mxu1  ;;  %1150 = vst [vmem:[%s1791_s3 + $0x8] sm:$0xff] %v1118_v0  ;;  %v1119_v5 = vsel %vm1055_vm2, %v1023_v54, %v1087_v60 }
 0x144   :  { %v844_v2 = vadd.f32 %v843_v63, %v730_v62  ;;  %v845_v4 = vpop.f32.mrb[6].mxu0  ;;  %v734_v7 = vpop.f32.mrb[7].mxu1  ;;  %1151 = vst [vmem:[%s1791_s3 + $0x10] sm:$0xff] %v1119_v5  ;;  %v1120_v9 = vsel %vm1056_vm3, %v1024_v56, %v1088_v1 }
 0x145   :  { %v846_v6 = vadd.f32 %v845_v4, %v732_v3  ;;  %v847_v8 = vpop.f32.mrb[7].mxu0  ;;  %1152 = vst [vmem:[%s1791_s3 + $0x18] sm:$0xff] %v1120_v9  ;;  %v1025_v11 = vadd.f32 %v1656_v40, %v842_v61 }
 0x146   :  { %v848_v10 = vadd.f32 %v847_v8, %v734_v7  ;;  %v1026_v12 = vadd.f32 %v1658_v44, %v844_v2 }
 0x147   :  { %vm1057_vm4 = vcmp.ge.f32.partialorder %v1025_v11, 0.0  ;;  %v1089_v13 = vmul.f32 0.01, %v1025_v11  ;;  %v1027_v14 = vadd.f32 %v1656_v40, %v846_v6 }
 0x148   :  { %vm1058_vm5 = vcmp.ge.f32.partialorder %v1026_v12, 0.0  ;;  %v1090_v15 = vmul.f32 0.01, %v1026_v12  ;;  %v1028_v16 = vadd.f32 %v1658_v44, %v848_v10 }
 0x149   :  { %v738_v17 = vpop.f32.mrb[8].mxu1  ;;  %v1121_v19 = vsel %vm1057_vm4, %v1025_v11, %v1089_v13  ;;  %vm1059_vm6 = vcmp.ge.f32.partialorder %v1027_v14, 0.0  ;;  %v1091_v20 = vmul.f32 0.01, %v1027_v14 }
 0x14a   :  { %v851_v18 = vpop.f32.mrb[8].mxu0  ;;  %v740_v22 = vpop.f32.mrb[9].mxu1  ;;  %1153 = vst [vmem:[%s1791_s3 + $0x20] sm:$0xff] %v1121_v19  ;;  %v1122_v24 = vsel %vm1058_vm5, %v1026_v12, %v1090_v15  ;;  %vm1060_vm7 = vcmp.ge.f32.partialorder %v1028_v16, 0.0  ;;  %v1092_v25 = vmul.f32 0.01, %v1028_v16 }
 0x14b   :  { %v852_v21 = vadd.f32 %v851_v18, %v738_v17  ;;  %v853_v23 = vpop.f32.mrb[9].mxu0  ;;  %v742_v27 = vpop.f32.mrb[10].mxu1  ;;  %1154 = vst [vmem:[%s1791_s3 + $0x28] sm:$0xff] %v1122_v24  ;;  %v1123_v29 = vsel %vm1059_vm6, %v1027_v14, %v1091_v20 }
 0x14c   :  { %v854_v26 = vadd.f32 %v853_v23, %v740_v22  ;;  %v855_v28 = vpop.f32.mrb[10].mxu0  ;;  %v744_v31 = vpop.f32.mrb[11].mxu1  ;;  %1155 = vst [vmem:[%s1791_s3 + $0x30] sm:$0xff] %v1123_v29  ;;  %v1124_v33 = vsel %vm1060_vm7, %v1028_v16, %v1092_v25 }
 0x14d   :  { %v856_v30 = vadd.f32 %v855_v28, %v742_v27  ;;  %v857_v32 = vpop.f32.mrb[11].mxu0  ;;  %1156 = vst [vmem:[%s1791_s3 + $0x38] sm:$0xff] %v1124_v33  ;;  %v1029_v35 = vadd.f32 %v1656_v40, %v852_v21 }
 0x14e   :  { %v858_v34 = vadd.f32 %v857_v32, %v744_v31  ;;  %v1030_v36 = vadd.f32 %v1658_v44, %v854_v26 }
 0x14f   :  { %vm1061_vm8 = vcmp.ge.f32.partialorder %v1029_v35, 0.0  ;;  %v1093_v37 = vmul.f32 0.01, %v1029_v35  ;;  %v1031_v38 = vadd.f32 %v1656_v40, %v856_v30 }
 0x150   :  { %vm1062_vm9 = vcmp.ge.f32.partialorder %v1030_v36, 0.0  ;;  %v1094_v39 = vmul.f32 0.01, %v1030_v36  ;;  %v1032_v41 = vadd.f32 %v1658_v44, %v858_v34 }
 0x151   :  { %v748_v42 = vpop.f32.mrb[12].mxu1  ;;  %v1125_v45 = vsel %vm1061_vm8, %v1029_v35, %v1093_v37  ;;  %vm1063_vm10 = vcmp.ge.f32.partialorder %v1031_v38, 0.0  ;;  %v1095_v46 = vmul.f32 0.01, %v1031_v38 }
 0x152   :  { %v861_v43 = vpop.f32.mrb[12].mxu0  ;;  %v750_v48 = vpop.f32.mrb[13].mxu1  ;;  %1157 = vst [vmem:[%s1791_s3 + $0x40] sm:$0xff] %v1125_v45  ;;  %v1126_v50 = vsel %vm1062_vm9, %v1030_v36, %v1094_v39  ;;  %vm1064_vm11 = vcmp.ge.f32.partialorder %v1032_v41, 0.0  ;;  %v1096_v51 = vmul.f32 0.01, %v1032_v41 }
 0x153   :  { %v862_v47 = vadd.f32 %v861_v43, %v748_v42  ;;  %v863_v49 = vpop.f32.mrb[13].mxu0  ;;  %v752_v53 = vpop.f32.mrb[14].mxu1  ;;  %1158 = vst [vmem:[%s1791_s3 + $0x48] sm:$0xff] %v1126_v50  ;;  %v1127_v55 = vsel %vm1063_vm10, %v1031_v38, %v1095_v46 }
 0x154   :  { %v864_v52 = vadd.f32 %v863_v49, %v750_v48  ;;  %v865_v54 = vpop.f32.mrb[14].mxu0  ;;  %v754_v57 = vpop.f32.mrb[15].mxu1  ;;  %1159 = vst [vmem:[%s1791_s3 + $0x50] sm:$0xff] %v1127_v55  ;;  %v1128_v59 = vsel %vm1064_vm11, %v1032_v41, %v1096_v51 }
 0x155   :  { %v866_v56 = vadd.f32 %v865_v54, %v752_v53  ;;  %v867_v58 = vpop.f32.mrb[15].mxu0  ;;  %1160 = vst [vmem:[%s1791_s3 + $0x58] sm:$0xff] %v1128_v59  ;;  %v1033_v61 = vadd.f32 %v1656_v40, %v862_v47 }
 0x156   :  { %v868_v60 = vadd.f32 %v867_v58, %v754_v57  ;;  %v1034_v62 = vadd.f32 %v1658_v44, %v864_v52 }
 0x157   :  { %vm1065_vm12 = vcmp.ge.f32.partialorder %v1033_v61, 0.0  ;;  %v1097_v63 = vmul.f32 0.01, %v1033_v61  ;;  %v1035_v0 = vadd.f32 %v1656_v40, %v866_v56 }
 0x158   :  { %vm1066_vm13 = vcmp.ge.f32.partialorder %v1034_v62, 0.0  ;;  %v1098_v1 = vmul.f32 0.01, %v1034_v62  ;;  %v1036_v2 = vadd.f32 %v1658_v44, %v868_v60 }
 0x159   :  { %v758_v3 = vpop.f32.mrb[16].mxu1  ;;  %v1129_v5 = vsel %vm1065_vm12, %v1033_v61, %v1097_v63  ;;  %vm1067_vm14 = vcmp.ge.f32.partialorder %v1035_v0, 0.0  ;;  %v1099_v6 = vmul.f32 0.01, %v1035_v0 }
 0x15a   :  { %v871_v4 = vpop.f32.mrb[16].mxu0  ;;  %v760_v8 = vpop.f32.mrb[17].mxu1  ;;  %1161 = vst [vmem:[%s1791_s3 + $0x60] sm:$0xff] %v1129_v5  ;;  %v1130_v10 = vsel %vm1066_vm13, %v1034_v62, %v1098_v1  ;;  %vm1068_vm15 = vcmp.ge.f32.partialorder %v1036_v2, 0.0  ;;  %v1100_v11 = vmul.f32 0.01, %v1036_v2 }
 0x15b   :  { %v872_v7 = vadd.f32 %v871_v4, %v758_v3  ;;  %v873_v9 = vpop.f32.mrb[17].mxu0  ;;  %v762_v13 = vpop.f32.mrb[18].mxu1  ;;  %1162 = vst [vmem:[%s1791_s3 + $0x68] sm:$0xff] %v1130_v10  ;;  %v1131_v15 = vsel %vm1067_vm14, %v1035_v0, %v1099_v6 }
 0x15c   :  { %v874_v12 = vadd.f32 %v873_v9, %v760_v8  ;;  %v875_v14 = vpop.f32.mrb[18].mxu0  ;;  %v764_v17 = vpop.f32.mrb[19].mxu1  ;;  %1163 = vst [vmem:[%s1791_s3 + $0x70] sm:$0xff] %v1131_v15  ;;  %v1132_v19 = vsel %vm1068_vm15, %v1036_v2, %v1100_v11 }
 0x15d   :  { %v876_v16 = vadd.f32 %v875_v14, %v762_v13  ;;  %v877_v18 = vpop.f32.mrb[19].mxu0  ;;  %1164 = vst [vmem:[%s1791_s3 + $0x78] sm:$0xff] %v1132_v19  ;;  %v1037_v21 = vadd.f32 %v1656_v40, %v872_v7 }
 0x15e   :  { %v878_v20 = vadd.f32 %v877_v18, %v764_v17  ;;  %v1038_v22 = vadd.f32 %v1658_v44, %v874_v12 }
 0x15f   :  { %vm1069_vm0 = vcmp.ge.f32.partialorder %v1037_v21, 0.0  ;;  %v1101_v23 = vmul.f32 0.01, %v1037_v21  ;;  %v1039_v24 = vadd.f32 %v1656_v40, %v876_v16 }
 0x160   :  { %vm1070_vm1 = vcmp.ge.f32.partialorder %v1038_v22, 0.0  ;;  %v1102_v25 = vmul.f32 0.01, %v1038_v22  ;;  %v1040_v26 = vadd.f32 %v1658_v44, %v878_v20 }
 0x161   :  { %v768_v27 = vpop.f32.mrb[20].mxu1  ;;  %v1133_v29 = vsel %vm1069_vm0, %v1037_v21, %v1101_v23  ;;  %vm1071_vm2 = vcmp.ge.f32.partialorder %v1039_v24, 0.0  ;;  %v1103_v30 = vmul.f32 0.01, %v1039_v24 }
 0x162   :  { %v881_v28 = vpop.f32.mrb[20].mxu0  ;;  %v770_v32 = vpop.f32.mrb[21].mxu1  ;;  %1165 = vst [vmem:[%s1791_s3 + $0x80] sm:$0xff] %v1133_v29  ;;  %v1134_v34 = vsel %vm1070_vm1, %v1038_v22, %v1102_v25  ;;  %vm1072_vm3 = vcmp.ge.f32.partialorder %v1040_v26, 0.0  ;;  %v1104_v35 = vmul.f32 0.01, %v1040_v26 }
 0x163   :  { %v882_v31 = vadd.f32 %v881_v28, %v768_v27  ;;  %v883_v33 = vpop.f32.mrb[21].mxu0  ;;  %v772_v37 = vpop.f32.mrb[22].mxu1  ;;  %1166 = vst [vmem:[%s1791_s3 + $0x88] sm:$0xff] %v1134_v34  ;;  %v1135_v39 = vsel %vm1071_vm2, %v1039_v24, %v1103_v30 }
 0x164   :  { %v884_v36 = vadd.f32 %v883_v33, %v770_v32  ;;  %v885_v38 = vpop.f32.mrb[22].mxu0  ;;  %v774_v42 = vpop.f32.mrb[23].mxu1  ;;  %1167 = vst [vmem:[%s1791_s3 + $0x90] sm:$0xff] %v1135_v39  ;;  %v1136_v45 = vsel %vm1072_vm3, %v1040_v26, %v1104_v35 }
 0x165   :  { %v886_v41 = vadd.f32 %v885_v38, %v772_v37  ;;  %v887_v43 = vpop.f32.mrb[23].mxu0  ;;  %1168 = vst [vmem:[%s1791_s3 + $0x98] sm:$0xff] %v1136_v45  ;;  %v1041_v47 = vadd.f32 %v1656_v40, %v882_v31 }
 0x166   :  { %v888_v46 = vadd.f32 %v887_v43, %v774_v42  ;;  %v1042_v48 = vadd.f32 %v1658_v44, %v884_v36 }
 0x167   :  { %vm1073_vm4 = vcmp.ge.f32.partialorder %v1041_v47, 0.0  ;;  %v1105_v49 = vmul.f32 0.01, %v1041_v47  ;;  %v1043_v50 = vadd.f32 %v1656_v40, %v886_v41 }
 0x168   :  { %vm1074_vm5 = vcmp.ge.f32.partialorder %v1042_v48, 0.0  ;;  %v1106_v51 = vmul.f32 0.01, %v1042_v48  ;;  %v1044_v52 = vadd.f32 %v1658_v44, %v888_v46 }
 0x169   :  { %v778_v53 = vpop.f32.mrb[24].mxu1  ;;  %v1137_v55 = vsel %vm1073_vm4, %v1041_v47, %v1105_v49  ;;  %vm1075_vm6 = vcmp.ge.f32.partialorder %v1043_v50, 0.0  ;;  %v1107_v56 = vmul.f32 0.01, %v1043_v50 }
 0x16a   :  { %v891_v54 = vpop.f32.mrb[24].mxu0  ;;  %v780_v58 = vpop.f32.mrb[25].mxu1  ;;  %1169 = vst [vmem:[%s1791_s3 + $0xa0] sm:$0xff] %v1137_v55  ;;  %v1138_v60 = vsel %vm1074_vm5, %v1042_v48, %v1106_v51  ;;  %vm1076_vm7 = vcmp.ge.f32.partialorder %v1044_v52, 0.0  ;;  %v1108_v61 = vmul.f32 0.01, %v1044_v52 }
 0x16b   :  { %v892_v57 = vadd.f32 %v891_v54, %v778_v53  ;;  %v893_v59 = vpop.f32.mrb[25].mxu0  ;;  %v782_v63 = vpop.f32.mrb[26].mxu1  ;;  %1170 = vst [vmem:[%s1791_s3 + $0xa8] sm:$0xff] %v1138_v60  ;;  %v1139_v1 = vsel %vm1075_vm6, %v1043_v50, %v1107_v56 }
 0x16c   :  { %v894_v62 = vadd.f32 %v893_v59, %v780_v58  ;;  %v895_v0 = vpop.f32.mrb[26].mxu0  ;;  %v784_v3 = vpop.f32.mrb[27].mxu1  ;;  %1171 = vst [vmem:[%s1791_s3 + $0xb0] sm:$0xff] %v1139_v1  ;;  %v1140_v5 = vsel %vm1076_vm7, %v1044_v52, %v1108_v61 }
 0x16d   :  { %v896_v2 = vadd.f32 %v895_v0, %v782_v63  ;;  %v897_v4 = vpop.f32.mrb[27].mxu0  ;;  %1172 = vst [vmem:[%s1791_s3 + $0xb8] sm:$0xff] %v1140_v5  ;;  %v1045_v7 = vadd.f32 %v1656_v40, %v892_v57 }
 0x16e   :  { %v898_v6 = vadd.f32 %v897_v4, %v784_v3  ;;  %v1046_v8 = vadd.f32 %v1658_v44, %v894_v62 }
 0x16f   :  { %vm1077_vm8 = vcmp.ge.f32.partialorder %v1045_v7, 0.0  ;;  %v1109_v9 = vmul.f32 0.01, %v1045_v7  ;;  %v1047_v10 = vadd.f32 %v1656_v40, %v896_v2 }
 0x170   :  { %vm1078_vm9 = vcmp.ge.f32.partialorder %v1046_v8, 0.0  ;;  %v1110_v11 = vmul.f32 0.01, %v1046_v8  ;;  %v1048_v12 = vadd.f32 %v1658_v44, %v898_v6 }
 0x171   :  { %v788_v13 = vpop.f32.mrb[28].mxu1  ;;  %v1141_v15 = vsel %vm1077_vm8, %v1045_v7, %v1109_v9  ;;  %vm1079_vm10 = vcmp.ge.f32.partialorder %v1047_v10, 0.0  ;;  %v1111_v16 = vmul.f32 0.01, %v1047_v10 }
 0x172   :  { %v901_v14 = vpop.f32.mrb[28].mxu0  ;;  %v790_v18 = vpop.f32.mrb[29].mxu1  ;;  %1173 = vst [vmem:[%s1791_s3 + $0xc0] sm:$0xff] %v1141_v15  ;;  %v1142_v20 = vsel %vm1078_vm9, %v1046_v8, %v1110_v11  ;;  %vm1080_vm11 = vcmp.ge.f32.partialorder %v1048_v12, 0.0  ;;  %v1112_v21 = vmul.f32 0.01, %v1048_v12 }
 0x173   :  { %v902_v17 = vadd.f32 %v901_v14, %v788_v13  ;;  %v903_v19 = vpop.f32.mrb[29].mxu0  ;;  %v792_v23 = vpop.f32.mrb[30].mxu1  ;;  %1174 = vst [vmem:[%s1791_s3 + $0xc8] sm:$0xff] %v1142_v20  ;;  %v1143_v25 = vsel %vm1079_vm10, %v1047_v10, %v1111_v16 }
 0x174   :  { %v904_v22 = vadd.f32 %v903_v19, %v790_v18  ;;  %v905_v24 = vpop.f32.mrb[30].mxu0  ;;  %v794_v27 = vpop.f32.mrb[31].mxu1  ;;  %1175 = vst [vmem:[%s1791_s3 + $0xd0] sm:$0xff] %v1143_v25  ;;  %v1144_v29 = vsel %vm1080_vm11, %v1048_v12, %v1112_v21 }
 0x175   :  { %v906_v26 = vadd.f32 %v905_v24, %v792_v23  ;;  %v907_v28 = vpop.f32.mrb[31].mxu0  ;;  %1176 = vst [vmem:[%s1791_s3 + $0xd8] sm:$0xff] %v1144_v29  ;;  %v1049_v31 = vadd.f32 %v1656_v40, %v902_v17 }
 0x176   :  { %v908_v30 = vadd.f32 %v907_v28, %v794_v27  ;;  %v1050_v32 = vadd.f32 %v1658_v44, %v904_v22 }
 0x177   :  { %vm1081_vm12 = vcmp.ge.f32.partialorder %v1049_v31, 0.0  ;;  %v1113_v33 = vmul.f32 0.01, %v1049_v31  ;;  %v1051_v34 = vadd.f32 %v1656_v40, %v906_v26 }
 0x178   :  { %vm1082_vm13 = vcmp.ge.f32.partialorder %v1050_v32, 0.0  ;;  %v1114_v35 = vmul.f32 0.01, %v1050_v32  ;;  %v1052_v36 = vadd.f32 %v1658_v44, %v908_v30 }
 0x179   :  { %v1145_v37 = vsel %vm1081_vm12, %v1049_v31, %v1113_v33  ;;  %vm1083_vm14 = vcmp.ge.f32.partialorder %v1051_v34, 0.0  ;;  %v1115_v38 = vmul.f32 0.01, %v1051_v34 }
 0x17a   :  { %1177 = vst [vmem:[%s1791_s3 + $0xe0] sm:$0xff] %v1145_v37  ;;  %v1146_v39 = vsel %vm1082_vm13, %v1050_v32, %v1114_v35  ;;  %vm1084_vm15 = vcmp.ge.f32.partialorder %v1052_v36, 0.0  ;;  %v1116_v41 = vmul.f32 0.01, %v1052_v36 }
 0x17b   :  { %1178 = vst [vmem:[%s1791_s3 + $0xe8] sm:$0xff] %v1146_v39  ;;  %v1147_v42 = vsel %vm1083_vm14, %v1051_v34, %v1115_v38 }
 0x17c   :  { %1179 = vst [vmem:[%s1791_s3 + $0xf0] sm:$0xff] %v1147_v42  ;;  %v1148_v40 = vsel %vm1084_vm15, %v1052_v36, %v1116_v41 }
 0x17d   :  { %1180 = vst [vmem:[%s1791_s3 + $0xf8] sm:$0xff] %v1148_v40 }
 0x17e   :  { %1185 = vsyncpa [#allocation3], 1 }
 0x17f   :  { %1186 = vsyncpa [#allocation5], 1 }

// kernel: encoder_forward.8
= control target key start
LH: loop header
LB: loop body
LE: loop exit
PB: predicated region body
PF: predicated region fallthrough
CT: control target
= control target key end

     0   :  { %8 = vsyncpa [#allocation3], 0  ;;  %s3006_s12 = smov [#allocation2]   ;;  %s3951_s0 = inlined_call_operand.vmem [shape: bf16[32,1024], index: 0, kind: input, shape index: {}]   ;;  %s3952_s1 = inlined_call_operand.vmem [shape: bf16[1024,512], index: 1, kind: input, shape index: {}]   ;;  %s3953_s2 = inlined_call_operand.hbm [shape: f32[1,512], index: 2, kind: input, shape index: {}]   ;;  %s3954_s3 = inlined_call_operand.vmem [shape: f32[32,512], index: 3, kind: output, shape index: {}]  }
   0x1   :  { %s19_s13 = sshll.u32 %s3006_s12, 4  ;;  %s2982_s16 = scalar_lea.hbm %s3953_s2, 64  ;;  %s20_s13 = int_to_ptr.vmem [resolvable:$true] %s19_s13 }
   0x2   :  { %p2983_p0 = scmp.ne.s32.totalorder %s3953_s2, %s2982_s16  ;;  %p2986_p1 = scmp.lt.u32.totalorder %s2982_s16, %s3953_s2 }
   0x4   :  { %p2988_p2 = pnand %p2986_p1, %p2983_p0 }
   0x6   :  { %2991 = shalt.err (!%p2988_p2)
}
   0x7   :  { %s2992_s21 = scalar_lea.vmem %s20_s13, 64  ;;  %p2997_p4 = scmp.lt.s32.totalorder %s20_s13, %s20_s13 }
   0x8   :  { %p2993_p3 = scmp.ne.s32.totalorder %s20_s13, %s2992_s21  ;;  %p2998_p5 = scmp.lt.s32.totalorder %s2992_s21, %s2992_s21 }
   0xa   :  { %p2999_p6 = por %p2998_p5, %p2997_p4 }
   0xc   :  { %p3000_p7 = pnand %p2999_p6, %p2993_p3 }
   0xe   :  { %3003 = shalt.err (!%p3000_p7)
}
   0xf   :  { %22 = dma.hbm_to_vmem [thread:$0]  %s3953_s2, 64, %s20_s13, [#allocation3]  }
  0x10   :  { %3004 = dma.done.wait [#allocation3], 64  }
  0x11   :  { %3005 = vsyncadd [#allocation3], 4294967232  ;;  %v2598_v0 = vld [vmem:[%s3952_s1 + $0x4] ss:$16 sps:$4 sm:$0xff]   ;;  %v2600_v1 = vld [vmem:[%s3952_s1 + $0xc] ss:$16 sps:$4 sm:$0xff]  }
  0x12   :  { %1694 = vmatprep.subr.bf16.mxu0 %v2598_v0  ;;  %v2602_v2 = vld [vmem:[%s3952_s1] ss:$16 sps:$4 sm:$0xff]   ;;  %v2603_v3 = vld [vmem:[%s3952_s1 + $0x8] ss:$16 sps:$4 sm:$0xff]   ;;  %1906 = vmatprep.subr.bf16.mxu1 %v2600_v1  ;;  %v2604_v4 = vld [vmem:[%s3952_s1 + $0x24] ss:$16 sps:$4 sm:$0xff]  }
  0x13   :  { %1695 = vmatpush1.bf16.msra.mxu0 %v2602_v2  ;;  %1907 = vmatpush1.bf16.msra.mxu1 %v2603_v3  ;;  %v2606_v5 = vld [vmem:[%s3952_s1 + $0x2c] ss:$16 sps:$4 sm:$0xff]   ;;  %v2608_v6 = vld [vmem:[%s3952_s1 + $0x20] ss:$16 sps:$4 sm:$0xff]   ;;  %v2609_v7 = vld [vmem:[%s3952_s1 + $0x28] ss:$16 sps:$4 sm:$0xff]  }
  0x14   :  { %1696 = vmatprep.subr.bf16.mxu0 %v2604_v4  ;;  %1908 = vmatprep.subr.bf16.mxu1 %v2606_v5  ;;  %v2610_v8 = vld [vmem:[%s3952_s1 + $0x44] ss:$16 sps:$4 sm:$0xff]   ;;  %v2612_v9 = vld [vmem:[%s3952_s1 + $0x4c] ss:$16 sps:$4 sm:$0xff]   ;;  %v2614_v10 = vld [vmem:[%s3952_s1 + $0x40] ss:$16 sps:$4 sm:$0xff]  }
  0x15   :  { %v2615_v11 = vld [vmem:[%s3952_s1 + $0x48] ss:$16 sps:$4 sm:$0xff]   ;;  %v2616_v12 = vld [vmem:[%s3952_s1 + $0x64] ss:$16 sps:$4 sm:$0xff]   ;;  %v2618_v13 = vld [vmem:[%s3952_s1 + $0x6c] ss:$16 sps:$4 sm:$0xff]  }
  0x16   :  { %v2620_v14 = vld [vmem:[%s3952_s1 + $0x60] ss:$16 sps:$4 sm:$0xff]   ;;  %v2621_v15 = vld [vmem:[%s3952_s1 + $0x68] ss:$16 sps:$4 sm:$0xff]   ;;  %v2622_v16 = vld [vmem:[%s3952_s1 + $0x84] ss:$16 sps:$4 sm:$0xff]  }
  0x17   :  { %1697 = vmatpush1.bf16.msra.mxu0 %v2608_v6  ;;  %1909 = vmatpush1.bf16.msra.mxu1 %v2609_v7  ;;  %v2624_v17 = vld [vmem:[%s3952_s1 + $0x8c] ss:$16 sps:$4 sm:$0xff]   ;;  %v2626_v18 = vld [vmem:[%s3952_s1 + $0x80] ss:$16 sps:$4 sm:$0xff]   ;;  %v2627_v19 = vld [vmem:[%s3952_s1 + $0x88] ss:$16 sps:$4 sm:$0xff]  }
  0x18   :  { %1698 = vmatprep.subr.bf16.mxu0 %v2610_v8  ;;  %1910 = vmatprep.subr.bf16.mxu1 %v2612_v9  ;;  %v2628_v20 = vld [vmem:[%s3952_s1 + $0xa4] ss:$16 sps:$4 sm:$0xff]   ;;  %v2630_v21 = vld [vmem:[%s3952_s1 + $0xac] ss:$16 sps:$4 sm:$0xff]   ;;  %v2632_v22 = vld [vmem:[%s3952_s1 + $0xa0] ss:$16 sps:$4 sm:$0xff]  }
  0x19   :  { %v2633_v23 = vld [vmem:[%s3952_s1 + $0xa8] ss:$16 sps:$4 sm:$0xff]   ;;  %v2634_v24 = vld [vmem:[%s3952_s1 + $0xc4] ss:$16 sps:$4 sm:$0xff]   ;;  %v2636_v25 = vld [vmem:[%s3952_s1 + $0xcc] ss:$16 sps:$4 sm:$0xff]  }
  0x1a   :  { %v2638_v26 = vld [vmem:[%s3952_s1 + $0xc0] ss:$16 sps:$4 sm:$0xff]   ;;  %v2639_v27 = vld [vmem:[%s3952_s1 + $0xc8] ss:$16 sps:$4 sm:$0xff]   ;;  %v2640_v28 = vld [vmem:[%s3952_s1 + $0xe4] ss:$16 sps:$4 sm:$0xff]  }
  0x1b   :  { %1699 = vmatpush1.bf16.msra.mxu0 %v2614_v10  ;;  %1911 = vmatpush1.bf16.msra.mxu1 %v2615_v11  ;;  %v2642_v29 = vld [vmem:[%s3952_s1 + $0xec] ss:$16 sps:$4 sm:$0xff]   ;;  %v2644_v30 = vld [vmem:[%s3952_s1 + $0xe0] ss:$16 sps:$4 sm:$0xff]   ;;  %v2645_v31 = vld [vmem:[%s3952_s1 + $0xe8] ss:$16 sps:$4 sm:$0xff]  }
  0x1c   :  { %1700 = vmatprep.subr.bf16.mxu0 %v2616_v12  ;;  %1912 = vmatprep.subr.bf16.mxu1 %v2618_v13  ;;  %v2646_v32 = vld [vmem:[%s3952_s1 + $0x104] ss:$16 sps:$4 sm:$0xff]   ;;  %v2648_v33 = vld [vmem:[%s3952_s1 + $0x10c] ss:$16 sps:$4 sm:$0xff]   ;;  %v2650_v34 = vld [vmem:[%s3952_s1 + $0x100] ss:$16 sps:$4 sm:$0xff]  }
  0x1d   :  { %v2651_v35 = vld [vmem:[%s3952_s1 + $0x108] ss:$16 sps:$4 sm:$0xff]   ;;  %v2652_v36 = vld [vmem:[%s3952_s1 + $0x124] ss:$16 sps:$4 sm:$0xff]   ;;  %v2654_v37 = vld [vmem:[%s3952_s1 + $0x12c] ss:$16 sps:$4 sm:$0xff]  }
  0x1e   :  { %v2656_v38 = vld [vmem:[%s3952_s1 + $0x120] ss:$16 sps:$4 sm:$0xff]   ;;  %v2657_v39 = vld [vmem:[%s3952_s1 + $0x128] ss:$16 sps:$4 sm:$0xff]   ;;  %v2658_v40 = vld [vmem:[%s3952_s1 + $0x144] ss:$16 sps:$4 sm:$0xff]  }
  0x1f   :  { %1701 = vmatpush1.bf16.msra.mxu0 %v2620_v14  ;;  %1913 = vmatpush1.bf16.msra.mxu1 %v2621_v15  ;;  %v2660_v41 = vld [vmem:[%s3952_s1 + $0x14c] ss:$16 sps:$4 sm:$0xff]   ;;  %v2662_v42 = vld [vmem:[%s3952_s1 + $0x140] ss:$16 sps:$4 sm:$0xff]   ;;  %v2663_v43 = vld [vmem:[%s3952_s1 + $0x148] ss:$16 sps:$4 sm:$0xff]  }
  0x20   :  { %1702 = vmatprep.subr.bf16.mxu0 %v2622_v16  ;;  %1914 = vmatprep.subr.bf16.mxu1 %v2624_v17  ;;  %v2664_v44 = vld [vmem:[%s3952_s1 + $0x164] ss:$16 sps:$4 sm:$0xff]   ;;  %v2666_v45 = vld [vmem:[%s3952_s1 + $0x16c] ss:$16 sps:$4 sm:$0xff]   ;;  %v2668_v48 = vld [vmem:[%s3952_s1 + $0x160] ss:$16 sps:$4 sm:$0xff]  }
  0x21   :  { %v62_v46 = vld [vmem:[%s3951_s0] sm:$0xff]  ;;  %v2669_v49 = vld [vmem:[%s3952_s1 + $0x168] ss:$16 sps:$4 sm:$0xff]   ;;  %v2672_v52 = vld [vmem:[%s3952_s1 + $0x18c] ss:$16 sps:$4 sm:$0xff]  }
  0x22   :  { %v66_v47 = vld [vmem:[%s3951_s0 + $0x20] sm:$0xff]  ;;  %v2675_v54 = vld [vmem:[%s3952_s1 + $0x188] ss:$16 sps:$4 sm:$0xff]   ;;  %v2678_v56 = vld [vmem:[%s3952_s1 + $0x1ac] ss:$16 sps:$4 sm:$0xff]  }
  0x23   :  { %1703 = vmatpush1.bf16.msra.mxu0 %v2626_v18  ;;  %1915 = vmatpush1.bf16.msra.mxu1 %v2627_v19  ;;  %v2277_v50 = vcombine.high %v62_v46, %v66_v47  ;;  %v2670_v51 = vld [vmem:[%s3952_s1 + $0x184] ss:$16 sps:$4 sm:$0xff]   ;;  %v2674_v53 = vld [vmem:[%s3952_s1 + $0x180] ss:$16 sps:$4 sm:$0xff]   ;;  %v2681_v58 = vld [vmem:[%s3952_s1 + $0x1a8] ss:$16 sps:$4 sm:$0xff]   ;;  %v2276_v5 = vcombine.low %v62_v46, %v66_v47 }
  0x24   :  { %1704 = vmatprep.subr.bf16.mxu0 %v2628_v20  ;;  %1916 = vmatprep.subr.bf16.mxu1 %v2630_v21  ;;  %v2676_v55 = vld [vmem:[%s3952_s1 + $0x1a4] ss:$16 sps:$4 sm:$0xff]   ;;  %v2680_v57 = vld [vmem:[%s3952_s1 + $0x1a0] ss:$16 sps:$4 sm:$0xff]   ;;  %v2684_v60 = vld [vmem:[%s3952_s1 + $0x1cc] ss:$16 sps:$4 sm:$0xff]  }
  0x25   :  { %1726 = vmatprep.mubr.bf16.mxu0 %v2277_v50  ;;  %1938 = vmatprep.mubr.bf16.mxu1 %v2277_v50  ;;  %v2682_v59 = vld [vmem:[%s3952_s1 + $0x1c4] ss:$16 sps:$4 sm:$0xff]   ;;  %v2686_v61 = vld [vmem:[%s3952_s1 + $0x1c0] ss:$16 sps:$4 sm:$0xff]   ;;  %v2687_v62 = vld [vmem:[%s3952_s1 + $0x1c8] ss:$16 sps:$4 sm:$0xff]  }
  0x26   :  { %v2688_v63 = vld [vmem:[%s3952_s1 + $0x1e4] ss:$16 sps:$4 sm:$0xff]   ;;  %v2690_v0 = vld [vmem:[%s3952_s1 + $0x1ec] ss:$16 sps:$4 sm:$0xff]   ;;  %v2692_v1 = vld [vmem:[%s3952_s1 + $0x1e0] ss:$16 sps:$4 sm:$0xff]  }
  0x27   :  { %1705 = vmatpush1.bf16.msra.mxu0 %v2632_v22  ;;  %1917 = vmatpush1.bf16.msra.mxu1 %v2633_v23  ;;  %v2693_v2 = vld [vmem:[%s3952_s1 + $0x1e8] ss:$16 sps:$4 sm:$0xff]   ;;  %v2696_v3 = vld [vmem:[%s3952_s1 + $0x204] ss:$16 sps:$4 sm:$0xff]   ;;  %v2699_v4 = vld [vmem:[%s3952_s1 + $0x20c] ss:$16 sps:$4 sm:$0xff]  }
  0x28   :  { %1706 = vmatprep.subr.bf16.mxu0 %v2634_v24  ;;  %1918 = vmatprep.subr.bf16.mxu1 %v2636_v25  ;;  %v2694_v6 = vld [vmem:[%s3952_s1 + $0x200] ss:$16 sps:$4 sm:$0xff]   ;;  %v2697_v7 = vld [vmem:[%s3952_s1 + $0x208] ss:$16 sps:$4 sm:$0xff]   ;;  %v2702_v8 = vld [vmem:[%s3952_s1 + $0x224] ss:$16 sps:$4 sm:$0xff]  }
  0x29   :  { %v2705_v9 = vld [vmem:[%s3952_s1 + $0x22c] ss:$16 sps:$4 sm:$0xff]   ;;  %v2700_v10 = vld [vmem:[%s3952_s1 + $0x220] ss:$16 sps:$4 sm:$0xff]   ;;  %v2703_v11 = vld [vmem:[%s3952_s1 + $0x228] ss:$16 sps:$4 sm:$0xff]  }
  0x2a   :  { %v2708_v12 = vld [vmem:[%s3952_s1 + $0x244] ss:$16 sps:$4 sm:$0xff]   ;;  %v2711_v13 = vld [vmem:[%s3952_s1 + $0x24c] ss:$16 sps:$4 sm:$0xff]   ;;  %v2706_v14 = vld [vmem:[%s3952_s1 + $0x240] ss:$16 sps:$4 sm:$0xff]  }
  0x2b   :  { %1707 = vmatpush1.bf16.msra.mxu0 %v2638_v26  ;;  %1919 = vmatpush1.bf16.msra.mxu1 %v2639_v27  ;;  %v2709_v15 = vld [vmem:[%s3952_s1 + $0x248] ss:$16 sps:$4 sm:$0xff]   ;;  %v2714_v16 = vld [vmem:[%s3952_s1 + $0x264] ss:$16 sps:$4 sm:$0xff]   ;;  %v2717_v17 = vld [vmem:[%s3952_s1 + $0x26c] ss:$16 sps:$4 sm:$0xff]  }
  0x2c   :  { %1708 = vmatprep.subr.bf16.mxu0 %v2640_v28  ;;  %1920 = vmatprep.subr.bf16.mxu1 %v2642_v29  ;;  %v2712_v18 = vld [vmem:[%s3952_s1 + $0x260] ss:$16 sps:$4 sm:$0xff]   ;;  %v2715_v19 = vld [vmem:[%s3952_s1 + $0x268] ss:$16 sps:$4 sm:$0xff]   ;;  %v2720_v20 = vld [vmem:[%s3952_s1 + $0x284] ss:$16 sps:$4 sm:$0xff]  }
  0x2d   :  { %v2723_v21 = vld [vmem:[%s3952_s1 + $0x28c] ss:$16 sps:$4 sm:$0xff]   ;;  %v2718_v22 = vld [vmem:[%s3952_s1 + $0x280] ss:$16 sps:$4 sm:$0xff]   ;;  %v2721_v23 = vld [vmem:[%s3952_s1 + $0x288] ss:$16 sps:$4 sm:$0xff]  }
  0x2e   :  { %v2726_v24 = vld [vmem:[%s3952_s1 + $0x2a4] ss:$16 sps:$4 sm:$0xff]   ;;  %v2729_v25 = vld [vmem:[%s3952_s1 + $0x2ac] ss:$16 sps:$4 sm:$0xff]   ;;  %v2724_v29 = vld [vmem:[%s3952_s1 + $0x2a0] ss:$16 sps:$4 sm:$0xff]  }
  0x2f   :  { %1709 = vmatpush1.bf16.msra.mxu0 %v2644_v30  ;;  %1921 = vmatpush1.bf16.msra.mxu1 %v2645_v31  ;;  %v70_v26 = vld [vmem:[%s3951_s0 + $0x40] sm:$0xff]  ;;  %v2727_v30 = vld [vmem:[%s3952_s1 + $0x2a8] ss:$16 sps:$4 sm:$0xff]  }
  0x30   :  { %1710 = vmatprep.subr.bf16.mxu0 %v2646_v32  ;;  %1922 = vmatprep.subr.bf16.mxu1 %v2648_v33  ;;  %v74_v27 = vld [vmem:[%s3951_s0 + $0x60] sm:$0xff]  ;;  %v2735_v33 = vld [vmem:[%s3952_s1 + $0x2cc] ss:$16 sps:$4 sm:$0xff]   ;;  %v2745_v46 = vld [vmem:[%s3952_s1 + $0x308] ss:$16 sps:$4 sm:$0xff]  }
  0x31   :  { %v2285_v28 = vcombine.high %v70_v26, %v74_v27  ;;  %v2284_v31 = vcombine.low %v70_v26, %v74_v27  ;;  %v2732_v32 = vld [vmem:[%s3952_s1 + $0x2c4] ss:$16 sps:$4 sm:$0xff]   ;;  %v2751_v50 = vld [vmem:[%s3952_s1 + $0x328] ss:$16 sps:$4 sm:$0xff]  }
  0x32   :  { %v2750_v47 = vld [vmem:[%s3952_s1 + $0x324] ss:$16 sps:$4 sm:$0xff]  }
  0x33   :  { %1711 = vmatpush1.bf16.msra.mxu0 %v2650_v34  ;;  %1923 = vmatpush1.bf16.msra.mxu1 %v2651_v35  ;;  %v3324_v34 = vld [vmem:[%s3951_s0 + $0x8] sm:$0xff]  ;;  %v3493_v27 = vld [vmem:[%s3951_s0 + $0x30] sm:$0xff] }
  0x34   :  { %1712 = vmatprep.subr.bf16.mxu0 %v2652_v36  ;;  %1924 = vmatprep.subr.bf16.mxu1 %v2654_v37  ;;  %v3329_v35 = vld [vmem:[%s3951_s0 + $0x28] sm:$0xff]  ;;  %v2730_v36 = vld [vmem:[%s3952_s1 + $0x2c0] ss:$16 sps:$4 sm:$0xff]  }
  0x35   :  { %v2733_v37 = vld [vmem:[%s3952_s1 + $0x2c8] ss:$16 sps:$4 sm:$0xff]  }
  0x37   :  { %1713 = vmatpush1.bf16.msra.mxu0 %v2656_v38  ;;  %1925 = vmatpush1.bf16.msra.mxu1 %v2657_v39  ;;  %v2279_v38 = vcombine.high %v3324_v34, %v3329_v35  ;;  %v2738_v39 = vld [vmem:[%s3952_s1 + $0x2e4] ss:$16 sps:$4 sm:$0xff]  }
  0x38   :  { %1714 = vmatprep.subr.bf16.mxu0 %v2658_v40  ;;  %1926 = vmatprep.subr.bf16.mxu1 %v2660_v41  ;;  %v2741_v40 = vld [vmem:[%s3952_s1 + $0x2ec] ss:$16 sps:$4 sm:$0xff]   ;;  %v2736_v41 = vld [vmem:[%s3952_s1 + $0x2e0] ss:$16 sps:$4 sm:$0xff]  }
  0x3b   :  { %1715 = vmatpush1.bf16.msra.mxu0 %v2662_v42  ;;  %1927 = vmatpush1.bf16.msra.mxu1 %v2663_v43  ;;  %v2739_v42 = vld [vmem:[%s3952_s1 + $0x2e8] ss:$16 sps:$4 sm:$0xff]   ;;  %v2744_v43 = vld [vmem:[%s3952_s1 + $0x304] ss:$16 sps:$4 sm:$0xff]  }
  0x3c   :  { %1716 = vmatprep.subr.bf16.mxu0 %v2664_v44  ;;  %1928 = vmatprep.subr.bf16.mxu1 %v2666_v45  ;;  %v2747_v44 = vld [vmem:[%s3952_s1 + $0x30c] ss:$16 sps:$4 sm:$0xff]   ;;  %v2742_v45 = vld [vmem:[%s3952_s1 + $0x300] ss:$16 sps:$4 sm:$0xff]  }
  0x3f   :  { %1717 = vmatpush1.bf16.msra.mxu0 %v2668_v48  ;;  %1929 = vmatpush1.bf16.msra.mxu1 %v2669_v49  ;;  %v2753_v48 = vld [vmem:[%s3952_s1 + $0x32c] ss:$16 sps:$4 sm:$0xff]   ;;  %v2748_v49 = vld [vmem:[%s3952_s1 + $0x320] ss:$16 sps:$4 sm:$0xff]  }
  0x40   :  { %1718 = vmatprep.subr.bf16.mxu0 %v2670_v51  ;;  %1930 = vmatprep.subr.bf16.mxu1 %v2672_v52  ;;  %v2756_v51 = vld [vmem:[%s3952_s1 + $0x344] ss:$16 sps:$4 sm:$0xff]   ;;  %v2759_v52 = vld [vmem:[%s3952_s1 + $0x34c] ss:$16 sps:$4 sm:$0xff]  }
  0x43   :  { %1719 = vmatpush1.bf16.msra.mxu0 %v2674_v53  ;;  %1931 = vmatpush1.bf16.msra.mxu1 %v2675_v54  ;;  %v2754_v53 = vld [vmem:[%s3952_s1 + $0x340] ss:$16 sps:$4 sm:$0xff]   ;;  %v2757_v54 = vld [vmem:[%s3952_s1 + $0x348] ss:$16 sps:$4 sm:$0xff]  }
  0x44   :  { %1720 = vmatprep.subr.bf16.mxu0 %v2676_v55  ;;  %1932 = vmatprep.subr.bf16.mxu1 %v2678_v56  ;;  %v2762_v55 = vld [vmem:[%s3952_s1 + $0x364] ss:$16 sps:$4 sm:$0xff]   ;;  %v2765_v56 = vld [vmem:[%s3952_s1 + $0x36c] ss:$16 sps:$4 sm:$0xff]  }
  0x47   :  { %1721 = vmatpush1.bf16.msra.mxu0 %v2680_v57  ;;  %1933 = vmatpush1.bf16.msra.mxu1 %v2681_v58  ;;  %v2760_v57 = vld [vmem:[%s3952_s1 + $0x360] ss:$16 sps:$4 sm:$0xff]   ;;  %v2763_v58 = vld [vmem:[%s3952_s1 + $0x368] ss:$16 sps:$4 sm:$0xff]  }
  0x48   :  { %1722 = vmatprep.subr.bf16.mxu0 %v2682_v59  ;;  %1934 = vmatprep.subr.bf16.mxu1 %v2684_v60  ;;  %v2768_v59 = vld [vmem:[%s3952_s1 + $0x384] ss:$16 sps:$4 sm:$0xff]   ;;  %v2771_v60 = vld [vmem:[%s3952_s1 + $0x38c] ss:$16 sps:$4 sm:$0xff]  }
  0x4b   :  { %1723 = vmatpush1.bf16.msra.mxu0 %v2686_v61  ;;  %1935 = vmatpush1.bf16.msra.mxu1 %v2687_v62  ;;  %v2766_v61 = vld [vmem:[%s3952_s1 + $0x380] ss:$16 sps:$4 sm:$0xff]   ;;  %v2769_v62 = vld [vmem:[%s3952_s1 + $0x388] ss:$16 sps:$4 sm:$0xff]  }
  0x4c   :  { %1724 = vmatprep.subr.bf16.mxu0 %v2688_v63  ;;  %1936 = vmatprep.subr.bf16.mxu1 %v2690_v0  ;;  %v2774_v63 = vld [vmem:[%s3952_s1 + $0x3a4] ss:$16 sps:$4 sm:$0xff]   ;;  %v2777_v0 = vld [vmem:[%s3952_s1 + $0x3ac] ss:$16 sps:$4 sm:$0xff]  }
  0x4f   :  { %1725 = vmatpush1.bf16.msra.mxu0 %v2692_v1  ;;  %1937 = vmatpush1.bf16.msra.mxu1 %v2693_v2  ;;  %v2772_v1 = vld [vmem:[%s3952_s1 + $0x3a0] ss:$16 sps:$4 sm:$0xff]   ;;  %v2775_v2 = vld [vmem:[%s3952_s1 + $0x3a8] ss:$16 sps:$4 sm:$0xff]  }
  0x50   :  { %1747 = vmatprep.subr.bf16.mxu0 %v2696_v3  ;;  %1959 = vmatprep.subr.bf16.mxu1 %v2699_v4  ;;  %v2780_v3 = vld [vmem:[%s3952_s1 + $0x3c4] ss:$16 sps:$4 sm:$0xff]   ;;  %v2783_v4 = vld [vmem:[%s3952_s1 + $0x3cc] ss:$16 sps:$4 sm:$0xff]  }
  0x52   :  { %1727 = vmatmul.mubr.bf16.vlgmr.msra.gmra.mrb[0].mxu0 %v2276_v5  ;;  %1939 = vmatmul.mubr.bf16.vlgmr.msra.gmra.mrb[0].mxu1 %v2276_v5  ;;  %v2778_v5 = vld [vmem:[%s3952_s1 + $0x3c0] ss:$16 sps:$4 sm:$0xff]  }
  0x53   :  { %1748 = vmatpush1.bf16.msra.mxu0 %v2694_v6  ;;  %1960 = vmatpush1.bf16.msra.mxu1 %v2697_v7  ;;  %v2781_v6 = vld [vmem:[%s3952_s1 + $0x3c8] ss:$16 sps:$4 sm:$0xff]   ;;  %v2786_v7 = vld [vmem:[%s3952_s1 + $0x3e4] ss:$16 sps:$4 sm:$0xff]  }
  0x54   :  { %1749 = vmatprep.subr.bf16.mxu0 %v2702_v8  ;;  %1961 = vmatprep.subr.bf16.mxu1 %v2705_v9  ;;  %v2789_v8 = vld [vmem:[%s3952_s1 + $0x3ec] ss:$16 sps:$4 sm:$0xff]   ;;  %v2784_v9 = vld [vmem:[%s3952_s1 + $0x3e0] ss:$16 sps:$4 sm:$0xff]  }
  0x55   :  { %1736 = vmatprep.mubr.bf16.mxu0 %v2285_v28  ;;  %1948 = vmatprep.mubr.bf16.mxu1 %v2285_v28  ;;  %v2802_v28 = vld [vmem:[%s3952_s1 + $0x440] ss:$16 sps:$4 sm:$0xff]  }
  0x57   :  { %1750 = vmatpush1.bf16.msra.mxu0 %v2700_v10  ;;  %1962 = vmatpush1.bf16.msra.mxu1 %v2703_v11  ;;  %v2787_v10 = vld [vmem:[%s3952_s1 + $0x3e8] ss:$16 sps:$4 sm:$0xff]   ;;  %v2792_v11 = vld [vmem:[%s3952_s1 + $0x404] ss:$16 sps:$4 sm:$0xff]  }
  0x58   :  { %1751 = vmatprep.subr.bf16.mxu0 %v2708_v12  ;;  %1963 = vmatprep.subr.bf16.mxu1 %v2711_v13  ;;  %v2795_v12 = vld [vmem:[%s3952_s1 + $0x40c] ss:$16 sps:$4 sm:$0xff]   ;;  %v2790_v13 = vld [vmem:[%s3952_s1 + $0x400] ss:$16 sps:$4 sm:$0xff]  }
  0x5a   :  { %1737 = vmatmul.mubr.bf16.gmra.mrb[4].mxu0 %v2284_v31  ;;  %1949 = vmatmul.mubr.bf16.gmra.mrb[4].mxu1 %v2284_v31  ;;  %v2813_v31 = vld [vmem:[%s3952_s1 + $0x46c] ss:$16 sps:$4 sm:$0xff]  }
  0x5b   :  { %1752 = vmatpush1.bf16.msra.mxu0 %v2706_v14  ;;  %1964 = vmatpush1.bf16.msra.mxu1 %v2709_v15  ;;  %v2793_v14 = vld [vmem:[%s3952_s1 + $0x408] ss:$16 sps:$4 sm:$0xff]   ;;  %v2278_v15 = vcombine.low %v3324_v34, %v3329_v35  ;;  %v2816_v35 = vld [vmem:[%s3952_s1 + $0x484] ss:$16 sps:$4 sm:$0xff]  }
  0x5c   :  { %1753 = vmatprep.subr.bf16.mxu0 %v2714_v16  ;;  %1965 = vmatprep.subr.bf16.mxu1 %v2717_v17  ;;  %v71_v16 = vld [vmem:[%s3951_s0 + $0x48] sm:$0xff] }
  0x5d   :  { %1779 = vmatprep.mubr.bf16.mxu0 %v2279_v38  ;;  %1991 = vmatprep.mubr.bf16.mxu1 %v2279_v38  ;;  %v75_v17 = vld [vmem:[%s3951_s0 + $0x68] sm:$0xff] }
  0x5e   :  { %v2286_v26 = vcombine.low %v71_v16, %v75_v17  ;;  %v2811_v34 = vld [vmem:[%s3952_s1 + $0x468] ss:$16 sps:$4 sm:$0xff]  }
  0x5f   :  { %1754 = vmatpush1.bf16.msra.mxu0 %v2712_v18  ;;  %1966 = vmatpush1.bf16.msra.mxu1 %v2715_v19  ;;  %v2798_v18 = vld [vmem:[%s3952_s1 + $0x424] ss:$16 sps:$4 sm:$0xff]   ;;  %v2801_v19 = vld [vmem:[%s3952_s1 + $0x42c] ss:$16 sps:$4 sm:$0xff]   ;;  %v2817_v38 = vld [vmem:[%s3952_s1 + $0x488] ss:$16 sps:$4 sm:$0xff]  }
  0x60   :  { %1755 = vmatprep.subr.bf16.mxu0 %v2720_v20  ;;  %1967 = vmatprep.subr.bf16.mxu1 %v2723_v21  ;;  %v2287_v20 = vcombine.high %v71_v16, %v75_v17  ;;  %v2796_v21 = vld [vmem:[%s3952_s1 + $0x420] ss:$16 sps:$4 sm:$0xff]   ;;  %v2885_v16 = vld [vmem:[%s3952_s1 + $0x5ec] ss:$16 sps:$4 sm:$0xff]  }
  0x61   :  { %v2880_v17 = vld [vmem:[%s3952_s1 + $0x5e0] ss:$16 sps:$4 sm:$0xff]  }
  0x63   :  { %1756 = vmatpush1.bf16.msra.mxu0 %v2718_v22  ;;  %1968 = vmatpush1.bf16.msra.mxu1 %v2721_v23  ;;  %v2799_v22 = vld [vmem:[%s3952_s1 + $0x428] ss:$16 sps:$4 sm:$0xff]   ;;  %v2804_v23 = vld [vmem:[%s3952_s1 + $0x444] ss:$16 sps:$4 sm:$0xff]  }
  0x64   :  { %1757 = vmatprep.subr.bf16.mxu0 %v2726_v24  ;;  %1969 = vmatprep.subr.bf16.mxu1 %v2729_v25  ;;  %v2807_v24 = vld [vmem:[%s3952_s1 + $0x44c] ss:$16 sps:$4 sm:$0xff]   ;;  %v3488_v25 = vld [vmem:[%s3951_s0 + $0x10] sm:$0xff] }
  0x67   :  { %1758 = vmatpush1.bf16.msra.mxu0 %v2724_v29  ;;  %1970 = vmatpush1.bf16.msra.mxu1 %v2727_v30  ;;  %v2805_v29 = vld [vmem:[%s3952_s1 + $0x448] ss:$16 sps:$4 sm:$0xff]   ;;  %v2810_v30 = vld [vmem:[%s3952_s1 + $0x464] ss:$16 sps:$4 sm:$0xff]  }
  0x68   :  { %1759 = vmatprep.subr.bf16.mxu0 %v2732_v32  ;;  %1971 = vmatprep.subr.bf16.mxu1 %v2735_v33  ;;  %v2281_v32 = vcombine.high %v3488_v25, %v3493_v27  ;;  %v2808_v33 = vld [vmem:[%s3952_s1 + $0x460] ss:$16 sps:$4 sm:$0xff]  }
  0x6b   :  { %1760 = vmatpush1.bf16.msra.mxu0 %v2730_v36  ;;  %1972 = vmatpush1.bf16.msra.mxu1 %v2733_v37  ;;  %v2819_v36 = vld [vmem:[%s3952_s1 + $0x48c] ss:$16 sps:$4 sm:$0xff]   ;;  %v2814_v37 = vld [vmem:[%s3952_s1 + $0x480] ss:$16 sps:$4 sm:$0xff]  }
  0x6c   :  { %1761 = vmatprep.subr.bf16.mxu0 %v2738_v39  ;;  %1973 = vmatprep.subr.bf16.mxu1 %v2741_v40  ;;  %v2822_v39 = vld [vmem:[%s3952_s1 + $0x4a4] ss:$16 sps:$4 sm:$0xff]   ;;  %v2825_v40 = vld [vmem:[%s3952_s1 + $0x4ac] ss:$16 sps:$4 sm:$0xff]  }
  0x6f   :  { %1762 = vmatpush1.bf16.msra.mxu0 %v2736_v41  ;;  %1974 = vmatpush1.bf16.msra.mxu1 %v2739_v42  ;;  %v2820_v41 = vld [vmem:[%s3952_s1 + $0x4a0] ss:$16 sps:$4 sm:$0xff]   ;;  %v2823_v42 = vld [vmem:[%s3952_s1 + $0x4a8] ss:$16 sps:$4 sm:$0xff]  }
  0x70   :  { %1763 = vmatprep.subr.bf16.mxu0 %v2744_v43  ;;  %1975 = vmatprep.subr.bf16.mxu1 %v2747_v44  ;;  %v2828_v43 = vld [vmem:[%s3952_s1 + $0x4c4] ss:$16 sps:$4 sm:$0xff]   ;;  %v2831_v44 = vld [vmem:[%s3952_s1 + $0x4cc] ss:$16 sps:$4 sm:$0xff]  }
  0x73   :  { %1764 = vmatpush1.bf16.msra.mxu0 %v2742_v45  ;;  %1976 = vmatpush1.bf16.msra.mxu1 %v2745_v46  ;;  %v2826_v45 = vld [vmem:[%s3952_s1 + $0x4c0] ss:$16 sps:$4 sm:$0xff]   ;;  %v2829_v46 = vld [vmem:[%s3952_s1 + $0x4c8] ss:$16 sps:$4 sm:$0xff]  }
  0x74   :  { %1765 = vmatprep.subr.bf16.mxu0 %v2750_v47  ;;  %1977 = vmatprep.subr.bf16.mxu1 %v2753_v48  ;;  %v2834_v47 = vld [vmem:[%s3952_s1 + $0x4e4] ss:$16 sps:$4 sm:$0xff]   ;;  %v2837_v48 = vld [vmem:[%s3952_s1 + $0x4ec] ss:$16 sps:$4 sm:$0xff]  }
  0x77   :  { %1766 = vmatpush1.bf16.msra.mxu0 %v2748_v49  ;;  %1978 = vmatpush1.bf16.msra.mxu1 %v2751_v50  ;;  %v2832_v49 = vld [vmem:[%s3952_s1 + $0x4e0] ss:$16 sps:$4 sm:$0xff]   ;;  %v2835_v50 = vld [vmem:[%s3952_s1 + $0x4e8] ss:$16 sps:$4 sm:$0xff]  }
  0x78   :  { %1767 = vmatprep.subr.bf16.mxu0 %v2756_v51  ;;  %1979 = vmatprep.subr.bf16.mxu1 %v2759_v52  ;;  %v2840_v51 = vld [vmem:[%s3952_s1 + $0x504] ss:$16 sps:$4 sm:$0xff]   ;;  %v2843_v52 = vld [vmem:[%s3952_s1 + $0x50c] ss:$16 sps:$4 sm:$0xff]  }
  0x7b   :  { %1768 = vmatpush1.bf16.msra.mxu0 %v2754_v53  ;;  %1980 = vmatpush1.bf16.msra.mxu1 %v2757_v54  ;;  %v2838_v53 = vld [vmem:[%s3952_s1 + $0x500] ss:$16 sps:$4 sm:$0xff]   ;;  %v2841_v54 = vld [vmem:[%s3952_s1 + $0x508] ss:$16 sps:$4 sm:$0xff]  }
  0x7c   :  { %1769 = vmatprep.subr.bf16.mxu0 %v2762_v55  ;;  %1981 = vmatprep.subr.bf16.mxu1 %v2765_v56  ;;  %v2846_v55 = vld [vmem:[%s3952_s1 + $0x524] ss:$16 sps:$4 sm:$0xff]   ;;  %v2849_v56 = vld [vmem:[%s3952_s1 + $0x52c] ss:$16 sps:$4 sm:$0xff]  }
  0x7f   :  { %1770 = vmatpush1.bf16.msra.mxu0 %v2760_v57  ;;  %1982 = vmatpush1.bf16.msra.mxu1 %v2763_v58  ;;  %v2844_v57 = vld [vmem:[%s3952_s1 + $0x520] ss:$16 sps:$4 sm:$0xff]   ;;  %v2847_v58 = vld [vmem:[%s3952_s1 + $0x528] ss:$16 sps:$4 sm:$0xff]  }
  0x80   :  { %1771 = vmatprep.subr.bf16.mxu0 %v2768_v59  ;;  %1983 = vmatprep.subr.bf16.mxu1 %v2771_v60  ;;  %v2852_v59 = vld [vmem:[%s3952_s1 + $0x544] ss:$16 sps:$4 sm:$0xff]   ;;  %v2855_v60 = vld [vmem:[%s3952_s1 + $0x54c] ss:$16 sps:$4 sm:$0xff]  }
  0x83   :  { %1772 = vmatpush1.bf16.msra.mxu0 %v2766_v61  ;;  %1984 = vmatpush1.bf16.msra.mxu1 %v2769_v62  ;;  %v2850_v61 = vld [vmem:[%s3952_s1 + $0x540] ss:$16 sps:$4 sm:$0xff]   ;;  %v2853_v62 = vld [vmem:[%s3952_s1 + $0x548] ss:$16 sps:$4 sm:$0xff]  }
  0x84   :  { %1773 = vmatprep.subr.bf16.mxu0 %v2774_v63  ;;  %1985 = vmatprep.subr.bf16.mxu1 %v2777_v0  ;;  %v2858_v63 = vld [vmem:[%s3952_s1 + $0x564] ss:$16 sps:$4 sm:$0xff]   ;;  %v2861_v0 = vld [vmem:[%s3952_s1 + $0x56c] ss:$16 sps:$4 sm:$0xff]  }
  0x87   :  { %1774 = vmatpush1.bf16.msra.mxu0 %v2772_v1  ;;  %1986 = vmatpush1.bf16.msra.mxu1 %v2775_v2  ;;  %v2856_v1 = vld [vmem:[%s3952_s1 + $0x560] ss:$16 sps:$4 sm:$0xff]   ;;  %v2859_v2 = vld [vmem:[%s3952_s1 + $0x568] ss:$16 sps:$4 sm:$0xff]  }
  0x88   :  { %1775 = vmatprep.subr.bf16.mxu0 %v2780_v3  ;;  %1987 = vmatprep.subr.bf16.mxu1 %v2783_v4  ;;  %v2864_v3 = vld [vmem:[%s3952_s1 + $0x584] ss:$16 sps:$4 sm:$0xff]   ;;  %v2867_v4 = vld [vmem:[%s3952_s1 + $0x58c] ss:$16 sps:$4 sm:$0xff]  }
  0x8b   :  { %1776 = vmatpush1.bf16.msra.mxu0 %v2778_v5  ;;  %1988 = vmatpush1.bf16.msra.mxu1 %v2781_v6  ;;  %v2862_v5 = vld [vmem:[%s3952_s1 + $0x580] ss:$16 sps:$4 sm:$0xff]   ;;  %v2865_v6 = vld [vmem:[%s3952_s1 + $0x588] ss:$16 sps:$4 sm:$0xff]  }
  0x8c   :  { %1777 = vmatprep.subr.bf16.mxu0 %v2786_v7  ;;  %1989 = vmatprep.subr.bf16.mxu1 %v2789_v8  ;;  %v2870_v7 = vld [vmem:[%s3952_s1 + $0x5a4] ss:$16 sps:$4 sm:$0xff]   ;;  %v2873_v8 = vld [vmem:[%s3952_s1 + $0x5ac] ss:$16 sps:$4 sm:$0xff]  }
  0x8f   :  { %1778 = vmatpush1.bf16.msra.mxu0 %v2784_v9  ;;  %1990 = vmatpush1.bf16.msra.mxu1 %v2787_v10  ;;  %v2868_v9 = vld [vmem:[%s3952_s1 + $0x5a0] ss:$16 sps:$4 sm:$0xff]   ;;  %v2871_v10 = vld [vmem:[%s3952_s1 + $0x5a8] ss:$16 sps:$4 sm:$0xff]  }
  0x90   :  { %1800 = vmatprep.subr.bf16.mxu0 %v2792_v11  ;;  %2012 = vmatprep.subr.bf16.mxu1 %v2795_v12  ;;  %v2876_v11 = vld [vmem:[%s3952_s1 + $0x5c4] ss:$16 sps:$4 sm:$0xff]   ;;  %v2879_v12 = vld [vmem:[%s3952_s1 + $0x5cc] ss:$16 sps:$4 sm:$0xff]  }
  0x92   :  { %1780 = vmatmul.mubr.bf16.vlgmr.msra.gmra.mrb[0].mxu0 %v2278_v15  ;;  %1992 = vmatmul.mubr.bf16.vlgmr.msra.gmra.mrb[0].mxu1 %v2278_v15  ;;  %v2882_v15 = vld [vmem:[%s3952_s1 + $0x5e4] ss:$16 sps:$4 sm:$0xff]  }
  0x93   :  { %1801 = vmatpush1.bf16.msra.mxu0 %v2790_v13  ;;  %2013 = vmatpush1.bf16.msra.mxu1 %v2793_v14  ;;  %v2874_v13 = vld [vmem:[%s3952_s1 + $0x5c0] ss:$16 sps:$4 sm:$0xff]   ;;  %v2877_v14 = vld [vmem:[%s3952_s1 + $0x5c8] ss:$16 sps:$4 sm:$0xff]  }
  0x94   :  { %1802 = vmatprep.subr.bf16.mxu0 %v2798_v18  ;;  %2014 = vmatprep.subr.bf16.mxu1 %v2801_v19  ;;  %v2883_v18 = vld [vmem:[%s3952_s1 + $0x5e8] ss:$16 sps:$4 sm:$0xff]   ;;  %v2888_v19 = vld [vmem:[%s3952_s1 + $0x604] ss:$16 sps:$4 sm:$0xff]  }
  0x95   :  { %1789 = vmatprep.mubr.bf16.mxu0 %v2287_v20  ;;  %2001 = vmatprep.mubr.bf16.mxu1 %v2287_v20  ;;  %v2891_v20 = vld [vmem:[%s3952_s1 + $0x60c] ss:$16 sps:$4 sm:$0xff]  }
  0x97   :  { %1803 = vmatpush1.bf16.msra.mxu0 %v2796_v21  ;;  %2015 = vmatpush1.bf16.msra.mxu1 %v2799_v22  ;;  %v2280_v21 = vcombine.low %v3488_v25, %v3493_v27  ;;  %v72_v22 = vld [vmem:[%s3951_s0 + $0x50] sm:$0xff]  ;;  %v2897_v27 = vld [vmem:[%s3952_s1 + $0x62c] ss:$16 sps:$4 sm:$0xff]  }
  0x98   :  { %1804 = vmatprep.subr.bf16.mxu0 %v2804_v23  ;;  %2016 = vmatprep.subr.bf16.mxu1 %v2807_v24  ;;  %v76_v23 = vld [vmem:[%s3951_s0 + $0x70] sm:$0xff] }
  0x99   :  { %v2886_v24 = vld [vmem:[%s3952_s1 + $0x600] ss:$16 sps:$4 sm:$0xff]   ;;  %v2894_v25 = vld [vmem:[%s3952_s1 + $0x624] ss:$16 sps:$4 sm:$0xff]  }
  0x9a   :  { %1790 = vmatmul.mubr.bf16.gmra.mrb[4].mxu0 %v2286_v26  ;;  %2002 = vmatmul.mubr.bf16.gmra.mrb[4].mxu1 %v2286_v26  ;;  %v2889_v26 = vld [vmem:[%s3952_s1 + $0x608] ss:$16 sps:$4 sm:$0xff]  }
  0x9b   :  { %1805 = vmatpush1.bf16.msra.mxu0 %v2802_v28  ;;  %2017 = vmatpush1.bf16.msra.mxu1 %v2805_v29  ;;  %v2289_v28 = vcombine.high %v72_v22, %v76_v23  ;;  %v2892_v29 = vld [vmem:[%s3952_s1 + $0x620] ss:$16 sps:$4 sm:$0xff]  }
  0x9c   :  { %1806 = vmatprep.subr.bf16.mxu0 %v2810_v30  ;;  %2018 = vmatprep.subr.bf16.mxu1 %v2813_v31  ;;  %v2895_v30 = vld [vmem:[%s3952_s1 + $0x628] ss:$16 sps:$4 sm:$0xff]   ;;  %v2900_v31 = vld [vmem:[%s3952_s1 + $0x644] ss:$16 sps:$4 sm:$0xff]  }
  0x9d   :  { %1832 = vmatprep.mubr.bf16.mxu0 %v2281_v32  ;;  %2044 = vmatprep.mubr.bf16.mxu1 %v2281_v32  ;;  %v2903_v32 = vld [vmem:[%s3952_s1 + $0x64c] ss:$16 sps:$4 sm:$0xff]  }
  0x9f   :  { %1807 = vmatpush1.bf16.msra.mxu0 %v2808_v33  ;;  %2019 = vmatpush1.bf16.msra.mxu1 %v2811_v34  ;;  %v2288_v33 = vcombine.low %v72_v22, %v76_v23  ;;  %v3700_v34 = vld [vmem:[%s3951_s0 + $0x18] sm:$0xff]  ;;  %v2978_v23 = vld [vmem:[%s3952_s1 + $0x7e4] ss:$16 sps:$4 sm:$0xff]  }
  0xa0   :  { %1808 = vmatprep.subr.bf16.mxu0 %v2816_v35  ;;  %2020 = vmatprep.subr.bf16.mxu1 %v2819_v36  ;;  %v3705_v35 = vld [vmem:[%s3951_s0 + $0x38] sm:$0xff]  ;;  %v2898_v36 = vld [vmem:[%s3952_s1 + $0x640] ss:$16 sps:$4 sm:$0xff]  }
  0xa1   :  { %v2973_v22 = vld [vmem:[%s3952_s1 + $0x7c8] ss:$16 sps:$4 sm:$0xff]  }
  0xa3   :  { %1809 = vmatpush1.bf16.msra.mxu0 %v2814_v37  ;;  %2021 = vmatpush1.bf16.msra.mxu1 %v2817_v38  ;;  %v2901_v37 = vld [vmem:[%s3952_s1 + $0x648] ss:$16 sps:$4 sm:$0xff]   ;;  %v2906_v38 = vld [vmem:[%s3952_s1 + $0x664] ss:$16 sps:$4 sm:$0xff]  }
  0xa4   :  { %1810 = vmatprep.subr.bf16.mxu0 %v2822_v39  ;;  %2022 = vmatprep.subr.bf16.mxu1 %v2825_v40  ;;  %v2909_v39 = vld [vmem:[%s3952_s1 + $0x66c] ss:$16 sps:$4 sm:$0xff]   ;;  %v2283_v40 = vcombine.high %v3700_v34, %v3705_v35 }
  0xa7   :  { %1811 = vmatpush1.bf16.msra.mxu0 %v2820_v41  ;;  %2023 = vmatpush1.bf16.msra.mxu1 %v2823_v42  ;;  %v2904_v41 = vld [vmem:[%s3952_s1 + $0x660] ss:$16 sps:$4 sm:$0xff]   ;;  %v2907_v42 = vld [vmem:[%s3952_s1 + $0x668] ss:$16 sps:$4 sm:$0xff]  }
  0xa8   :  { %1812 = vmatprep.subr.bf16.mxu0 %v2828_v43  ;;  %2024 = vmatprep.subr.bf16.mxu1 %v2831_v44  ;;  %v2912_v43 = vld [vmem:[%s3952_s1 + $0x684] ss:$16 sps:$4 sm:$0xff]   ;;  %v2915_v44 = vld [vmem:[%s3952_s1 + $0x68c] ss:$16 sps:$4 sm:$0xff]  }
  0xab   :  { %1813 = vmatpush1.bf16.msra.mxu0 %v2826_v45  ;;  %2025 = vmatpush1.bf16.msra.mxu1 %v2829_v46  ;;  %v2910_v45 = vld [vmem:[%s3952_s1 + $0x680] ss:$16 sps:$4 sm:$0xff]   ;;  %v2913_v46 = vld [vmem:[%s3952_s1 + $0x688] ss:$16 sps:$4 sm:$0xff]  }
  0xac   :  { %1814 = vmatprep.subr.bf16.mxu0 %v2834_v47  ;;  %2026 = vmatprep.subr.bf16.mxu1 %v2837_v48  ;;  %v2918_v47 = vld [vmem:[%s3952_s1 + $0x6a4] ss:$16 sps:$4 sm:$0xff]   ;;  %v2921_v48 = vld [vmem:[%s3952_s1 + $0x6ac] ss:$16 sps:$4 sm:$0xff]  }
  0xaf   :  { %1815 = vmatpush1.bf16.msra.mxu0 %v2832_v49  ;;  %2027 = vmatpush1.bf16.msra.mxu1 %v2835_v50  ;;  %v2916_v49 = vld [vmem:[%s3952_s1 + $0x6a0] ss:$16 sps:$4 sm:$0xff]   ;;  %v2919_v50 = vld [vmem:[%s3952_s1 + $0x6a8] ss:$16 sps:$4 sm:$0xff]  }
  0xb0   :  { %1816 = vmatprep.subr.bf16.mxu0 %v2840_v51  ;;  %2028 = vmatprep.subr.bf16.mxu1 %v2843_v52  ;;  %v2924_v51 = vld [vmem:[%s3952_s1 + $0x6c4] ss:$16 sps:$4 sm:$0xff]   ;;  %v2927_v52 = vld [vmem:[%s3952_s1 + $0x6cc] ss:$16 sps:$4 sm:$0xff]  }
  0xb3   :  { %1817 = vmatpush1.bf16.msra.mxu0 %v2838_v53  ;;  %2029 = vmatpush1.bf16.msra.mxu1 %v2841_v54  ;;  %v2922_v53 = vld [vmem:[%s3952_s1 + $0x6c0] ss:$16 sps:$4 sm:$0xff]   ;;  %v2925_v54 = vld [vmem:[%s3952_s1 + $0x6c8] ss:$16 sps:$4 sm:$0xff]  }
  0xb4   :  { %1818 = vmatprep.subr.bf16.mxu0 %v2846_v55  ;;  %2030 = vmatprep.subr.bf16.mxu1 %v2849_v56  ;;  %v2930_v55 = vld [vmem:[%s3952_s1 + $0x6e4] ss:$16 sps:$4 sm:$0xff]   ;;  %v2933_v56 = vld [vmem:[%s3952_s1 + $0x6ec] ss:$16 sps:$4 sm:$0xff]  }
  0xb7   :  { %1819 = vmatpush1.bf16.msra.mxu0 %v2844_v57  ;;  %2031 = vmatpush1.bf16.msra.mxu1 %v2847_v58  ;;  %v2928_v57 = vld [vmem:[%s3952_s1 + $0x6e0] ss:$16 sps:$4 sm:$0xff]   ;;  %v2931_v58 = vld [vmem:[%s3952_s1 + $0x6e8] ss:$16 sps:$4 sm:$0xff]  }
  0xb8   :  { %1820 = vmatprep.subr.bf16.mxu0 %v2852_v59  ;;  %2032 = vmatprep.subr.bf16.mxu1 %v2855_v60  ;;  %v2936_v59 = vld [vmem:[%s3952_s1 + $0x704] ss:$16 sps:$4 sm:$0xff]   ;;  %v2939_v60 = vld [vmem:[%s3952_s1 + $0x70c] ss:$16 sps:$4 sm:$0xff]  }
  0xbb   :  { %1821 = vmatpush1.bf16.msra.mxu0 %v2850_v61  ;;  %2033 = vmatpush1.bf16.msra.mxu1 %v2853_v62  ;;  %v2934_v61 = vld [vmem:[%s3952_s1 + $0x700] ss:$16 sps:$4 sm:$0xff]   ;;  %v2937_v62 = vld [vmem:[%s3952_s1 + $0x708] ss:$16 sps:$4 sm:$0xff]  }
  0xbc   :  { %1822 = vmatprep.subr.bf16.mxu0 %v2858_v63  ;;  %2034 = vmatprep.subr.bf16.mxu1 %v2861_v0  ;;  %v2942_v63 = vld [vmem:[%s3952_s1 + $0x724] ss:$16 sps:$4 sm:$0xff]   ;;  %v2945_v0 = vld [vmem:[%s3952_s1 + $0x72c] ss:$16 sps:$4 sm:$0xff]  }
  0xbf   :  { %1823 = vmatpush1.bf16.msra.mxu0 %v2856_v1  ;;  %2035 = vmatpush1.bf16.msra.mxu1 %v2859_v2  ;;  %v2940_v1 = vld [vmem:[%s3952_s1 + $0x720] ss:$16 sps:$4 sm:$0xff]   ;;  %v2943_v2 = vld [vmem:[%s3952_s1 + $0x728] ss:$16 sps:$4 sm:$0xff]  }
  0xc0   :  { %1824 = vmatprep.subr.bf16.mxu0 %v2864_v3  ;;  %2036 = vmatprep.subr.bf16.mxu1 %v2867_v4  ;;  %v2948_v3 = vld [vmem:[%s3952_s1 + $0x744] ss:$16 sps:$4 sm:$0xff]   ;;  %v2951_v4 = vld [vmem:[%s3952_s1 + $0x74c] ss:$16 sps:$4 sm:$0xff]  }
  0xc3   :  { %1825 = vmatpush1.bf16.msra.mxu0 %v2862_v5  ;;  %2037 = vmatpush1.bf16.msra.mxu1 %v2865_v6  ;;  %v2946_v5 = vld [vmem:[%s3952_s1 + $0x740] ss:$16 sps:$4 sm:$0xff]   ;;  %v2949_v6 = vld [vmem:[%s3952_s1 + $0x748] ss:$16 sps:$4 sm:$0xff]  }
  0xc4   :  { %1826 = vmatprep.subr.bf16.mxu0 %v2870_v7  ;;  %2038 = vmatprep.subr.bf16.mxu1 %v2873_v8  ;;  %v2954_v7 = vld [vmem:[%s3952_s1 + $0x764] ss:$16 sps:$4 sm:$0xff]   ;;  %v2957_v8 = vld [vmem:[%s3952_s1 + $0x76c] ss:$16 sps:$4 sm:$0xff]  }
  0xc7   :  { %1827 = vmatpush1.bf16.msra.mxu0 %v2868_v9  ;;  %2039 = vmatpush1.bf16.msra.mxu1 %v2871_v10  ;;  %v2952_v9 = vld [vmem:[%s3952_s1 + $0x760] ss:$16 sps:$4 sm:$0xff]   ;;  %v2955_v10 = vld [vmem:[%s3952_s1 + $0x768] ss:$16 sps:$4 sm:$0xff]  }
  0xc8   :  { %1828 = vmatprep.subr.bf16.mxu0 %v2876_v11  ;;  %2040 = vmatprep.subr.bf16.mxu1 %v2879_v12  ;;  %v2960_v11 = vld [vmem:[%s3952_s1 + $0x784] ss:$16 sps:$4 sm:$0xff]   ;;  %v2963_v12 = vld [vmem:[%s3952_s1 + $0x78c] ss:$16 sps:$4 sm:$0xff]  }
  0xcb   :  { %1829 = vmatpush1.bf16.msra.mxu0 %v2874_v13  ;;  %2041 = vmatpush1.bf16.msra.mxu1 %v2877_v14  ;;  %v2958_v13 = vld [vmem:[%s3952_s1 + $0x780] ss:$16 sps:$4 sm:$0xff]   ;;  %v2961_v14 = vld [vmem:[%s3952_s1 + $0x788] ss:$16 sps:$4 sm:$0xff]  }
  0xcc   :  { %1830 = vmatprep.subr.bf16.mxu0 %v2882_v15  ;;  %2042 = vmatprep.subr.bf16.mxu1 %v2885_v16  ;;  %v2966_v15 = vld [vmem:[%s3952_s1 + $0x7a4] ss:$16 sps:$4 sm:$0xff]   ;;  %v2969_v16 = vld [vmem:[%s3952_s1 + $0x7ac] ss:$16 sps:$4 sm:$0xff]  }
  0xcf   :  { %1831 = vmatpush1.bf16.msra.mxu0 %v2880_v17  ;;  %2043 = vmatpush1.bf16.msra.mxu1 %v2883_v18  ;;  %v2964_v17 = vld [vmem:[%s3952_s1 + $0x7a0] ss:$16 sps:$4 sm:$0xff]   ;;  %v2967_v18 = vld [vmem:[%s3952_s1 + $0x7a8] ss:$16 sps:$4 sm:$0xff]  }
  0xd0   :  { %1853 = vmatprep.subr.bf16.mxu0 %v2888_v19  ;;  %2065 = vmatprep.subr.bf16.mxu1 %v2891_v20  ;;  %v2972_v19 = vld [vmem:[%s3952_s1 + $0x7c4] ss:$16 sps:$4 sm:$0xff]   ;;  %v2975_v20 = vld [vmem:[%s3952_s1 + $0x7cc] ss:$16 sps:$4 sm:$0xff]  }
  0xd2   :  { %1833 = vmatmul.mubr.bf16.vlgmr.msra.gmra.mrb[0].mxu0 %v2280_v21  ;;  %2045 = vmatmul.mubr.bf16.vlgmr.msra.gmra.mrb[0].mxu1 %v2280_v21  ;;  %v2970_v21 = vld [vmem:[%s3952_s1 + $0x7c0] ss:$16 sps:$4 sm:$0xff]  }
  0xd3   :  { %1854 = vmatpush1.bf16.msra.mxu0 %v2886_v24  ;;  %2066 = vmatpush1.bf16.msra.mxu1 %v2889_v26  ;;  %v2981_v24 = vld [vmem:[%s3952_s1 + $0x7ec] ss:$16 sps:$4 sm:$0xff]   ;;  %v2976_v26 = vld [vmem:[%s3952_s1 + $0x7e0] ss:$16 sps:$4 sm:$0xff]  }
  0xd4   :  { %1855 = vmatprep.subr.bf16.mxu0 %v2894_v25  ;;  %2067 = vmatprep.subr.bf16.mxu1 %v2897_v27  ;;  %v2979_v25 = vld [vmem:[%s3952_s1 + $0x7e8] ss:$16 sps:$4 sm:$0xff]  }
  0xd5   :  { %1842 = vmatprep.mubr.bf16.mxu0 %v2289_v28  ;;  %2054 = vmatprep.mubr.bf16.mxu1 %v2289_v28  ;;  %v73_v27 = vld [vmem:[%s3951_s0 + $0x58] sm:$0xff] }
  0xd6   :  { %v77_v28 = vld [vmem:[%s3951_s0 + $0x78] sm:$0xff] }
  0xd7   :  { %1856 = vmatpush1.bf16.msra.mxu0 %v2892_v29  ;;  %2068 = vmatpush1.bf16.msra.mxu1 %v2895_v30  ;;  %v2282_v29 = vcombine.low %v3700_v34, %v3705_v35  ;;  %v2291_v30 = vcombine.high %v73_v27, %v77_v28 }
  0xd8   :  { %1857 = vmatprep.subr.bf16.mxu0 %v2900_v31  ;;  %2069 = vmatprep.subr.bf16.mxu1 %v2903_v32  ;;  %v2290_v31 = vcombine.low %v73_v27, %v77_v28  ;;  %v2171_v32 = vlaneseq }
  0xda   :  { %1843 = vmatmul.mubr.bf16.gmra.mrb[4].mxu0 %v2288_v33  ;;  %2055 = vmatmul.mubr.bf16.gmra.mrb[4].mxu1 %v2288_v33  ;;  %v2172_v33 = vshrl.u32 %v2171_v32, 7 }
  0xdb   :  { %1858 = vmatpush1.bf16.msra.mxu0 %v2898_v36  ;;  %2070 = vmatpush1.bf16.msra.mxu1 %v2901_v37 }
  0xdc   :  { %1859 = vmatprep.subr.bf16.mxu0 %v2906_v38  ;;  %2071 = vmatprep.subr.bf16.mxu1 %v2909_v39  ;;  %v2173_v36 = vsub.s32 0, %v2172_v33  ;;  %v2181_v37 = vsub.s32 2, %v2172_v33  ;;  %v2169_v38 = vld [vmem:[#allocation2] sm:$0xf]  ;;  %v2177_v39 = vsub.s32 1, %v2172_v33 }
  0xdd   :  { %1885 = vmatprep.mubr.bf16.mxu0 %v2283_v40  ;;  %2097 = vmatprep.mubr.bf16.mxu1 %v2283_v40  ;;  %v2185_v40 = vsub.s32 3, %v2172_v33 }
  0xde   :  { %v3881_v34 = vrot.slane %v2169_v38, %v2181_v37 }
  0xdf   :  { %1860 = vmatpush1.bf16.msra.mxu0 %v2904_v41  ;;  %2072 = vmatpush1.bf16.msra.mxu1 %v2907_v42  ;;  %v3879_v41 = vrot.slane %v2169_v38, %v2173_v36 }
  0xe0   :  { %1861 = vmatprep.subr.bf16.mxu0 %v2912_v43  ;;  %2073 = vmatprep.subr.bf16.mxu1 %v2915_v44  ;;  %v3883_v43 = vrot.slane %v2169_v38, %v2177_v39  ;;  %v3885_v44 = vrot.slane %v2169_v38, %v2185_v40 }
  0xe3   :  { %1862 = vmatpush1.bf16.msra.mxu0 %v2910_v45  ;;  %2074 = vmatpush1.bf16.msra.mxu1 %v2913_v46 }
  0xe4   :  { %1863 = vmatprep.subr.bf16.mxu0 %v2918_v47  ;;  %2075 = vmatprep.subr.bf16.mxu1 %v2921_v48 }
  0xe7   :  { %1864 = vmatpush1.bf16.msra.mxu0 %v2916_v49  ;;  %2076 = vmatpush1.bf16.msra.mxu1 %v2919_v50 }
  0xe8   :  { %1865 = vmatprep.subr.bf16.mxu0 %v2924_v51  ;;  %2077 = vmatprep.subr.bf16.mxu1 %v2927_v52 }
  0xeb   :  { %1866 = vmatpush1.bf16.msra.mxu0 %v2922_v53  ;;  %2078 = vmatpush1.bf16.msra.mxu1 %v2925_v54 }
  0xec   :  { %1867 = vmatprep.subr.bf16.mxu0 %v2930_v55  ;;  %2079 = vmatprep.subr.bf16.mxu1 %v2933_v56 }
  0xef   :  { %1868 = vmatpush1.bf16.msra.mxu0 %v2928_v57  ;;  %2080 = vmatpush1.bf16.msra.mxu1 %v2931_v58 }
  0xf0   :  { %1869 = vmatprep.subr.bf16.mxu0 %v2936_v59  ;;  %2081 = vmatprep.subr.bf16.mxu1 %v2939_v60 }
  0xf3   :  { %1870 = vmatpush1.bf16.msra.mxu0 %v2934_v61  ;;  %2082 = vmatpush1.bf16.msra.mxu1 %v2937_v62 }
  0xf4   :  { %1871 = vmatprep.subr.bf16.mxu0 %v2942_v63  ;;  %2083 = vmatprep.subr.bf16.mxu1 %v2945_v0 }
  0xf7   :  { %1872 = vmatpush1.bf16.msra.mxu0 %v2940_v1  ;;  %2084 = vmatpush1.bf16.msra.mxu1 %v2943_v2 }
  0xf8   :  { %1873 = vmatprep.subr.bf16.mxu0 %v2948_v3  ;;  %2085 = vmatprep.subr.bf16.mxu1 %v2951_v4 }
  0xfb   :  { %1874 = vmatpush1.bf16.msra.mxu0 %v2946_v5  ;;  %2086 = vmatpush1.bf16.msra.mxu1 %v2949_v6 }
  0xfc   :  { %1875 = vmatprep.subr.bf16.mxu0 %v2954_v7  ;;  %2087 = vmatprep.subr.bf16.mxu1 %v2957_v8 }
  0xff   :  { %1876 = vmatpush1.bf16.msra.mxu0 %v2952_v9  ;;  %2088 = vmatpush1.bf16.msra.mxu1 %v2955_v10 }
 0x100   :  { %1877 = vmatprep.subr.bf16.mxu0 %v2960_v11  ;;  %2089 = vmatprep.subr.bf16.mxu1 %v2963_v12 }
 0x103   :  { %1878 = vmatpush1.bf16.msra.mxu0 %v2958_v13  ;;  %2090 = vmatpush1.bf16.msra.mxu1 %v2961_v14 }
 0x104   :  { %1879 = vmatprep.subr.bf16.mxu0 %v2966_v15  ;;  %2091 = vmatprep.subr.bf16.mxu1 %v2969_v16 }
 0x107   :  { %1880 = vmatpush1.bf16.msra.mxu0 %v2964_v17  ;;  %2092 = vmatpush1.bf16.msra.mxu1 %v2967_v18 }
 0x108   :  { %1881 = vmatprep.subr.bf16.mxu0 %v2972_v19  ;;  %2093 = vmatprep.subr.bf16.mxu1 %v2975_v20 }
 0x10b   :  { %1882 = vmatpush1.bf16.msra.mxu0 %v2970_v21  ;;  %2094 = vmatpush1.bf16.msra.mxu1 %v2973_v22 }
 0x10c   :  { %1883 = vmatprep.subr.bf16.mxu0 %v2978_v23  ;;  %2095 = vmatprep.subr.bf16.mxu1 %v2981_v24 }
 0x10f   :  { %1884 = vmatpush1.bf16.msra.mxu0 %v2976_v26  ;;  %2096 = vmatpush1.bf16.msra.mxu1 %v2979_v25 }
 0x112   :  { %1886 = vmatmul.mubr.bf16.vlgmr.msra.gmra.mrb[0].mxu0 %v2282_v29  ;;  %2098 = vmatmul.mubr.bf16.vlgmr.msra.gmra.mrb[0].mxu1 %v2282_v29 }
 0x113   :  { %1895 = vmatprep.mubr.bf16.mxu0 %v2291_v30  ;;  %2107 = vmatprep.mubr.bf16.mxu1 %v2291_v30 }
 0x11a   :  { %1896 = vmatmul.mubr.bf16.gmra.mrb[4].mxu0 %v2290_v31  ;;  %2108 = vmatmul.mubr.bf16.gmra.mrb[4].mxu1 %v2290_v31 }
 0x1e5   :  { %v1887_v35 = vpop.f32.mrb[0].mxu0  ;;  %v2099_v42 = vpop.f32.mrb[0].mxu1 }
 0x1e6   :  { %v1889_v45 = vpop.f32.mrb[1].mxu0  ;;  %v2101_v46 = vpop.f32.mrb[1].mxu1  ;;  %v2191_v49 = vadd.f32 %v3879_v41, %v1887_v35  ;;  %v2193_v50 = vadd.f32 %v3881_v34, %v2099_v42 }
 0x1e7   :  { %v1891_v47 = vpop.f32.mrb[2].mxu0  ;;  %v2103_v48 = vpop.f32.mrb[2].mxu1  ;;  %v2192_v53 = vadd.f32 %v3883_v43, %v1889_v45  ;;  %v2194_v54 = vadd.f32 %v3885_v44, %v2101_v46 }
 0x1e8   :  { %v1893_v51 = vpop.f32.mrb[3].mxu0  ;;  %v2105_v52 = vpop.f32.mrb[3].mxu1  ;;  %vm2207_vm0 = vcmp.ge.f32.partialorder %v2191_v49, 0.0  ;;  %v2223_v55 = vmul.f32 0.01, %v2191_v49  ;;  %vm2209_vm1 = vcmp.ge.f32.partialorder %v2193_v50, 0.0  ;;  %v2195_v61 = vadd.f32 %v3879_v41, %v1891_v47 }
 0x1e9   :  { %v2225_v56 = vmul.f32 0.01, %v2193_v50  ;;  %vm2208_vm2 = vcmp.ge.f32.partialorder %v2192_v53, 0.0  ;;  %v2224_v57 = vmul.f32 0.01, %v2192_v53  ;;  %vm2210_vm3 = vcmp.ge.f32.partialorder %v2194_v54, 0.0 }
 0x1ea   :  { %v2226_v58 = vmul.f32 0.01, %v2194_v54  ;;  %v2239_v59 = vsel %vm2207_vm0, %v2191_v49, %v2223_v55  ;;  %v2197_v62 = vadd.f32 %v3881_v34, %v2103_v48  ;;  %v2196_v1 = vadd.f32 %v3883_v43, %v1893_v51 }
 0x1eb   :  { %v2241_v60 = vsel %vm2209_vm1, %v2193_v50, %v2225_v56  ;;  %2255 = vst [vmem:[%s3954_s3] sm:$0xff] %v2239_v59  ;;  %v2240_v63 = vsel %vm2208_vm2, %v2192_v53, %v2224_v57  ;;  %v2198_v2 = vadd.f32 %v3885_v44, %v2105_v52  ;;  %vm2211_vm4 = vcmp.ge.f32.partialorder %v2195_v61, 0.0 }
 0x1ec   :  { %2257 = vst [vmem:[%s3954_s3 + $0x10] sm:$0xff] %v2241_v60  ;;  %v2242_v0 = vsel %vm2210_vm3, %v2194_v54, %v2226_v58  ;;  %2256 = vst [vmem:[%s3954_s3 + $0x8] sm:$0xff] %v2240_v63  ;;  %v2227_v5 = vmul.f32 0.01, %v2195_v61  ;;  %vm2213_vm5 = vcmp.ge.f32.partialorder %v2197_v62, 0.0  ;;  %vm2212_vm6 = vcmp.ge.f32.partialorder %v2196_v1, 0.0 }
 0x1ed   :  { %v1897_v3 = vpop.f32.mrb[4].mxu0  ;;  %v2109_v4 = vpop.f32.mrb[4].mxu1  ;;  %2258 = vst [vmem:[%s3954_s3 + $0x18] sm:$0xff] %v2242_v0  ;;  %v2229_v6 = vmul.f32 0.01, %v2197_v62  ;;  %vm2214_vm7 = vcmp.ge.f32.partialorder %v2198_v2, 0.0 }
 0x1ee   :  { %v2228_v7 = vmul.f32 0.01, %v2196_v1  ;;  %v2230_v8 = vmul.f32 0.01, %v2198_v2  ;;  %v2243_v9 = vsel %vm2211_vm4, %v2195_v61, %v2227_v5  ;;  %v1899_v11 = vpop.f32.mrb[5].mxu0  ;;  %v2111_v12 = vpop.f32.mrb[5].mxu1  ;;  %v2199_v17 = vadd.f32 %v3879_v41, %v1897_v3 }
 0x1ef   :  { %v2245_v10 = vsel %vm2213_vm5, %v2197_v62, %v2229_v6  ;;  %2259 = vst [vmem:[%s3954_s3 + $0x20] sm:$0xff] %v2243_v9  ;;  %v1901_v15 = vpop.f32.mrb[6].mxu0  ;;  %v2113_v16 = vpop.f32.mrb[6].mxu1  ;;  %v2201_v18 = vadd.f32 %v3881_v34, %v2109_v4  ;;  %v2200_v21 = vadd.f32 %v3883_v43, %v1899_v11  ;;  %v2202_v22 = vadd.f32 %v3885_v44, %v2111_v12 }
 0x1f0   :  { %2261 = vst [vmem:[%s3954_s3 + $0x30] sm:$0xff] %v2245_v10  ;;  %v2244_v13 = vsel %vm2212_vm6, %v2196_v1, %v2228_v7  ;;  %v2246_v14 = vsel %vm2214_vm7, %v2198_v2, %v2230_v8  ;;  %v1903_v19 = vpop.f32.mrb[7].mxu0  ;;  %v2115_v20 = vpop.f32.mrb[7].mxu1  ;;  %vm2215_vm8 = vcmp.ge.f32.partialorder %v2199_v17, 0.0  ;;  %v2231_v23 = vmul.f32 0.01, %v2199_v17 }
 0x1f1   :  { %2260 = vst [vmem:[%s3954_s3 + $0x28] sm:$0xff] %v2244_v13  ;;  %2262 = vst [vmem:[%s3954_s3 + $0x38] sm:$0xff] %v2246_v14  ;;  %vm2217_vm9 = vcmp.ge.f32.partialorder %v2201_v18, 0.0  ;;  %v2233_v24 = vmul.f32 0.01, %v2201_v18  ;;  %vm2216_vm10 = vcmp.ge.f32.partialorder %v2200_v21, 0.0  ;;  %v2203_v29 = vadd.f32 %v3879_v41, %v1901_v15 }
 0x1f2   :  { %v2232_v26 = vmul.f32 0.01, %v2200_v21  ;;  %vm2218_vm11 = vcmp.ge.f32.partialorder %v2202_v22, 0.0  ;;  %v2234_v25 = vmul.f32 0.01, %v2202_v22  ;;  %v2247_v27 = vsel %vm2215_vm8, %v2199_v17, %v2231_v23 }
 0x1f3   :  { %v2249_v28 = vsel %vm2217_vm9, %v2201_v18, %v2233_v24  ;;  %v2205_v30 = vadd.f32 %v3881_v34, %v2113_v16  ;;  %2263 = vst [vmem:[%s3954_s3 + $0x40] sm:$0xff] %v2247_v27  ;;  %v2204_v33 = vadd.f32 %v3883_v43, %v1903_v19  ;;  %v2206_v36 = vadd.f32 %v3885_v44, %v2115_v20 }
 0x1f4   :  { %2265 = vst [vmem:[%s3954_s3 + $0x50] sm:$0xff] %v2249_v28  ;;  %v2248_v31 = vsel %vm2216_vm10, %v2200_v21, %v2232_v26  ;;  %v2250_v32 = vsel %vm2218_vm11, %v2202_v22, %v2234_v25  ;;  %vm2219_vm12 = vcmp.ge.f32.partialorder %v2203_v29, 0.0  ;;  %v2235_v37 = vmul.f32 0.01, %v2203_v29 }
 0x1f5   :  { %2264 = vst [vmem:[%s3954_s3 + $0x48] sm:$0xff] %v2248_v31  ;;  %2266 = vst [vmem:[%s3954_s3 + $0x58] sm:$0xff] %v2250_v32  ;;  %vm2221_vm13 = vcmp.ge.f32.partialorder %v2205_v30, 0.0  ;;  %v2237_v38 = vmul.f32 0.01, %v2205_v30  ;;  %vm2220_vm14 = vcmp.ge.f32.partialorder %v2204_v33, 0.0 }
 0x1f6   :  { %v2236_v39 = vmul.f32 0.01, %v2204_v33  ;;  %vm2222_vm15 = vcmp.ge.f32.partialorder %v2206_v36, 0.0  ;;  %v2238_v40 = vmul.f32 0.01, %v2206_v36  ;;  %v2251_v41 = vsel %vm2219_vm12, %v2203_v29, %v2235_v37 }
 0x1f7   :  { %v2253_v34 = vsel %vm2221_vm13, %v2205_v30, %v2237_v38  ;;  %2267 = vst [vmem:[%s3954_s3 + $0x60] sm:$0xff] %v2251_v41 }
 0x1f8   :  { %2269 = vst [vmem:[%s3954_s3 + $0x70] sm:$0xff] %v2253_v34  ;;  %v2252_v35 = vsel %vm2220_vm14, %v2204_v33, %v2236_v39  ;;  %v2254_v42 = vsel %vm2222_vm15, %v2206_v36, %v2238_v40 }
 0x1f9   :  { %2268 = vst [vmem:[%s3954_s3 + $0x68] sm:$0xff] %v2252_v35  ;;  %2270 = vst [vmem:[%s3954_s3 + $0x78] sm:$0xff] %v2254_v42 }
 0x1fa   :  { %2275 = vsyncpa [#allocation3], 1 }

// kernel: encoder_forward.10
= control target key start
LH: loop header
LB: loop body
LE: loop exit
PB: predicated region body
PF: predicated region fallthrough
CT: control target
= control target key end

     0   :  { %s3928_s18 = smov 0   ;;  %s3930_s19 = smov 0   ;;  %s4875_s0 = inlined_call_operand.vmem [shape: bf16[2,4096], index: 0, kind: input, shape index: {}]   ;;  %s4876_s1 = inlined_call_operand.vmem [shape: bf16[4096,1024], index: 1, kind: input, shape index: {}]   ;;  %s4877_s2 = inlined_call_operand.vmem [shape: f32[1,1024], index: 2, kind: input, shape index: {}]   ;;  %s4878_s3 = inlined_call_operand.vmem [shape: f32[1,1024], index: 3, kind: input, shape index: {}]   ;;  %s4879_s4 = inlined_call_operand.vmem [shape: f32[1,1024], index: 4, kind: input, shape index: {}]   ;;  %s4880_s5 = inlined_call_operand.vmem [shape: f32[2,1024], index: 5, kind: output, shape index: {}]  }
   0x1   :  { %s3932_s20 = smov 0   ;;  %s3934_s21 = smov 0  }
   0x2   :  { %s3936_s22 = smov 0   ;;  %s3938_s23 = smov 0  }
   0x3   :  { %s3940_s24 = smov 0  }
   0x4 LB: > { %s27_s25 = sadd.s32 1, %s3885_s22  ;;  %s30_s26 = sadd.s32 1, %s3889_s23  ;;  %s3893_s24 = sphi %s3940_s24, %s15_s24   ;;  %s3889_s23 = sphi %s3938_s23, %s4887_s23   ;;  %s3885_s22 = sphi %s3936_s22, %s4886_s22   ;;  %s3881_s21 = sphi %s3934_s21, %s4885_s21   ;;  %s3877_s20 = sphi %s3932_s20, %s4884_s20   ;;  %s3873_s19 = sphi %s3930_s19, %s4883_s19   ;;  %s3869_s18 = sphi %s3928_s18, %s4882_s18  }
   0x5   : > { %p28_p0 = scmp.ge.s32.totalorder %s27_s25, 4  ;;  %p78_p1 = scmp.ne.s32.totalorder %s3873_s19, %s3869_s18 }
   0x6   : > { %p79_p2 = scmp.eq.s32.totalorder %s3893_s24, 0  ;;  %s71_s30 = sadd.s32 1, %s3873_s19 }
   0x7   : > { %s4889_s25 = smov (%p28_p0, %s27_s25), 0  ;;  %s4891_s26 = smov (!%p28_p0, %s30_s26), %s3889_s23 }
   0x8   : > { %p80_p3 = por %p79_p2, %p78_p1  ;;  %p32_p4 = scmp.ge.s32.totalorder %s4891_s26, 2 }
   0x9   : > { %s66_s27 = ssub.s32 %s3885_s22, %s4889_s25  ;;  %p3096_p6 = scmp.ge.s32.totalorder %s3893_s24, 8 }
   0xa   : > { %s4893_s26 = smov (%p32_p4, %s4891_s26), 0 }
   0xb   : > { %s67_s28 = ssub.s32 %s3889_s23, %s4893_s26  ;;  %210 = sbr.rel (%p3096_p6) target bundleno = 153 (0x99), region = 16 }
   0xc   : > { %s68_s29 = sor.u32 %s67_s28, %s66_s27 }
   0xd   : > { %p69_p5 = scmp.eq.s32.totalorder %s68_s29, 0 }
   0xf   : > { %s3979_s6 = scalar_select %p69_p5, %s3873_s19, %s71_s30  }
  0x12   : > { %225 = sbr.rel (!%p80_p3) target bundleno = 153 (0x99), region = 24  ;;  %s227_s7 = sand.u32 (%p80_p3), 1, %s3873_s19  }
  0x13   : > { %s3099_s8 = sshll.u32 (%p80_p3), %s3889_s23, 2  ;;  %s3097_s9 = sshll.u32 (%p80_p3), %s227_s7, 11 }
  0x14   : > { %s3370_s10 = sshll.u32 (%p80_p3), %s3885_s22, 10  ;;  %s3993_s16 = scalar_lea.vmem (%p80_p3), [#allocation2], %s3097_s9 }
  0x15   : > { %s233_s11 = sadd.s32 (%p80_p3), %s3370_s10, %s3099_s8 }
  0x16   : > { %s3101_s12 = sshll.u32 (%p80_p3), %s233_s11, 2 }
  0x17   : > { %s3988_s15 = scalar_lea.vmem (%p80_p3), %s4876_s1, %s3101_s12 }
  0x18   : > { %v248_v0 = vld [vmem:[%s3988_s15] sm:$0xff] (%p80_p3)  ;;  %v250_v1 = vld [vmem:[%s3988_s15 + $0x8] sm:$0xff] (%p80_p3) }
  0x19   : > { %v252_v2 = vld [vmem:[%s3988_s15 + $0x20] sm:$0xff]  ;;  %249 = vst [vmem:[%s3993_s16] sm:$0xff] %v248_v0  ;;  %251 = vst [vmem:[%s3993_s16 + $0x8] sm:$0xff] %v250_v1  ;;  %v254_v3 = vld [vmem:[%s3988_s15 + $0x28] sm:$0xff] }
  0x1a   : > { %253 = vst [vmem:[%s3993_s16 + $0x10] sm:$0xff] %v252_v2  ;;  %v256_v4 = vld [vmem:[%s3988_s15 + $0x40] sm:$0xff]  ;;  %v258_v5 = vld [vmem:[%s3988_s15 + $0x48] sm:$0xff]  ;;  %255 = vst [vmem:[%s3993_s16 + $0x18] sm:$0xff] %v254_v3 }
  0x1b   : > { %257 = vst [vmem:[%s3993_s16 + $0x20] sm:$0xff] %v256_v4  ;;  %259 = vst [vmem:[%s3993_s16 + $0x28] sm:$0xff] %v258_v5  ;;  %v260_v6 = vld [vmem:[%s3988_s15 + $0x60] sm:$0xff]  ;;  %v262_v7 = vld [vmem:[%s3988_s15 + $0x68] sm:$0xff] }
  0x1c   : > { %v264_v8 = vld [vmem:[%s3988_s15 + $0x80] sm:$0xff]  ;;  %261 = vst [vmem:[%s3993_s16 + $0x30] sm:$0xff] %v260_v6  ;;  %263 = vst [vmem:[%s3993_s16 + $0x38] sm:$0xff] %v262_v7  ;;  %v266_v9 = vld [vmem:[%s3988_s15 + $0x88] sm:$0xff] }
  0x1d   : > { %265 = vst [vmem:[%s3993_s16 + $0x40] sm:$0xff] %v264_v8  ;;  %v268_v10 = vld [vmem:[%s3988_s15 + $0xa0] sm:$0xff]  ;;  %v270_v11 = vld [vmem:[%s3988_s15 + $0xa8] sm:$0xff]  ;;  %267 = vst [vmem:[%s3993_s16 + $0x48] sm:$0xff] %v266_v9 }
  0x1e   : > { %269 = vst [vmem:[%s3993_s16 + $0x50] sm:$0xff] %v268_v10  ;;  %271 = vst [vmem:[%s3993_s16 + $0x58] sm:$0xff] %v270_v11  ;;  %v272_v12 = vld [vmem:[%s3988_s15 + $0xc0] sm:$0xff]  ;;  %v274_v13 = vld [vmem:[%s3988_s15 + $0xc8] sm:$0xff] }
  0x1f   : > { %v276_v14 = vld [vmem:[%s3988_s15 + $0xe0] sm:$0xff]  ;;  %273 = vst [vmem:[%s3993_s16 + $0x60] sm:$0xff] %v272_v12  ;;  %275 = vst [vmem:[%s3993_s16 + $0x68] sm:$0xff] %v274_v13  ;;  %v278_v15 = vld [vmem:[%s3988_s15 + $0xe8] sm:$0xff] }
  0x20   : > { %277 = vst [vmem:[%s3993_s16 + $0x70] sm:$0xff] %v276_v14  ;;  %v280_v16 = vld [vmem:[%s3988_s15 + $0x100] sm:$0xff]  ;;  %v282_v17 = vld [vmem:[%s3988_s15 + $0x108] sm:$0xff]  ;;  %279 = vst [vmem:[%s3993_s16 + $0x78] sm:$0xff] %v278_v15 }
  0x21   : > { %281 = vst [vmem:[%s3993_s16 + $0x80] sm:$0xff] %v280_v16  ;;  %283 = vst [vmem:[%s3993_s16 + $0x88] sm:$0xff] %v282_v17  ;;  %v284_v18 = vld [vmem:[%s3988_s15 + $0x120] sm:$0xff]  ;;  %v286_v19 = vld [vmem:[%s3988_s15 + $0x128] sm:$0xff] }
  0x22   : > { %v288_v20 = vld [vmem:[%s3988_s15 + $0x140] sm:$0xff]  ;;  %285 = vst [vmem:[%s3993_s16 + $0x90] sm:$0xff] %v284_v18  ;;  %287 = vst [vmem:[%s3993_s16 + $0x98] sm:$0xff] %v286_v19  ;;  %v290_v21 = vld [vmem:[%s3988_s15 + $0x148] sm:$0xff] }
  0x23   : > { %289 = vst [vmem:[%s3993_s16 + $0xa0] sm:$0xff] %v288_v20  ;;  %v292_v22 = vld [vmem:[%s3988_s15 + $0x160] sm:$0xff]  ;;  %v294_v23 = vld [vmem:[%s3988_s15 + $0x168] sm:$0xff]  ;;  %291 = vst [vmem:[%s3993_s16 + $0xa8] sm:$0xff] %v290_v21 }
  0x24   : > { %293 = vst [vmem:[%s3993_s16 + $0xb0] sm:$0xff] %v292_v22  ;;  %295 = vst [vmem:[%s3993_s16 + $0xb8] sm:$0xff] %v294_v23  ;;  %v296_v24 = vld [vmem:[%s3988_s15 + $0x180] sm:$0xff]  ;;  %v298_v25 = vld [vmem:[%s3988_s15 + $0x188] sm:$0xff] }
  0x25   : > { %v300_v26 = vld [vmem:[%s3988_s15 + $0x1a0] sm:$0xff]  ;;  %297 = vst [vmem:[%s3993_s16 + $0xc0] sm:$0xff] %v296_v24  ;;  %299 = vst [vmem:[%s3993_s16 + $0xc8] sm:$0xff] %v298_v25  ;;  %v302_v27 = vld [vmem:[%s3988_s15 + $0x1a8] sm:$0xff] }
  0x26   : > { %301 = vst [vmem:[%s3993_s16 + $0xd0] sm:$0xff] %v300_v26  ;;  %v304_v28 = vld [vmem:[%s3988_s15 + $0x1c0] sm:$0xff]  ;;  %v306_v29 = vld [vmem:[%s3988_s15 + $0x1c8] sm:$0xff]  ;;  %303 = vst [vmem:[%s3993_s16 + $0xd8] sm:$0xff] %v302_v27 }
  0x27   : > { %305 = vst [vmem:[%s3993_s16 + $0xe0] sm:$0xff] %v304_v28  ;;  %307 = vst [vmem:[%s3993_s16 + $0xe8] sm:$0xff] %v306_v29  ;;  %v308_v30 = vld [vmem:[%s3988_s15 + $0x1e0] sm:$0xff]  ;;  %v310_v31 = vld [vmem:[%s3988_s15 + $0x1e8] sm:$0xff] }
  0x28   : > { %v312_v32 = vld [vmem:[%s3988_s15 + $0x200] sm:$0xff]  ;;  %309 = vst [vmem:[%s3993_s16 + $0xf0] sm:$0xff] %v308_v30  ;;  %311 = vst [vmem:[%s3993_s16 + $0xf8] sm:$0xff] %v310_v31  ;;  %v314_v33 = vld [vmem:[%s3988_s15 + $0x208] sm:$0xff] }
  0x29   : > { %313 = vst [vmem:[%s3993_s16 + $0x100] sm:$0xff] %v312_v32  ;;  %v316_v34 = vld [vmem:[%s3988_s15 + $0x220] sm:$0xff]  ;;  %v318_v35 = vld [vmem:[%s3988_s15 + $0x228] sm:$0xff]  ;;  %315 = vst [vmem:[%s3993_s16 + $0x108] sm:$0xff] %v314_v33 }
  0x2a   : > { %317 = vst [vmem:[%s3993_s16 + $0x110] sm:$0xff] %v316_v34  ;;  %319 = vst [vmem:[%s3993_s16 + $0x118] sm:$0xff] %v318_v35  ;;  %v320_v36 = vld [vmem:[%s3988_s15 + $0x240] sm:$0xff]  ;;  %v322_v37 = vld [vmem:[%s3988_s15 + $0x248] sm:$0xff] }
  0x2b   : > { %v324_v38 = vld [vmem:[%s3988_s15 + $0x260] sm:$0xff]  ;;  %321 = vst [vmem:[%s3993_s16 + $0x120] sm:$0xff] %v320_v36  ;;  %323 = vst [vmem:[%s3993_s16 + $0x128] sm:$0xff] %v322_v37  ;;  %v326_v39 = vld [vmem:[%s3988_s15 + $0x268] sm:$0xff] }
  0x2c   : > { %325 = vst [vmem:[%s3993_s16 + $0x130] sm:$0xff] %v324_v38  ;;  %v328_v40 = vld [vmem:[%s3988_s15 + $0x280] sm:$0xff]  ;;  %v330_v41 = vld [vmem:[%s3988_s15 + $0x288] sm:$0xff]  ;;  %327 = vst [vmem:[%s3993_s16 + $0x138] sm:$0xff] %v326_v39 }
  0x2d   : > { %329 = vst [vmem:[%s3993_s16 + $0x140] sm:$0xff] %v328_v40  ;;  %331 = vst [vmem:[%s3993_s16 + $0x148] sm:$0xff] %v330_v41  ;;  %v332_v42 = vld [vmem:[%s3988_s15 + $0x2a0] sm:$0xff]  ;;  %v334_v43 = vld [vmem:[%s3988_s15 + $0x2a8] sm:$0xff] }
  0x2e   : > { %v336_v44 = vld [vmem:[%s3988_s15 + $0x2c0] sm:$0xff]  ;;  %333 = vst [vmem:[%s3993_s16 + $0x150] sm:$0xff] %v332_v42  ;;  %335 = vst [vmem:[%s3993_s16 + $0x158] sm:$0xff] %v334_v43  ;;  %v338_v45 = vld [vmem:[%s3988_s15 + $0x2c8] sm:$0xff] }
  0x2f   : > { %337 = vst [vmem:[%s3993_s16 + $0x160] sm:$0xff] %v336_v44  ;;  %v340_v46 = vld [vmem:[%s3988_s15 + $0x2e0] sm:$0xff]  ;;  %v342_v47 = vld [vmem:[%s3988_s15 + $0x2e8] sm:$0xff]  ;;  %339 = vst [vmem:[%s3993_s16 + $0x168] sm:$0xff] %v338_v45 }
  0x30   : > { %341 = vst [vmem:[%s3993_s16 + $0x170] sm:$0xff] %v340_v46  ;;  %343 = vst [vmem:[%s3993_s16 + $0x178] sm:$0xff] %v342_v47  ;;  %v344_v48 = vld [vmem:[%s3988_s15 + $0x300] sm:$0xff]  ;;  %v346_v49 = vld [vmem:[%s3988_s15 + $0x308] sm:$0xff] }
  0x31   : > { %v348_v50 = vld [vmem:[%s3988_s15 + $0x320] sm:$0xff]  ;;  %345 = vst [vmem:[%s3993_s16 + $0x180] sm:$0xff] %v344_v48  ;;  %347 = vst [vmem:[%s3993_s16 + $0x188] sm:$0xff] %v346_v49  ;;  %v350_v51 = vld [vmem:[%s3988_s15 + $0x328] sm:$0xff] }
  0x32   : > { %349 = vst [vmem:[%s3993_s16 + $0x190] sm:$0xff] %v348_v50  ;;  %v352_v52 = vld [vmem:[%s3988_s15 + $0x340] sm:$0xff]  ;;  %v354_v53 = vld [vmem:[%s3988_s15 + $0x348] sm:$0xff]  ;;  %351 = vst [vmem:[%s3993_s16 + $0x198] sm:$0xff] %v350_v51 }
  0x33   : > { %353 = vst [vmem:[%s3993_s16 + $0x1a0] sm:$0xff] %v352_v52  ;;  %355 = vst [vmem:[%s3993_s16 + $0x1a8] sm:$0xff] %v354_v53  ;;  %v356_v54 = vld [vmem:[%s3988_s15 + $0x360] sm:$0xff]  ;;  %v358_v55 = vld [vmem:[%s3988_s15 + $0x368] sm:$0xff] }
  0x34   : > { %v360_v56 = vld [vmem:[%s3988_s15 + $0x380] sm:$0xff]  ;;  %357 = vst [vmem:[%s3993_s16 + $0x1b0] sm:$0xff] %v356_v54  ;;  %359 = vst [vmem:[%s3993_s16 + $0x1b8] sm:$0xff] %v358_v55  ;;  %v362_v57 = vld [vmem:[%s3988_s15 + $0x388] sm:$0xff] }
  0x35   : > { %361 = vst [vmem:[%s3993_s16 + $0x1c0] sm:$0xff] %v360_v56  ;;  %v364_v58 = vld [vmem:[%s3988_s15 + $0x3a0] sm:$0xff]  ;;  %v366_v59 = vld [vmem:[%s3988_s15 + $0x3a8] sm:$0xff]  ;;  %363 = vst [vmem:[%s3993_s16 + $0x1c8] sm:$0xff] %v362_v57 }
  0x36   : > { %365 = vst [vmem:[%s3993_s16 + $0x1d0] sm:$0xff] %v364_v58  ;;  %367 = vst [vmem:[%s3993_s16 + $0x1d8] sm:$0xff] %v366_v59  ;;  %v368_v60 = vld [vmem:[%s3988_s15 + $0x3c0] sm:$0xff]  ;;  %v370_v61 = vld [vmem:[%s3988_s15 + $0x3c8] sm:$0xff] }
  0x37   : > { %v372_v62 = vld [vmem:[%s3988_s15 + $0x3e0] sm:$0xff]  ;;  %369 = vst [vmem:[%s3993_s16 + $0x1e0] sm:$0xff] %v368_v60  ;;  %371 = vst [vmem:[%s3993_s16 + $0x1e8] sm:$0xff] %v370_v61  ;;  %v374_v63 = vld [vmem:[%s3988_s15 + $0x3e8] sm:$0xff] }
  0x38   : > { %373 = vst [vmem:[%s3993_s16 + $0x1f0] sm:$0xff] %v372_v62  ;;  %v376_v0 = vld [vmem:[%s3988_s15 + $0x400] sm:$0xff]  ;;  %v378_v1 = vld [vmem:[%s3988_s15 + $0x408] sm:$0xff]  ;;  %375 = vst [vmem:[%s3993_s16 + $0x1f8] sm:$0xff] %v374_v63 }
  0x39   : > { %377 = vst [vmem:[%s3993_s16 + $0x200] sm:$0xff] %v376_v0  ;;  %379 = vst [vmem:[%s3993_s16 + $0x208] sm:$0xff] %v378_v1  ;;  %v380_v2 = vld [vmem:[%s3988_s15 + $0x420] sm:$0xff]  ;;  %v382_v3 = vld [vmem:[%s3988_s15 + $0x428] sm:$0xff] }
  0x3a   : > { %v384_v4 = vld [vmem:[%s3988_s15 + $0x440] sm:$0xff]  ;;  %381 = vst [vmem:[%s3993_s16 + $0x210] sm:$0xff] %v380_v2  ;;  %383 = vst [vmem:[%s3993_s16 + $0x218] sm:$0xff] %v382_v3  ;;  %v386_v5 = vld [vmem:[%s3988_s15 + $0x448] sm:$0xff] }
  0x3b   : > { %385 = vst [vmem:[%s3993_s16 + $0x220] sm:$0xff] %v384_v4  ;;  %v388_v6 = vld [vmem:[%s3988_s15 + $0x460] sm:$0xff]  ;;  %v390_v7 = vld [vmem:[%s3988_s15 + $0x468] sm:$0xff]  ;;  %387 = vst [vmem:[%s3993_s16 + $0x228] sm:$0xff] %v386_v5 }
  0x3c   : > { %389 = vst [vmem:[%s3993_s16 + $0x230] sm:$0xff] %v388_v6  ;;  %391 = vst [vmem:[%s3993_s16 + $0x238] sm:$0xff] %v390_v7  ;;  %v392_v8 = vld [vmem:[%s3988_s15 + $0x480] sm:$0xff]  ;;  %v394_v9 = vld [vmem:[%s3988_s15 + $0x488] sm:$0xff] }
  0x3d   : > { %v396_v10 = vld [vmem:[%s3988_s15 + $0x4a0] sm:$0xff]  ;;  %393 = vst [vmem:[%s3993_s16 + $0x240] sm:$0xff] %v392_v8  ;;  %395 = vst [vmem:[%s3993_s16 + $0x248] sm:$0xff] %v394_v9  ;;  %v398_v11 = vld [vmem:[%s3988_s15 + $0x4a8] sm:$0xff] }
  0x3e   : > { %397 = vst [vmem:[%s3993_s16 + $0x250] sm:$0xff] %v396_v10  ;;  %v400_v12 = vld [vmem:[%s3988_s15 + $0x4c0] sm:$0xff]  ;;  %v402_v13 = vld [vmem:[%s3988_s15 + $0x4c8] sm:$0xff]  ;;  %399 = vst [vmem:[%s3993_s16 + $0x258] sm:$0xff] %v398_v11 }
  0x3f   : > { %401 = vst [vmem:[%s3993_s16 + $0x260] sm:$0xff] %v400_v12  ;;  %403 = vst [vmem:[%s3993_s16 + $0x268] sm:$0xff] %v402_v13  ;;  %v404_v14 = vld [vmem:[%s3988_s15 + $0x4e0] sm:$0xff]  ;;  %v406_v15 = vld [vmem:[%s3988_s15 + $0x4e8] sm:$0xff] }
  0x40   : > { %v408_v16 = vld [vmem:[%s3988_s15 + $0x500] sm:$0xff]  ;;  %405 = vst [vmem:[%s3993_s16 + $0x270] sm:$0xff] %v404_v14  ;;  %407 = vst [vmem:[%s3993_s16 + $0x278] sm:$0xff] %v406_v15  ;;  %v410_v17 = vld [vmem:[%s3988_s15 + $0x508] sm:$0xff] }
  0x41   : > { %409 = vst [vmem:[%s3993_s16 + $0x280] sm:$0xff] %v408_v16  ;;  %v412_v18 = vld [vmem:[%s3988_s15 + $0x520] sm:$0xff]  ;;  %v414_v19 = vld [vmem:[%s3988_s15 + $0x528] sm:$0xff]  ;;  %411 = vst [vmem:[%s3993_s16 + $0x288] sm:$0xff] %v410_v17 }
  0x42   : > { %413 = vst [vmem:[%s3993_s16 + $0x290] sm:$0xff] %v412_v18  ;;  %415 = vst [vmem:[%s3993_s16 + $0x298] sm:$0xff] %v414_v19  ;;  %v416_v20 = vld [vmem:[%s3988_s15 + $0x540] sm:$0xff]  ;;  %v418_v21 = vld [vmem:[%s3988_s15 + $0x548] sm:$0xff] }
  0x43   : > { %v420_v22 = vld [vmem:[%s3988_s15 + $0x560] sm:$0xff]  ;;  %417 = vst [vmem:[%s3993_s16 + $0x2a0] sm:$0xff] %v416_v20  ;;  %419 = vst [vmem:[%s3993_s16 + $0x2a8] sm:$0xff] %v418_v21  ;;  %v422_v23 = vld [vmem:[%s3988_s15 + $0x568] sm:$0xff] }
  0x44   : > { %421 = vst [vmem:[%s3993_s16 + $0x2b0] sm:$0xff] %v420_v22  ;;  %v424_v24 = vld [vmem:[%s3988_s15 + $0x580] sm:$0xff]  ;;  %v426_v25 = vld [vmem:[%s3988_s15 + $0x588] sm:$0xff]  ;;  %423 = vst [vmem:[%s3993_s16 + $0x2b8] sm:$0xff] %v422_v23 }
  0x45   : > { %425 = vst [vmem:[%s3993_s16 + $0x2c0] sm:$0xff] %v424_v24  ;;  %427 = vst [vmem:[%s3993_s16 + $0x2c8] sm:$0xff] %v426_v25  ;;  %v428_v26 = vld [vmem:[%s3988_s15 + $0x5a0] sm:$0xff]  ;;  %v430_v27 = vld [vmem:[%s3988_s15 + $0x5a8] sm:$0xff] }
  0x46   : > { %v432_v28 = vld [vmem:[%s3988_s15 + $0x5c0] sm:$0xff]  ;;  %429 = vst [vmem:[%s3993_s16 + $0x2d0] sm:$0xff] %v428_v26  ;;  %431 = vst [vmem:[%s3993_s16 + $0x2d8] sm:$0xff] %v430_v27  ;;  %v434_v29 = vld [vmem:[%s3988_s15 + $0x5c8] sm:$0xff] }
  0x47   : > { %433 = vst [vmem:[%s3993_s16 + $0x2e0] sm:$0xff] %v432_v28  ;;  %v436_v30 = vld [vmem:[%s3988_s15 + $0x5e0] sm:$0xff]  ;;  %v438_v31 = vld [vmem:[%s3988_s15 + $0x5e8] sm:$0xff]  ;;  %435 = vst [vmem:[%s3993_s16 + $0x2e8] sm:$0xff] %v434_v29 }
  0x48   : > { %437 = vst [vmem:[%s3993_s16 + $0x2f0] sm:$0xff] %v436_v30  ;;  %439 = vst [vmem:[%s3993_s16 + $0x2f8] sm:$0xff] %v438_v31  ;;  %v440_v32 = vld [vmem:[%s3988_s15 + $0x600] sm:$0xff]  ;;  %v442_v33 = vld [vmem:[%s3988_s15 + $0x608] sm:$0xff] }
  0x49   : > { %v444_v34 = vld [vmem:[%s3988_s15 + $0x620] sm:$0xff]  ;;  %441 = vst [vmem:[%s3993_s16 + $0x300] sm:$0xff] %v440_v32  ;;  %443 = vst [vmem:[%s3993_s16 + $0x308] sm:$0xff] %v442_v33  ;;  %v446_v35 = vld [vmem:[%s3988_s15 + $0x628] sm:$0xff] }
  0x4a   : > { %445 = vst [vmem:[%s3993_s16 + $0x310] sm:$0xff] %v444_v34  ;;  %v448_v36 = vld [vmem:[%s3988_s15 + $0x640] sm:$0xff]  ;;  %v450_v37 = vld [vmem:[%s3988_s15 + $0x648] sm:$0xff]  ;;  %447 = vst [vmem:[%s3993_s16 + $0x318] sm:$0xff] %v446_v35 }
  0x4b   : > { %449 = vst [vmem:[%s3993_s16 + $0x320] sm:$0xff] %v448_v36  ;;  %451 = vst [vmem:[%s3993_s16 + $0x328] sm:$0xff] %v450_v37  ;;  %v452_v38 = vld [vmem:[%s3988_s15 + $0x660] sm:$0xff]  ;;  %v454_v39 = vld [vmem:[%s3988_s15 + $0x668] sm:$0xff] }
  0x4c   : > { %v456_v40 = vld [vmem:[%s3988_s15 + $0x680] sm:$0xff]  ;;  %453 = vst [vmem:[%s3993_s16 + $0x330] sm:$0xff] %v452_v38  ;;  %455 = vst [vmem:[%s3993_s16 + $0x338] sm:$0xff] %v454_v39  ;;  %v458_v41 = vld [vmem:[%s3988_s15 + $0x688] sm:$0xff] }
  0x4d   : > { %457 = vst [vmem:[%s3993_s16 + $0x340] sm:$0xff] %v456_v40  ;;  %v460_v42 = vld [vmem:[%s3988_s15 + $0x6a0] sm:$0xff]  ;;  %v462_v43 = vld [vmem:[%s3988_s15 + $0x6a8] sm:$0xff]  ;;  %459 = vst [vmem:[%s3993_s16 + $0x348] sm:$0xff] %v458_v41 }
  0x4e   : > { %461 = vst [vmem:[%s3993_s16 + $0x350] sm:$0xff] %v460_v42  ;;  %463 = vst [vmem:[%s3993_s16 + $0x358] sm:$0xff] %v462_v43  ;;  %v464_v44 = vld [vmem:[%s3988_s15 + $0x6c0] sm:$0xff]  ;;  %v466_v45 = vld [vmem:[%s3988_s15 + $0x6c8] sm:$0xff] }
  0x4f   : > { %v468_v46 = vld [vmem:[%s3988_s15 + $0x6e0] sm:$0xff]  ;;  %465 = vst [vmem:[%s3993_s16 + $0x360] sm:$0xff] %v464_v44  ;;  %467 = vst [vmem:[%s3993_s16 + $0x368] sm:$0xff] %v466_v45  ;;  %v470_v47 = vld [vmem:[%s3988_s15 + $0x6e8] sm:$0xff] }
  0x50   : > { %469 = vst [vmem:[%s3993_s16 + $0x370] sm:$0xff] %v468_v46  ;;  %v472_v48 = vld [vmem:[%s3988_s15 + $0x700] sm:$0xff]  ;;  %v474_v49 = vld [vmem:[%s3988_s15 + $0x708] sm:$0xff]  ;;  %471 = vst [vmem:[%s3993_s16 + $0x378] sm:$0xff] %v470_v47 }
  0x51   : > { %473 = vst [vmem:[%s3993_s16 + $0x380] sm:$0xff] %v472_v48  ;;  %475 = vst [vmem:[%s3993_s16 + $0x388] sm:$0xff] %v474_v49  ;;  %v476_v50 = vld [vmem:[%s3988_s15 + $0x720] sm:$0xff]  ;;  %v478_v51 = vld [vmem:[%s3988_s15 + $0x728] sm:$0xff] }
  0x52   : > { %v480_v52 = vld [vmem:[%s3988_s15 + $0x740] sm:$0xff]  ;;  %477 = vst [vmem:[%s3993_s16 + $0x390] sm:$0xff] %v476_v50  ;;  %479 = vst [vmem:[%s3993_s16 + $0x398] sm:$0xff] %v478_v51  ;;  %v482_v53 = vld [vmem:[%s3988_s15 + $0x748] sm:$0xff] }
  0x53   : > { %481 = vst [vmem:[%s3993_s16 + $0x3a0] sm:$0xff] %v480_v52  ;;  %v484_v54 = vld [vmem:[%s3988_s15 + $0x760] sm:$0xff]  ;;  %v486_v55 = vld [vmem:[%s3988_s15 + $0x768] sm:$0xff]  ;;  %483 = vst [vmem:[%s3993_s16 + $0x3a8] sm:$0xff] %v482_v53 }
  0x54   : > { %485 = vst [vmem:[%s3993_s16 + $0x3b0] sm:$0xff] %v484_v54  ;;  %487 = vst [vmem:[%s3993_s16 + $0x3b8] sm:$0xff] %v486_v55  ;;  %v488_v56 = vld [vmem:[%s3988_s15 + $0x780] sm:$0xff]  ;;  %v490_v57 = vld [vmem:[%s3988_s15 + $0x788] sm:$0xff] }
  0x55   : > { %v492_v58 = vld [vmem:[%s3988_s15 + $0x7a0] sm:$0xff]  ;;  %489 = vst [vmem:[%s3993_s16 + $0x3c0] sm:$0xff] %v488_v56  ;;  %491 = vst [vmem:[%s3993_s16 + $0x3c8] sm:$0xff] %v490_v57  ;;  %v494_v59 = vld [vmem:[%s3988_s15 + $0x7a8] sm:$0xff] }
  0x56   : > { %493 = vst [vmem:[%s3993_s16 + $0x3d0] sm:$0xff] %v492_v58  ;;  %v496_v60 = vld [vmem:[%s3988_s15 + $0x7c0] sm:$0xff]  ;;  %v498_v61 = vld [vmem:[%s3988_s15 + $0x7c8] sm:$0xff]  ;;  %495 = vst [vmem:[%s3993_s16 + $0x3d8] sm:$0xff] %v494_v59 }
  0x57   : > { %497 = vst [vmem:[%s3993_s16 + $0x3e0] sm:$0xff] %v496_v60  ;;  %499 = vst [vmem:[%s3993_s16 + $0x3e8] sm:$0xff] %v498_v61  ;;  %v500_v62 = vld [vmem:[%s3988_s15 + $0x7e0] sm:$0xff]  ;;  %v502_v63 = vld [vmem:[%s3988_s15 + $0x7e8] sm:$0xff] }
  0x58   : > { %v504_v0 = vld [vmem:[%s3988_s15 + $0x800] sm:$0xff]  ;;  %501 = vst [vmem:[%s3993_s16 + $0x3f0] sm:$0xff] %v500_v62  ;;  %503 = vst [vmem:[%s3993_s16 + $0x3f8] sm:$0xff] %v502_v63  ;;  %v506_v1 = vld [vmem:[%s3988_s15 + $0x808] sm:$0xff] }
  0x59   : > { %505 = vst [vmem:[%s3993_s16 + $0x400] sm:$0xff] %v504_v0  ;;  %v508_v2 = vld [vmem:[%s3988_s15 + $0x820] sm:$0xff]  ;;  %v510_v3 = vld [vmem:[%s3988_s15 + $0x828] sm:$0xff]  ;;  %507 = vst [vmem:[%s3993_s16 + $0x408] sm:$0xff] %v506_v1 }
  0x5a   : > { %509 = vst [vmem:[%s3993_s16 + $0x410] sm:$0xff] %v508_v2  ;;  %511 = vst [vmem:[%s3993_s16 + $0x418] sm:$0xff] %v510_v3  ;;  %v512_v4 = vld [vmem:[%s3988_s15 + $0x840] sm:$0xff]  ;;  %v514_v5 = vld [vmem:[%s3988_s15 + $0x848] sm:$0xff] }
  0x5b   : > { %v516_v6 = vld [vmem:[%s3988_s15 + $0x860] sm:$0xff]  ;;  %513 = vst [vmem:[%s3993_s16 + $0x420] sm:$0xff] %v512_v4  ;;  %515 = vst [vmem:[%s3993_s16 + $0x428] sm:$0xff] %v514_v5  ;;  %v518_v7 = vld [vmem:[%s3988_s15 + $0x868] sm:$0xff] }
  0x5c   : > { %517 = vst [vmem:[%s3993_s16 + $0x430] sm:$0xff] %v516_v6  ;;  %v520_v8 = vld [vmem:[%s3988_s15 + $0x880] sm:$0xff]  ;;  %v522_v9 = vld [vmem:[%s3988_s15 + $0x888] sm:$0xff]  ;;  %519 = vst [vmem:[%s3993_s16 + $0x438] sm:$0xff] %v518_v7 }
  0x5d   : > { %521 = vst [vmem:[%s3993_s16 + $0x440] sm:$0xff] %v520_v8  ;;  %523 = vst [vmem:[%s3993_s16 + $0x448] sm:$0xff] %v522_v9  ;;  %v524_v10 = vld [vmem:[%s3988_s15 + $0x8a0] sm:$0xff]  ;;  %v526_v11 = vld [vmem:[%s3988_s15 + $0x8a8] sm:$0xff] }
  0x5e   : > { %v528_v12 = vld [vmem:[%s3988_s15 + $0x8c0] sm:$0xff]  ;;  %525 = vst [vmem:[%s3993_s16 + $0x450] sm:$0xff] %v524_v10  ;;  %527 = vst [vmem:[%s3993_s16 + $0x458] sm:$0xff] %v526_v11  ;;  %v530_v13 = vld [vmem:[%s3988_s15 + $0x8c8] sm:$0xff] }
  0x5f   : > { %529 = vst [vmem:[%s3993_s16 + $0x460] sm:$0xff] %v528_v12  ;;  %v532_v14 = vld [vmem:[%s3988_s15 + $0x8e0] sm:$0xff]  ;;  %v534_v15 = vld [vmem:[%s3988_s15 + $0x8e8] sm:$0xff]  ;;  %531 = vst [vmem:[%s3993_s16 + $0x468] sm:$0xff] %v530_v13 }
  0x60   : > { %533 = vst [vmem:[%s3993_s16 + $0x470] sm:$0xff] %v532_v14  ;;  %535 = vst [vmem:[%s3993_s16 + $0x478] sm:$0xff] %v534_v15  ;;  %v536_v16 = vld [vmem:[%s3988_s15 + $0x900] sm:$0xff]  ;;  %v538_v17 = vld [vmem:[%s3988_s15 + $0x908] sm:$0xff] }
  0x61   : > { %v540_v18 = vld [vmem:[%s3988_s15 + $0x920] sm:$0xff]  ;;  %537 = vst [vmem:[%s3993_s16 + $0x480] sm:$0xff] %v536_v16  ;;  %539 = vst [vmem:[%s3993_s16 + $0x488] sm:$0xff] %v538_v17  ;;  %v542_v19 = vld [vmem:[%s3988_s15 + $0x928] sm:$0xff] }
  0x62   : > { %541 = vst [vmem:[%s3993_s16 + $0x490] sm:$0xff] %v540_v18  ;;  %v544_v20 = vld [vmem:[%s3988_s15 + $0x940] sm:$0xff]  ;;  %v546_v21 = vld [vmem:[%s3988_s15 + $0x948] sm:$0xff]  ;;  %543 = vst [vmem:[%s3993_s16 + $0x498] sm:$0xff] %v542_v19 }
  0x63   : > { %545 = vst [vmem:[%s3993_s16 + $0x4a0] sm:$0xff] %v544_v20  ;;  %547 = vst [vmem:[%s3993_s16 + $0x4a8] sm:$0xff] %v546_v21  ;;  %v548_v22 = vld [vmem:[%s3988_s15 + $0x960] sm:$0xff]  ;;  %v550_v23 = vld [vmem:[%s3988_s15 + $0x968] sm:$0xff] }
  0x64   : > { %v552_v24 = vld [vmem:[%s3988_s15 + $0x980] sm:$0xff]  ;;  %549 = vst [vmem:[%s3993_s16 + $0x4b0] sm:$0xff] %v548_v22  ;;  %551 = vst [vmem:[%s3993_s16 + $0x4b8] sm:$0xff] %v550_v23  ;;  %v554_v25 = vld [vmem:[%s3988_s15 + $0x988] sm:$0xff] }
  0x65   : > { %553 = vst [vmem:[%s3993_s16 + $0x4c0] sm:$0xff] %v552_v24  ;;  %v556_v26 = vld [vmem:[%s3988_s15 + $0x9a0] sm:$0xff]  ;;  %v558_v27 = vld [vmem:[%s3988_s15 + $0x9a8] sm:$0xff]  ;;  %555 = vst [vmem:[%s3993_s16 + $0x4c8] sm:$0xff] %v554_v25 }
  0x66   : > { %557 = vst [vmem:[%s3993_s16 + $0x4d0] sm:$0xff] %v556_v26  ;;  %559 = vst [vmem:[%s3993_s16 + $0x4d8] sm:$0xff] %v558_v27  ;;  %v560_v28 = vld [vmem:[%s3988_s15 + $0x9c0] sm:$0xff]  ;;  %v562_v29 = vld [vmem:[%s3988_s15 + $0x9c8] sm:$0xff] }
  0x67   : > { %v564_v30 = vld [vmem:[%s3988_s15 + $0x9e0] sm:$0xff]  ;;  %561 = vst [vmem:[%s3993_s16 + $0x4e0] sm:$0xff] %v560_v28  ;;  %563 = vst [vmem:[%s3993_s16 + $0x4e8] sm:$0xff] %v562_v29  ;;  %v566_v31 = vld [vmem:[%s3988_s15 + $0x9e8] sm:$0xff] }
  0x68   : > { %565 = vst [vmem:[%s3993_s16 + $0x4f0] sm:$0xff] %v564_v30  ;;  %v568_v32 = vld [vmem:[%s3988_s15 + $0xa00] sm:$0xff]  ;;  %v570_v33 = vld [vmem:[%s3988_s15 + $0xa08] sm:$0xff]  ;;  %567 = vst [vmem:[%s3993_s16 + $0x4f8] sm:$0xff] %v566_v31 }
  0x69   : > { %569 = vst [vmem:[%s3993_s16 + $0x500] sm:$0xff] %v568_v32  ;;  %571 = vst [vmem:[%s3993_s16 + $0x508] sm:$0xff] %v570_v33  ;;  %v572_v34 = vld [vmem:[%s3988_s15 + $0xa20] sm:$0xff]  ;;  %v574_v35 = vld [vmem:[%s3988_s15 + $0xa28] sm:$0xff] }
  0x6a   : > { %v576_v36 = vld [vmem:[%s3988_s15 + $0xa40] sm:$0xff]  ;;  %573 = vst [vmem:[%s3993_s16 + $0x510] sm:$0xff] %v572_v34  ;;  %575 = vst [vmem:[%s3993_s16 + $0x518] sm:$0xff] %v574_v35  ;;  %v578_v37 = vld [vmem:[%s3988_s15 + $0xa48] sm:$0xff] }
  0x6b   : > { %577 = vst [vmem:[%s3993_s16 + $0x520] sm:$0xff] %v576_v36  ;;  %v580_v38 = vld [vmem:[%s3988_s15 + $0xa60] sm:$0xff]  ;;  %v582_v39 = vld [vmem:[%s3988_s15 + $0xa68] sm:$0xff]  ;;  %579 = vst [vmem:[%s3993_s16 + $0x528] sm:$0xff] %v578_v37 }
  0x6c   : > { %581 = vst [vmem:[%s3993_s16 + $0x530] sm:$0xff] %v580_v38  ;;  %583 = vst [vmem:[%s3993_s16 + $0x538] sm:$0xff] %v582_v39  ;;  %v584_v40 = vld [vmem:[%s3988_s15 + $0xa80] sm:$0xff]  ;;  %v586_v41 = vld [vmem:[%s3988_s15 + $0xa88] sm:$0xff] }
  0x6d   : > { %v588_v42 = vld [vmem:[%s3988_s15 + $0xaa0] sm:$0xff]  ;;  %585 = vst [vmem:[%s3993_s16 + $0x540] sm:$0xff] %v584_v40  ;;  %587 = vst [vmem:[%s3993_s16 + $0x548] sm:$0xff] %v586_v41  ;;  %v590_v43 = vld [vmem:[%s3988_s15 + $0xaa8] sm:$0xff] }
  0x6e   : > { %589 = vst [vmem:[%s3993_s16 + $0x550] sm:$0xff] %v588_v42  ;;  %v592_v44 = vld [vmem:[%s3988_s15 + $0xac0] sm:$0xff]  ;;  %v594_v45 = vld [vmem:[%s3988_s15 + $0xac8] sm:$0xff]  ;;  %591 = vst [vmem:[%s3993_s16 + $0x558] sm:$0xff] %v590_v43 }
  0x6f   : > { %593 = vst [vmem:[%s3993_s16 + $0x560] sm:$0xff] %v592_v44  ;;  %595 = vst [vmem:[%s3993_s16 + $0x568] sm:$0xff] %v594_v45  ;;  %v596_v46 = vld [vmem:[%s3988_s15 + $0xae0] sm:$0xff]  ;;  %v598_v47 = vld [vmem:[%s3988_s15 + $0xae8] sm:$0xff] }
  0x70   : > { %v600_v48 = vld [vmem:[%s3988_s15 + $0xb00] sm:$0xff]  ;;  %597 = vst [vmem:[%s3993_s16 + $0x570] sm:$0xff] %v596_v46  ;;  %599 = vst [vmem:[%s3993_s16 + $0x578] sm:$0xff] %v598_v47  ;;  %v602_v49 = vld [vmem:[%s3988_s15 + $0xb08] sm:$0xff] }
  0x71   : > { %601 = vst [vmem:[%s3993_s16 + $0x580] sm:$0xff] %v600_v48  ;;  %v604_v50 = vld [vmem:[%s3988_s15 + $0xb20] sm:$0xff]  ;;  %v606_v51 = vld [vmem:[%s3988_s15 + $0xb28] sm:$0xff]  ;;  %603 = vst [vmem:[%s3993_s16 + $0x588] sm:$0xff] %v602_v49 }
  0x72   : > { %605 = vst [vmem:[%s3993_s16 + $0x590] sm:$0xff] %v604_v50  ;;  %607 = vst [vmem:[%s3993_s16 + $0x598] sm:$0xff] %v606_v51  ;;  %v608_v52 = vld [vmem:[%s3988_s15 + $0xb40] sm:$0xff]  ;;  %v610_v53 = vld [vmem:[%s3988_s15 + $0xb48] sm:$0xff] }
  0x73   : > { %v612_v54 = vld [vmem:[%s3988_s15 + $0xb60] sm:$0xff]  ;;  %609 = vst [vmem:[%s3993_s16 + $0x5a0] sm:$0xff] %v608_v52  ;;  %611 = vst [vmem:[%s3993_s16 + $0x5a8] sm:$0xff] %v610_v53  ;;  %v614_v55 = vld [vmem:[%s3988_s15 + $0xb68] sm:$0xff] }
  0x74   : > { %613 = vst [vmem:[%s3993_s16 + $0x5b0] sm:$0xff] %v612_v54  ;;  %v616_v56 = vld [vmem:[%s3988_s15 + $0xb80] sm:$0xff]  ;;  %v618_v57 = vld [vmem:[%s3988_s15 + $0xb88] sm:$0xff]  ;;  %615 = vst [vmem:[%s3993_s16 + $0x5b8] sm:$0xff] %v614_v55 }
  0x75   : > { %617 = vst [vmem:[%s3993_s16 + $0x5c0] sm:$0xff] %v616_v56  ;;  %619 = vst [vmem:[%s3993_s16 + $0x5c8] sm:$0xff] %v618_v57  ;;  %v620_v58 = vld [vmem:[%s3988_s15 + $0xba0] sm:$0xff]  ;;  %v622_v59 = vld [vmem:[%s3988_s15 + $0xba8] sm:$0xff] }
  0x76   : > { %v624_v60 = vld [vmem:[%s3988_s15 + $0xbc0] sm:$0xff]  ;;  %621 = vst [vmem:[%s3993_s16 + $0x5d0] sm:$0xff] %v620_v58  ;;  %623 = vst [vmem:[%s3993_s16 + $0x5d8] sm:$0xff] %v622_v59  ;;  %v626_v61 = vld [vmem:[%s3988_s15 + $0xbc8] sm:$0xff] }
  0x77   : > { %625 = vst [vmem:[%s3993_s16 + $0x5e0] sm:$0xff] %v624_v60  ;;  %v628_v62 = vld [vmem:[%s3988_s15 + $0xbe0] sm:$0xff]  ;;  %v630_v63 = vld [vmem:[%s3988_s15 + $0xbe8] sm:$0xff]  ;;  %627 = vst [vmem:[%s3993_s16 + $0x5e8] sm:$0xff] %v626_v61 }
  0x78   : > { %629 = vst [vmem:[%s3993_s16 + $0x5f0] sm:$0xff] %v628_v62  ;;  %631 = vst [vmem:[%s3993_s16 + $0x5f8] sm:$0xff] %v630_v63  ;;  %v632_v0 = vld [vmem:[%s3988_s15 + $0xc00] sm:$0xff]  ;;  %v634_v1 = vld [vmem:[%s3988_s15 + $0xc08] sm:$0xff] }
  0x79   : > { %v636_v2 = vld [vmem:[%s3988_s15 + $0xc20] sm:$0xff]  ;;  %633 = vst [vmem:[%s3993_s16 + $0x600] sm:$0xff] %v632_v0  ;;  %635 = vst [vmem:[%s3993_s16 + $0x608] sm:$0xff] %v634_v1  ;;  %v638_v3 = vld [vmem:[%s3988_s15 + $0xc28] sm:$0xff] }
  0x7a   : > { %637 = vst [vmem:[%s3993_s16 + $0x610] sm:$0xff] %v636_v2  ;;  %v640_v4 = vld [vmem:[%s3988_s15 + $0xc40] sm:$0xff]  ;;  %v642_v5 = vld [vmem:[%s3988_s15 + $0xc48] sm:$0xff]  ;;  %639 = vst [vmem:[%s3993_s16 + $0x618] sm:$0xff] %v638_v3 }
  0x7b   : > { %641 = vst [vmem:[%s3993_s16 + $0x620] sm:$0xff] %v640_v4  ;;  %643 = vst [vmem:[%s3993_s16 + $0x628] sm:$0xff] %v642_v5  ;;  %v644_v6 = vld [vmem:[%s3988_s15 + $0xc60] sm:$0xff]  ;;  %v646_v7 = vld [vmem:[%s3988_s15 + $0xc68] sm:$0xff] }
  0x7c   : > { %v648_v8 = vld [vmem:[%s3988_s15 + $0xc80] sm:$0xff]  ;;  %645 = vst [vmem:[%s3993_s16 + $0x630] sm:$0xff] %v644_v6  ;;  %647 = vst [vmem:[%s3993_s16 + $0x638] sm:$0xff] %v646_v7  ;;  %v650_v9 = vld [vmem:[%s3988_s15 + $0xc88] sm:$0xff] }
  0x7d   : > { %649 = vst [vmem:[%s3993_s16 + $0x640] sm:$0xff] %v648_v8  ;;  %v652_v10 = vld [vmem:[%s3988_s15 + $0xca0] sm:$0xff]  ;;  %v654_v11 = vld [vmem:[%s3988_s15 + $0xca8] sm:$0xff]  ;;  %651 = vst [vmem:[%s3993_s16 + $0x648] sm:$0xff] %v650_v9 }
  0x7e   : > { %653 = vst [vmem:[%s3993_s16 + $0x650] sm:$0xff] %v652_v10  ;;  %655 = vst [vmem:[%s3993_s16 + $0x658] sm:$0xff] %v654_v11  ;;  %v656_v12 = vld [vmem:[%s3988_s15 + $0xcc0] sm:$0xff]  ;;  %v658_v13 = vld [vmem:[%s3988_s15 + $0xcc8] sm:$0xff] }
  0x7f   : > { %v660_v14 = vld [vmem:[%s3988_s15 + $0xce0] sm:$0xff]  ;;  %657 = vst [vmem:[%s3993_s16 + $0x660] sm:$0xff] %v656_v12  ;;  %659 = vst [vmem:[%s3993_s16 + $0x668] sm:$0xff] %v658_v13  ;;  %v662_v15 = vld [vmem:[%s3988_s15 + $0xce8] sm:$0xff] }
  0x80   : > { %661 = vst [vmem:[%s3993_s16 + $0x670] sm:$0xff] %v660_v14  ;;  %v664_v16 = vld [vmem:[%s3988_s15 + $0xd00] sm:$0xff]  ;;  %v666_v17 = vld [vmem:[%s3988_s15 + $0xd08] sm:$0xff]  ;;  %663 = vst [vmem:[%s3993_s16 + $0x678] sm:$0xff] %v662_v15 }
  0x81   : > { %665 = vst [vmem:[%s3993_s16 + $0x680] sm:$0xff] %v664_v16  ;;  %667 = vst [vmem:[%s3993_s16 + $0x688] sm:$0xff] %v666_v17  ;;  %v668_v18 = vld [vmem:[%s3988_s15 + $0xd20] sm:$0xff]  ;;  %v670_v19 = vld [vmem:[%s3988_s15 + $0xd28] sm:$0xff] }
  0x82   : > { %v672_v20 = vld [vmem:[%s3988_s15 + $0xd40] sm:$0xff]  ;;  %669 = vst [vmem:[%s3993_s16 + $0x690] sm:$0xff] %v668_v18  ;;  %671 = vst [vmem:[%s3993_s16 + $0x698] sm:$0xff] %v670_v19  ;;  %v674_v21 = vld [vmem:[%s3988_s15 + $0xd48] sm:$0xff] }
  0x83   : > { %673 = vst [vmem:[%s3993_s16 + $0x6a0] sm:$0xff] %v672_v20  ;;  %v676_v22 = vld [vmem:[%s3988_s15 + $0xd60] sm:$0xff]  ;;  %v678_v23 = vld [vmem:[%s3988_s15 + $0xd68] sm:$0xff]  ;;  %675 = vst [vmem:[%s3993_s16 + $0x6a8] sm:$0xff] %v674_v21 }
  0x84   : > { %677 = vst [vmem:[%s3993_s16 + $0x6b0] sm:$0xff] %v676_v22  ;;  %679 = vst [vmem:[%s3993_s16 + $0x6b8] sm:$0xff] %v678_v23  ;;  %v680_v24 = vld [vmem:[%s3988_s15 + $0xd80] sm:$0xff]  ;;  %v682_v25 = vld [vmem:[%s3988_s15 + $0xd88] sm:$0xff] }
  0x85   : > { %v684_v26 = vld [vmem:[%s3988_s15 + $0xda0] sm:$0xff]  ;;  %681 = vst [vmem:[%s3993_s16 + $0x6c0] sm:$0xff] %v680_v24  ;;  %683 = vst [vmem:[%s3993_s16 + $0x6c8] sm:$0xff] %v682_v25  ;;  %v686_v27 = vld [vmem:[%s3988_s15 + $0xda8] sm:$0xff] }
  0x86   : > { %685 = vst [vmem:[%s3993_s16 + $0x6d0] sm:$0xff] %v684_v26  ;;  %v688_v28 = vld [vmem:[%s3988_s15 + $0xdc0] sm:$0xff]  ;;  %v690_v29 = vld [vmem:[%s3988_s15 + $0xdc8] sm:$0xff]  ;;  %687 = vst [vmem:[%s3993_s16 + $0x6d8] sm:$0xff] %v686_v27 }
  0x87   : > { %689 = vst [vmem:[%s3993_s16 + $0x6e0] sm:$0xff] %v688_v28  ;;  %691 = vst [vmem:[%s3993_s16 + $0x6e8] sm:$0xff] %v690_v29  ;;  %v692_v30 = vld [vmem:[%s3988_s15 + $0xde0] sm:$0xff]  ;;  %v694_v31 = vld [vmem:[%s3988_s15 + $0xde8] sm:$0xff] }
  0x88   : > { %v696_v32 = vld [vmem:[%s3988_s15 + $0xe00] sm:$0xff]  ;;  %693 = vst [vmem:[%s3993_s16 + $0x6f0] sm:$0xff] %v692_v30  ;;  %695 = vst [vmem:[%s3993_s16 + $0x6f8] sm:$0xff] %v694_v31  ;;  %v698_v33 = vld [vmem:[%s3988_s15 + $0xe08] sm:$0xff] }
  0x89   : > { %697 = vst [vmem:[%s3993_s16 + $0x700] sm:$0xff] %v696_v32  ;;  %v700_v34 = vld [vmem:[%s3988_s15 + $0xe20] sm:$0xff]  ;;  %v702_v35 = vld [vmem:[%s3988_s15 + $0xe28] sm:$0xff]  ;;  %699 = vst [vmem:[%s3993_s16 + $0x708] sm:$0xff] %v698_v33 }
  0x8a   : > { %701 = vst [vmem:[%s3993_s16 + $0x710] sm:$0xff] %v700_v34  ;;  %703 = vst [vmem:[%s3993_s16 + $0x718] sm:$0xff] %v702_v35  ;;  %v704_v36 = vld [vmem:[%s3988_s15 + $0xe40] sm:$0xff]  ;;  %v706_v37 = vld [vmem:[%s3988_s15 + $0xe48] sm:$0xff] }
  0x8b   : > { %v708_v38 = vld [vmem:[%s3988_s15 + $0xe60] sm:$0xff]  ;;  %705 = vst [vmem:[%s3993_s16 + $0x720] sm:$0xff] %v704_v36  ;;  %707 = vst [vmem:[%s3993_s16 + $0x728] sm:$0xff] %v706_v37  ;;  %v710_v39 = vld [vmem:[%s3988_s15 + $0xe68] sm:$0xff] }
  0x8c   : > { %709 = vst [vmem:[%s3993_s16 + $0x730] sm:$0xff] %v708_v38  ;;  %v712_v40 = vld [vmem:[%s3988_s15 + $0xe80] sm:$0xff]  ;;  %v714_v41 = vld [vmem:[%s3988_s15 + $0xe88] sm:$0xff]  ;;  %711 = vst [vmem:[%s3993_s16 + $0x738] sm:$0xff] %v710_v39 }
  0x8d   : > { %713 = vst [vmem:[%s3993_s16 + $0x740] sm:$0xff] %v712_v40  ;;  %715 = vst [vmem:[%s3993_s16 + $0x748] sm:$0xff] %v714_v41  ;;  %v716_v42 = vld [vmem:[%s3988_s15 + $0xea0] sm:$0xff]  ;;  %v718_v43 = vld [vmem:[%s3988_s15 + $0xea8] sm:$0xff] }
  0x8e   : > { %v720_v44 = vld [vmem:[%s3988_s15 + $0xec0] sm:$0xff]  ;;  %717 = vst [vmem:[%s3993_s16 + $0x750] sm:$0xff] %v716_v42  ;;  %719 = vst [vmem:[%s3993_s16 + $0x758] sm:$0xff] %v718_v43  ;;  %v722_v45 = vld [vmem:[%s3988_s15 + $0xec8] sm:$0xff] }
  0x8f   : > { %721 = vst [vmem:[%s3993_s16 + $0x760] sm:$0xff] %v720_v44  ;;  %v724_v46 = vld [vmem:[%s3988_s15 + $0xee0] sm:$0xff]  ;;  %v726_v47 = vld [vmem:[%s3988_s15 + $0xee8] sm:$0xff]  ;;  %723 = vst [vmem:[%s3993_s16 + $0x768] sm:$0xff] %v722_v45 }
  0x90   : > { %725 = vst [vmem:[%s3993_s16 + $0x770] sm:$0xff] %v724_v46  ;;  %727 = vst [vmem:[%s3993_s16 + $0x778] sm:$0xff] %v726_v47  ;;  %v728_v48 = vld [vmem:[%s3988_s15 + $0xf00] sm:$0xff]  ;;  %v730_v49 = vld [vmem:[%s3988_s15 + $0xf08] sm:$0xff] }
  0x91   : > { %v732_v50 = vld [vmem:[%s3988_s15 + $0xf20] sm:$0xff]  ;;  %729 = vst [vmem:[%s3993_s16 + $0x780] sm:$0xff] %v728_v48  ;;  %731 = vst [vmem:[%s3993_s16 + $0x788] sm:$0xff] %v730_v49  ;;  %v734_v51 = vld [vmem:[%s3988_s15 + $0xf28] sm:$0xff] }
  0x92   : > { %733 = vst [vmem:[%s3993_s16 + $0x790] sm:$0xff] %v732_v50  ;;  %v736_v52 = vld [vmem:[%s3988_s15 + $0xf40] sm:$0xff]  ;;  %v738_v53 = vld [vmem:[%s3988_s15 + $0xf48] sm:$0xff]  ;;  %735 = vst [vmem:[%s3993_s16 + $0x798] sm:$0xff] %v734_v51 }
  0x93   : > { %737 = vst [vmem:[%s3993_s16 + $0x7a0] sm:$0xff] %v736_v52  ;;  %739 = vst [vmem:[%s3993_s16 + $0x7a8] sm:$0xff] %v738_v53  ;;  %v740_v54 = vld [vmem:[%s3988_s15 + $0xf60] sm:$0xff]  ;;  %v742_v55 = vld [vmem:[%s3988_s15 + $0xf68] sm:$0xff] }
  0x94   : > { %v744_v56 = vld [vmem:[%s3988_s15 + $0xf80] sm:$0xff]  ;;  %741 = vst [vmem:[%s3993_s16 + $0x7b0] sm:$0xff] %v740_v54  ;;  %743 = vst [vmem:[%s3993_s16 + $0x7b8] sm:$0xff] %v742_v55  ;;  %v746_v57 = vld [vmem:[%s3988_s15 + $0xf88] sm:$0xff] }
  0x95   : > { %745 = vst [vmem:[%s3993_s16 + $0x7c0] sm:$0xff] %v744_v56  ;;  %v748_v58 = vld [vmem:[%s3988_s15 + $0xfa0] sm:$0xff]  ;;  %v750_v59 = vld [vmem:[%s3988_s15 + $0xfa8] sm:$0xff]  ;;  %747 = vst [vmem:[%s3993_s16 + $0x7c8] sm:$0xff] %v746_v57 }
  0x96   : > { %749 = vst [vmem:[%s3993_s16 + $0x7d0] sm:$0xff] %v748_v58  ;;  %751 = vst [vmem:[%s3993_s16 + $0x7d8] sm:$0xff] %v750_v59  ;;  %v752_v60 = vld [vmem:[%s3988_s15 + $0xfc0] sm:$0xff]  ;;  %v754_v61 = vld [vmem:[%s3988_s15 + $0xfc8] sm:$0xff] }
  0x97   : > { %v756_v62 = vld [vmem:[%s3988_s15 + $0xfe0] sm:$0xff]  ;;  %753 = vst [vmem:[%s3993_s16 + $0x7e0] sm:$0xff] %v752_v60  ;;  %755 = vst [vmem:[%s3993_s16 + $0x7e8] sm:$0xff] %v754_v61  ;;  %v758_v63 = vld [vmem:[%s3988_s15 + $0xfe8] sm:$0xff] }
  0x98   : > { %757 = vst [vmem:[%s3993_s16 + $0x7f0] sm:$0xff] %v756_v62  ;;  %759 = vst [vmem:[%s3993_s16 + $0x7f8] sm:$0xff] %v758_v63 }
  0x99 PF: > { %p3102_p7 = scmp.ge.s32.totalorder %s3893_s24, 1  ;;  %p788_p8 = scmp.lt.s32.totalorder %s3893_s24, 9 }
  0x9b   : > { %p789_p9 = pnand %p3102_p7, %p788_p8 }
  0x9c   : > { %s795_s17 = sand.u32 (!%p789_p9), 1, %s3869_s18   ;;  %s3104_s27 = sshll.u32 (!%p789_p9), %s3877_s20, 3 }
  0x9d   : > { %792 = sbr.rel (%p789_p9) target bundleno = 670 (0x29e), region = 59  ;;  %s3103_s28 = sshll.u32 (!%p789_p9), %s795_s17, 11 }
  0x9e   : > { %p849_p10 = scmp.lt.s32.totalorder (!%p789_p9), %s3104_s27, 31  ;;  %s3105_s29 = sshll.u32 (!%p789_p9), %s3881_s21, 2 }
  0x9f   : > { %p858_p11 = scmp.lt.s32.totalorder (!%p789_p9), %s3105_s29, 7  ;;  %s4535_s8 = scalar_lea.vmem (!%p789_p9), [#allocation2], %s3103_s28 }
  0xa0   : > { %p3110_p12 = scmp.ne.s32.totalorder (!%p789_p9), %s3877_s20, 0 }
  0xa4   : > { %s4895_s27 = smov (!%p849_p10, %s3104_s27), 31  ;;  %s4897_s29 = smov (!%p858_p11, %s3105_s29), 7 }
  0xa5   : > { %s860_s18 = scalar_lea.vmem %s4877_s2, %s4897_s29  ;;  %s865_s12 = scalar_lea.vmem %s4878_s3, %s4897_s29  ;;  %v3895_v0 = vmov (!%p3110_p12), 0.0  }
  0xa6   : > { %s870_s15 = scalar_lea.vmem %s4879_s4, %s4897_s29  ;;  %s3109_s16 = sshll.u32 %s4897_s29, 1 }
  0xa7   : > { %s4533_s7 = scalar_lea.vmem %s4880_s5, %s3109_s16  ;;  %885 = sbr.rel (%p3110_p12) target bundleno = 174 (0xae), region = 67 }
  0xa8   : > { %886 = vst [vmem:[%s4533_s7] sm:$0xff] (!%p3110_p12), %v3895_v0 }
  0xae PF: > { %v3454_v1 = vld [vmem:[%s4535_s8 + $0x4] ss:$16 sps:$4 sm:$0xff]   ;;  %v3456_v2 = vld [vmem:[%s4535_s8 + $0xc] ss:$16 sps:$4 sm:$0xff]   ;;  %v3458_v3 = vld [vmem:[%s4535_s8] ss:$16 sps:$4 sm:$0xff]   ;;  %v1150_v39 = vlaneseq  ;;  %s4881_s10 = scalar_lea.vmem %s4875_s0, %s4895_s27 }
  0xaf   : > { %2483 = vmatprep.subr.bf16.mxu0 %v3454_v1  ;;  %v3459_v4 = vld [vmem:[%s4535_s8 + $0x8] ss:$16 sps:$4 sm:$0xff]   ;;  %2647 = vmatprep.subr.bf16.mxu1 %v3456_v2  ;;  %v3460_v5 = vld [vmem:[%s4535_s8 + $0x24] ss:$16 sps:$4 sm:$0xff]   ;;  %v3462_v6 = vld [vmem:[%s4535_s8 + $0x2c] ss:$16 sps:$4 sm:$0xff]  }
  0xb0   : > { %2484 = vmatpush1.bf16.msra.mxu0 %v3458_v3  ;;  %2648 = vmatpush1.bf16.msra.mxu1 %v3459_v4  ;;  %v3464_v7 = vld [vmem:[%s4535_s8 + $0x20] ss:$16 sps:$4 sm:$0xff]   ;;  %v3465_v8 = vld [vmem:[%s4535_s8 + $0x28] ss:$16 sps:$4 sm:$0xff]   ;;  %v3466_v9 = vld [vmem:[%s4535_s8 + $0x44] ss:$16 sps:$4 sm:$0xff]  }
  0xb1   : > { %2485 = vmatprep.subr.bf16.mxu0 %v3460_v5  ;;  %2649 = vmatprep.subr.bf16.mxu1 %v3462_v6  ;;  %v3468_v10 = vld [vmem:[%s4535_s8 + $0x4c] ss:$16 sps:$4 sm:$0xff]   ;;  %v3470_v11 = vld [vmem:[%s4535_s8 + $0x40] ss:$16 sps:$4 sm:$0xff]   ;;  %v3471_v12 = vld [vmem:[%s4535_s8 + $0x48] ss:$16 sps:$4 sm:$0xff]  }
  0xb2   : > { %v3472_v13 = vld [vmem:[%s4535_s8 + $0x64] ss:$16 sps:$4 sm:$0xff]   ;;  %v3474_v14 = vld [vmem:[%s4535_s8 + $0x6c] ss:$16 sps:$4 sm:$0xff]   ;;  %v3476_v15 = vld [vmem:[%s4535_s8 + $0x60] ss:$16 sps:$4 sm:$0xff]  }
  0xb3   : > { %v3477_v16 = vld [vmem:[%s4535_s8 + $0x68] ss:$16 sps:$4 sm:$0xff]   ;;  %v3478_v17 = vld [vmem:[%s4535_s8 + $0x84] ss:$16 sps:$4 sm:$0xff]   ;;  %v3480_v18 = vld [vmem:[%s4535_s8 + $0x8c] ss:$16 sps:$4 sm:$0xff]  }
  0xb4   : > { %2486 = vmatpush1.bf16.msra.mxu0 %v3464_v7  ;;  %2650 = vmatpush1.bf16.msra.mxu1 %v3465_v8  ;;  %v3482_v19 = vld [vmem:[%s4535_s8 + $0x80] ss:$16 sps:$4 sm:$0xff]   ;;  %v3483_v20 = vld [vmem:[%s4535_s8 + $0x88] ss:$16 sps:$4 sm:$0xff]   ;;  %v3484_v21 = vld [vmem:[%s4535_s8 + $0xa4] ss:$16 sps:$4 sm:$0xff]  }
  0xb5   : > { %2487 = vmatprep.subr.bf16.mxu0 %v3466_v9  ;;  %2651 = vmatprep.subr.bf16.mxu1 %v3468_v10  ;;  %v3486_v22 = vld [vmem:[%s4535_s8 + $0xac] ss:$16 sps:$4 sm:$0xff]   ;;  %v3488_v23 = vld [vmem:[%s4535_s8 + $0xa0] ss:$16 sps:$4 sm:$0xff]   ;;  %v3489_v24 = vld [vmem:[%s4535_s8 + $0xa8] ss:$16 sps:$4 sm:$0xff]  }
  0xb6   : > { %v3490_v25 = vld [vmem:[%s4535_s8 + $0xc4] ss:$16 sps:$4 sm:$0xff]   ;;  %v3492_v26 = vld [vmem:[%s4535_s8 + $0xcc] ss:$16 sps:$4 sm:$0xff]   ;;  %v3494_v27 = vld [vmem:[%s4535_s8 + $0xc0] ss:$16 sps:$4 sm:$0xff]  }
  0xb7   : > { %v3495_v28 = vld [vmem:[%s4535_s8 + $0xc8] ss:$16 sps:$4 sm:$0xff]   ;;  %v3496_v29 = vld [vmem:[%s4535_s8 + $0xe4] ss:$16 sps:$4 sm:$0xff]   ;;  %v3498_v30 = vld [vmem:[%s4535_s8 + $0xec] ss:$16 sps:$4 sm:$0xff]  }
  0xb8   : > { %2488 = vmatpush1.bf16.msra.mxu0 %v3470_v11  ;;  %2652 = vmatpush1.bf16.msra.mxu1 %v3471_v12  ;;  %v3500_v31 = vld [vmem:[%s4535_s8 + $0xe0] ss:$16 sps:$4 sm:$0xff]   ;;  %v3501_v32 = vld [vmem:[%s4535_s8 + $0xe8] ss:$16 sps:$4 sm:$0xff]   ;;  %v3502_v33 = vld [vmem:[%s4535_s8 + $0x104] ss:$16 sps:$4 sm:$0xff]  }
  0xb9   : > { %2489 = vmatprep.subr.bf16.mxu0 %v3472_v13  ;;  %2653 = vmatprep.subr.bf16.mxu1 %v3474_v14  ;;  %v3504_v34 = vld [vmem:[%s4535_s8 + $0x10c] ss:$16 sps:$4 sm:$0xff]   ;;  %v3506_v35 = vld [vmem:[%s4535_s8 + $0x100] ss:$16 sps:$4 sm:$0xff]   ;;  %v3507_v36 = vld [vmem:[%s4535_s8 + $0x108] ss:$16 sps:$4 sm:$0xff]  }
  0xba   : > { %v3896_v37 = vmov 1966171168   ;;  %v3508_v40 = vld [vmem:[%s4535_s8 + $0x124] ss:$16 sps:$4 sm:$0xff]   ;;  %v3510_v41 = vld [vmem:[%s4535_s8 + $0x12c] ss:$16 sps:$4 sm:$0xff]  }
  0xbb   : > { %v1148_v38 = vunpack.c.l.s4 %v3896_v37  ;;  %v3512_v42 = vld [vmem:[%s4535_s8 + $0x120] ss:$16 sps:$4 sm:$0xff]   ;;  %v4578_v44 = vshrl.u32 %v1150_v39, 7  ;;  %v3513_v45 = vld [vmem:[%s4535_s8 + $0x128] ss:$16 sps:$4 sm:$0xff]   ;;  %p3367_p13 = scmp.ne.s32.totalorder %s3877_s20, 3 }
  0xbc   : > { %2490 = vmatpush1.bf16.msra.mxu0 %v3476_v15  ;;  %2654 = vmatpush1.bf16.msra.mxu1 %v3477_v16  ;;  %v3514_v46 = vld [vmem:[%s4535_s8 + $0x144] ss:$16 sps:$4 sm:$0xff]   ;;  %v3516_v47 = vld [vmem:[%s4535_s8 + $0x14c] ss:$16 sps:$4 sm:$0xff]   ;;  %v3518_v48 = vld [vmem:[%s4535_s8 + $0x140] ss:$16 sps:$4 sm:$0xff]  }
  0xbd   : > { %2491 = vmatprep.subr.bf16.mxu0 %v3478_v17  ;;  %2655 = vmatprep.subr.bf16.mxu1 %v3480_v18  ;;  %v1149_v43 = vunpack.c.0.s8 %v1148_v38  ;;  %v3519_v49 = vld [vmem:[%s4535_s8 + $0x148] ss:$16 sps:$4 sm:$0xff]   ;;  %v3520_v51 = vld [vmem:[%s4535_s8 + $0x164] ss:$16 sps:$4 sm:$0xff]   ;;  %v3522_v52 = vld [vmem:[%s4535_s8 + $0x16c] ss:$16 sps:$4 sm:$0xff]  }
  0xbe   : > { %v888_v53 = vld [vmem:[%s4881_s10] sm:$0xff]  ;;  %v3525_v56 = vld [vmem:[%s4535_s8 + $0x168] ss:$16 sps:$4 sm:$0xff]   ;;  %v3528_v58 = vld [vmem:[%s4535_s8 + $0x18c] ss:$16 sps:$4 sm:$0xff]  }
  0xbf   : > { %v4586_v50 = vsub.s32 %v1149_v43, %v4578_v44  ;;  %v3524_v54 = vld [vmem:[%s4535_s8 + $0x160] ss:$16 sps:$4 sm:$0xff]   ;;  %v3526_v57 = vld [vmem:[%s4535_s8 + $0x184] ss:$16 sps:$4 sm:$0xff]   ;;  %v3531_v62 = vld [vmem:[%s4535_s8 + $0x188] ss:$16 sps:$4 sm:$0xff]   ;;  %v1146_v10 = vcombine.high %v888_v53, %v888_v53 }
  0xc0   : > { %2492 = vmatpush1.bf16.msra.mxu0 %v3482_v19  ;;  %2656 = vmatpush1.bf16.msra.mxu1 %v3483_v20  ;;  %v3530_v60 = vld [vmem:[%s4535_s8 + $0x180] ss:$16 sps:$4 sm:$0xff]   ;;  %v3532_v63 = vld [vmem:[%s4535_s8 + $0x1a4] ss:$16 sps:$4 sm:$0xff]   ;;  %v3534_v0 = vld [vmem:[%s4535_s8 + $0x1ac] ss:$16 sps:$4 sm:$0xff]  }
  0xc1   : > { %2493 = vmatprep.subr.bf16.mxu0 %v3484_v21  ;;  %2657 = vmatprep.subr.bf16.mxu1 %v3486_v22  ;;  %v1153_v55 = vrot.slane %v888_v53, %v4586_v50  ;;  %v3536_v1 = vld [vmem:[%s4535_s8 + $0x1a0] ss:$16 sps:$4 sm:$0xff]   ;;  %v3537_v2 = vld [vmem:[%s4535_s8 + $0x1a8] ss:$16 sps:$4 sm:$0xff]   ;;  %v3538_v3 = vld [vmem:[%s4535_s8 + $0x1c4] ss:$16 sps:$4 sm:$0xff]   ;;  %v1160_v14 = vrot.slane %v1146_v10, %v4586_v50 }
  0xc2   : > { %v3540_v4 = vld [vmem:[%s4535_s8 + $0x1cc] ss:$16 sps:$4 sm:$0xff]   ;;  %v3542_v5 = vld [vmem:[%s4535_s8 + $0x1c0] ss:$16 sps:$4 sm:$0xff]   ;;  %v3543_v6 = vld [vmem:[%s4535_s8 + $0x1c8] ss:$16 sps:$4 sm:$0xff]  }
  0xc3   : > { %v1161_v59 = vcombine.high %v1153_v55, %v1153_v55  ;;  %v3544_v7 = vld [vmem:[%s4535_s8 + $0x1e4] ss:$16 sps:$4 sm:$0xff]   ;;  %v3546_v8 = vld [vmem:[%s4535_s8 + $0x1ec] ss:$16 sps:$4 sm:$0xff]   ;;  %v3548_v9 = vld [vmem:[%s4535_s8 + $0x1e0] ss:$16 sps:$4 sm:$0xff]   ;;  %v4620_v16 = vrot.slane %v1153_v55, %v4586_v50  ;;  %v1162_v17 = vcombine.high %v1160_v14, %v1160_v14  ;;  %v4629_v22 = vrot.slane %v1160_v14, %v4586_v50 }
  0xc4   : > { %2494 = vmatpush1.bf16.msra.mxu0 %v3488_v23  ;;  %2658 = vmatpush1.bf16.msra.mxu1 %v3489_v24  ;;  %v3549_v11 = vld [vmem:[%s4535_s8 + $0x1e8] ss:$16 sps:$4 sm:$0xff]   ;;  %v3552_v12 = vld [vmem:[%s4535_s8 + $0x204] ss:$16 sps:$4 sm:$0xff]   ;;  %v3555_v13 = vld [vmem:[%s4535_s8 + $0x20c] ss:$16 sps:$4 sm:$0xff]  }
  0xc5   : > { %2495 = vmatprep.subr.bf16.mxu0 %v3490_v25  ;;  %2659 = vmatprep.subr.bf16.mxu1 %v3492_v26  ;;  %v1183_v61 = vrot.slane %v1161_v59, %v4586_v50  ;;  %v3550_v15 = vld [vmem:[%s4535_s8 + $0x200] ss:$16 sps:$4 sm:$0xff]   ;;  %v3553_v18 = vld [vmem:[%s4535_s8 + $0x208] ss:$16 sps:$4 sm:$0xff]   ;;  %v3558_v19 = vld [vmem:[%s4535_s8 + $0x224] ss:$16 sps:$4 sm:$0xff]   ;;  %v4626_v21 = vrot.slane %v1162_v17, %v4586_v50 }
  0xc6   : > { %v3561_v20 = vld [vmem:[%s4535_s8 + $0x22c] ss:$16 sps:$4 sm:$0xff]   ;;  %v3556_v24 = vld [vmem:[%s4535_s8 + $0x220] ss:$16 sps:$4 sm:$0xff]   ;;  %v3559_v25 = vld [vmem:[%s4535_s8 + $0x228] ss:$16 sps:$4 sm:$0xff]  }
  0xc7   : > { %2515 = vmatprep.mubr.bf16.mxu0 %v1183_v61  ;;  %2679 = vmatprep.mubr.bf16.mxu1 %v1183_v61  ;;  %v1193_v23 = vcombine.high %v1183_v61, %v1183_v61  ;;  %v3564_v26 = vld [vmem:[%s4535_s8 + $0x244] ss:$16 sps:$4 sm:$0xff]   ;;  %v3577_v37 = vld [vmem:[%s4535_s8 + $0x288] ss:$16 sps:$4 sm:$0xff]   ;;  %v3585_v39 = vld [vmem:[%s4535_s8 + $0x2ac] ss:$16 sps:$4 sm:$0xff]  }
  0xc8   : > { %2496 = vmatpush1.bf16.msra.mxu0 %v3494_v27  ;;  %2660 = vmatpush1.bf16.msra.mxu1 %v3495_v28  ;;  %v3567_v27 = vld [vmem:[%s4535_s8 + $0x24c] ss:$16 sps:$4 sm:$0xff]   ;;  %v3562_v28 = vld [vmem:[%s4535_s8 + $0x240] ss:$16 sps:$4 sm:$0xff]   ;;  %v3582_v38 = vld [vmem:[%s4535_s8 + $0x2a4] ss:$16 sps:$4 sm:$0xff]  }
  0xc9   : > { %2497 = vmatprep.subr.bf16.mxu0 %v3496_v29  ;;  %2661 = vmatprep.subr.bf16.mxu1 %v3498_v30  ;;  %v3565_v29 = vld [vmem:[%s4535_s8 + $0x248] ss:$16 sps:$4 sm:$0xff]   ;;  %v3570_v30 = vld [vmem:[%s4535_s8 + $0x264] ss:$16 sps:$4 sm:$0xff]   ;;  %v3591_v43 = vld [vmem:[%s4535_s8 + $0x2cc] ss:$16 sps:$4 sm:$0xff]  }
  0xca   : > { %v3595_v50 = vld [vmem:[%s4535_s8 + $0x2e8] ss:$16 sps:$4 sm:$0xff]   ;;  %v3598_v53 = vld [vmem:[%s4535_s8 + $0x300] ss:$16 sps:$4 sm:$0xff]   ;;  %v3606_v55 = vld [vmem:[%s4535_s8 + $0x324] ss:$16 sps:$4 sm:$0xff]  }
  0xcb   : > { %v3612_v59 = vld [vmem:[%s4535_s8 + $0x344] ss:$16 sps:$4 sm:$0xff]   ;;  %v3610_v61 = vld [vmem:[%s4535_s8 + $0x340] ss:$16 sps:$4 sm:$0xff]   ;;  %v3631_v10 = vld [vmem:[%s4535_s8 + $0x3a8] ss:$16 sps:$4 sm:$0xff]  }
  0xcc   : > { %2498 = vmatpush1.bf16.msra.mxu0 %v3500_v31  ;;  %2662 = vmatpush1.bf16.msra.mxu1 %v3501_v32  ;;  %v3573_v31 = vld [vmem:[%s4535_s8 + $0x26c] ss:$16 sps:$4 sm:$0xff]   ;;  %v3568_v32 = vld [vmem:[%s4535_s8 + $0x260] ss:$16 sps:$4 sm:$0xff]   ;;  %v3637_v14 = vld [vmem:[%s4535_s8 + $0x3c8] ss:$16 sps:$4 sm:$0xff]  }
  0xcd   : > { %2499 = vmatprep.subr.bf16.mxu0 %v3502_v33  ;;  %2663 = vmatprep.subr.bf16.mxu1 %v3504_v34  ;;  %v3571_v33 = vld [vmem:[%s4535_s8 + $0x268] ss:$16 sps:$4 sm:$0xff]   ;;  %v3576_v34 = vld [vmem:[%s4535_s8 + $0x284] ss:$16 sps:$4 sm:$0xff]   ;;  %v3645_v17 = vld [vmem:[%s4535_s8 + $0x3ec] ss:$16 sps:$4 sm:$0xff]  }
  0xd0   : > { %2500 = vmatpush1.bf16.msra.mxu0 %v3506_v35  ;;  %2664 = vmatpush1.bf16.msra.mxu1 %v3507_v36  ;;  %v3579_v35 = vld [vmem:[%s4535_s8 + $0x28c] ss:$16 sps:$4 sm:$0xff]   ;;  %v3574_v36 = vld [vmem:[%s4535_s8 + $0x280] ss:$16 sps:$4 sm:$0xff]  }
  0xd1   : > { %2501 = vmatprep.subr.bf16.mxu0 %v3508_v40  ;;  %2665 = vmatprep.subr.bf16.mxu1 %v3510_v41  ;;  %v3580_v40 = vld [vmem:[%s4535_s8 + $0x2a0] ss:$16 sps:$4 sm:$0xff]   ;;  %v3583_v41 = vld [vmem:[%s4535_s8 + $0x2a8] ss:$16 sps:$4 sm:$0xff]  }
  0xd4   : > { %2502 = vmatpush1.bf16.msra.mxu0 %v3512_v42  ;;  %2666 = vmatpush1.bf16.msra.mxu1 %v3513_v45  ;;  %v3588_v42 = vld [vmem:[%s4535_s8 + $0x2c4] ss:$16 sps:$4 sm:$0xff]   ;;  %v3586_v45 = vld [vmem:[%s4535_s8 + $0x2c0] ss:$16 sps:$4 sm:$0xff]  }
  0xd5   : > { %2503 = vmatprep.subr.bf16.mxu0 %v3514_v46  ;;  %2667 = vmatprep.subr.bf16.mxu1 %v3516_v47  ;;  %v3589_v46 = vld [vmem:[%s4535_s8 + $0x2c8] ss:$16 sps:$4 sm:$0xff]   ;;  %v3594_v47 = vld [vmem:[%s4535_s8 + $0x2e4] ss:$16 sps:$4 sm:$0xff]  }
  0xd8   : > { %2504 = vmatpush1.bf16.msra.mxu0 %v3518_v48  ;;  %2668 = vmatpush1.bf16.msra.mxu1 %v3519_v49  ;;  %v3597_v48 = vld [vmem:[%s4535_s8 + $0x2ec] ss:$16 sps:$4 sm:$0xff]   ;;  %v3592_v49 = vld [vmem:[%s4535_s8 + $0x2e0] ss:$16 sps:$4 sm:$0xff]  }
  0xd9   : > { %2505 = vmatprep.subr.bf16.mxu0 %v3520_v51  ;;  %2669 = vmatprep.subr.bf16.mxu1 %v3522_v52  ;;  %v3600_v51 = vld [vmem:[%s4535_s8 + $0x304] ss:$16 sps:$4 sm:$0xff]   ;;  %v3603_v52 = vld [vmem:[%s4535_s8 + $0x30c] ss:$16 sps:$4 sm:$0xff]  }
  0xdc   : > { %2506 = vmatpush1.bf16.msra.mxu0 %v3524_v54  ;;  %2670 = vmatpush1.bf16.msra.mxu1 %v3525_v56  ;;  %v3601_v54 = vld [vmem:[%s4535_s8 + $0x308] ss:$16 sps:$4 sm:$0xff]   ;;  %v3609_v56 = vld [vmem:[%s4535_s8 + $0x32c] ss:$16 sps:$4 sm:$0xff]  }
  0xdd   : > { %2507 = vmatprep.subr.bf16.mxu0 %v3526_v57  ;;  %2671 = vmatprep.subr.bf16.mxu1 %v3528_v58  ;;  %v3604_v57 = vld [vmem:[%s4535_s8 + $0x320] ss:$16 sps:$4 sm:$0xff]   ;;  %v3607_v58 = vld [vmem:[%s4535_s8 + $0x328] ss:$16 sps:$4 sm:$0xff]  }
  0xe0   : > { %2508 = vmatpush1.bf16.msra.mxu0 %v3530_v60  ;;  %2672 = vmatpush1.bf16.msra.mxu1 %v3531_v62  ;;  %v3615_v60 = vld [vmem:[%s4535_s8 + $0x34c] ss:$16 sps:$4 sm:$0xff]   ;;  %v3613_v62 = vld [vmem:[%s4535_s8 + $0x348] ss:$16 sps:$4 sm:$0xff]  }
  0xe1   : > { %2509 = vmatprep.subr.bf16.mxu0 %v3532_v63  ;;  %2673 = vmatprep.subr.bf16.mxu1 %v3534_v0  ;;  %v3618_v63 = vld [vmem:[%s4535_s8 + $0x364] ss:$16 sps:$4 sm:$0xff]   ;;  %v3621_v0 = vld [vmem:[%s4535_s8 + $0x36c] ss:$16 sps:$4 sm:$0xff]  }
  0xe4   : > { %2510 = vmatpush1.bf16.msra.mxu0 %v3536_v1  ;;  %2674 = vmatpush1.bf16.msra.mxu1 %v3537_v2  ;;  %v3616_v1 = vld [vmem:[%s4535_s8 + $0x360] ss:$16 sps:$4 sm:$0xff]   ;;  %v3619_v2 = vld [vmem:[%s4535_s8 + $0x368] ss:$16 sps:$4 sm:$0xff]  }
  0xe5   : > { %2511 = vmatprep.subr.bf16.mxu0 %v3538_v3  ;;  %2675 = vmatprep.subr.bf16.mxu1 %v3540_v4  ;;  %v3624_v3 = vld [vmem:[%s4535_s8 + $0x384] ss:$16 sps:$4 sm:$0xff]   ;;  %v3627_v4 = vld [vmem:[%s4535_s8 + $0x38c] ss:$16 sps:$4 sm:$0xff]  }
  0xe8   : > { %2512 = vmatpush1.bf16.msra.mxu0 %v3542_v5  ;;  %2676 = vmatpush1.bf16.msra.mxu1 %v3543_v6  ;;  %v3622_v5 = vld [vmem:[%s4535_s8 + $0x380] ss:$16 sps:$4 sm:$0xff]   ;;  %v3625_v6 = vld [vmem:[%s4535_s8 + $0x388] ss:$16 sps:$4 sm:$0xff]  }
  0xe9   : > { %2513 = vmatprep.subr.bf16.mxu0 %v3544_v7  ;;  %2677 = vmatprep.subr.bf16.mxu1 %v3546_v8  ;;  %v3630_v7 = vld [vmem:[%s4535_s8 + $0x3a4] ss:$16 sps:$4 sm:$0xff]   ;;  %v3633_v8 = vld [vmem:[%s4535_s8 + $0x3ac] ss:$16 sps:$4 sm:$0xff]  }
  0xec   : > { %2514 = vmatpush1.bf16.msra.mxu0 %v3548_v9  ;;  %2678 = vmatpush1.bf16.msra.mxu1 %v3549_v11  ;;  %v3628_v9 = vld [vmem:[%s4535_s8 + $0x3a0] ss:$16 sps:$4 sm:$0xff]   ;;  %v3636_v11 = vld [vmem:[%s4535_s8 + $0x3c4] ss:$16 sps:$4 sm:$0xff]  }
  0xed   : > { %2524 = vmatprep.subr.bf16.mxu0 %v3552_v12  ;;  %2688 = vmatprep.subr.bf16.mxu1 %v3555_v13  ;;  %v3639_v12 = vld [vmem:[%s4535_s8 + $0x3cc] ss:$16 sps:$4 sm:$0xff]   ;;  %v3634_v13 = vld [vmem:[%s4535_s8 + $0x3c0] ss:$16 sps:$4 sm:$0xff]  }
  0xef   : > { %2516 = vmatmul.mubr.bf16.vlgmr.msra.gmra.mrb[0].mxu0 %v4620_v16  ;;  %2680 = vmatmul.mubr.bf16.vlgmr.msra.gmra.mrb[0].mxu1 %v4620_v16 }
  0xf0   : > { %2525 = vmatpush1.bf16.msra.mxu0 %v3550_v15  ;;  %2689 = vmatpush1.bf16.msra.mxu1 %v3553_v18  ;;  %v3642_v15 = vld [vmem:[%s4535_s8 + $0x3e4] ss:$16 sps:$4 sm:$0xff]   ;;  %v3640_v18 = vld [vmem:[%s4535_s8 + $0x3e0] ss:$16 sps:$4 sm:$0xff]  }
  0xf1   : > { %2526 = vmatprep.subr.bf16.mxu0 %v3558_v19  ;;  %2690 = vmatprep.subr.bf16.mxu1 %v3561_v20  ;;  %v3643_v19 = vld [vmem:[%s4535_s8 + $0x3e8] ss:$16 sps:$4 sm:$0xff]   ;;  %v3648_v20 = vld [vmem:[%s4535_s8 + $0x404] ss:$16 sps:$4 sm:$0xff]  }
  0xf2   : > { %2556 = vmatprep.mubr.bf16.mxu0 %v1193_v23  ;;  %2720 = vmatprep.mubr.bf16.mxu1 %v1193_v23  ;;  %v3651_v23 = vld [vmem:[%s4535_s8 + $0x40c] ss:$16 sps:$4 sm:$0xff]  }
  0xf4   : > { %2527 = vmatpush1.bf16.msra.mxu0 %v3556_v24  ;;  %2691 = vmatpush1.bf16.msra.mxu1 %v3559_v25  ;;  %v3646_v24 = vld [vmem:[%s4535_s8 + $0x400] ss:$16 sps:$4 sm:$0xff]   ;;  %v1191_v25 = vcombine.high %v4620_v16, %v4620_v16  ;;  %v3655_v16 = vld [vmem:[%s4535_s8 + $0x428] ss:$16 sps:$4 sm:$0xff]  }
  0xf5   : > { %2528 = vmatprep.subr.bf16.mxu0 %v3564_v26  ;;  %2692 = vmatprep.subr.bf16.mxu1 %v3567_v27  ;;  %v3649_v26 = vld [vmem:[%s4535_s8 + $0x408] ss:$16 sps:$4 sm:$0xff]   ;;  %v3654_v27 = vld [vmem:[%s4535_s8 + $0x424] ss:$16 sps:$4 sm:$0xff]  }
  0xf8   : > { %2529 = vmatpush1.bf16.msra.mxu0 %v3562_v28  ;;  %2693 = vmatpush1.bf16.msra.mxu1 %v3565_v29  ;;  %v3657_v28 = vld [vmem:[%s4535_s8 + $0x42c] ss:$16 sps:$4 sm:$0xff]   ;;  %v3652_v29 = vld [vmem:[%s4535_s8 + $0x420] ss:$16 sps:$4 sm:$0xff]  }
  0xf9   : > { %2530 = vmatprep.subr.bf16.mxu0 %v3570_v30  ;;  %2694 = vmatprep.subr.bf16.mxu1 %v3573_v31  ;;  %v3660_v30 = vld [vmem:[%s4535_s8 + $0x444] ss:$16 sps:$4 sm:$0xff]   ;;  %v3663_v31 = vld [vmem:[%s4535_s8 + $0x44c] ss:$16 sps:$4 sm:$0xff]  }
  0xfc   : > { %2531 = vmatpush1.bf16.msra.mxu0 %v3568_v32  ;;  %2695 = vmatpush1.bf16.msra.mxu1 %v3571_v33  ;;  %v3658_v32 = vld [vmem:[%s4535_s8 + $0x440] ss:$16 sps:$4 sm:$0xff]   ;;  %v3661_v33 = vld [vmem:[%s4535_s8 + $0x448] ss:$16 sps:$4 sm:$0xff]  }
  0xfd   : > { %2532 = vmatprep.subr.bf16.mxu0 %v3576_v34  ;;  %2696 = vmatprep.subr.bf16.mxu1 %v3579_v35  ;;  %v3666_v34 = vld [vmem:[%s4535_s8 + $0x464] ss:$16 sps:$4 sm:$0xff]   ;;  %v3669_v35 = vld [vmem:[%s4535_s8 + $0x46c] ss:$16 sps:$4 sm:$0xff]  }
 0x100   : > { %2533 = vmatpush1.bf16.msra.mxu0 %v3574_v36  ;;  %2697 = vmatpush1.bf16.msra.mxu1 %v3577_v37  ;;  %v3664_v36 = vld [vmem:[%s4535_s8 + $0x460] ss:$16 sps:$4 sm:$0xff]   ;;  %v3667_v37 = vld [vmem:[%s4535_s8 + $0x468] ss:$16 sps:$4 sm:$0xff]  }
 0x101   : > { %2534 = vmatprep.subr.bf16.mxu0 %v3582_v38  ;;  %2698 = vmatprep.subr.bf16.mxu1 %v3585_v39  ;;  %v3672_v38 = vld [vmem:[%s4535_s8 + $0x484] ss:$16 sps:$4 sm:$0xff]   ;;  %v3675_v39 = vld [vmem:[%s4535_s8 + $0x48c] ss:$16 sps:$4 sm:$0xff]  }
 0x104   : > { %2535 = vmatpush1.bf16.msra.mxu0 %v3580_v40  ;;  %2699 = vmatpush1.bf16.msra.mxu1 %v3583_v41  ;;  %v3670_v40 = vld [vmem:[%s4535_s8 + $0x480] ss:$16 sps:$4 sm:$0xff]   ;;  %v3673_v41 = vld [vmem:[%s4535_s8 + $0x488] ss:$16 sps:$4 sm:$0xff]  }
 0x105   : > { %2536 = vmatprep.subr.bf16.mxu0 %v3588_v42  ;;  %2700 = vmatprep.subr.bf16.mxu1 %v3591_v43  ;;  %v3678_v42 = vld [vmem:[%s4535_s8 + $0x4a4] ss:$16 sps:$4 sm:$0xff]   ;;  %v3681_v43 = vld [vmem:[%s4535_s8 + $0x4ac] ss:$16 sps:$4 sm:$0xff]  }
 0x108   : > { %2537 = vmatpush1.bf16.msra.mxu0 %v3586_v45  ;;  %2701 = vmatpush1.bf16.msra.mxu1 %v3589_v46  ;;  %v3676_v45 = vld [vmem:[%s4535_s8 + $0x4a0] ss:$16 sps:$4 sm:$0xff]   ;;  %v3679_v46 = vld [vmem:[%s4535_s8 + $0x4a8] ss:$16 sps:$4 sm:$0xff]  }
 0x109   : > { %2538 = vmatprep.subr.bf16.mxu0 %v3594_v47  ;;  %2702 = vmatprep.subr.bf16.mxu1 %v3597_v48  ;;  %v3684_v47 = vld [vmem:[%s4535_s8 + $0x4c4] ss:$16 sps:$4 sm:$0xff]   ;;  %v3687_v48 = vld [vmem:[%s4535_s8 + $0x4cc] ss:$16 sps:$4 sm:$0xff]  }
 0x10c   : > { %2539 = vmatpush1.bf16.msra.mxu0 %v3592_v49  ;;  %2703 = vmatpush1.bf16.msra.mxu1 %v3595_v50  ;;  %v3682_v49 = vld [vmem:[%s4535_s8 + $0x4c0] ss:$16 sps:$4 sm:$0xff]   ;;  %v3685_v50 = vld [vmem:[%s4535_s8 + $0x4c8] ss:$16 sps:$4 sm:$0xff]  }
 0x10d   : > { %2540 = vmatprep.subr.bf16.mxu0 %v3600_v51  ;;  %2704 = vmatprep.subr.bf16.mxu1 %v3603_v52  ;;  %v3690_v51 = vld [vmem:[%s4535_s8 + $0x4e4] ss:$16 sps:$4 sm:$0xff]   ;;  %v3693_v52 = vld [vmem:[%s4535_s8 + $0x4ec] ss:$16 sps:$4 sm:$0xff]  }
 0x110   : > { %2541 = vmatpush1.bf16.msra.mxu0 %v3598_v53  ;;  %2705 = vmatpush1.bf16.msra.mxu1 %v3601_v54  ;;  %v3688_v53 = vld [vmem:[%s4535_s8 + $0x4e0] ss:$16 sps:$4 sm:$0xff]   ;;  %v3691_v54 = vld [vmem:[%s4535_s8 + $0x4e8] ss:$16 sps:$4 sm:$0xff]  }
 0x111   : > { %2542 = vmatprep.subr.bf16.mxu0 %v3606_v55  ;;  %2706 = vmatprep.subr.bf16.mxu1 %v3609_v56  ;;  %v3696_v55 = vld [vmem:[%s4535_s8 + $0x504] ss:$16 sps:$4 sm:$0xff]   ;;  %v3699_v56 = vld [vmem:[%s4535_s8 + $0x50c] ss:$16 sps:$4 sm:$0xff]  }
 0x114   : > { %2543 = vmatpush1.bf16.msra.mxu0 %v3604_v57  ;;  %2707 = vmatpush1.bf16.msra.mxu1 %v3607_v58  ;;  %v3694_v57 = vld [vmem:[%s4535_s8 + $0x500] ss:$16 sps:$4 sm:$0xff]   ;;  %v3697_v58 = vld [vmem:[%s4535_s8 + $0x508] ss:$16 sps:$4 sm:$0xff]  }
 0x115   : > { %2544 = vmatprep.subr.bf16.mxu0 %v3612_v59  ;;  %2708 = vmatprep.subr.bf16.mxu1 %v3615_v60  ;;  %v3702_v59 = vld [vmem:[%s4535_s8 + $0x524] ss:$16 sps:$4 sm:$0xff]   ;;  %v3705_v60 = vld [vmem:[%s4535_s8 + $0x52c] ss:$16 sps:$4 sm:$0xff]  }
 0x118   : > { %2545 = vmatpush1.bf16.msra.mxu0 %v3610_v61  ;;  %2709 = vmatpush1.bf16.msra.mxu1 %v3613_v62  ;;  %v3700_v61 = vld [vmem:[%s4535_s8 + $0x520] ss:$16 sps:$4 sm:$0xff]   ;;  %v3703_v62 = vld [vmem:[%s4535_s8 + $0x528] ss:$16 sps:$4 sm:$0xff]  }
 0x119   : > { %2546 = vmatprep.subr.bf16.mxu0 %v3618_v63  ;;  %2710 = vmatprep.subr.bf16.mxu1 %v3621_v0  ;;  %v3708_v63 = vld [vmem:[%s4535_s8 + $0x544] ss:$16 sps:$4 sm:$0xff]   ;;  %v3711_v0 = vld [vmem:[%s4535_s8 + $0x54c] ss:$16 sps:$4 sm:$0xff]  }
 0x11c   : > { %2547 = vmatpush1.bf16.msra.mxu0 %v3616_v1  ;;  %2711 = vmatpush1.bf16.msra.mxu1 %v3619_v2  ;;  %v3706_v1 = vld [vmem:[%s4535_s8 + $0x540] ss:$16 sps:$4 sm:$0xff]   ;;  %v3709_v2 = vld [vmem:[%s4535_s8 + $0x548] ss:$16 sps:$4 sm:$0xff]  }
 0x11d   : > { %2548 = vmatprep.subr.bf16.mxu0 %v3624_v3  ;;  %2712 = vmatprep.subr.bf16.mxu1 %v3627_v4  ;;  %v3714_v3 = vld [vmem:[%s4535_s8 + $0x564] ss:$16 sps:$4 sm:$0xff]   ;;  %v3717_v4 = vld [vmem:[%s4535_s8 + $0x56c] ss:$16 sps:$4 sm:$0xff]  }
 0x120   : > { %2549 = vmatpush1.bf16.msra.mxu0 %v3622_v5  ;;  %2713 = vmatpush1.bf16.msra.mxu1 %v3625_v6  ;;  %v3712_v5 = vld [vmem:[%s4535_s8 + $0x560] ss:$16 sps:$4 sm:$0xff]   ;;  %v3715_v6 = vld [vmem:[%s4535_s8 + $0x568] ss:$16 sps:$4 sm:$0xff]  }
 0x121   : > { %2550 = vmatprep.subr.bf16.mxu0 %v3630_v7  ;;  %2714 = vmatprep.subr.bf16.mxu1 %v3633_v8  ;;  %v3720_v7 = vld [vmem:[%s4535_s8 + $0x584] ss:$16 sps:$4 sm:$0xff]   ;;  %v3723_v8 = vld [vmem:[%s4535_s8 + $0x58c] ss:$16 sps:$4 sm:$0xff]  }
 0x124   : > { %2551 = vmatpush1.bf16.msra.mxu0 %v3628_v9  ;;  %2715 = vmatpush1.bf16.msra.mxu1 %v3631_v10  ;;  %v3718_v9 = vld [vmem:[%s4535_s8 + $0x580] ss:$16 sps:$4 sm:$0xff]   ;;  %v3721_v10 = vld [vmem:[%s4535_s8 + $0x588] ss:$16 sps:$4 sm:$0xff]  }
 0x125   : > { %2552 = vmatprep.subr.bf16.mxu0 %v3636_v11  ;;  %2716 = vmatprep.subr.bf16.mxu1 %v3639_v12  ;;  %v3726_v11 = vld [vmem:[%s4535_s8 + $0x5a4] ss:$16 sps:$4 sm:$0xff]   ;;  %v3729_v12 = vld [vmem:[%s4535_s8 + $0x5ac] ss:$16 sps:$4 sm:$0xff]  }
 0x128   : > { %2553 = vmatpush1.bf16.msra.mxu0 %v3634_v13  ;;  %2717 = vmatpush1.bf16.msra.mxu1 %v3637_v14  ;;  %v3724_v13 = vld [vmem:[%s4535_s8 + $0x5a0] ss:$16 sps:$4 sm:$0xff]   ;;  %v3727_v14 = vld [vmem:[%s4535_s8 + $0x5a8] ss:$16 sps:$4 sm:$0xff]  }
 0x129   : > { %2554 = vmatprep.subr.bf16.mxu0 %v3642_v15  ;;  %2718 = vmatprep.subr.bf16.mxu1 %v3645_v17  ;;  %v3732_v15 = vld [vmem:[%s4535_s8 + $0x5c4] ss:$16 sps:$4 sm:$0xff]   ;;  %v3735_v17 = vld [vmem:[%s4535_s8 + $0x5cc] ss:$16 sps:$4 sm:$0xff]  }
 0x12c   : > { %2555 = vmatpush1.bf16.msra.mxu0 %v3640_v18  ;;  %2719 = vmatpush1.bf16.msra.mxu1 %v3643_v19  ;;  %v3730_v18 = vld [vmem:[%s4535_s8 + $0x5c0] ss:$16 sps:$4 sm:$0xff]   ;;  %v3733_v19 = vld [vmem:[%s4535_s8 + $0x5c8] ss:$16 sps:$4 sm:$0xff]  }
 0x12d   : > { %2565 = vmatprep.subr.bf16.mxu0 %v3648_v20  ;;  %2729 = vmatprep.subr.bf16.mxu1 %v3651_v23  ;;  %v3738_v20 = vld [vmem:[%s4535_s8 + $0x5e4] ss:$16 sps:$4 sm:$0xff]   ;;  %v3741_v23 = vld [vmem:[%s4535_s8 + $0x5ec] ss:$16 sps:$4 sm:$0xff]  }
 0x12f   : > { %2557 = vmatmul.mubr.bf16.vlgmr.msra.gmra.mrb[0].mxu0 %v1191_v25  ;;  %2721 = vmatmul.mubr.bf16.vlgmr.msra.gmra.mrb[0].mxu1 %v1191_v25  ;;  %v3739_v25 = vld [vmem:[%s4535_s8 + $0x5e8] ss:$16 sps:$4 sm:$0xff]  }
 0x130   : > { %2566 = vmatpush1.bf16.msra.mxu0 %v3646_v24  ;;  %2730 = vmatpush1.bf16.msra.mxu1 %v3649_v26  ;;  %v3736_v24 = vld [vmem:[%s4535_s8 + $0x5e0] ss:$16 sps:$4 sm:$0xff]   ;;  %v3745_v26 = vld [vmem:[%s4535_s8 + $0x604] ss:$16 sps:$4 sm:$0xff]  }
 0x131   : > { %2567 = vmatprep.subr.bf16.mxu0 %v3654_v27  ;;  %2731 = vmatprep.subr.bf16.mxu1 %v3657_v28  ;;  %v3748_v27 = vld [vmem:[%s4535_s8 + $0x60c] ss:$16 sps:$4 sm:$0xff]   ;;  %v3743_v28 = vld [vmem:[%s4535_s8 + $0x600] ss:$16 sps:$4 sm:$0xff]  }
 0x132   : > { %2597 = vmatprep.mubr.bf16.mxu0 %v4626_v21  ;;  %2761 = vmatprep.mubr.bf16.mxu1 %v4626_v21 }
 0x134   : > { %2568 = vmatpush1.bf16.msra.mxu0 %v3652_v29  ;;  %2732 = vmatpush1.bf16.msra.mxu1 %v3655_v16  ;;  %v3746_v29 = vld [vmem:[%s4535_s8 + $0x608] ss:$16 sps:$4 sm:$0xff]   ;;  %v3751_v16 = vld [vmem:[%s4535_s8 + $0x624] ss:$16 sps:$4 sm:$0xff]  }
 0x135   : > { %2569 = vmatprep.subr.bf16.mxu0 %v3660_v30  ;;  %2733 = vmatprep.subr.bf16.mxu1 %v3663_v31  ;;  %v3754_v30 = vld [vmem:[%s4535_s8 + $0x62c] ss:$16 sps:$4 sm:$0xff]   ;;  %v1194_v31 = vcombine.high %v4626_v21, %v4626_v21  ;;  %v3755_v21 = vld [vmem:[%s4535_s8 + $0x640] ss:$16 sps:$4 sm:$0xff]  }
 0x138   : > { %2570 = vmatpush1.bf16.msra.mxu0 %v3658_v32  ;;  %2734 = vmatpush1.bf16.msra.mxu1 %v3661_v33  ;;  %v3749_v32 = vld [vmem:[%s4535_s8 + $0x620] ss:$16 sps:$4 sm:$0xff]   ;;  %v3752_v33 = vld [vmem:[%s4535_s8 + $0x628] ss:$16 sps:$4 sm:$0xff]  }
 0x139   : > { %2571 = vmatprep.subr.bf16.mxu0 %v3666_v34  ;;  %2735 = vmatprep.subr.bf16.mxu1 %v3669_v35  ;;  %v3757_v34 = vld [vmem:[%s4535_s8 + $0x644] ss:$16 sps:$4 sm:$0xff]   ;;  %v3760_v35 = vld [vmem:[%s4535_s8 + $0x64c] ss:$16 sps:$4 sm:$0xff]  }
 0x13c   : > { %2572 = vmatpush1.bf16.msra.mxu0 %v3664_v36  ;;  %2736 = vmatpush1.bf16.msra.mxu1 %v3667_v37  ;;  %v3758_v36 = vld [vmem:[%s4535_s8 + $0x648] ss:$16 sps:$4 sm:$0xff]   ;;  %v3763_v37 = vld [vmem:[%s4535_s8 + $0x664] ss:$16 sps:$4 sm:$0xff]  }
 0x13d   : > { %2573 = vmatprep.subr.bf16.mxu0 %v3672_v38  ;;  %2737 = vmatprep.subr.bf16.mxu1 %v3675_v39  ;;  %v3766_v38 = vld [vmem:[%s4535_s8 + $0x66c] ss:$16 sps:$4 sm:$0xff]   ;;  %v3761_v39 = vld [vmem:[%s4535_s8 + $0x660] ss:$16 sps:$4 sm:$0xff]  }
 0x140   : > { %2574 = vmatpush1.bf16.msra.mxu0 %v3670_v40  ;;  %2738 = vmatpush1.bf16.msra.mxu1 %v3673_v41  ;;  %v3764_v40 = vld [vmem:[%s4535_s8 + $0x668] ss:$16 sps:$4 sm:$0xff]   ;;  %v3769_v41 = vld [vmem:[%s4535_s8 + $0x684] ss:$16 sps:$4 sm:$0xff]  }
 0x141   : > { %2575 = vmatprep.subr.bf16.mxu0 %v3678_v42  ;;  %2739 = vmatprep.subr.bf16.mxu1 %v3681_v43  ;;  %v3772_v42 = vld [vmem:[%s4535_s8 + $0x68c] ss:$16 sps:$4 sm:$0xff]   ;;  %v3767_v43 = vld [vmem:[%s4535_s8 + $0x680] ss:$16 sps:$4 sm:$0xff]  }
 0x144   : > { %2576 = vmatpush1.bf16.msra.mxu0 %v3676_v45  ;;  %2740 = vmatpush1.bf16.msra.mxu1 %v3679_v46  ;;  %v3770_v45 = vld [vmem:[%s4535_s8 + $0x688] ss:$16 sps:$4 sm:$0xff]   ;;  %v3775_v46 = vld [vmem:[%s4535_s8 + $0x6a4] ss:$16 sps:$4 sm:$0xff]  }
 0x145   : > { %2577 = vmatprep.subr.bf16.mxu0 %v3684_v47  ;;  %2741 = vmatprep.subr.bf16.mxu1 %v3687_v48  ;;  %v3778_v47 = vld [vmem:[%s4535_s8 + $0x6ac] ss:$16 sps:$4 sm:$0xff]   ;;  %v3773_v48 = vld [vmem:[%s4535_s8 + $0x6a0] ss:$16 sps:$4 sm:$0xff]  }
 0x148   : > { %2578 = vmatpush1.bf16.msra.mxu0 %v3682_v49  ;;  %2742 = vmatpush1.bf16.msra.mxu1 %v3685_v50  ;;  %v3776_v49 = vld [vmem:[%s4535_s8 + $0x6a8] ss:$16 sps:$4 sm:$0xff]   ;;  %v3781_v50 = vld [vmem:[%s4535_s8 + $0x6c4] ss:$16 sps:$4 sm:$0xff]  }
 0x149   : > { %2579 = vmatprep.subr.bf16.mxu0 %v3690_v51  ;;  %2743 = vmatprep.subr.bf16.mxu1 %v3693_v52  ;;  %v3784_v51 = vld [vmem:[%s4535_s8 + $0x6cc] ss:$16 sps:$4 sm:$0xff]   ;;  %v3779_v52 = vld [vmem:[%s4535_s8 + $0x6c0] ss:$16 sps:$4 sm:$0xff]  }
 0x14c   : > { %2580 = vmatpush1.bf16.msra.mxu0 %v3688_v53  ;;  %2744 = vmatpush1.bf16.msra.mxu1 %v3691_v54  ;;  %v3782_v53 = vld [vmem:[%s4535_s8 + $0x6c8] ss:$16 sps:$4 sm:$0xff]   ;;  %v3787_v54 = vld [vmem:[%s4535_s8 + $0x6e4] ss:$16 sps:$4 sm:$0xff]  }
 0x14d   : > { %2581 = vmatprep.subr.bf16.mxu0 %v3696_v55  ;;  %2745 = vmatprep.subr.bf16.mxu1 %v3699_v56  ;;  %v3790_v55 = vld [vmem:[%s4535_s8 + $0x6ec] ss:$16 sps:$4 sm:$0xff]   ;;  %v3785_v56 = vld [vmem:[%s4535_s8 + $0x6e0] ss:$16 sps:$4 sm:$0xff]  }
 0x150   : > { %2582 = vmatpush1.bf16.msra.mxu0 %v3694_v57  ;;  %2746 = vmatpush1.bf16.msra.mxu1 %v3697_v58  ;;  %v3788_v57 = vld [vmem:[%s4535_s8 + $0x6e8] ss:$16 sps:$4 sm:$0xff]   ;;  %v3793_v58 = vld [vmem:[%s4535_s8 + $0x704] ss:$16 sps:$4 sm:$0xff]  }
 0x151   : > { %2583 = vmatprep.subr.bf16.mxu0 %v3702_v59  ;;  %2747 = vmatprep.subr.bf16.mxu1 %v3705_v60  ;;  %v3796_v59 = vld [vmem:[%s4535_s8 + $0x70c] ss:$16 sps:$4 sm:$0xff]   ;;  %v3791_v60 = vld [vmem:[%s4535_s8 + $0x700] ss:$16 sps:$4 sm:$0xff]  }
 0x154   : > { %2584 = vmatpush1.bf16.msra.mxu0 %v3700_v61  ;;  %2748 = vmatpush1.bf16.msra.mxu1 %v3703_v62  ;;  %v3794_v61 = vld [vmem:[%s4535_s8 + $0x708] ss:$16 sps:$4 sm:$0xff]   ;;  %v3799_v62 = vld [vmem:[%s4535_s8 + $0x724] ss:$16 sps:$4 sm:$0xff]  }
 0x155   : > { %2585 = vmatprep.subr.bf16.mxu0 %v3708_v63  ;;  %2749 = vmatprep.subr.bf16.mxu1 %v3711_v0  ;;  %v3802_v63 = vld [vmem:[%s4535_s8 + $0x72c] ss:$16 sps:$4 sm:$0xff]   ;;  %v3797_v0 = vld [vmem:[%s4535_s8 + $0x720] ss:$16 sps:$4 sm:$0xff]  }
 0x158   : > { %2586 = vmatpush1.bf16.msra.mxu0 %v3706_v1  ;;  %2750 = vmatpush1.bf16.msra.mxu1 %v3709_v2  ;;  %v3800_v1 = vld [vmem:[%s4535_s8 + $0x728] ss:$16 sps:$4 sm:$0xff]   ;;  %v3805_v2 = vld [vmem:[%s4535_s8 + $0x744] ss:$16 sps:$4 sm:$0xff]  }
 0x159   : > { %2587 = vmatprep.subr.bf16.mxu0 %v3714_v3  ;;  %2751 = vmatprep.subr.bf16.mxu1 %v3717_v4  ;;  %v3808_v3 = vld [vmem:[%s4535_s8 + $0x74c] ss:$16 sps:$4 sm:$0xff]   ;;  %v3803_v4 = vld [vmem:[%s4535_s8 + $0x740] ss:$16 sps:$4 sm:$0xff]  }
 0x15c   : > { %2588 = vmatpush1.bf16.msra.mxu0 %v3712_v5  ;;  %2752 = vmatpush1.bf16.msra.mxu1 %v3715_v6  ;;  %v3806_v5 = vld [vmem:[%s4535_s8 + $0x748] ss:$16 sps:$4 sm:$0xff]   ;;  %v3811_v6 = vld [vmem:[%s4535_s8 + $0x764] ss:$16 sps:$4 sm:$0xff]  }
 0x15d   : > { %2589 = vmatprep.subr.bf16.mxu0 %v3720_v7  ;;  %2753 = vmatprep.subr.bf16.mxu1 %v3723_v8  ;;  %v3814_v7 = vld [vmem:[%s4535_s8 + $0x76c] ss:$16 sps:$4 sm:$0xff]   ;;  %v3809_v8 = vld [vmem:[%s4535_s8 + $0x760] ss:$16 sps:$4 sm:$0xff]  }
 0x160   : > { %2590 = vmatpush1.bf16.msra.mxu0 %v3718_v9  ;;  %2754 = vmatpush1.bf16.msra.mxu1 %v3721_v10  ;;  %v3812_v9 = vld [vmem:[%s4535_s8 + $0x768] ss:$16 sps:$4 sm:$0xff]   ;;  %v3817_v10 = vld [vmem:[%s4535_s8 + $0x784] ss:$16 sps:$4 sm:$0xff]  }
 0x161   : > { %2591 = vmatprep.subr.bf16.mxu0 %v3726_v11  ;;  %2755 = vmatprep.subr.bf16.mxu1 %v3729_v12  ;;  %v3820_v11 = vld [vmem:[%s4535_s8 + $0x78c] ss:$16 sps:$4 sm:$0xff]   ;;  %v3815_v12 = vld [vmem:[%s4535_s8 + $0x780] ss:$16 sps:$4 sm:$0xff]  }
 0x164   : > { %2592 = vmatpush1.bf16.msra.mxu0 %v3724_v13  ;;  %2756 = vmatpush1.bf16.msra.mxu1 %v3727_v14  ;;  %v3818_v13 = vld [vmem:[%s4535_s8 + $0x788] ss:$16 sps:$4 sm:$0xff]   ;;  %v3823_v14 = vld [vmem:[%s4535_s8 + $0x7a4] ss:$16 sps:$4 sm:$0xff]  }
 0x165   : > { %2593 = vmatprep.subr.bf16.mxu0 %v3732_v15  ;;  %2757 = vmatprep.subr.bf16.mxu1 %v3735_v17  ;;  %v3826_v15 = vld [vmem:[%s4535_s8 + $0x7ac] ss:$16 sps:$4 sm:$0xff]   ;;  %v3821_v17 = vld [vmem:[%s4535_s8 + $0x7a0] ss:$16 sps:$4 sm:$0xff]  }
 0x168   : > { %2594 = vmatpush1.bf16.msra.mxu0 %v3730_v18  ;;  %2758 = vmatpush1.bf16.msra.mxu1 %v3733_v19  ;;  %v3824_v18 = vld [vmem:[%s4535_s8 + $0x7a8] ss:$16 sps:$4 sm:$0xff]   ;;  %v3829_v19 = vld [vmem:[%s4535_s8 + $0x7c4] ss:$16 sps:$4 sm:$0xff]  }
 0x169   : > { %2595 = vmatprep.subr.bf16.mxu0 %v3738_v20  ;;  %2759 = vmatprep.subr.bf16.mxu1 %v3741_v23  ;;  %v3832_v20 = vld [vmem:[%s4535_s8 + $0x7cc] ss:$16 sps:$4 sm:$0xff]   ;;  %v3827_v23 = vld [vmem:[%s4535_s8 + $0x7c0] ss:$16 sps:$4 sm:$0xff]  }
 0x16c   : > { %2596 = vmatpush1.bf16.msra.mxu0 %v3736_v24  ;;  %2760 = vmatpush1.bf16.msra.mxu1 %v3739_v25  ;;  %v3830_v24 = vld [vmem:[%s4535_s8 + $0x7c8] ss:$16 sps:$4 sm:$0xff]   ;;  %v3835_v25 = vld [vmem:[%s4535_s8 + $0x7e4] ss:$16 sps:$4 sm:$0xff]  }
 0x16d   : > { %2606 = vmatprep.subr.bf16.mxu0 %v3745_v26  ;;  %2770 = vmatprep.subr.bf16.mxu1 %v3748_v27  ;;  %v3838_v26 = vld [vmem:[%s4535_s8 + $0x7ec] ss:$16 sps:$4 sm:$0xff]   ;;  %v3833_v27 = vld [vmem:[%s4535_s8 + $0x7e0] ss:$16 sps:$4 sm:$0xff]  }
 0x16f   : > { %2598 = vmatmul.mubr.bf16.vlgmr.msra.gmra.mrb[0].mxu0 %v4629_v22  ;;  %2762 = vmatmul.mubr.bf16.vlgmr.msra.gmra.mrb[0].mxu1 %v4629_v22 }
 0x170   : > { %2607 = vmatpush1.bf16.msra.mxu0 %v3743_v28  ;;  %2771 = vmatpush1.bf16.msra.mxu1 %v3746_v29  ;;  %v3836_v28 = vld [vmem:[%s4535_s8 + $0x7e8] ss:$16 sps:$4 sm:$0xff]   ;;  %v1192_v29 = vcombine.high %v4629_v22, %v4629_v22 }
 0x171   : > { %2608 = vmatprep.subr.bf16.mxu0 %v3751_v16  ;;  %2772 = vmatprep.subr.bf16.mxu1 %v3754_v30  ;;  %v3897_v16 = vmov 1983009808  }
 0x172   : > { %2638 = vmatprep.mubr.bf16.mxu0 %v1194_v31  ;;  %2802 = vmatprep.mubr.bf16.mxu1 %v1194_v31  ;;  %v2818_v30 = vunpack.c.l.s4 %v3897_v16 }
 0x174   : > { %2609 = vmatpush1.bf16.msra.mxu0 %v3749_v32  ;;  %2773 = vmatpush1.bf16.msra.mxu1 %v3752_v33  ;;  %v2819_v31 = vunpack.c.0.s8 %v2818_v30 }
 0x175   : > { %2610 = vmatprep.subr.bf16.mxu0 %v3757_v34  ;;  %2774 = vmatprep.subr.bf16.mxu1 %v3760_v35 }
 0x176   : > { %v2822_v34 = vsub.s32 %v2819_v31, %v4578_v44 }
 0x178   : > { %2611 = vmatpush1.bf16.msra.mxu0 %v3755_v21  ;;  %2775 = vmatpush1.bf16.msra.mxu1 %v3758_v36 }
 0x179   : > { %2612 = vmatprep.subr.bf16.mxu0 %v3763_v37  ;;  %2776 = vmatprep.subr.bf16.mxu1 %v3766_v38 }
 0x17c   : > { %2613 = vmatpush1.bf16.msra.mxu0 %v3761_v39  ;;  %2777 = vmatpush1.bf16.msra.mxu1 %v3764_v40 }
 0x17d   : > { %2614 = vmatprep.subr.bf16.mxu0 %v3769_v41  ;;  %2778 = vmatprep.subr.bf16.mxu1 %v3772_v42 }
 0x180   : > { %2615 = vmatpush1.bf16.msra.mxu0 %v3767_v43  ;;  %2779 = vmatpush1.bf16.msra.mxu1 %v3770_v45  ;;  %v887_v43 = vld [vmem:[%s4533_s7] sm:$0xff] }
 0x181   : > { %2616 = vmatprep.subr.bf16.mxu0 %v3775_v46  ;;  %2780 = vmatprep.subr.bf16.mxu1 %v3778_v47  ;;  %v2840_v47 = vld [vmem:[%s860_s18] sm:$0xf] (!%p3367_p13) }
 0x184   : > { %2617 = vmatpush1.bf16.msra.mxu0 %v3773_v48  ;;  %2781 = vmatpush1.bf16.msra.mxu1 %v3776_v49  ;;  %v2844_v48 = vsub.s32 (!%p3367_p13), 0, %v4578_v44  ;;  %v2848_v49 = vsub.s32 (!%p3367_p13), 1, %v4578_v44 }
 0x185   : > { %2618 = vmatprep.subr.bf16.mxu0 %v3781_v50  ;;  %2782 = vmatprep.subr.bf16.mxu1 %v3784_v51  ;;  %v2852_v50 = vsub.s32 (!%p3367_p13), 2, %v4578_v44  ;;  %v2856_v51 = vsub.s32 (!%p3367_p13), 3, %v4578_v44 }
 0x188   : > { %2619 = vmatpush1.bf16.msra.mxu0 %v3779_v52  ;;  %2783 = vmatpush1.bf16.msra.mxu1 %v3782_v53  ;;  %v2880_v52 = vld [vmem:[%s865_s12] sm:$0xf] (!%p3367_p13) }
 0x189   : > { %2620 = vmatprep.subr.bf16.mxu0 %v3787_v54  ;;  %2784 = vmatprep.subr.bf16.mxu1 %v3790_v55  ;;  %v2917_v53 = vld [vmem:[%s870_s15] sm:$0xf] (!%p3367_p13)  ;;  %v2845_v54 = vrot.slane (!%p3367_p13), %v2840_v47, %v2844_v48  ;;  %v2849_v55 = vrot.slane (!%p3367_p13), %v2840_v47, %v2848_v49 }
 0x18b   : > { %v2858_v44 = vcombine.low (!%p3367_p13), %v2845_v54, %v2849_v55 }
 0x18c   : > { %2621 = vmatpush1.bf16.msra.mxu0 %v3785_v56  ;;  %2785 = vmatpush1.bf16.msra.mxu1 %v3788_v57  ;;  %v2853_v56 = vrot.slane (!%p3367_p13), %v2840_v47, %v2852_v50  ;;  %v2885_v57 = vrot.slane (!%p3367_p13), %v2880_v52, %v2844_v48 }
 0x18d   : > { %2622 = vmatprep.subr.bf16.mxu0 %v3793_v58  ;;  %2786 = vmatprep.subr.bf16.mxu1 %v3796_v59  ;;  %v2857_v58 = vrot.slane (!%p3367_p13), %v2840_v47, %v2856_v51  ;;  %v2889_v59 = vrot.slane (!%p3367_p13), %v2880_v52, %v2848_v49 }
 0x190   : > { %2623 = vmatpush1.bf16.msra.mxu0 %v3791_v60  ;;  %2787 = vmatpush1.bf16.msra.mxu1 %v3794_v61  ;;  %v2893_v60 = vrot.slane (!%p3367_p13), %v2880_v52, %v2852_v50  ;;  %v2897_v61 = vrot.slane (!%p3367_p13), %v2880_v52, %v2856_v51 }
 0x191   : > { %2624 = vmatprep.subr.bf16.mxu0 %v3799_v62  ;;  %2788 = vmatprep.subr.bf16.mxu1 %v3802_v63  ;;  %v2922_v62 = vrot.slane (!%p3367_p13), %v2917_v53, %v2844_v48  ;;  %v2926_v63 = vrot.slane (!%p3367_p13), %v2917_v53, %v2848_v49 }
 0x194   : > { %2625 = vmatpush1.bf16.msra.mxu0 %v3797_v0  ;;  %2789 = vmatpush1.bf16.msra.mxu1 %v3800_v1  ;;  %v2930_v0 = vrot.slane (!%p3367_p13), %v2917_v53, %v2852_v50  ;;  %v2859_v1 = vcombine.low (!%p3367_p13), %v2853_v56, %v2857_v58 }
 0x195   : > { %2626 = vmatprep.subr.bf16.mxu0 %v3805_v2  ;;  %2790 = vmatprep.subr.bf16.mxu1 %v3808_v3  ;;  %v2898_v2 = vcombine.low (!%p3367_p13), %v2885_v57, %v2889_v59  ;;  %v2899_v3 = vcombine.low (!%p3367_p13), %v2893_v60, %v2897_v61 }
 0x198   : > { %2627 = vmatpush1.bf16.msra.mxu0 %v3803_v4  ;;  %2791 = vmatpush1.bf16.msra.mxu1 %v3806_v5  ;;  %v2934_v4 = vrot.slane (!%p3367_p13), %v2917_v53, %v2856_v51  ;;  %v2866_v5 = vrot.slane (!%p3367_p13), %v2858_v44, %v2822_v34 }
 0x199   : > { %2628 = vmatprep.subr.bf16.mxu0 %v3811_v6  ;;  %2792 = vmatprep.subr.bf16.mxu1 %v3814_v7  ;;  %v2935_v6 = vcombine.low (!%p3367_p13), %v2922_v62, %v2926_v63  ;;  %v2873_v7 = vrot.slane (!%p3367_p13), %v2859_v1, %v2822_v34 }
 0x19c   : > { %2629 = vmatpush1.bf16.msra.mxu0 %v3809_v8  ;;  %2793 = vmatpush1.bf16.msra.mxu1 %v3812_v9  ;;  %v2936_v8 = vcombine.low (!%p3367_p13), %v2930_v0, %v2934_v4 }
 0x19d   : > { %2630 = vmatprep.subr.bf16.mxu0 %v3817_v10  ;;  %2794 = vmatprep.subr.bf16.mxu1 %v3820_v11  ;;  %v2906_v10 = vrot.slane (!%p3367_p13), %v2898_v2, %v2822_v34  ;;  %v2913_v11 = vrot.slane (!%p3367_p13), %v2899_v3, %v2822_v34 }
 0x1a0   : > { %2631 = vmatpush1.bf16.msra.mxu0 %v3815_v12  ;;  %2795 = vmatpush1.bf16.msra.mxu1 %v3818_v13  ;;  %v2874_v12 = vcombine.low (!%p3367_p13), %v2866_v5, %v2873_v7  ;;  %v2943_v13 = vrot.slane (!%p3367_p13), %v2935_v6, %v2822_v34 }
 0x1a1   : > { %2632 = vmatprep.subr.bf16.mxu0 %v3823_v14  ;;  %2796 = vmatprep.subr.bf16.mxu1 %v3826_v15  ;;  %v2950_v14 = vrot.slane (!%p3367_p13), %v2936_v8, %v2822_v34 }
 0x1a4   : > { %2633 = vmatpush1.bf16.msra.mxu0 %v3821_v17  ;;  %2797 = vmatpush1.bf16.msra.mxu1 %v3824_v18  ;;  %v2914_v17 = vcombine.low (!%p3367_p13), %v2906_v10, %v2913_v11 }
 0x1a5   : > { %2634 = vmatprep.subr.bf16.mxu0 %v3829_v19  ;;  %2798 = vmatprep.subr.bf16.mxu1 %v3832_v20  ;;  %v2951_v19 = vcombine.low (!%p3367_p13), %v2943_v13, %v2950_v14 }
 0x1a8   : > { %2635 = vmatpush1.bf16.msra.mxu0 %v3827_v23  ;;  %2799 = vmatpush1.bf16.msra.mxu1 %v3830_v24 }
 0x1a9   : > { %2636 = vmatprep.subr.bf16.mxu0 %v3835_v25  ;;  %2800 = vmatprep.subr.bf16.mxu1 %v3838_v26 }
 0x1ac   : > { %2637 = vmatpush1.bf16.msra.mxu0 %v3833_v27  ;;  %2801 = vmatpush1.bf16.msra.mxu1 %v3836_v28 }
 0x1af   : > { %2639 = vmatmul.mubr.bf16.vlgmr.msra.gmra.mrb[0].mxu0 %v1192_v29  ;;  %2803 = vmatmul.mubr.bf16.vlgmr.msra.gmra.mrb[0].mxu1 %v1192_v29 }
 0x282   : > { %v2640_v32 = vpop.f32.mrb[0].mxu0  ;;  %v2804_v33 = vpop.f32.mrb[0].mxu1 }
 0x283   : > { %v2642_v35 = vpop.f32.mrb[1].mxu0  ;;  %v2806_v21 = vpop.f32.mrb[1].mxu1 }
 0x284   : > { %v2815_v36 = vcombine.low %v2640_v32, %v2642_v35  ;;  %v2816_v37 = vcombine.low %v2804_v33, %v2806_v21  ;;  %v2644_v38 = vpop.f32.mrb[2].mxu0  ;;  %v2808_v39 = vpop.f32.mrb[2].mxu1 }
 0x285   : > { %v2645_v22 = vpop.f32.mrb[3].mxu0  ;;  %v2809_v40 = vpop.f32.mrb[3].mxu1 }
 0x286   : > { %v2823_v41 = vrot.slane %v2815_v36, %v2822_v34  ;;  %v2830_v42 = vrot.slane %v2816_v37, %v2822_v34  ;;  %2838 = sbr.rel (%p3367_p13) target bundleno = 670 (0x29e), region = 71 }
 0x288   : > { %v2831_v45 = vcombine.low %v2823_v41, %v2830_v42 }
 0x28a   : > { %v2833_v46 = vadd.f32 %v2831_v45, %v887_v43 }
 0x28c   : > { %2834 = vst [vmem:[%s4533_s7] sm:$0xff] %v2833_v46 }
 0x293   : > { %v2839_v9 = vld [vmem:[%s4533_s7] sm:$0xff] }
 0x294   : > { %v2876_v15 = vadd.f32 %v2874_v12, %v2839_v9 }
 0x296   : > { %vm2877_vm0 = vcmp.ge.f32.partialorder %v2876_v15, 0.0  ;;  %v2878_v18 = vmul.f32 0.01, %v2876_v15 }
 0x298   : > { %v2879_v20 = vsel %vm2877_vm0, %v2876_v15, %v2878_v18 }
 0x299   : > { %v2916_v23 = vmul.f32 %v2914_v17, %v2879_v20 }
 0x29b   : > { %v2953_v24 = vadd.f32 %v2951_v19, %v2916_v23 }
 0x29d   : > { %2954 = vst [vmem:[%s4533_s7] sm:$0xff] %v2953_v24 }
 0x29e PF: > { %s15_s24 = sadd.s32 1, %s3893_s24   ;;  %s4882_s18 = smov %s3873_s19 }
 0x29f   : > { %p12_p0 = scmp.ge.s32.totalorder %s15_s24, 10   ;;  %s4883_s19 = smov %s3979_s6 }
 0x2a0   : > { %s4884_s20 = smov %s3885_s22  ;;  %s4885_s21 = smov %s3889_s23 }
 0x2a1   : > { %s4886_s22 = smov %s4889_s25  ;;  %s4887_s23 = smov %s4893_s26 }
 0x2a2   :  { %14 = sbr.rel (!%p12_p0) target bundleno = 4 (0x4), region = 118 }

// kernel: encoder_forward.9
= control target key start
LH: loop header
LB: loop body
LE: loop exit
PB: predicated region body
PF: predicated region fallthrough
CT: control target
= control target key end

     0   :  { %8 = vsyncpa [#allocation3], 0  ;;  %s3748_s0 = inlined_call_operand.vmem [shape: bf16[8,2048], index: 0, kind: input, shape index: {}]   ;;  %s3749_s1 = inlined_call_operand.hbm [shape: bf16[2048,1024], index: 1, kind: input, shape index: {}]   ;;  %s3750_s2 = inlined_call_operand.vmem [shape: f32[1,1024], index: 2, kind: input, shape index: {}]   ;;  %s3751_s3 = inlined_call_operand.vmem [shape: f32[8,1024], index: 3, kind: output, shape index: {}]  }
   0x1   :  { %10 = vsyncpa [#allocation3 + $0x1], 0  ;;  %s3252_s12 = smov 0   ;;  %s3254_s13 = smov 0  }
   0x2   :  { %s3256_s14 = smov 0   ;;  %s3258_s15 = smov 0  }
   0x3   :  { %s3260_s16 = smov 0   ;;  %s3262_s17 = smov 0  }
   0x4   :  { %s3264_s18 = smov 0   ;;  %s3266_s19 = smov 0  }
   0x5 LB: > { %s2377_s20 = sadd.s32 4294967295, %s3225_s19   ;;  %s28_s21 = sadd.s32 1, %s3217_s17  ;;  %s3225_s19 = sphi %s3266_s19, %s16_s19   ;;  %s3221_s18 = sphi %s3264_s18, %s3761_s18   ;;  %s3217_s17 = sphi %s3262_s17, %s3760_s17   ;;  %s3213_s16 = sphi %s3260_s16, %s3759_s16   ;;  %s3209_s15 = sphi %s3258_s15, %s3758_s15   ;;  %s3205_s14 = sphi %s3256_s14, %s3757_s14   ;;  %s3201_s13 = sphi %s3254_s13, %s3756_s13   ;;  %s3197_s12 = sphi %s3252_s12, %s3755_s12  }
   0x6   : > { %p29_p0 = scmp.ge.s32.totalorder %s28_s21, 2  ;;  %s31_s22 = sadd.s32 1, %s3221_s18 }
   0x7   : > { %s72_s23 = sadd.s32 1, %s3205_s14  ;;  %p79_p1 = scmp.ne.s32.totalorder %s3205_s14, %s3201_s13 }
   0x8   : > { %s3763_s21 = smov (%p29_p0, %s28_s21), 0  ;;  %s3765_s22 = smov (!%p29_p0, %s31_s22), %s3221_s18 }
   0x9   : > { %s67_s24 = ssub.s32 %s3217_s17, %s3763_s21  ;;  %p80_p2 = scmp.eq.s32.totalorder %s3225_s19, 0 }
   0xa   : > { %p33_p3 = scmp.ge.s32.totalorder %s3765_s22, 2  ;;  %p85_p4 = scmp.ne.s32.totalorder %s3201_s13, %s3197_s12 }
   0xb   : > { %p3303_p5 = por %p80_p2, %p79_p1  ;;  %p86_p6 = scmp.eq.s32.totalorder %s2377_s20, 0 }
   0xc   : > { %s3767_s22 = smov (%p33_p3, %s3765_s22), 0  ;;  %p2668_p8 = scmp.lt.s32.totalorder %s3225_s19, 4 }
   0xd   : > { %p3309_p7 = por %p86_p6, %p85_p4  ;;  %s68_s27 = ssub.s32 %s3221_s18, %s3767_s22 }
   0xe   : > { %s69_s28 = sor.u32 %s68_s27, %s67_s24  ;;  %s176_s29 = sand.u32 1, %s3205_s14  }
   0xf   : > { %p70_p9 = scmp.eq.s32.totalorder %s69_s28, 0  ;;  %s2381_s30 = sshll.u32 %s176_s29, 11 }
  0x10   : > { %s2383_s4 = sshll.u32 %s3221_s18, 2  ;;  %s2661_s6 = sshll.u32 %s3217_s17, 10 }
  0x11   : > { %s3319_s5 = scalar_select %p70_p9, %s3205_s14, %s72_s23  }
  0x12   : > { %s187_s7 = sadd.s32 %s2661_s6, %s2383_s4  ;;  %s180_s8 = scalar_lea.vmem [#allocation2], %s2381_s30 }
  0x13   : > { %s190_s9 = sshll.u32 %s180_s8, 4  ;;  %s2385_s10 = sshll.u32 %s187_s7, 6  ;;  %s3322_s9 = int_to_ptr.vmem [resolvable:$true] %s190_s9 }
  0x14   : > { %s3327_s20 = scalar_lea.hbm %s3749_s1, %s2385_s10  ;;  %p3333_p10 = pnand %p2668_p8, %p3303_p5 }
  0x15   : > { %s3337_s24 = scalar_lea.sflag [#allocation3], %s176_s29  ;;  %s3129_s27 = scalar_lea.hbm %s3327_s20, 32768 }
  0x16   : > { %p3130_p11 = scmp.ne.s32.totalorder %s3327_s20, %s3129_s27  ;;  %p3131_p12 = pneg %p3333_p10 }
  0x17   : > { %s3134_s30 = scalar_lea.hbm %s3749_s1, 131072  ;;  %p3135_p1 = scmp.lt.u32.totalorder %s3327_s20, %s3749_s1 }
  0x18   : > { %p3132_p13 = pnand %p3131_p12, %p3130_p11  ;;  %p3136_p2 = scmp.lt.u32.totalorder %s3134_s30, %s3129_s27 }
  0x19   : > { %p3138_p4 = scmp.lt.u32.totalorder %s3129_s27, %s3327_s20 }
  0x1a   : > { %p3133_p0 = pneg %p3132_p13  ;;  %p3137_p3 = por %p3136_p2, %p3135_p1 }
  0x1c   : > { %p3139_p5 = por %p3138_p4, %p3137_p3 }
  0x1e   : > { %p3140_p6 = pnand %p3139_p5, %p3133_p0 }
  0x20   : > { %3143 = shalt.err (!%p3140_p6)
}
  0x21   : > { %s3144_s29 = scalar_lea.vmem %s3322_s9, 32768  ;;  %s3227_s7 = smov [#allocation2]  }
  0x22   : > { %p3145_p8 = scmp.ne.s32.totalorder %s3322_s9, %s3144_s29  ;;  %s3149_s8 = sshll.u32 %s3227_s7, 4  ;;  %s3150_s8 = int_to_ptr.vmem [resolvable:$false] %s3149_s8 }
  0x23   : > { %s3151_s10 = scalar_lea.vmem %s3150_s8, 65536  ;;  %p3152_p13 = scmp.lt.s32.totalorder %s3322_s9, %s3150_s8 }
  0x24   : > { %p3147_p9 = pnand %p3145_p8, %p3131_p12  ;;  %p3153_p1 = scmp.lt.s32.totalorder %s3151_s10, %s3144_s29 }
  0x26   : > { %p3148_p11 = pneg %p3147_p9  ;;  %p3154_p2 = por %p3153_p1, %p3152_p13 }
  0x28   : > { %p3155_p3 = pnand %p3154_p2, %p3148_p11 }
  0x2a   : > { %3158 = shalt.err (!%p3155_p3)
}
  0x2b   : > { %s3228_s11 = smov 512   ;;  %s3229_s12 = smov 256  }
  0x2c   : > { %s3230_s27 = smov 16   ;;  %p2386_p12 = scmp.ge.s32.totalorder %s3225_s19, 1 }
  0x2d   : > { %2667 = dma.hbm_to_vmem [thread:$0]  (!%p3333_p10), %s3327_s20, 32768, %s3322_s9, %s3337_s24, %s3228_s11, %s3229_s12, %s3230_s27  }
  0x2e   : > { %p206_p0 = scmp.lt.s32.totalorder %s3225_s19, 5 }
  0x30   : > { %p207_p4 = pnand %p2386_p12, %p206_p0 }
  0x31   : > { %s212_s25 = sand.u32 (!%p207_p4), 1, %s3201_s13  }
  0x32   : > { %210 = sbr.rel (%p207_p4) target bundleno = 561 (0x231), region = 32  ;;  %s2387_s28 = sshll.u32 (!%p207_p4), %s212_s25, 11 }
  0x33   : > { %s213_s30 = scalar_lea.sflag (!%p207_p4), [#allocation3], %s212_s25  ;;  %s3368_s4 = scalar_lea.vmem (!%p207_p4), [#allocation2], %s2387_s28 }
  0x39   : > { %3192 = dma.done.wait (%p3309_p7), %s213_s30, 32768  }
  0x3a   : > { %3194 = vsyncadd (%p3309_p7), %s213_s30, 4294934528  ;;  %s2388_s23 = sshll.u32 %s3209_s15, 3  ;;  %s2390_s9 = sshll.u32 %s3213_s16, 2 }
  0x3b   : > { %p259_p10 = scmp.lt.s32.totalorder %s2388_s23, 15  ;;  %p269_p5 = scmp.lt.s32.totalorder %s2390_s9, 7 }
  0x3c   : > { %p2393_p7 = scmp.ne.s32.totalorder %s3209_s15, 0 }
  0x3d   : > { %s3769_s23 = smov (!%p259_p10, %s2388_s23), 15  ;;  %s3771_s9 = smov (!%p269_p5, %s2390_s9), 7 }
  0x3e   : > { %s2389_s20 = sshll.u32 %s3769_s23, 2  ;;  %s271_s8 = scalar_lea.vmem %s3750_s2, %s3771_s9  ;;  %v3231_v0 = vmov (!%p2393_p7), 0.0  }
  0x3f   : > { %s3381_s29 = scalar_lea.vmem %s3748_s0, %s2389_s20  ;;  %s2392_s10 = sshll.u32 %s3771_s9, 3 }
  0x40   : > { %s3391_s12 = scalar_lea.vmem %s3751_s3, %s2392_s10  ;;  %286 = sbr.rel (%p2393_p7) target bundleno = 71 (0x47), region = 40 }
  0x41   : > { %287 = vst [vmem:[%s3391_s12] sm:$0xff] (!%p2393_p7), %v3231_v0  ;;  %288 = vst [vmem:[%s3391_s12 + $0x8] sm:$0xff] (!%p2393_p7), %v3231_v0 }
  0x42   : > { %289 = vst [vmem:[%s3391_s12 + $0x10] sm:$0xff] (!%p2393_p7), %v3231_v0  ;;  %290 = vst [vmem:[%s3391_s12 + $0x18] sm:$0xff] (!%p2393_p7), %v3231_v0 }
  0x47 PF: > { %v2737_v1 = vld [vmem:[%s3368_s4 + $0x4] ss:$16 sps:$4 sm:$0xff]   ;;  %v2741_v3 = vld [vmem:[%s3368_s4] ss:$16 sps:$4 sm:$0xff]   ;;  %v296_v49 = vld [vmem:[%s3381_s29 + $0x8] sm:$0xff]  ;;  %p2658_p6 = scmp.ne.s32.totalorder %s3209_s15, 1 }
  0x48   : > { %v2739_v2 = vld [vmem:[%s3368_s4 + $0x204] ss:$16 sps:$4 sm:$0xff]   ;;  %1863 = vmatprep.subr.bf16.mxu0 %v2737_v1  ;;  %v2742_v4 = vld [vmem:[%s3368_s4 + $0x200] ss:$16 sps:$4 sm:$0xff]   ;;  %v3450_v52 = vcombine.high %v296_v49, %v296_v49 }
  0x49   : > { %1904 = vmatprep.subr.bf16.mxu1 %v2739_v2  ;;  %v2743_v5 = vld [vmem:[%s3368_s4 + $0x24] ss:$16 sps:$4 sm:$0xff]   ;;  %1864 = vmatpush1.bf16.msra.mxu0 %v2741_v3  ;;  %v2747_v7 = vld [vmem:[%s3368_s4 + $0x20] ss:$16 sps:$4 sm:$0xff]  }
  0x4a   : > { %1905 = vmatpush1.bf16.msra.mxu1 %v2742_v4  ;;  %v2745_v6 = vld [vmem:[%s3368_s4 + $0x224] ss:$16 sps:$4 sm:$0xff]   ;;  %1865 = vmatprep.subr.bf16.mxu0 %v2743_v5  ;;  %v2748_v8 = vld [vmem:[%s3368_s4 + $0x220] ss:$16 sps:$4 sm:$0xff]  }
  0x4b   : > { %1906 = vmatprep.subr.bf16.mxu1 %v2745_v6  ;;  %v2749_v9 = vld [vmem:[%s3368_s4 + $0x44] ss:$16 sps:$4 sm:$0xff]   ;;  %v2753_v11 = vld [vmem:[%s3368_s4 + $0x40] ss:$16 sps:$4 sm:$0xff]   ;;  %1936 = vmatprep.mubr.bf16.mxu1 %v3450_v52 }
  0x4c   : > { %v2751_v10 = vld [vmem:[%s3368_s4 + $0x244] ss:$16 sps:$4 sm:$0xff]   ;;  %v2754_v12 = vld [vmem:[%s3368_s4 + $0x240] ss:$16 sps:$4 sm:$0xff]  }
  0x4d   : > { %1866 = vmatpush1.bf16.msra.mxu0 %v2747_v7  ;;  %v2755_v13 = vld [vmem:[%s3368_s4 + $0x64] ss:$16 sps:$4 sm:$0xff]   ;;  %v2759_v15 = vld [vmem:[%s3368_s4 + $0x60] ss:$16 sps:$4 sm:$0xff]  }
  0x4e   : > { %1907 = vmatpush1.bf16.msra.mxu1 %v2748_v8  ;;  %1867 = vmatprep.subr.bf16.mxu0 %v2749_v9  ;;  %v2757_v14 = vld [vmem:[%s3368_s4 + $0x264] ss:$16 sps:$4 sm:$0xff]   ;;  %v2760_v16 = vld [vmem:[%s3368_s4 + $0x260] ss:$16 sps:$4 sm:$0xff]   ;;  %v3474_v8 = vcombine.low %v296_v49, %v296_v49 }
  0x4f   : > { %1908 = vmatprep.subr.bf16.mxu1 %v2751_v10  ;;  %v2761_v17 = vld [vmem:[%s3368_s4 + $0x84] ss:$16 sps:$4 sm:$0xff]   ;;  %v2765_v19 = vld [vmem:[%s3368_s4 + $0x80] ss:$16 sps:$4 sm:$0xff]  }
  0x50   : > { %v2763_v18 = vld [vmem:[%s3368_s4 + $0x284] ss:$16 sps:$4 sm:$0xff]   ;;  %v2766_v20 = vld [vmem:[%s3368_s4 + $0x280] ss:$16 sps:$4 sm:$0xff]  }
  0x51   : > { %1868 = vmatpush1.bf16.msra.mxu0 %v2753_v11  ;;  %v2767_v21 = vld [vmem:[%s3368_s4 + $0xa4] ss:$16 sps:$4 sm:$0xff]   ;;  %v2771_v23 = vld [vmem:[%s3368_s4 + $0xa0] ss:$16 sps:$4 sm:$0xff]  }
  0x52   : > { %1909 = vmatpush1.bf16.msra.mxu1 %v2754_v12  ;;  %1869 = vmatprep.subr.bf16.mxu0 %v2755_v13  ;;  %v2769_v22 = vld [vmem:[%s3368_s4 + $0x2a4] ss:$16 sps:$4 sm:$0xff]   ;;  %v2772_v24 = vld [vmem:[%s3368_s4 + $0x2a0] ss:$16 sps:$4 sm:$0xff]  }
  0x53   : > { %1910 = vmatprep.subr.bf16.mxu1 %v2757_v14  ;;  %v2773_v25 = vld [vmem:[%s3368_s4 + $0xc4] ss:$16 sps:$4 sm:$0xff]   ;;  %v2777_v27 = vld [vmem:[%s3368_s4 + $0xc0] ss:$16 sps:$4 sm:$0xff]  }
  0x54   : > { %v2775_v26 = vld [vmem:[%s3368_s4 + $0x2c4] ss:$16 sps:$4 sm:$0xff]   ;;  %v2778_v28 = vld [vmem:[%s3368_s4 + $0x2c0] ss:$16 sps:$4 sm:$0xff]  }
  0x55   : > { %1870 = vmatpush1.bf16.msra.mxu0 %v2759_v15  ;;  %v2779_v29 = vld [vmem:[%s3368_s4 + $0xe4] ss:$16 sps:$4 sm:$0xff]   ;;  %v2783_v31 = vld [vmem:[%s3368_s4 + $0xe0] ss:$16 sps:$4 sm:$0xff]  }
  0x56   : > { %1911 = vmatpush1.bf16.msra.mxu1 %v2760_v16  ;;  %1871 = vmatprep.subr.bf16.mxu0 %v2761_v17  ;;  %v2781_v30 = vld [vmem:[%s3368_s4 + $0x2e4] ss:$16 sps:$4 sm:$0xff]   ;;  %v2784_v32 = vld [vmem:[%s3368_s4 + $0x2e0] ss:$16 sps:$4 sm:$0xff]  }
  0x57   : > { %1912 = vmatprep.subr.bf16.mxu1 %v2763_v18  ;;  %v2785_v33 = vld [vmem:[%s3368_s4 + $0x104] ss:$16 sps:$4 sm:$0xff]   ;;  %v2789_v35 = vld [vmem:[%s3368_s4 + $0x100] ss:$16 sps:$4 sm:$0xff]  }
  0x58   : > { %v2787_v34 = vld [vmem:[%s3368_s4 + $0x304] ss:$16 sps:$4 sm:$0xff]   ;;  %v2790_v36 = vld [vmem:[%s3368_s4 + $0x300] ss:$16 sps:$4 sm:$0xff]  }
  0x59   : > { %1872 = vmatpush1.bf16.msra.mxu0 %v2765_v19  ;;  %v2791_v37 = vld [vmem:[%s3368_s4 + $0x124] ss:$16 sps:$4 sm:$0xff]   ;;  %v2795_v39 = vld [vmem:[%s3368_s4 + $0x120] ss:$16 sps:$4 sm:$0xff]  }
  0x5a   : > { %1913 = vmatpush1.bf16.msra.mxu1 %v2766_v20  ;;  %1873 = vmatprep.subr.bf16.mxu0 %v2767_v21  ;;  %v2793_v38 = vld [vmem:[%s3368_s4 + $0x324] ss:$16 sps:$4 sm:$0xff]   ;;  %v2796_v40 = vld [vmem:[%s3368_s4 + $0x320] ss:$16 sps:$4 sm:$0xff]  }
  0x5b   : > { %1914 = vmatprep.subr.bf16.mxu1 %v2769_v22  ;;  %v2797_v41 = vld [vmem:[%s3368_s4 + $0x144] ss:$16 sps:$4 sm:$0xff]   ;;  %v2801_v43 = vld [vmem:[%s3368_s4 + $0x140] ss:$16 sps:$4 sm:$0xff]  }
  0x5c   : > { %v2799_v42 = vld [vmem:[%s3368_s4 + $0x344] ss:$16 sps:$4 sm:$0xff]   ;;  %v2802_v44 = vld [vmem:[%s3368_s4 + $0x340] ss:$16 sps:$4 sm:$0xff]  }
  0x5d   : > { %1874 = vmatpush1.bf16.msra.mxu0 %v2771_v23  ;;  %v2803_v45 = vld [vmem:[%s3368_s4 + $0x164] ss:$16 sps:$4 sm:$0xff]   ;;  %v2807_v50 = vld [vmem:[%s3368_s4 + $0x160] ss:$16 sps:$4 sm:$0xff]  }
  0x5e   : > { %1915 = vmatpush1.bf16.msra.mxu1 %v2772_v24  ;;  %1875 = vmatprep.subr.bf16.mxu0 %v2773_v25  ;;  %v2805_v46 = vld [vmem:[%s3368_s4 + $0x364] ss:$16 sps:$4 sm:$0xff]   ;;  %v2808_v51 = vld [vmem:[%s3368_s4 + $0x360] ss:$16 sps:$4 sm:$0xff]  }
  0x5f   : > { %1916 = vmatprep.subr.bf16.mxu1 %v2775_v26  ;;  %v295_v47 = vld [vmem:[%s3381_s29] sm:$0xff] }
  0x60   : > { %v3445_v48 = vcombine.high %v295_v47, %v295_v47  ;;  %v2809_v53 = vld [vmem:[%s3368_s4 + $0x184] ss:$16 sps:$4 sm:$0xff]   ;;  %v2813_v55 = vld [vmem:[%s3368_s4 + $0x180] ss:$16 sps:$4 sm:$0xff]   ;;  %v3472_v7 = vcombine.low %v295_v47, %v295_v47 }
  0x61   : > { %1876 = vmatpush1.bf16.msra.mxu0 %v2777_v27  ;;  %v2811_v54 = vld [vmem:[%s3368_s4 + $0x384] ss:$16 sps:$4 sm:$0xff]   ;;  %v2814_v56 = vld [vmem:[%s3368_s4 + $0x380] ss:$16 sps:$4 sm:$0xff]  }
  0x62   : > { %1917 = vmatpush1.bf16.msra.mxu1 %v2778_v28  ;;  %1877 = vmatprep.subr.bf16.mxu0 %v2779_v29  ;;  %v2815_v57 = vld [vmem:[%s3368_s4 + $0x1a4] ss:$16 sps:$4 sm:$0xff]   ;;  %v2819_v59 = vld [vmem:[%s3368_s4 + $0x1a0] ss:$16 sps:$4 sm:$0xff]  }
  0x63   : > { %1918 = vmatprep.subr.bf16.mxu1 %v2781_v30  ;;  %1895 = vmatprep.mubr.bf16.mxu0 %v3445_v48  ;;  %v2817_v58 = vld [vmem:[%s3368_s4 + $0x3a4] ss:$16 sps:$4 sm:$0xff]   ;;  %v2820_v60 = vld [vmem:[%s3368_s4 + $0x3a0] ss:$16 sps:$4 sm:$0xff]  }
  0x64   : > { %v2821_v61 = vld [vmem:[%s3368_s4 + $0x1c4] ss:$16 sps:$4 sm:$0xff]   ;;  %v2825_v63 = vld [vmem:[%s3368_s4 + $0x1c0] ss:$16 sps:$4 sm:$0xff]  }
  0x65   : > { %1878 = vmatpush1.bf16.msra.mxu0 %v2783_v31  ;;  %v2823_v62 = vld [vmem:[%s3368_s4 + $0x3c4] ss:$16 sps:$4 sm:$0xff]   ;;  %v2826_v0 = vld [vmem:[%s3368_s4 + $0x3c0] ss:$16 sps:$4 sm:$0xff]  }
  0x66   : > { %1919 = vmatpush1.bf16.msra.mxu1 %v2784_v32  ;;  %1879 = vmatprep.subr.bf16.mxu0 %v2785_v33  ;;  %v2827_v1 = vld [vmem:[%s3368_s4 + $0x1e4] ss:$16 sps:$4 sm:$0xff]   ;;  %v2831_v3 = vld [vmem:[%s3368_s4 + $0x1e0] ss:$16 sps:$4 sm:$0xff]  }
  0x67   : > { %1920 = vmatprep.subr.bf16.mxu1 %v2787_v34  ;;  %v2829_v2 = vld [vmem:[%s3368_s4 + $0x3e4] ss:$16 sps:$4 sm:$0xff]   ;;  %v2832_v4 = vld [vmem:[%s3368_s4 + $0x3e0] ss:$16 sps:$4 sm:$0xff]   ;;  %v3506_v34 = vld [vmem:[%s3381_s29 + $0x18] sm:$0xff] }
  0x68   : > { %v2839_v5 = vld [vmem:[%s3368_s4 + $0x404] ss:$16 sps:$4 sm:$0xff]   ;;  %v2837_v9 = vld [vmem:[%s3368_s4 + $0x400] ss:$16 sps:$4 sm:$0xff]  }
  0x69   : > { %1880 = vmatpush1.bf16.msra.mxu0 %v2789_v35  ;;  %v2842_v6 = vld [vmem:[%s3368_s4 + $0x604] ss:$16 sps:$4 sm:$0xff]   ;;  %v2840_v10 = vld [vmem:[%s3368_s4 + $0x600] ss:$16 sps:$4 sm:$0xff]  }
  0x6a   : > { %1921 = vmatpush1.bf16.msra.mxu1 %v2790_v36  ;;  %1881 = vmatprep.subr.bf16.mxu0 %v2791_v37  ;;  %v2845_v11 = vld [vmem:[%s3368_s4 + $0x424] ss:$16 sps:$4 sm:$0xff]   ;;  %v2843_v13 = vld [vmem:[%s3368_s4 + $0x420] ss:$16 sps:$4 sm:$0xff]  }
  0x6b   : > { %1922 = vmatprep.subr.bf16.mxu1 %v2793_v38  ;;  %v2848_v12 = vld [vmem:[%s3368_s4 + $0x624] ss:$16 sps:$4 sm:$0xff]   ;;  %v2846_v14 = vld [vmem:[%s3368_s4 + $0x620] ss:$16 sps:$4 sm:$0xff]   ;;  %v3516_v38 = vcombine.high %v3506_v34, %v3506_v34 }
  0x6c   : > { %v2851_v15 = vld [vmem:[%s3368_s4 + $0x444] ss:$16 sps:$4 sm:$0xff]   ;;  %v2849_v17 = vld [vmem:[%s3368_s4 + $0x440] ss:$16 sps:$4 sm:$0xff]  }
  0x6d   : > { %1882 = vmatpush1.bf16.msra.mxu0 %v2795_v39  ;;  %v2854_v16 = vld [vmem:[%s3368_s4 + $0x644] ss:$16 sps:$4 sm:$0xff]   ;;  %v2852_v18 = vld [vmem:[%s3368_s4 + $0x640] ss:$16 sps:$4 sm:$0xff]  }
  0x6e   : > { %1923 = vmatpush1.bf16.msra.mxu1 %v2796_v40  ;;  %1883 = vmatprep.subr.bf16.mxu0 %v2797_v41  ;;  %v2857_v19 = vld [vmem:[%s3368_s4 + $0x464] ss:$16 sps:$4 sm:$0xff]   ;;  %v2855_v21 = vld [vmem:[%s3368_s4 + $0x460] ss:$16 sps:$4 sm:$0xff]  }
  0x6f   : > { %1924 = vmatprep.subr.bf16.mxu1 %v2799_v42  ;;  %v2860_v20 = vld [vmem:[%s3368_s4 + $0x664] ss:$16 sps:$4 sm:$0xff]   ;;  %v2858_v22 = vld [vmem:[%s3368_s4 + $0x660] ss:$16 sps:$4 sm:$0xff]  }
  0x70   : > { %v2863_v23 = vld [vmem:[%s3368_s4 + $0x484] ss:$16 sps:$4 sm:$0xff]   ;;  %v2861_v25 = vld [vmem:[%s3368_s4 + $0x480] ss:$16 sps:$4 sm:$0xff]  }
  0x71   : > { %1884 = vmatpush1.bf16.msra.mxu0 %v2801_v43  ;;  %v2866_v24 = vld [vmem:[%s3368_s4 + $0x684] ss:$16 sps:$4 sm:$0xff]   ;;  %v2864_v26 = vld [vmem:[%s3368_s4 + $0x680] ss:$16 sps:$4 sm:$0xff]  }
  0x72   : > { %1925 = vmatpush1.bf16.msra.mxu1 %v2802_v44  ;;  %1885 = vmatprep.subr.bf16.mxu0 %v2803_v45  ;;  %v2869_v27 = vld [vmem:[%s3368_s4 + $0x4a4] ss:$16 sps:$4 sm:$0xff]   ;;  %v2867_v29 = vld [vmem:[%s3368_s4 + $0x4a0] ss:$16 sps:$4 sm:$0xff]  }
  0x73   : > { %1926 = vmatprep.subr.bf16.mxu1 %v2805_v46  ;;  %v2872_v28 = vld [vmem:[%s3368_s4 + $0x6a4] ss:$16 sps:$4 sm:$0xff]   ;;  %v2870_v30 = vld [vmem:[%s3368_s4 + $0x6a0] ss:$16 sps:$4 sm:$0xff]  }
  0x74   : > { %v2875_v31 = vld [vmem:[%s3368_s4 + $0x4c4] ss:$16 sps:$4 sm:$0xff]   ;;  %v2873_v35 = vld [vmem:[%s3368_s4 + $0x4c0] ss:$16 sps:$4 sm:$0xff]  }
  0x75   : > { %1886 = vmatpush1.bf16.msra.mxu0 %v2807_v50  ;;  %v2878_v32 = vld [vmem:[%s3368_s4 + $0x6c4] ss:$16 sps:$4 sm:$0xff]   ;;  %v2876_v36 = vld [vmem:[%s3368_s4 + $0x6c0] ss:$16 sps:$4 sm:$0xff]  }
  0x76   : > { %1927 = vmatpush1.bf16.msra.mxu1 %v2808_v51  ;;  %1887 = vmatprep.subr.bf16.mxu0 %v2809_v53  ;;  %v3503_v33 = vld [vmem:[%s3381_s29 + $0x10] sm:$0xff] }
  0x77   : > { %1928 = vmatprep.subr.bf16.mxu1 %v2811_v54  ;;  %v3512_v37 = vcombine.high %v3503_v33, %v3503_v33  ;;  %v2881_v39 = vld [vmem:[%s3368_s4 + $0x4e4] ss:$16 sps:$4 sm:$0xff]   ;;  %v2879_v41 = vld [vmem:[%s3368_s4 + $0x4e0] ss:$16 sps:$4 sm:$0xff]  }
  0x78   : > { %v2884_v40 = vld [vmem:[%s3368_s4 + $0x6e4] ss:$16 sps:$4 sm:$0xff]   ;;  %v2882_v42 = vld [vmem:[%s3368_s4 + $0x6e0] ss:$16 sps:$4 sm:$0xff]  }
  0x79   : > { %1888 = vmatpush1.bf16.msra.mxu0 %v2813_v55  ;;  %v2887_v43 = vld [vmem:[%s3368_s4 + $0x504] ss:$16 sps:$4 sm:$0xff]   ;;  %v2885_v45 = vld [vmem:[%s3368_s4 + $0x500] ss:$16 sps:$4 sm:$0xff]  }
  0x7a   : > { %1929 = vmatpush1.bf16.msra.mxu1 %v2814_v56  ;;  %1889 = vmatprep.subr.bf16.mxu0 %v2815_v57  ;;  %v2890_v44 = vld [vmem:[%s3368_s4 + $0x704] ss:$16 sps:$4 sm:$0xff]   ;;  %v2888_v46 = vld [vmem:[%s3368_s4 + $0x700] ss:$16 sps:$4 sm:$0xff]  }
  0x7b   : > { %1930 = vmatprep.subr.bf16.mxu1 %v2817_v58  ;;  %v2893_v47 = vld [vmem:[%s3368_s4 + $0x524] ss:$16 sps:$4 sm:$0xff]   ;;  %v2891_v50 = vld [vmem:[%s3368_s4 + $0x520] ss:$16 sps:$4 sm:$0xff]  }
  0x7c   : > { %v2896_v49 = vld [vmem:[%s3368_s4 + $0x724] ss:$16 sps:$4 sm:$0xff]   ;;  %v2894_v51 = vld [vmem:[%s3368_s4 + $0x720] ss:$16 sps:$4 sm:$0xff]  }
  0x7d   : > { %1890 = vmatpush1.bf16.msra.mxu0 %v2819_v59  ;;  %v2899_v53 = vld [vmem:[%s3368_s4 + $0x544] ss:$16 sps:$4 sm:$0xff]   ;;  %v2897_v55 = vld [vmem:[%s3368_s4 + $0x540] ss:$16 sps:$4 sm:$0xff]  }
  0x7e   : > { %1931 = vmatpush1.bf16.msra.mxu1 %v2820_v60  ;;  %1891 = vmatprep.subr.bf16.mxu0 %v2821_v61  ;;  %v2902_v54 = vld [vmem:[%s3368_s4 + $0x744] ss:$16 sps:$4 sm:$0xff]   ;;  %v2900_v56 = vld [vmem:[%s3368_s4 + $0x740] ss:$16 sps:$4 sm:$0xff]  }
  0x7f   : > { %1932 = vmatprep.subr.bf16.mxu1 %v2823_v62  ;;  %v2905_v57 = vld [vmem:[%s3368_s4 + $0x564] ss:$16 sps:$4 sm:$0xff]   ;;  %v2903_v59 = vld [vmem:[%s3368_s4 + $0x560] ss:$16 sps:$4 sm:$0xff]  }
  0x80   : > { %v2908_v58 = vld [vmem:[%s3368_s4 + $0x764] ss:$16 sps:$4 sm:$0xff]   ;;  %v2906_v60 = vld [vmem:[%s3368_s4 + $0x760] ss:$16 sps:$4 sm:$0xff]  }
  0x81   : > { %1892 = vmatpush1.bf16.msra.mxu0 %v2825_v63  ;;  %v2911_v61 = vld [vmem:[%s3368_s4 + $0x584] ss:$16 sps:$4 sm:$0xff]   ;;  %v2909_v63 = vld [vmem:[%s3368_s4 + $0x580] ss:$16 sps:$4 sm:$0xff]  }
  0x82   : > { %1933 = vmatpush1.bf16.msra.mxu1 %v2826_v0  ;;  %1893 = vmatprep.subr.bf16.mxu0 %v2827_v1  ;;  %v2914_v62 = vld [vmem:[%s3368_s4 + $0x784] ss:$16 sps:$4 sm:$0xff]   ;;  %v2912_v0 = vld [vmem:[%s3368_s4 + $0x780] ss:$16 sps:$4 sm:$0xff]  }
  0x83   : > { %1934 = vmatprep.subr.bf16.mxu1 %v2829_v2  ;;  %v2917_v1 = vld [vmem:[%s3368_s4 + $0x5a4] ss:$16 sps:$4 sm:$0xff]  }
  0x84   : > { %v2920_v2 = vld [vmem:[%s3368_s4 + $0x7a4] ss:$16 sps:$4 sm:$0xff]  }
  0x85   : > { %1894 = vmatpush1.bf16.msra.mxu0 %v2831_v3  ;;  %v2915_v3 = vld [vmem:[%s3368_s4 + $0x5a0] ss:$16 sps:$4 sm:$0xff]  }
  0x86   : > { %1935 = vmatpush1.bf16.msra.mxu1 %v2832_v4  ;;  %1945 = vmatprep.subr.bf16.mxu0 %v2839_v5  ;;  %v2918_v4 = vld [vmem:[%s3368_s4 + $0x7a0] ss:$16 sps:$4 sm:$0xff]   ;;  %v2923_v5 = vld [vmem:[%s3368_s4 + $0x5c4] ss:$16 sps:$4 sm:$0xff]  }
  0x87   : > { %1986 = vmatprep.subr.bf16.mxu1 %v2842_v6  ;;  %v2926_v6 = vld [vmem:[%s3368_s4 + $0x7c4] ss:$16 sps:$4 sm:$0xff]  }
  0x88   : > { %1896 = vmatmul.mubr.bf16.vlgmr.msra.gmra.mrb[0].mxu0 %v3472_v7 }
  0x89   : > { %1937 = vmatmul.mubr.bf16.vlgmr.msra.gmra.mrb[0].mxu1 %v3474_v8  ;;  %1946 = vmatpush1.bf16.msra.mxu0 %v2837_v9  ;;  %v2921_v9 = vld [vmem:[%s3368_s4 + $0x5c0] ss:$16 sps:$4 sm:$0xff]  }
  0x8a   : > { %1987 = vmatpush1.bf16.msra.mxu1 %v2840_v10  ;;  %1947 = vmatprep.subr.bf16.mxu0 %v2845_v11  ;;  %v2924_v10 = vld [vmem:[%s3368_s4 + $0x7c0] ss:$16 sps:$4 sm:$0xff]   ;;  %v2929_v11 = vld [vmem:[%s3368_s4 + $0x5e4] ss:$16 sps:$4 sm:$0xff]  }
  0x8b   : > { %1988 = vmatprep.subr.bf16.mxu1 %v2848_v12  ;;  %1977 = vmatprep.mubr.bf16.mxu0 %v3512_v37  ;;  %v2932_v12 = vld [vmem:[%s3368_s4 + $0x7e4] ss:$16 sps:$4 sm:$0xff]  }
  0x8c   : > { %2018 = vmatprep.mubr.bf16.mxu1 %v3516_v38 }
  0x8d   : > { %1948 = vmatpush1.bf16.msra.mxu0 %v2843_v13  ;;  %v2927_v13 = vld [vmem:[%s3368_s4 + $0x5e0] ss:$16 sps:$4 sm:$0xff]  }
  0x8e   : > { %1989 = vmatpush1.bf16.msra.mxu1 %v2846_v14  ;;  %1949 = vmatprep.subr.bf16.mxu0 %v2851_v15  ;;  %v2930_v14 = vld [vmem:[%s3368_s4 + $0x7e0] ss:$16 sps:$4 sm:$0xff]   ;;  %v2939_v15 = vld [vmem:[%s3368_s4 + $0xc] ss:$16 sps:$4 sm:$0xff]  }
  0x8f   : > { %1990 = vmatprep.subr.bf16.mxu1 %v2854_v16  ;;  %v2942_v16 = vld [vmem:[%s3368_s4 + $0x20c] ss:$16 sps:$4 sm:$0xff]  }
  0x91   : > { %1950 = vmatpush1.bf16.msra.mxu0 %v2849_v17  ;;  %v3560_v17 = vcombine.low %v3503_v33, %v3503_v33  ;;  %v2961_v33 = vld [vmem:[%s3368_s4 + $0x88] ss:$16 sps:$4 sm:$0xff]  }
  0x92   : > { %1991 = vmatpush1.bf16.msra.mxu1 %v2852_v18  ;;  %1951 = vmatprep.subr.bf16.mxu0 %v2857_v19  ;;  %v3564_v18 = vcombine.low %v3506_v34, %v3506_v34  ;;  %v2937_v19 = vld [vmem:[%s3368_s4 + $0x8] ss:$16 sps:$4 sm:$0xff]  }
  0x93   : > { %1992 = vmatprep.subr.bf16.mxu1 %v2860_v20  ;;  %v2940_v20 = vld [vmem:[%s3368_s4 + $0x208] ss:$16 sps:$4 sm:$0xff]  }
  0x94   : > { %v2964_v34 = vld [vmem:[%s3368_s4 + $0x288] ss:$16 sps:$4 sm:$0xff]  }
  0x95   : > { %1952 = vmatpush1.bf16.msra.mxu0 %v2855_v21  ;;  %v2945_v21 = vld [vmem:[%s3368_s4 + $0x2c] ss:$16 sps:$4 sm:$0xff]  }
  0x96   : > { %1993 = vmatpush1.bf16.msra.mxu1 %v2858_v22  ;;  %1953 = vmatprep.subr.bf16.mxu0 %v2863_v23  ;;  %v2948_v22 = vld [vmem:[%s3368_s4 + $0x22c] ss:$16 sps:$4 sm:$0xff]   ;;  %v2943_v23 = vld [vmem:[%s3368_s4 + $0x28] ss:$16 sps:$4 sm:$0xff]  }
  0x97   : > { %1994 = vmatprep.subr.bf16.mxu1 %v2866_v24  ;;  %v2946_v24 = vld [vmem:[%s3368_s4 + $0x228] ss:$16 sps:$4 sm:$0xff]  }
  0x99   : > { %1954 = vmatpush1.bf16.msra.mxu0 %v2861_v25  ;;  %v2951_v25 = vld [vmem:[%s3368_s4 + $0x4c] ss:$16 sps:$4 sm:$0xff]  }
  0x9a   : > { %1995 = vmatpush1.bf16.msra.mxu1 %v2864_v26  ;;  %1955 = vmatprep.subr.bf16.mxu0 %v2869_v27  ;;  %v2954_v26 = vld [vmem:[%s3368_s4 + $0x24c] ss:$16 sps:$4 sm:$0xff]   ;;  %v2949_v27 = vld [vmem:[%s3368_s4 + $0x48] ss:$16 sps:$4 sm:$0xff]  }
  0x9b   : > { %1996 = vmatprep.subr.bf16.mxu1 %v2872_v28  ;;  %v2952_v28 = vld [vmem:[%s3368_s4 + $0x248] ss:$16 sps:$4 sm:$0xff]  }
  0x9d   : > { %1956 = vmatpush1.bf16.msra.mxu0 %v2867_v29  ;;  %v2957_v29 = vld [vmem:[%s3368_s4 + $0x6c] ss:$16 sps:$4 sm:$0xff]  }
  0x9e   : > { %1997 = vmatpush1.bf16.msra.mxu1 %v2870_v30  ;;  %1957 = vmatprep.subr.bf16.mxu0 %v2875_v31  ;;  %v2960_v30 = vld [vmem:[%s3368_s4 + $0x26c] ss:$16 sps:$4 sm:$0xff]   ;;  %v2955_v31 = vld [vmem:[%s3368_s4 + $0x68] ss:$16 sps:$4 sm:$0xff]  }
  0x9f   : > { %1998 = vmatprep.subr.bf16.mxu1 %v2878_v32  ;;  %v2958_v32 = vld [vmem:[%s3368_s4 + $0x268] ss:$16 sps:$4 sm:$0xff]  }
  0xa1   : > { %1958 = vmatpush1.bf16.msra.mxu0 %v2873_v35  ;;  %v2969_v35 = vld [vmem:[%s3368_s4 + $0xac] ss:$16 sps:$4 sm:$0xff]  }
  0xa2   : > { %1999 = vmatpush1.bf16.msra.mxu1 %v2876_v36  ;;  %1959 = vmatprep.subr.bf16.mxu0 %v2881_v39  ;;  %v2972_v36 = vld [vmem:[%s3368_s4 + $0x2ac] ss:$16 sps:$4 sm:$0xff]   ;;  %v2967_v39 = vld [vmem:[%s3368_s4 + $0xa8] ss:$16 sps:$4 sm:$0xff]  }
  0xa3   : > { %2000 = vmatprep.subr.bf16.mxu1 %v2884_v40  ;;  %v2970_v40 = vld [vmem:[%s3368_s4 + $0x2a8] ss:$16 sps:$4 sm:$0xff]  }
  0xa5   : > { %1960 = vmatpush1.bf16.msra.mxu0 %v2879_v41  ;;  %v2975_v41 = vld [vmem:[%s3368_s4 + $0xcc] ss:$16 sps:$4 sm:$0xff]  }
  0xa6   : > { %2001 = vmatpush1.bf16.msra.mxu1 %v2882_v42  ;;  %1961 = vmatprep.subr.bf16.mxu0 %v2887_v43  ;;  %v2978_v42 = vld [vmem:[%s3368_s4 + $0x2cc] ss:$16 sps:$4 sm:$0xff]   ;;  %v2973_v43 = vld [vmem:[%s3368_s4 + $0xc8] ss:$16 sps:$4 sm:$0xff]  }
  0xa7   : > { %2002 = vmatprep.subr.bf16.mxu1 %v2890_v44  ;;  %v2976_v44 = vld [vmem:[%s3368_s4 + $0x2c8] ss:$16 sps:$4 sm:$0xff]  }
  0xa9   : > { %1962 = vmatpush1.bf16.msra.mxu0 %v2885_v45  ;;  %v2981_v45 = vld [vmem:[%s3368_s4 + $0xec] ss:$16 sps:$4 sm:$0xff]  }
  0xaa   : > { %2003 = vmatpush1.bf16.msra.mxu1 %v2888_v46  ;;  %1963 = vmatprep.subr.bf16.mxu0 %v2893_v47  ;;  %v2984_v46 = vld [vmem:[%s3368_s4 + $0x2ec] ss:$16 sps:$4 sm:$0xff]   ;;  %v2979_v47 = vld [vmem:[%s3368_s4 + $0xe8] ss:$16 sps:$4 sm:$0xff]  }
  0xab   : > { %2004 = vmatprep.subr.bf16.mxu1 %v2896_v49  ;;  %v2982_v49 = vld [vmem:[%s3368_s4 + $0x2e8] ss:$16 sps:$4 sm:$0xff]  }
  0xad   : > { %1964 = vmatpush1.bf16.msra.mxu0 %v2891_v50  ;;  %v2987_v50 = vld [vmem:[%s3368_s4 + $0x10c] ss:$16 sps:$4 sm:$0xff]  }
  0xae   : > { %2005 = vmatpush1.bf16.msra.mxu1 %v2894_v51  ;;  %1965 = vmatprep.subr.bf16.mxu0 %v2899_v53  ;;  %v2990_v51 = vld [vmem:[%s3368_s4 + $0x30c] ss:$16 sps:$4 sm:$0xff]   ;;  %v2985_v53 = vld [vmem:[%s3368_s4 + $0x108] ss:$16 sps:$4 sm:$0xff]  }
  0xaf   : > { %2006 = vmatprep.subr.bf16.mxu1 %v2902_v54  ;;  %v2988_v54 = vld [vmem:[%s3368_s4 + $0x308] ss:$16 sps:$4 sm:$0xff]  }
  0xb1   : > { %1966 = vmatpush1.bf16.msra.mxu0 %v2897_v55  ;;  %v2993_v55 = vld [vmem:[%s3368_s4 + $0x12c] ss:$16 sps:$4 sm:$0xff]  }
  0xb2   : > { %2007 = vmatpush1.bf16.msra.mxu1 %v2900_v56  ;;  %1967 = vmatprep.subr.bf16.mxu0 %v2905_v57  ;;  %v2996_v56 = vld [vmem:[%s3368_s4 + $0x32c] ss:$16 sps:$4 sm:$0xff]   ;;  %v2991_v57 = vld [vmem:[%s3368_s4 + $0x128] ss:$16 sps:$4 sm:$0xff]  }
  0xb3   : > { %2008 = vmatprep.subr.bf16.mxu1 %v2908_v58  ;;  %v2994_v58 = vld [vmem:[%s3368_s4 + $0x328] ss:$16 sps:$4 sm:$0xff]  }
  0xb5   : > { %1968 = vmatpush1.bf16.msra.mxu0 %v2903_v59  ;;  %v2999_v59 = vld [vmem:[%s3368_s4 + $0x14c] ss:$16 sps:$4 sm:$0xff]  }
  0xb6   : > { %2009 = vmatpush1.bf16.msra.mxu1 %v2906_v60  ;;  %1969 = vmatprep.subr.bf16.mxu0 %v2911_v61  ;;  %v3002_v60 = vld [vmem:[%s3368_s4 + $0x34c] ss:$16 sps:$4 sm:$0xff]   ;;  %v2997_v61 = vld [vmem:[%s3368_s4 + $0x148] ss:$16 sps:$4 sm:$0xff]  }
  0xb7   : > { %2010 = vmatprep.subr.bf16.mxu1 %v2914_v62  ;;  %v3000_v62 = vld [vmem:[%s3368_s4 + $0x348] ss:$16 sps:$4 sm:$0xff]  }
  0xb9   : > { %1970 = vmatpush1.bf16.msra.mxu0 %v2909_v63  ;;  %v3005_v63 = vld [vmem:[%s3368_s4 + $0x16c] ss:$16 sps:$4 sm:$0xff]  }
  0xba   : > { %2011 = vmatpush1.bf16.msra.mxu1 %v2912_v0  ;;  %1971 = vmatprep.subr.bf16.mxu0 %v2917_v1  ;;  %v3008_v0 = vld [vmem:[%s3368_s4 + $0x36c] ss:$16 sps:$4 sm:$0xff]   ;;  %v3003_v1 = vld [vmem:[%s3368_s4 + $0x168] ss:$16 sps:$4 sm:$0xff]  }
  0xbb   : > { %2012 = vmatprep.subr.bf16.mxu1 %v2920_v2  ;;  %v3006_v2 = vld [vmem:[%s3368_s4 + $0x368] ss:$16 sps:$4 sm:$0xff]  }
  0xbd   : > { %1972 = vmatpush1.bf16.msra.mxu0 %v2915_v3  ;;  %v3011_v3 = vld [vmem:[%s3368_s4 + $0x18c] ss:$16 sps:$4 sm:$0xff]  }
  0xbe   : > { %2013 = vmatpush1.bf16.msra.mxu1 %v2918_v4  ;;  %1973 = vmatprep.subr.bf16.mxu0 %v2923_v5  ;;  %v3014_v4 = vld [vmem:[%s3368_s4 + $0x38c] ss:$16 sps:$4 sm:$0xff]   ;;  %v3009_v5 = vld [vmem:[%s3368_s4 + $0x188] ss:$16 sps:$4 sm:$0xff]  }
  0xbf   : > { %2014 = vmatprep.subr.bf16.mxu1 %v2926_v6  ;;  %v3012_v6 = vld [vmem:[%s3368_s4 + $0x388] ss:$16 sps:$4 sm:$0xff]  }
  0xc1   : > { %1974 = vmatpush1.bf16.msra.mxu0 %v2921_v9  ;;  %v3017_v9 = vld [vmem:[%s3368_s4 + $0x1ac] ss:$16 sps:$4 sm:$0xff]  }
  0xc2   : > { %2015 = vmatpush1.bf16.msra.mxu1 %v2924_v10  ;;  %1975 = vmatprep.subr.bf16.mxu0 %v2929_v11  ;;  %v3020_v10 = vld [vmem:[%s3368_s4 + $0x3ac] ss:$16 sps:$4 sm:$0xff]   ;;  %v3015_v11 = vld [vmem:[%s3368_s4 + $0x1a8] ss:$16 sps:$4 sm:$0xff]  }
  0xc3   : > { %2016 = vmatprep.subr.bf16.mxu1 %v2932_v12  ;;  %v3018_v12 = vld [vmem:[%s3368_s4 + $0x3a8] ss:$16 sps:$4 sm:$0xff]  }
  0xc5   : > { %1976 = vmatpush1.bf16.msra.mxu0 %v2927_v13  ;;  %v3023_v13 = vld [vmem:[%s3368_s4 + $0x1cc] ss:$16 sps:$4 sm:$0xff]  }
  0xc6   : > { %2017 = vmatpush1.bf16.msra.mxu1 %v2930_v14  ;;  %2027 = vmatprep.subr.bf16.mxu0 %v2939_v15  ;;  %v3026_v14 = vld [vmem:[%s3368_s4 + $0x3cc] ss:$16 sps:$4 sm:$0xff]   ;;  %v3021_v15 = vld [vmem:[%s3368_s4 + $0x1c8] ss:$16 sps:$4 sm:$0xff]  }
  0xc7   : > { %2068 = vmatprep.subr.bf16.mxu1 %v2942_v16  ;;  %v3024_v16 = vld [vmem:[%s3368_s4 + $0x3c8] ss:$16 sps:$4 sm:$0xff]  }
  0xc8   : > { %1978 = vmatmul.mubr.bf16.vlgmr.msra.gmra.mrb[4].mxu0 %v3560_v17 }
  0xc9   : > { %2019 = vmatmul.mubr.bf16.vlgmr.msra.gmra.mrb[4].mxu1 %v3564_v18  ;;  %2028 = vmatpush1.bf16.msra.mxu0 %v2937_v19  ;;  %v3029_v19 = vld [vmem:[%s3368_s4 + $0x1ec] ss:$16 sps:$4 sm:$0xff]  }
  0xca   : > { %2069 = vmatpush1.bf16.msra.mxu1 %v2940_v20  ;;  %2029 = vmatprep.subr.bf16.mxu0 %v2945_v21  ;;  %v3032_v20 = vld [vmem:[%s3368_s4 + $0x3ec] ss:$16 sps:$4 sm:$0xff]   ;;  %v3027_v21 = vld [vmem:[%s3368_s4 + $0x1e8] ss:$16 sps:$4 sm:$0xff]  }
  0xcb   : > { %2070 = vmatprep.subr.bf16.mxu1 %v2948_v22  ;;  %2059 = vmatprep.mubr.bf16.mxu0 %v3445_v48  ;;  %v2963_v48 = vld [vmem:[%s3368_s4 + $0x8c] ss:$16 sps:$4 sm:$0xff]   ;;  %v3030_v22 = vld [vmem:[%s3368_s4 + $0x3e8] ss:$16 sps:$4 sm:$0xff]  }
  0xcc   : > { %2100 = vmatprep.mubr.bf16.mxu1 %v3450_v52  ;;  %v2966_v52 = vld [vmem:[%s3368_s4 + $0x28c] ss:$16 sps:$4 sm:$0xff]  }
  0xcd   : > { %2030 = vmatpush1.bf16.msra.mxu0 %v2943_v23  ;;  %v3035_v23 = vld [vmem:[%s3368_s4 + $0x40c] ss:$16 sps:$4 sm:$0xff]  }
  0xce   : > { %2071 = vmatpush1.bf16.msra.mxu1 %v2946_v24  ;;  %2031 = vmatprep.subr.bf16.mxu0 %v2951_v25  ;;  %v3038_v24 = vld [vmem:[%s3368_s4 + $0x60c] ss:$16 sps:$4 sm:$0xff]   ;;  %v3033_v25 = vld [vmem:[%s3368_s4 + $0x408] ss:$16 sps:$4 sm:$0xff]  }
  0xcf   : > { %2072 = vmatprep.subr.bf16.mxu1 %v2954_v26  ;;  %v3036_v26 = vld [vmem:[%s3368_s4 + $0x608] ss:$16 sps:$4 sm:$0xff]  }
  0xd1   : > { %2032 = vmatpush1.bf16.msra.mxu0 %v2949_v27  ;;  %v3041_v27 = vld [vmem:[%s3368_s4 + $0x42c] ss:$16 sps:$4 sm:$0xff]  }
  0xd2   : > { %2073 = vmatpush1.bf16.msra.mxu1 %v2952_v28  ;;  %2033 = vmatprep.subr.bf16.mxu0 %v2957_v29  ;;  %v3044_v28 = vld [vmem:[%s3368_s4 + $0x62c] ss:$16 sps:$4 sm:$0xff]   ;;  %v3039_v29 = vld [vmem:[%s3368_s4 + $0x428] ss:$16 sps:$4 sm:$0xff]  }
  0xd3   : > { %2074 = vmatprep.subr.bf16.mxu1 %v2960_v30  ;;  %v3042_v30 = vld [vmem:[%s3368_s4 + $0x628] ss:$16 sps:$4 sm:$0xff]  }
  0xd5   : > { %2034 = vmatpush1.bf16.msra.mxu0 %v2955_v31  ;;  %v3047_v31 = vld [vmem:[%s3368_s4 + $0x44c] ss:$16 sps:$4 sm:$0xff]  }
  0xd6   : > { %2075 = vmatpush1.bf16.msra.mxu1 %v2958_v32  ;;  %2035 = vmatprep.subr.bf16.mxu0 %v2963_v48  ;;  %v3050_v32 = vld [vmem:[%s3368_s4 + $0x64c] ss:$16 sps:$4 sm:$0xff]  }
  0xd7   : > { %2076 = vmatprep.subr.bf16.mxu1 %v2966_v52  ;;  %v3053_v48 = vld [vmem:[%s3368_s4 + $0x46c] ss:$16 sps:$4 sm:$0xff]  }
  0xd8   : > { %v3056_v52 = vld [vmem:[%s3368_s4 + $0x66c] ss:$16 sps:$4 sm:$0xff]  }
  0xd9   : > { %2036 = vmatpush1.bf16.msra.mxu0 %v2961_v33  ;;  %v3051_v33 = vld [vmem:[%s3368_s4 + $0x468] ss:$16 sps:$4 sm:$0xff]  }
  0xda   : > { %2077 = vmatpush1.bf16.msra.mxu1 %v2964_v34  ;;  %2037 = vmatprep.subr.bf16.mxu0 %v2969_v35  ;;  %v3062_v34 = vld [vmem:[%s3368_s4 + $0x68c] ss:$16 sps:$4 sm:$0xff]   ;;  %v3057_v35 = vld [vmem:[%s3368_s4 + $0x488] ss:$16 sps:$4 sm:$0xff]  }
  0xdb   : > { %2078 = vmatprep.subr.bf16.mxu1 %v2972_v36  ;;  %v3060_v36 = vld [vmem:[%s3368_s4 + $0x688] ss:$16 sps:$4 sm:$0xff]  }
  0xdd   : > { %2038 = vmatpush1.bf16.msra.mxu0 %v2967_v39  ;;  %v3065_v39 = vld [vmem:[%s3368_s4 + $0x4ac] ss:$16 sps:$4 sm:$0xff]  }
  0xde   : > { %2079 = vmatpush1.bf16.msra.mxu1 %v2970_v40  ;;  %2039 = vmatprep.subr.bf16.mxu0 %v2975_v41  ;;  %v3068_v40 = vld [vmem:[%s3368_s4 + $0x6ac] ss:$16 sps:$4 sm:$0xff]   ;;  %v3063_v41 = vld [vmem:[%s3368_s4 + $0x4a8] ss:$16 sps:$4 sm:$0xff]  }
  0xdf   : > { %2080 = vmatprep.subr.bf16.mxu1 %v2978_v42  ;;  %v3066_v42 = vld [vmem:[%s3368_s4 + $0x6a8] ss:$16 sps:$4 sm:$0xff]  }
  0xe1   : > { %2040 = vmatpush1.bf16.msra.mxu0 %v2973_v43  ;;  %v3071_v43 = vld [vmem:[%s3368_s4 + $0x4cc] ss:$16 sps:$4 sm:$0xff]  }
  0xe2   : > { %2081 = vmatpush1.bf16.msra.mxu1 %v2976_v44  ;;  %2041 = vmatprep.subr.bf16.mxu0 %v2981_v45  ;;  %v3074_v44 = vld [vmem:[%s3368_s4 + $0x6cc] ss:$16 sps:$4 sm:$0xff]   ;;  %v3069_v45 = vld [vmem:[%s3368_s4 + $0x4c8] ss:$16 sps:$4 sm:$0xff]  }
  0xe3   : > { %2082 = vmatprep.subr.bf16.mxu1 %v2984_v46  ;;  %v3072_v46 = vld [vmem:[%s3368_s4 + $0x6c8] ss:$16 sps:$4 sm:$0xff]  }
  0xe5   : > { %2042 = vmatpush1.bf16.msra.mxu0 %v2979_v47  ;;  %v3077_v47 = vld [vmem:[%s3368_s4 + $0x4ec] ss:$16 sps:$4 sm:$0xff]  }
  0xe6   : > { %2083 = vmatpush1.bf16.msra.mxu1 %v2982_v49  ;;  %2043 = vmatprep.subr.bf16.mxu0 %v2987_v50  ;;  %v3080_v49 = vld [vmem:[%s3368_s4 + $0x6ec] ss:$16 sps:$4 sm:$0xff]   ;;  %v3075_v50 = vld [vmem:[%s3368_s4 + $0x4e8] ss:$16 sps:$4 sm:$0xff]  }
  0xe7   : > { %2084 = vmatprep.subr.bf16.mxu1 %v2990_v51  ;;  %v3078_v51 = vld [vmem:[%s3368_s4 + $0x6e8] ss:$16 sps:$4 sm:$0xff]  }
  0xe9   : > { %2044 = vmatpush1.bf16.msra.mxu0 %v2985_v53  ;;  %v3083_v53 = vld [vmem:[%s3368_s4 + $0x50c] ss:$16 sps:$4 sm:$0xff]  }
  0xea   : > { %2085 = vmatpush1.bf16.msra.mxu1 %v2988_v54  ;;  %2045 = vmatprep.subr.bf16.mxu0 %v2993_v55  ;;  %v3086_v54 = vld [vmem:[%s3368_s4 + $0x70c] ss:$16 sps:$4 sm:$0xff]   ;;  %v3081_v55 = vld [vmem:[%s3368_s4 + $0x508] ss:$16 sps:$4 sm:$0xff]  }
  0xeb   : > { %2086 = vmatprep.subr.bf16.mxu1 %v2996_v56  ;;  %v3084_v56 = vld [vmem:[%s3368_s4 + $0x708] ss:$16 sps:$4 sm:$0xff]  }
  0xed   : > { %2046 = vmatpush1.bf16.msra.mxu0 %v2991_v57  ;;  %v3089_v57 = vld [vmem:[%s3368_s4 + $0x52c] ss:$16 sps:$4 sm:$0xff]  }
  0xee   : > { %2087 = vmatpush1.bf16.msra.mxu1 %v2994_v58  ;;  %2047 = vmatprep.subr.bf16.mxu0 %v2999_v59  ;;  %v3092_v58 = vld [vmem:[%s3368_s4 + $0x72c] ss:$16 sps:$4 sm:$0xff]   ;;  %v3087_v59 = vld [vmem:[%s3368_s4 + $0x528] ss:$16 sps:$4 sm:$0xff]  }
  0xef   : > { %2088 = vmatprep.subr.bf16.mxu1 %v3002_v60  ;;  %v3090_v60 = vld [vmem:[%s3368_s4 + $0x728] ss:$16 sps:$4 sm:$0xff]  }
  0xf1   : > { %2048 = vmatpush1.bf16.msra.mxu0 %v2997_v61  ;;  %v3095_v61 = vld [vmem:[%s3368_s4 + $0x54c] ss:$16 sps:$4 sm:$0xff]  }
  0xf2   : > { %2089 = vmatpush1.bf16.msra.mxu1 %v3000_v62  ;;  %2049 = vmatprep.subr.bf16.mxu0 %v3005_v63  ;;  %v3098_v62 = vld [vmem:[%s3368_s4 + $0x74c] ss:$16 sps:$4 sm:$0xff]   ;;  %v3093_v63 = vld [vmem:[%s3368_s4 + $0x548] ss:$16 sps:$4 sm:$0xff]  }
  0xf3   : > { %2090 = vmatprep.subr.bf16.mxu1 %v3008_v0  ;;  %v3096_v0 = vld [vmem:[%s3368_s4 + $0x748] ss:$16 sps:$4 sm:$0xff]  }
  0xf5   : > { %2050 = vmatpush1.bf16.msra.mxu0 %v3003_v1  ;;  %v3101_v1 = vld [vmem:[%s3368_s4 + $0x56c] ss:$16 sps:$4 sm:$0xff]  }
  0xf6   : > { %2091 = vmatpush1.bf16.msra.mxu1 %v3006_v2  ;;  %2051 = vmatprep.subr.bf16.mxu0 %v3011_v3  ;;  %v3104_v2 = vld [vmem:[%s3368_s4 + $0x76c] ss:$16 sps:$4 sm:$0xff]   ;;  %v3099_v3 = vld [vmem:[%s3368_s4 + $0x568] ss:$16 sps:$4 sm:$0xff]  }
  0xf7   : > { %2092 = vmatprep.subr.bf16.mxu1 %v3014_v4  ;;  %v3102_v4 = vld [vmem:[%s3368_s4 + $0x768] ss:$16 sps:$4 sm:$0xff]  }
  0xf9   : > { %2052 = vmatpush1.bf16.msra.mxu0 %v3009_v5  ;;  %v3107_v5 = vld [vmem:[%s3368_s4 + $0x58c] ss:$16 sps:$4 sm:$0xff]  }
  0xfa   : > { %2093 = vmatpush1.bf16.msra.mxu1 %v3012_v6  ;;  %2053 = vmatprep.subr.bf16.mxu0 %v3017_v9  ;;  %v3110_v6 = vld [vmem:[%s3368_s4 + $0x78c] ss:$16 sps:$4 sm:$0xff]   ;;  %v3105_v9 = vld [vmem:[%s3368_s4 + $0x588] ss:$16 sps:$4 sm:$0xff]  }
  0xfb   : > { %2094 = vmatprep.subr.bf16.mxu1 %v3020_v10  ;;  %v3108_v10 = vld [vmem:[%s3368_s4 + $0x788] ss:$16 sps:$4 sm:$0xff]  }
  0xfd   : > { %2054 = vmatpush1.bf16.msra.mxu0 %v3015_v11  ;;  %v3113_v11 = vld [vmem:[%s3368_s4 + $0x5ac] ss:$16 sps:$4 sm:$0xff]  }
  0xfe   : > { %2095 = vmatpush1.bf16.msra.mxu1 %v3018_v12  ;;  %2055 = vmatprep.subr.bf16.mxu0 %v3023_v13  ;;  %v3116_v12 = vld [vmem:[%s3368_s4 + $0x7ac] ss:$16 sps:$4 sm:$0xff]   ;;  %v3111_v13 = vld [vmem:[%s3368_s4 + $0x5a8] ss:$16 sps:$4 sm:$0xff]  }
  0xff   : > { %2096 = vmatprep.subr.bf16.mxu1 %v3026_v14  ;;  %v3114_v14 = vld [vmem:[%s3368_s4 + $0x7a8] ss:$16 sps:$4 sm:$0xff]  }
 0x101   : > { %2056 = vmatpush1.bf16.msra.mxu0 %v3021_v15  ;;  %v3119_v15 = vld [vmem:[%s3368_s4 + $0x5cc] ss:$16 sps:$4 sm:$0xff]  }
 0x102   : > { %2097 = vmatpush1.bf16.msra.mxu1 %v3024_v16  ;;  %2057 = vmatprep.subr.bf16.mxu0 %v3029_v19  ;;  %v3122_v16 = vld [vmem:[%s3368_s4 + $0x7cc] ss:$16 sps:$4 sm:$0xff]   ;;  %v3117_v19 = vld [vmem:[%s3368_s4 + $0x5c8] ss:$16 sps:$4 sm:$0xff]  }
 0x103   : > { %2098 = vmatprep.subr.bf16.mxu1 %v3032_v20  ;;  %v3120_v20 = vld [vmem:[%s3368_s4 + $0x7c8] ss:$16 sps:$4 sm:$0xff]  }
 0x105   : > { %2058 = vmatpush1.bf16.msra.mxu0 %v3027_v21  ;;  %v3125_v21 = vld [vmem:[%s3368_s4 + $0x5ec] ss:$16 sps:$4 sm:$0xff]  }
 0x106   : > { %2099 = vmatpush1.bf16.msra.mxu1 %v3030_v22  ;;  %2109 = vmatprep.subr.bf16.mxu0 %v3035_v23  ;;  %v3128_v22 = vld [vmem:[%s3368_s4 + $0x7ec] ss:$16 sps:$4 sm:$0xff]   ;;  %v3123_v23 = vld [vmem:[%s3368_s4 + $0x5e8] ss:$16 sps:$4 sm:$0xff]  }
 0x107   : > { %2150 = vmatprep.subr.bf16.mxu1 %v3038_v24  ;;  %v3126_v24 = vld [vmem:[%s3368_s4 + $0x7e8] ss:$16 sps:$4 sm:$0xff]  }
 0x108   : > { %2060 = vmatmul.mubr.bf16.vlgmr.msra.gmra.mrb[8].mxu0 %v3472_v7  ;;  %v3045_v7 = vld [vmem:[%s3368_s4 + $0x448] ss:$16 sps:$4 sm:$0xff]  }
 0x109   : > { %2101 = vmatmul.mubr.bf16.vlgmr.msra.gmra.mrb[8].mxu1 %v3474_v8  ;;  %2110 = vmatpush1.bf16.msra.mxu0 %v3033_v25  ;;  %v3048_v8 = vld [vmem:[%s3368_s4 + $0x648] ss:$16 sps:$4 sm:$0xff]  }
 0x10a   : > { %2151 = vmatpush1.bf16.msra.mxu1 %v3036_v26  ;;  %2111 = vmatprep.subr.bf16.mxu0 %v3041_v27 }
 0x10b   : > { %2152 = vmatprep.subr.bf16.mxu1 %v3044_v28  ;;  %2141 = vmatprep.mubr.bf16.mxu0 %v3512_v37  ;;  %v3054_v37 = vld [vmem:[%s3368_s4 + $0x668] ss:$16 sps:$4 sm:$0xff]  }
 0x10c   : > { %2182 = vmatprep.mubr.bf16.mxu1 %v3516_v38  ;;  %v3059_v38 = vld [vmem:[%s3368_s4 + $0x48c] ss:$16 sps:$4 sm:$0xff]  }
 0x10d   : > { %2112 = vmatpush1.bf16.msra.mxu0 %v3039_v29 }
 0x10e   : > { %2153 = vmatpush1.bf16.msra.mxu1 %v3042_v30  ;;  %2113 = vmatprep.subr.bf16.mxu0 %v3047_v31 }
 0x10f   : > { %2154 = vmatprep.subr.bf16.mxu1 %v3050_v32 }
 0x111   : > { %2114 = vmatpush1.bf16.msra.mxu0 %v3045_v7 }
 0x112   : > { %2155 = vmatpush1.bf16.msra.mxu1 %v3048_v8  ;;  %2115 = vmatprep.subr.bf16.mxu0 %v3053_v48 }
 0x113   : > { %2156 = vmatprep.subr.bf16.mxu1 %v3056_v52 }
 0x115   : > { %2116 = vmatpush1.bf16.msra.mxu0 %v3051_v33 }
 0x116   : > { %2157 = vmatpush1.bf16.msra.mxu1 %v3054_v37  ;;  %2117 = vmatprep.subr.bf16.mxu0 %v3059_v38  ;;  %v291_v37 = vld [vmem:[%s3391_s12] sm:$0xff] }
 0x117   : > { %2158 = vmatprep.subr.bf16.mxu1 %v3062_v34 }
 0x119   : > { %2118 = vmatpush1.bf16.msra.mxu0 %v3057_v35 }
 0x11a   : > { %2159 = vmatpush1.bf16.msra.mxu1 %v3060_v36  ;;  %2119 = vmatprep.subr.bf16.mxu0 %v3065_v39  ;;  %v292_v39 = vld [vmem:[%s3391_s12 + $0x8] sm:$0xff] }
 0x11b   : > { %2160 = vmatprep.subr.bf16.mxu1 %v3068_v40 }
 0x11d   : > { %2120 = vmatpush1.bf16.msra.mxu0 %v3063_v41 }
 0x11e   : > { %2161 = vmatpush1.bf16.msra.mxu1 %v3066_v42  ;;  %2121 = vmatprep.subr.bf16.mxu0 %v3071_v43  ;;  %v293_v43 = vld [vmem:[%s3391_s12 + $0x10] sm:$0xff] }
 0x11f   : > { %2162 = vmatprep.subr.bf16.mxu1 %v3074_v44  ;;  %v294_v44 = vld [vmem:[%s3391_s12 + $0x18] sm:$0xff] }
 0x121   : > { %2122 = vmatpush1.bf16.msra.mxu0 %v3069_v45 }
 0x122   : > { %2163 = vmatpush1.bf16.msra.mxu1 %v3072_v46  ;;  %2123 = vmatprep.subr.bf16.mxu0 %v3077_v47 }
 0x123   : > { %2164 = vmatprep.subr.bf16.mxu1 %v3080_v49 }
 0x125   : > { %2124 = vmatpush1.bf16.msra.mxu0 %v3075_v50 }
 0x126   : > { %2165 = vmatpush1.bf16.msra.mxu1 %v3078_v51  ;;  %2125 = vmatprep.subr.bf16.mxu0 %v3083_v53 }
 0x127   : > { %2166 = vmatprep.subr.bf16.mxu1 %v3086_v54 }
 0x129   : > { %2126 = vmatpush1.bf16.msra.mxu0 %v3081_v55 }
 0x12a   : > { %2167 = vmatpush1.bf16.msra.mxu1 %v3084_v56  ;;  %2127 = vmatprep.subr.bf16.mxu0 %v3089_v57 }
 0x12b   : > { %2168 = vmatprep.subr.bf16.mxu1 %v3092_v58 }
 0x12d   : > { %2128 = vmatpush1.bf16.msra.mxu0 %v3087_v59 }
 0x12e   : > { %2169 = vmatpush1.bf16.msra.mxu1 %v3090_v60  ;;  %2129 = vmatprep.subr.bf16.mxu0 %v3095_v61 }
 0x12f   : > { %2170 = vmatprep.subr.bf16.mxu1 %v3098_v62 }
 0x131   : > { %2130 = vmatpush1.bf16.msra.mxu0 %v3093_v63 }
 0x132   : > { %2171 = vmatpush1.bf16.msra.mxu1 %v3096_v0  ;;  %2131 = vmatprep.subr.bf16.mxu0 %v3101_v1 }
 0x133   : > { %2172 = vmatprep.subr.bf16.mxu1 %v3104_v2 }
 0x135   : > { %2132 = vmatpush1.bf16.msra.mxu0 %v3099_v3 }
 0x136   : > { %2173 = vmatpush1.bf16.msra.mxu1 %v3102_v4  ;;  %2133 = vmatprep.subr.bf16.mxu0 %v3107_v5 }
 0x137   : > { %2174 = vmatprep.subr.bf16.mxu1 %v3110_v6 }
 0x139   : > { %2134 = vmatpush1.bf16.msra.mxu0 %v3105_v9 }
 0x13a   : > { %2175 = vmatpush1.bf16.msra.mxu1 %v3108_v10  ;;  %2135 = vmatprep.subr.bf16.mxu0 %v3113_v11  ;;  %v2209_v11 = vlaneseq (!%p2658_p6) }
 0x13b   : > { %2176 = vmatprep.subr.bf16.mxu1 %v3116_v12 }
 0x13c   : > { %v2210_v12 = vshrl.u32 (!%p2658_p6), %v2209_v11, 7 }
 0x13d   : > { %2136 = vmatpush1.bf16.msra.mxu0 %v3111_v13  ;;  %v2207_v13 = vld [vmem:[%s271_s8] sm:$0xf] (!%p2658_p6) }
 0x13e   : > { %2177 = vmatpush1.bf16.msra.mxu1 %v3114_v14  ;;  %2137 = vmatprep.subr.bf16.mxu0 %v3119_v15  ;;  %v2211_v15 = vsub.s32 (!%p2658_p6), 0, %v2210_v12 }
 0x13f   : > { %2178 = vmatprep.subr.bf16.mxu1 %v3122_v16  ;;  %v2215_v16 = vsub.s32 (!%p2658_p6), 1, %v2210_v12 }
 0x141   : > { %2138 = vmatpush1.bf16.msra.mxu0 %v3117_v19  ;;  %v2219_v19 = vsub.s32 (!%p2658_p6), 2, %v2210_v12 }
 0x142   : > { %2179 = vmatpush1.bf16.msra.mxu1 %v3120_v20  ;;  %2139 = vmatprep.subr.bf16.mxu0 %v3125_v21  ;;  %v2223_v20 = vsub.s32 (!%p2658_p6), 3, %v2210_v12 }
 0x143   : > { %2180 = vmatprep.subr.bf16.mxu1 %v3128_v22 }
 0x145   : > { %2140 = vmatpush1.bf16.msra.mxu0 %v3123_v23 }
 0x146   : > { %2181 = vmatpush1.bf16.msra.mxu1 %v3126_v24  ;;  %v2212_v24 = vrot.slane (!%p2658_p6), %v2207_v13, %v2211_v15 }
 0x148   : > { %2142 = vmatmul.mubr.bf16.vlgmr.msra.gmra.mrb[12].mxu0 %v3560_v17 }
 0x149   : > { %2183 = vmatmul.mubr.bf16.vlgmr.msra.gmra.mrb[12].mxu1 %v3564_v18 }
 0x15b   : > { %v1897_v25 = vpop.f32.mrb[0].mxu0 }
 0x15c   : > { %v1938_v26 = vpop.f32.mrb[0].mxu1  ;;  %v1899_v28 = vpop.f32.mrb[1].mxu0 }
 0x15d   : > { %v1939_v27 = vadd.f32 %v1938_v26, %v1897_v25  ;;  %v1940_v29 = vpop.f32.mrb[1].mxu1  ;;  %v1901_v31 = vpop.f32.mrb[2].mxu0  ;;  %v2216_v25 = vrot.slane (!%p2658_p6), %v2207_v13, %v2215_v16  ;;  %v2220_v26 = vrot.slane (!%p2658_p6), %v2207_v13, %v2219_v19 }
 0x15e   : > { %v1941_v30 = vadd.f32 %v1940_v29, %v1899_v28  ;;  %v1942_v32 = vpop.f32.mrb[2].mxu1  ;;  %v1902_v7 = vpop.f32.mrb[3].mxu0 }
 0x15f   : > { %v1943_v8 = vpop.f32.mrb[3].mxu1 }
 0x19b   : > { %v1979_v48 = vpop.f32.mrb[4].mxu0 }
 0x19c   : > { %v2020_v52 = vpop.f32.mrb[4].mxu1  ;;  %v1980_v33 = vadd.f32 %v1979_v48, %v1939_v27  ;;  %v1981_v17 = vpop.f32.mrb[5].mxu0  ;;  %v2224_v27 = vrot.slane (!%p2658_p6), %v2207_v13, %v2223_v20 }
 0x19d   : > { %v2022_v18 = vpop.f32.mrb[5].mxu1  ;;  %v1982_v38 = vadd.f32 %v1981_v17, %v1941_v30  ;;  %v1983_v34 = vpop.f32.mrb[6].mxu0 }
 0x19e   : > { %v2024_v35 = vpop.f32.mrb[6].mxu1  ;;  %v2021_v36 = vadd.f32 %v2020_v52, %v1980_v33  ;;  %v1984_v40 = vpop.f32.mrb[7].mxu0 }
 0x19f   : > { %v2025_v41 = vpop.f32.mrb[7].mxu1  ;;  %v2023_v42 = vadd.f32 %v2022_v18, %v1982_v38 }
 0x1a0   : > { %v2191_v45 = vadd.f32 %v2021_v36, %v291_v37 }
 0x1a1   : > { %v2192_v46 = vadd.f32 %v2023_v42, %v292_v39 }
 0x1a2   : > { %2195 = vst [vmem:[%s3391_s12] sm:$0xff] %v2191_v45 }
 0x1a3   : > { %2196 = vst [vmem:[%s3391_s12 + $0x8] sm:$0xff] %v2192_v46 }
 0x1a9   : > { %v2203_v14 = vld [vmem:[%s3391_s12] sm:$0xff] (!%p2658_p6) }
 0x1aa   : > { %v2204_v21 = vld [vmem:[%s3391_s12 + $0x8] sm:$0xff] (!%p2658_p6)  ;;  %v2229_v28 = vadd.f32 (!%p2658_p6), %v2212_v24, %v2203_v14 }
 0x1ab   : > { %v2230_v29 = vadd.f32 (!%p2658_p6), %v2216_v25, %v2204_v21 }
 0x1ac   : > { %vm2233_vm0 = vcmp.ge.f32.partialorder (!%p2658_p6), %v2229_v28, 0.0  ;;  %v2237_v32 = vmul.f32 (!%p2658_p6), 0.01, %v2229_v28 }
 0x1ad   : > { %vm2234_vm1 = vcmp.ge.f32.partialorder (!%p2658_p6), %v2230_v29, 0.0  ;;  %v2238_v7 = vmul.f32 (!%p2658_p6), 0.01, %v2230_v29 }
 0x1ae   : > { %v2241_v52 = vsel (!%p2658_p6), %vm2233_vm0, %v2229_v28, %v2237_v32 }
 0x1af   : > { %v2242_v33 = vsel (!%p2658_p6), %vm2234_vm1, %v2230_v29, %v2238_v7  ;;  %2245 = vst [vmem:[%s3391_s12] sm:$0xff] (!%p2658_p6), %v2241_v52 }
 0x1b0   : > { %2246 = vst [vmem:[%s3391_s12 + $0x8] sm:$0xff] (!%p2658_p6), %v2242_v33 }
 0x1db   : > { %v2061_v47 = vpop.f32.mrb[8].mxu0 }
 0x1dc   : > { %v2102_v49 = vpop.f32.mrb[8].mxu1  ;;  %v2063_v51 = vpop.f32.mrb[9].mxu0 }
 0x1dd   : > { %v2103_v50 = vadd.f32 %v2102_v49, %v2061_v47  ;;  %v2104_v53 = vpop.f32.mrb[9].mxu1  ;;  %v2065_v55 = vpop.f32.mrb[10].mxu0 }
 0x1de   : > { %v2105_v54 = vadd.f32 %v2104_v53, %v2063_v51  ;;  %v2106_v56 = vpop.f32.mrb[10].mxu1  ;;  %v2066_v57 = vpop.f32.mrb[11].mxu0 }
 0x1df   : > { %v2107_v58 = vpop.f32.mrb[11].mxu1 }
 0x21b   : > { %v2143_v59 = vpop.f32.mrb[12].mxu0 }
 0x21c   : > { %v2184_v60 = vpop.f32.mrb[12].mxu1  ;;  %v2144_v61 = vadd.f32 %v2143_v59, %v2103_v50  ;;  %v2145_v62 = vpop.f32.mrb[13].mxu0 }
 0x21d   : > { %v2186_v63 = vpop.f32.mrb[13].mxu1  ;;  %v2146_v0 = vadd.f32 %v2145_v62, %v2105_v54  ;;  %v2147_v1 = vpop.f32.mrb[14].mxu0  ;;  %2202 = sbr.rel (%p2658_p6) target bundleno = 561 (0x231), region = 44 }
 0x21e   : > { %v2188_v2 = vpop.f32.mrb[14].mxu1  ;;  %v2185_v3 = vadd.f32 %v2184_v60, %v2144_v61  ;;  %v2148_v4 = vpop.f32.mrb[15].mxu0 }
 0x21f   : > { %v2189_v5 = vpop.f32.mrb[15].mxu1  ;;  %v2187_v6 = vadd.f32 %v2186_v63, %v2146_v0 }
 0x220   : > { %v2193_v9 = vadd.f32 %v2185_v3, %v293_v43 }
 0x221   : > { %v2194_v10 = vadd.f32 %v2187_v6, %v294_v44 }
 0x222   : > { %2197 = vst [vmem:[%s3391_s12 + $0x10] sm:$0xff] %v2193_v9 }
 0x223   : > { %2198 = vst [vmem:[%s3391_s12 + $0x18] sm:$0xff] %v2194_v10 }
 0x229   : > { %v2205_v22 = vld [vmem:[%s3391_s12 + $0x10] sm:$0xff] }
 0x22a   : > { %v2206_v23 = vld [vmem:[%s3391_s12 + $0x18] sm:$0xff]  ;;  %v2231_v30 = vadd.f32 %v2220_v26, %v2205_v22 }
 0x22b   : > { %v2232_v31 = vadd.f32 %v2224_v27, %v2206_v23 }
 0x22c   : > { %vm2235_vm2 = vcmp.ge.f32.partialorder %v2231_v30, 0.0  ;;  %v2239_v8 = vmul.f32 0.01, %v2231_v30 }
 0x22d   : > { %vm2236_vm3 = vcmp.ge.f32.partialorder %v2232_v31, 0.0  ;;  %v2240_v48 = vmul.f32 0.01, %v2232_v31 }
 0x22e   : > { %v2243_v17 = vsel %vm2235_vm2, %v2231_v30, %v2239_v8 }
 0x22f   : > { %v2244_v18 = vsel %vm2236_vm3, %v2232_v31, %v2240_v48  ;;  %2247 = vst [vmem:[%s3391_s12 + $0x10] sm:$0xff] %v2243_v17 }
 0x230   : > { %2248 = vst [vmem:[%s3391_s12 + $0x18] sm:$0xff] %v2244_v18 }
 0x231 PF: > { %s16_s19 = sadd.s32 1, %s3225_s19   ;;  %s3755_s12 = smov %s3201_s13 }
 0x232   : > { %p13_p8 = scmp.ge.s32.totalorder %s16_s19, 6   ;;  %s3756_s13 = smov %s3205_s14 }
 0x233   : > { %s3757_s14 = smov %s3319_s5  ;;  %s3758_s15 = smov %s3217_s17 }
 0x234   : > { %s3759_s16 = smov %s3221_s18  ;;  %s3760_s17 = smov %s3763_s21 }
 0x235   : > { %s3761_s18 = smov %s3767_s22  ;;  %15 = sbr.rel (!%p13_p8) target bundleno = 5 (0x5), region = 86 }
 0x23c   :  { %2279 = vsyncpa [#allocation3], 1 }
 0x23d   :  { %2281 = vsyncpa [#allocation3 + $0x1], 1 }

// kernel: encoder_forward.11
= control target key start
LH: loop header
LB: loop body
LE: loop exit
PB: predicated region body
PF: predicated region fallthrough
CT: control target
= control target key end

     0   :  { %8 = vsyncpa [#allocation4], 0  ;;  %s4699_s0 = inlined_call_operand.vmem [shape: bf16[2,1024], index: 0, kind: input, shape index: {}]   ;;  %s4700_s1 = inlined_call_operand.vmem [shape: bf16[1024,1024], index: 1, kind: input, shape index: {}]   ;;  %s4701_s2 = inlined_call_operand.vmem [shape: f32[1,1024], index: 2, kind: input, shape index: {}]   ;;  %s4702_s3 = inlined_call_operand.hbm [shape: f32[2,1024], index: 3, kind: output, shape index: {}]  }
   0x1   :  { %10 = vsyncpa [#allocation4 + $0x1], 0  ;;  %s3746_s12 = smov 0   ;;  %s3748_s13 = smov 0  }
   0x2   :  { %s3750_s14 = smov 0   ;;  %s3752_s15 = smov 0  }
   0x3   :  { %s3754_s16 = smov 0   ;;  %s3756_s17 = smov 0  }
   0x4 LB: > { %s2901_s18 = sadd.s32 4294967295, %s3721_s17   ;;  %s2902_s19 = sadd.s32 4294967294, %s3721_s17   ;;  %s3721_s17 = sphi %s3756_s17, %s16_s17   ;;  %s3717_s16 = sphi %s3754_s16, %s4709_s16   ;;  %s3713_s15 = sphi %s3752_s15, %s4708_s15   ;;  %s3709_s14 = sphi %s3750_s14, %s4707_s14   ;;  %s3705_s13 = sphi %s3748_s13, %s4706_s13   ;;  %s3701_s12 = sphi %s3746_s12, %s4705_s12  }
   0x5   : > { %s31_s20 = sadd.s32 1, %s3717_s16  ;;  %s72_s21 = sadd.s32 1, %s3709_s14 }
   0x6   : > { %p33_p0 = scmp.ge.s32.totalorder %s31_s20, 2  ;;  %p79_p1 = scmp.ne.s32.totalorder %s3709_s14, %s3705_s13 }
   0x7   : > { %p80_p2 = scmp.eq.s32.totalorder %s3721_s17, 0  ;;  %p137_p3 = scmp.eq.s32.totalorder %s2901_s18, 1 }
   0x8   : > { %s4711_s20 = smov (%p33_p0, %s31_s20), 0  ;;  %p142_p6 = scmp.ne.s32.totalorder %s3705_s13, %s3701_s12 }
   0x9   : > { %p81_p4 = por %p80_p2, %p79_p1  ;;  %p3785_p5 = por %p137_p3, %p79_p1 }
   0xa   : > { %s68_s23 = ssub.s32 %s3717_s16, %s4711_s20  ;;  %p143_p8 = scmp.eq.s32.totalorder %s2902_s19, 1 }
   0xb   : > { %p70_p7 = scmp.eq.s32.totalorder %s68_s23, 0  ;;  %p2905_p10 = scmp.ge.s32.totalorder %s3721_s17, 2 }
   0xc   : > { %p3796_p9 = por %p143_p8, %p142_p6 }
   0xd   : > { %s3794_s24 = scalar_select %p70_p7, %s3709_s14, %s72_s21  }
   0xe   : > { %171 = sbr.rel (%p2905_p10) target bundleno = 153 (0x99), region = 20 }
  0x15   : > { %174 = sbr.rel (!%p81_p4) target bundleno = 153 (0x99), region = 24  ;;  %s176_s26 = sand.u32 (%p81_p4), 1, %s3709_s14  }
  0x16   : > { %s3174_s27 = sshll.u32 (%p81_p4), %s3717_s16, 4  ;;  %s2906_s28 = sshll.u32 (%p81_p4), %s176_s26, 11 }
  0x17   : > { %s3808_s4 = scalar_lea.vmem (%p81_p4), %s4700_s1, %s3174_s27  ;;  %s3813_s5 = scalar_lea.vmem (%p81_p4), [#allocation2], %s2906_s28 }
  0x18   : > { %v197_v0 = vld [vmem:[%s3808_s4] sm:$0xff] (%p81_p4)  ;;  %v199_v1 = vld [vmem:[%s3808_s4 + $0x8] sm:$0xff] (%p81_p4) }
  0x19   : > { %v201_v2 = vld [vmem:[%s3808_s4 + $0x20] sm:$0xff] (%p81_p4)  ;;  %198 = vst [vmem:[%s3813_s5] sm:$0xff] (%p81_p4), %v197_v0  ;;  %200 = vst [vmem:[%s3813_s5 + $0x8] sm:$0xff] (%p81_p4), %v199_v1  ;;  %v203_v3 = vld [vmem:[%s3808_s4 + $0x28] sm:$0xff] (%p81_p4) }
  0x1a   : > { %202 = vst [vmem:[%s3813_s5 + $0x10] sm:$0xff] (%p81_p4), %v201_v2  ;;  %v205_v4 = vld [vmem:[%s3808_s4 + $0x40] sm:$0xff] (%p81_p4)  ;;  %v207_v5 = vld [vmem:[%s3808_s4 + $0x48] sm:$0xff] (%p81_p4)  ;;  %204 = vst [vmem:[%s3813_s5 + $0x18] sm:$0xff] (%p81_p4), %v203_v3 }
  0x1b   : > { %206 = vst [vmem:[%s3813_s5 + $0x20] sm:$0xff] (%p81_p4), %v205_v4  ;;  %208 = vst [vmem:[%s3813_s5 + $0x28] sm:$0xff] (%p81_p4), %v207_v5  ;;  %v209_v6 = vld [vmem:[%s3808_s4 + $0x60] sm:$0xff] (%p81_p4)  ;;  %v211_v7 = vld [vmem:[%s3808_s4 + $0x68] sm:$0xff] (%p81_p4) }
  0x1c   : > { %v213_v8 = vld [vmem:[%s3808_s4 + $0x80] sm:$0xff]  ;;  %210 = vst [vmem:[%s3813_s5 + $0x30] sm:$0xff] %v209_v6  ;;  %212 = vst [vmem:[%s3813_s5 + $0x38] sm:$0xff] %v211_v7  ;;  %v215_v9 = vld [vmem:[%s3808_s4 + $0x88] sm:$0xff] }
  0x1d   : > { %214 = vst [vmem:[%s3813_s5 + $0x40] sm:$0xff] %v213_v8  ;;  %v217_v10 = vld [vmem:[%s3808_s4 + $0xa0] sm:$0xff]  ;;  %v219_v11 = vld [vmem:[%s3808_s4 + $0xa8] sm:$0xff]  ;;  %216 = vst [vmem:[%s3813_s5 + $0x48] sm:$0xff] %v215_v9 }
  0x1e   : > { %218 = vst [vmem:[%s3813_s5 + $0x50] sm:$0xff] %v217_v10  ;;  %220 = vst [vmem:[%s3813_s5 + $0x58] sm:$0xff] %v219_v11  ;;  %v221_v12 = vld [vmem:[%s3808_s4 + $0xc0] sm:$0xff]  ;;  %v223_v13 = vld [vmem:[%s3808_s4 + $0xc8] sm:$0xff] }
  0x1f   : > { %v225_v14 = vld [vmem:[%s3808_s4 + $0xe0] sm:$0xff]  ;;  %222 = vst [vmem:[%s3813_s5 + $0x60] sm:$0xff] %v221_v12  ;;  %224 = vst [vmem:[%s3813_s5 + $0x68] sm:$0xff] %v223_v13  ;;  %v227_v15 = vld [vmem:[%s3808_s4 + $0xe8] sm:$0xff] }
  0x20   : > { %226 = vst [vmem:[%s3813_s5 + $0x70] sm:$0xff] %v225_v14  ;;  %v229_v16 = vld [vmem:[%s3808_s4 + $0x100] sm:$0xff]  ;;  %v231_v17 = vld [vmem:[%s3808_s4 + $0x108] sm:$0xff]  ;;  %228 = vst [vmem:[%s3813_s5 + $0x78] sm:$0xff] %v227_v15 }
  0x21   : > { %230 = vst [vmem:[%s3813_s5 + $0x80] sm:$0xff] %v229_v16  ;;  %232 = vst [vmem:[%s3813_s5 + $0x88] sm:$0xff] %v231_v17  ;;  %v233_v18 = vld [vmem:[%s3808_s4 + $0x120] sm:$0xff]  ;;  %v235_v19 = vld [vmem:[%s3808_s4 + $0x128] sm:$0xff] }
  0x22   : > { %v237_v20 = vld [vmem:[%s3808_s4 + $0x140] sm:$0xff]  ;;  %234 = vst [vmem:[%s3813_s5 + $0x90] sm:$0xff] %v233_v18  ;;  %236 = vst [vmem:[%s3813_s5 + $0x98] sm:$0xff] %v235_v19  ;;  %v239_v21 = vld [vmem:[%s3808_s4 + $0x148] sm:$0xff] }
  0x23   : > { %238 = vst [vmem:[%s3813_s5 + $0xa0] sm:$0xff] %v237_v20  ;;  %v241_v22 = vld [vmem:[%s3808_s4 + $0x160] sm:$0xff]  ;;  %v243_v23 = vld [vmem:[%s3808_s4 + $0x168] sm:$0xff]  ;;  %240 = vst [vmem:[%s3813_s5 + $0xa8] sm:$0xff] %v239_v21 }
  0x24   : > { %242 = vst [vmem:[%s3813_s5 + $0xb0] sm:$0xff] %v241_v22  ;;  %244 = vst [vmem:[%s3813_s5 + $0xb8] sm:$0xff] %v243_v23  ;;  %v245_v24 = vld [vmem:[%s3808_s4 + $0x180] sm:$0xff]  ;;  %v247_v25 = vld [vmem:[%s3808_s4 + $0x188] sm:$0xff] }
  0x25   : > { %v249_v26 = vld [vmem:[%s3808_s4 + $0x1a0] sm:$0xff]  ;;  %246 = vst [vmem:[%s3813_s5 + $0xc0] sm:$0xff] %v245_v24  ;;  %248 = vst [vmem:[%s3813_s5 + $0xc8] sm:$0xff] %v247_v25  ;;  %v251_v27 = vld [vmem:[%s3808_s4 + $0x1a8] sm:$0xff] }
  0x26   : > { %250 = vst [vmem:[%s3813_s5 + $0xd0] sm:$0xff] %v249_v26  ;;  %v253_v28 = vld [vmem:[%s3808_s4 + $0x1c0] sm:$0xff]  ;;  %v255_v29 = vld [vmem:[%s3808_s4 + $0x1c8] sm:$0xff]  ;;  %252 = vst [vmem:[%s3813_s5 + $0xd8] sm:$0xff] %v251_v27 }
  0x27   : > { %254 = vst [vmem:[%s3813_s5 + $0xe0] sm:$0xff] %v253_v28  ;;  %256 = vst [vmem:[%s3813_s5 + $0xe8] sm:$0xff] %v255_v29  ;;  %v257_v30 = vld [vmem:[%s3808_s4 + $0x1e0] sm:$0xff]  ;;  %v259_v31 = vld [vmem:[%s3808_s4 + $0x1e8] sm:$0xff] }
  0x28   : > { %v261_v32 = vld [vmem:[%s3808_s4 + $0x200] sm:$0xff]  ;;  %258 = vst [vmem:[%s3813_s5 + $0xf0] sm:$0xff] %v257_v30  ;;  %260 = vst [vmem:[%s3813_s5 + $0xf8] sm:$0xff] %v259_v31  ;;  %v263_v33 = vld [vmem:[%s3808_s4 + $0x208] sm:$0xff] }
  0x29   : > { %262 = vst [vmem:[%s3813_s5 + $0x100] sm:$0xff] %v261_v32  ;;  %v265_v34 = vld [vmem:[%s3808_s4 + $0x220] sm:$0xff]  ;;  %v267_v35 = vld [vmem:[%s3808_s4 + $0x228] sm:$0xff]  ;;  %264 = vst [vmem:[%s3813_s5 + $0x108] sm:$0xff] %v263_v33 }
  0x2a   : > { %266 = vst [vmem:[%s3813_s5 + $0x110] sm:$0xff] %v265_v34  ;;  %268 = vst [vmem:[%s3813_s5 + $0x118] sm:$0xff] %v267_v35  ;;  %v269_v36 = vld [vmem:[%s3808_s4 + $0x240] sm:$0xff]  ;;  %v271_v37 = vld [vmem:[%s3808_s4 + $0x248] sm:$0xff] }
  0x2b   : > { %v273_v38 = vld [vmem:[%s3808_s4 + $0x260] sm:$0xff]  ;;  %270 = vst [vmem:[%s3813_s5 + $0x120] sm:$0xff] %v269_v36  ;;  %272 = vst [vmem:[%s3813_s5 + $0x128] sm:$0xff] %v271_v37  ;;  %v275_v39 = vld [vmem:[%s3808_s4 + $0x268] sm:$0xff] }
  0x2c   : > { %274 = vst [vmem:[%s3813_s5 + $0x130] sm:$0xff] %v273_v38  ;;  %v277_v40 = vld [vmem:[%s3808_s4 + $0x280] sm:$0xff]  ;;  %v279_v41 = vld [vmem:[%s3808_s4 + $0x288] sm:$0xff]  ;;  %276 = vst [vmem:[%s3813_s5 + $0x138] sm:$0xff] %v275_v39 }
  0x2d   : > { %278 = vst [vmem:[%s3813_s5 + $0x140] sm:$0xff] %v277_v40  ;;  %280 = vst [vmem:[%s3813_s5 + $0x148] sm:$0xff] %v279_v41  ;;  %v281_v42 = vld [vmem:[%s3808_s4 + $0x2a0] sm:$0xff]  ;;  %v283_v43 = vld [vmem:[%s3808_s4 + $0x2a8] sm:$0xff] }
  0x2e   : > { %v285_v44 = vld [vmem:[%s3808_s4 + $0x2c0] sm:$0xff]  ;;  %282 = vst [vmem:[%s3813_s5 + $0x150] sm:$0xff] %v281_v42  ;;  %284 = vst [vmem:[%s3813_s5 + $0x158] sm:$0xff] %v283_v43  ;;  %v287_v45 = vld [vmem:[%s3808_s4 + $0x2c8] sm:$0xff] }
  0x2f   : > { %286 = vst [vmem:[%s3813_s5 + $0x160] sm:$0xff] %v285_v44  ;;  %v289_v46 = vld [vmem:[%s3808_s4 + $0x2e0] sm:$0xff]  ;;  %v291_v47 = vld [vmem:[%s3808_s4 + $0x2e8] sm:$0xff]  ;;  %288 = vst [vmem:[%s3813_s5 + $0x168] sm:$0xff] %v287_v45 }
  0x30   : > { %290 = vst [vmem:[%s3813_s5 + $0x170] sm:$0xff] %v289_v46  ;;  %292 = vst [vmem:[%s3813_s5 + $0x178] sm:$0xff] %v291_v47  ;;  %v293_v48 = vld [vmem:[%s3808_s4 + $0x300] sm:$0xff]  ;;  %v295_v49 = vld [vmem:[%s3808_s4 + $0x308] sm:$0xff] }
  0x31   : > { %v297_v50 = vld [vmem:[%s3808_s4 + $0x320] sm:$0xff]  ;;  %294 = vst [vmem:[%s3813_s5 + $0x180] sm:$0xff] %v293_v48  ;;  %296 = vst [vmem:[%s3813_s5 + $0x188] sm:$0xff] %v295_v49  ;;  %v299_v51 = vld [vmem:[%s3808_s4 + $0x328] sm:$0xff] }
  0x32   : > { %298 = vst [vmem:[%s3813_s5 + $0x190] sm:$0xff] %v297_v50  ;;  %v301_v52 = vld [vmem:[%s3808_s4 + $0x340] sm:$0xff]  ;;  %v303_v53 = vld [vmem:[%s3808_s4 + $0x348] sm:$0xff]  ;;  %300 = vst [vmem:[%s3813_s5 + $0x198] sm:$0xff] %v299_v51 }
  0x33   : > { %302 = vst [vmem:[%s3813_s5 + $0x1a0] sm:$0xff] %v301_v52  ;;  %304 = vst [vmem:[%s3813_s5 + $0x1a8] sm:$0xff] %v303_v53  ;;  %v305_v54 = vld [vmem:[%s3808_s4 + $0x360] sm:$0xff]  ;;  %v307_v55 = vld [vmem:[%s3808_s4 + $0x368] sm:$0xff] }
  0x34   : > { %v309_v56 = vld [vmem:[%s3808_s4 + $0x380] sm:$0xff]  ;;  %306 = vst [vmem:[%s3813_s5 + $0x1b0] sm:$0xff] %v305_v54  ;;  %308 = vst [vmem:[%s3813_s5 + $0x1b8] sm:$0xff] %v307_v55  ;;  %v311_v57 = vld [vmem:[%s3808_s4 + $0x388] sm:$0xff] }
  0x35   : > { %310 = vst [vmem:[%s3813_s5 + $0x1c0] sm:$0xff] %v309_v56  ;;  %v313_v58 = vld [vmem:[%s3808_s4 + $0x3a0] sm:$0xff]  ;;  %v315_v59 = vld [vmem:[%s3808_s4 + $0x3a8] sm:$0xff]  ;;  %312 = vst [vmem:[%s3813_s5 + $0x1c8] sm:$0xff] %v311_v57 }
  0x36   : > { %314 = vst [vmem:[%s3813_s5 + $0x1d0] sm:$0xff] %v313_v58  ;;  %316 = vst [vmem:[%s3813_s5 + $0x1d8] sm:$0xff] %v315_v59  ;;  %v317_v60 = vld [vmem:[%s3808_s4 + $0x3c0] sm:$0xff]  ;;  %v319_v61 = vld [vmem:[%s3808_s4 + $0x3c8] sm:$0xff] }
  0x37   : > { %v321_v62 = vld [vmem:[%s3808_s4 + $0x3e0] sm:$0xff]  ;;  %318 = vst [vmem:[%s3813_s5 + $0x1e0] sm:$0xff] %v317_v60  ;;  %320 = vst [vmem:[%s3813_s5 + $0x1e8] sm:$0xff] %v319_v61  ;;  %v323_v63 = vld [vmem:[%s3808_s4 + $0x3e8] sm:$0xff] }
  0x38   : > { %322 = vst [vmem:[%s3813_s5 + $0x1f0] sm:$0xff] %v321_v62  ;;  %v325_v0 = vld [vmem:[%s3808_s4 + $0x400] sm:$0xff]  ;;  %v327_v1 = vld [vmem:[%s3808_s4 + $0x408] sm:$0xff]  ;;  %324 = vst [vmem:[%s3813_s5 + $0x1f8] sm:$0xff] %v323_v63 }
  0x39   : > { %326 = vst [vmem:[%s3813_s5 + $0x200] sm:$0xff] %v325_v0  ;;  %328 = vst [vmem:[%s3813_s5 + $0x208] sm:$0xff] %v327_v1  ;;  %v329_v2 = vld [vmem:[%s3808_s4 + $0x420] sm:$0xff]  ;;  %v331_v3 = vld [vmem:[%s3808_s4 + $0x428] sm:$0xff] }
  0x3a   : > { %v333_v4 = vld [vmem:[%s3808_s4 + $0x440] sm:$0xff]  ;;  %330 = vst [vmem:[%s3813_s5 + $0x210] sm:$0xff] %v329_v2  ;;  %332 = vst [vmem:[%s3813_s5 + $0x218] sm:$0xff] %v331_v3  ;;  %v335_v5 = vld [vmem:[%s3808_s4 + $0x448] sm:$0xff] }
  0x3b   : > { %334 = vst [vmem:[%s3813_s5 + $0x220] sm:$0xff] %v333_v4  ;;  %v337_v6 = vld [vmem:[%s3808_s4 + $0x460] sm:$0xff]  ;;  %v339_v7 = vld [vmem:[%s3808_s4 + $0x468] sm:$0xff]  ;;  %336 = vst [vmem:[%s3813_s5 + $0x228] sm:$0xff] %v335_v5 }
  0x3c   : > { %338 = vst [vmem:[%s3813_s5 + $0x230] sm:$0xff] %v337_v6  ;;  %340 = vst [vmem:[%s3813_s5 + $0x238] sm:$0xff] %v339_v7  ;;  %v341_v8 = vld [vmem:[%s3808_s4 + $0x480] sm:$0xff]  ;;  %v343_v9 = vld [vmem:[%s3808_s4 + $0x488] sm:$0xff] }
  0x3d   : > { %v345_v10 = vld [vmem:[%s3808_s4 + $0x4a0] sm:$0xff]  ;;  %342 = vst [vmem:[%s3813_s5 + $0x240] sm:$0xff] %v341_v8  ;;  %344 = vst [vmem:[%s3813_s5 + $0x248] sm:$0xff] %v343_v9  ;;  %v347_v11 = vld [vmem:[%s3808_s4 + $0x4a8] sm:$0xff] }
  0x3e   : > { %346 = vst [vmem:[%s3813_s5 + $0x250] sm:$0xff] %v345_v10  ;;  %v349_v12 = vld [vmem:[%s3808_s4 + $0x4c0] sm:$0xff]  ;;  %v351_v13 = vld [vmem:[%s3808_s4 + $0x4c8] sm:$0xff]  ;;  %348 = vst [vmem:[%s3813_s5 + $0x258] sm:$0xff] %v347_v11 }
  0x3f   : > { %350 = vst [vmem:[%s3813_s5 + $0x260] sm:$0xff] %v349_v12  ;;  %352 = vst [vmem:[%s3813_s5 + $0x268] sm:$0xff] %v351_v13  ;;  %v353_v14 = vld [vmem:[%s3808_s4 + $0x4e0] sm:$0xff]  ;;  %v355_v15 = vld [vmem:[%s3808_s4 + $0x4e8] sm:$0xff] }
  0x40   : > { %v357_v16 = vld [vmem:[%s3808_s4 + $0x500] sm:$0xff]  ;;  %354 = vst [vmem:[%s3813_s5 + $0x270] sm:$0xff] %v353_v14  ;;  %356 = vst [vmem:[%s3813_s5 + $0x278] sm:$0xff] %v355_v15  ;;  %v359_v17 = vld [vmem:[%s3808_s4 + $0x508] sm:$0xff] }
  0x41   : > { %358 = vst [vmem:[%s3813_s5 + $0x280] sm:$0xff] %v357_v16  ;;  %v361_v18 = vld [vmem:[%s3808_s4 + $0x520] sm:$0xff]  ;;  %v363_v19 = vld [vmem:[%s3808_s4 + $0x528] sm:$0xff]  ;;  %360 = vst [vmem:[%s3813_s5 + $0x288] sm:$0xff] %v359_v17 }
  0x42   : > { %362 = vst [vmem:[%s3813_s5 + $0x290] sm:$0xff] %v361_v18  ;;  %364 = vst [vmem:[%s3813_s5 + $0x298] sm:$0xff] %v363_v19  ;;  %v365_v20 = vld [vmem:[%s3808_s4 + $0x540] sm:$0xff]  ;;  %v367_v21 = vld [vmem:[%s3808_s4 + $0x548] sm:$0xff] }
  0x43   : > { %v369_v22 = vld [vmem:[%s3808_s4 + $0x560] sm:$0xff]  ;;  %366 = vst [vmem:[%s3813_s5 + $0x2a0] sm:$0xff] %v365_v20  ;;  %368 = vst [vmem:[%s3813_s5 + $0x2a8] sm:$0xff] %v367_v21  ;;  %v371_v23 = vld [vmem:[%s3808_s4 + $0x568] sm:$0xff] }
  0x44   : > { %370 = vst [vmem:[%s3813_s5 + $0x2b0] sm:$0xff] %v369_v22  ;;  %v373_v24 = vld [vmem:[%s3808_s4 + $0x580] sm:$0xff]  ;;  %v375_v25 = vld [vmem:[%s3808_s4 + $0x588] sm:$0xff]  ;;  %372 = vst [vmem:[%s3813_s5 + $0x2b8] sm:$0xff] %v371_v23 }
  0x45   : > { %374 = vst [vmem:[%s3813_s5 + $0x2c0] sm:$0xff] %v373_v24  ;;  %376 = vst [vmem:[%s3813_s5 + $0x2c8] sm:$0xff] %v375_v25  ;;  %v377_v26 = vld [vmem:[%s3808_s4 + $0x5a0] sm:$0xff]  ;;  %v379_v27 = vld [vmem:[%s3808_s4 + $0x5a8] sm:$0xff] }
  0x46   : > { %v381_v28 = vld [vmem:[%s3808_s4 + $0x5c0] sm:$0xff]  ;;  %378 = vst [vmem:[%s3813_s5 + $0x2d0] sm:$0xff] %v377_v26  ;;  %380 = vst [vmem:[%s3813_s5 + $0x2d8] sm:$0xff] %v379_v27  ;;  %v383_v29 = vld [vmem:[%s3808_s4 + $0x5c8] sm:$0xff] }
  0x47   : > { %382 = vst [vmem:[%s3813_s5 + $0x2e0] sm:$0xff] %v381_v28  ;;  %v385_v30 = vld [vmem:[%s3808_s4 + $0x5e0] sm:$0xff]  ;;  %v387_v31 = vld [vmem:[%s3808_s4 + $0x5e8] sm:$0xff]  ;;  %384 = vst [vmem:[%s3813_s5 + $0x2e8] sm:$0xff] %v383_v29 }
  0x48   : > { %386 = vst [vmem:[%s3813_s5 + $0x2f0] sm:$0xff] %v385_v30  ;;  %388 = vst [vmem:[%s3813_s5 + $0x2f8] sm:$0xff] %v387_v31  ;;  %v389_v32 = vld [vmem:[%s3808_s4 + $0x600] sm:$0xff]  ;;  %v391_v33 = vld [vmem:[%s3808_s4 + $0x608] sm:$0xff] }
  0x49   : > { %v393_v34 = vld [vmem:[%s3808_s4 + $0x620] sm:$0xff]  ;;  %390 = vst [vmem:[%s3813_s5 + $0x300] sm:$0xff] %v389_v32  ;;  %392 = vst [vmem:[%s3813_s5 + $0x308] sm:$0xff] %v391_v33  ;;  %v395_v35 = vld [vmem:[%s3808_s4 + $0x628] sm:$0xff] }
  0x4a   : > { %394 = vst [vmem:[%s3813_s5 + $0x310] sm:$0xff] %v393_v34  ;;  %v397_v36 = vld [vmem:[%s3808_s4 + $0x640] sm:$0xff]  ;;  %v399_v37 = vld [vmem:[%s3808_s4 + $0x648] sm:$0xff]  ;;  %396 = vst [vmem:[%s3813_s5 + $0x318] sm:$0xff] %v395_v35 }
  0x4b   : > { %398 = vst [vmem:[%s3813_s5 + $0x320] sm:$0xff] %v397_v36  ;;  %400 = vst [vmem:[%s3813_s5 + $0x328] sm:$0xff] %v399_v37  ;;  %v401_v38 = vld [vmem:[%s3808_s4 + $0x660] sm:$0xff]  ;;  %v403_v39 = vld [vmem:[%s3808_s4 + $0x668] sm:$0xff] }
  0x4c   : > { %v405_v40 = vld [vmem:[%s3808_s4 + $0x680] sm:$0xff]  ;;  %402 = vst [vmem:[%s3813_s5 + $0x330] sm:$0xff] %v401_v38  ;;  %404 = vst [vmem:[%s3813_s5 + $0x338] sm:$0xff] %v403_v39  ;;  %v407_v41 = vld [vmem:[%s3808_s4 + $0x688] sm:$0xff] }
  0x4d   : > { %406 = vst [vmem:[%s3813_s5 + $0x340] sm:$0xff] %v405_v40  ;;  %v409_v42 = vld [vmem:[%s3808_s4 + $0x6a0] sm:$0xff]  ;;  %v411_v43 = vld [vmem:[%s3808_s4 + $0x6a8] sm:$0xff]  ;;  %408 = vst [vmem:[%s3813_s5 + $0x348] sm:$0xff] %v407_v41 }
  0x4e   : > { %410 = vst [vmem:[%s3813_s5 + $0x350] sm:$0xff] %v409_v42  ;;  %412 = vst [vmem:[%s3813_s5 + $0x358] sm:$0xff] %v411_v43  ;;  %v413_v44 = vld [vmem:[%s3808_s4 + $0x6c0] sm:$0xff]  ;;  %v415_v45 = vld [vmem:[%s3808_s4 + $0x6c8] sm:$0xff] }
  0x4f   : > { %v417_v46 = vld [vmem:[%s3808_s4 + $0x6e0] sm:$0xff]  ;;  %414 = vst [vmem:[%s3813_s5 + $0x360] sm:$0xff] %v413_v44  ;;  %416 = vst [vmem:[%s3813_s5 + $0x368] sm:$0xff] %v415_v45  ;;  %v419_v47 = vld [vmem:[%s3808_s4 + $0x6e8] sm:$0xff] }
  0x50   : > { %418 = vst [vmem:[%s3813_s5 + $0x370] sm:$0xff] %v417_v46  ;;  %v421_v48 = vld [vmem:[%s3808_s4 + $0x700] sm:$0xff]  ;;  %v423_v49 = vld [vmem:[%s3808_s4 + $0x708] sm:$0xff]  ;;  %420 = vst [vmem:[%s3813_s5 + $0x378] sm:$0xff] %v419_v47 }
  0x51   : > { %422 = vst [vmem:[%s3813_s5 + $0x380] sm:$0xff] %v421_v48  ;;  %424 = vst [vmem:[%s3813_s5 + $0x388] sm:$0xff] %v423_v49  ;;  %v425_v50 = vld [vmem:[%s3808_s4 + $0x720] sm:$0xff]  ;;  %v427_v51 = vld [vmem:[%s3808_s4 + $0x728] sm:$0xff] }
  0x52   : > { %v429_v52 = vld [vmem:[%s3808_s4 + $0x740] sm:$0xff]  ;;  %426 = vst [vmem:[%s3813_s5 + $0x390] sm:$0xff] %v425_v50  ;;  %428 = vst [vmem:[%s3813_s5 + $0x398] sm:$0xff] %v427_v51  ;;  %v431_v53 = vld [vmem:[%s3808_s4 + $0x748] sm:$0xff] }
  0x53   : > { %430 = vst [vmem:[%s3813_s5 + $0x3a0] sm:$0xff] %v429_v52  ;;  %v433_v54 = vld [vmem:[%s3808_s4 + $0x760] sm:$0xff]  ;;  %v435_v55 = vld [vmem:[%s3808_s4 + $0x768] sm:$0xff]  ;;  %432 = vst [vmem:[%s3813_s5 + $0x3a8] sm:$0xff] %v431_v53 }
  0x54   : > { %434 = vst [vmem:[%s3813_s5 + $0x3b0] sm:$0xff] %v433_v54  ;;  %436 = vst [vmem:[%s3813_s5 + $0x3b8] sm:$0xff] %v435_v55  ;;  %v437_v56 = vld [vmem:[%s3808_s4 + $0x780] sm:$0xff]  ;;  %v439_v57 = vld [vmem:[%s3808_s4 + $0x788] sm:$0xff] }
  0x55   : > { %v441_v58 = vld [vmem:[%s3808_s4 + $0x7a0] sm:$0xff]  ;;  %438 = vst [vmem:[%s3813_s5 + $0x3c0] sm:$0xff] %v437_v56  ;;  %440 = vst [vmem:[%s3813_s5 + $0x3c8] sm:$0xff] %v439_v57  ;;  %v443_v59 = vld [vmem:[%s3808_s4 + $0x7a8] sm:$0xff] }
  0x56   : > { %442 = vst [vmem:[%s3813_s5 + $0x3d0] sm:$0xff] %v441_v58  ;;  %v445_v60 = vld [vmem:[%s3808_s4 + $0x7c0] sm:$0xff]  ;;  %v447_v61 = vld [vmem:[%s3808_s4 + $0x7c8] sm:$0xff]  ;;  %444 = vst [vmem:[%s3813_s5 + $0x3d8] sm:$0xff] %v443_v59 }
  0x57   : > { %446 = vst [vmem:[%s3813_s5 + $0x3e0] sm:$0xff] %v445_v60  ;;  %448 = vst [vmem:[%s3813_s5 + $0x3e8] sm:$0xff] %v447_v61  ;;  %v449_v62 = vld [vmem:[%s3808_s4 + $0x7e0] sm:$0xff]  ;;  %v451_v63 = vld [vmem:[%s3808_s4 + $0x7e8] sm:$0xff] }
  0x58   : > { %v453_v0 = vld [vmem:[%s3808_s4 + $0x800] sm:$0xff]  ;;  %450 = vst [vmem:[%s3813_s5 + $0x3f0] sm:$0xff] %v449_v62  ;;  %452 = vst [vmem:[%s3813_s5 + $0x3f8] sm:$0xff] %v451_v63  ;;  %v455_v1 = vld [vmem:[%s3808_s4 + $0x808] sm:$0xff] }
  0x59   : > { %454 = vst [vmem:[%s3813_s5 + $0x400] sm:$0xff] %v453_v0  ;;  %v457_v2 = vld [vmem:[%s3808_s4 + $0x820] sm:$0xff]  ;;  %v459_v3 = vld [vmem:[%s3808_s4 + $0x828] sm:$0xff]  ;;  %456 = vst [vmem:[%s3813_s5 + $0x408] sm:$0xff] %v455_v1 }
  0x5a   : > { %458 = vst [vmem:[%s3813_s5 + $0x410] sm:$0xff] %v457_v2  ;;  %460 = vst [vmem:[%s3813_s5 + $0x418] sm:$0xff] %v459_v3  ;;  %v461_v4 = vld [vmem:[%s3808_s4 + $0x840] sm:$0xff]  ;;  %v463_v5 = vld [vmem:[%s3808_s4 + $0x848] sm:$0xff] }
  0x5b   : > { %v465_v6 = vld [vmem:[%s3808_s4 + $0x860] sm:$0xff]  ;;  %462 = vst [vmem:[%s3813_s5 + $0x420] sm:$0xff] %v461_v4  ;;  %464 = vst [vmem:[%s3813_s5 + $0x428] sm:$0xff] %v463_v5  ;;  %v467_v7 = vld [vmem:[%s3808_s4 + $0x868] sm:$0xff] }
  0x5c   : > { %466 = vst [vmem:[%s3813_s5 + $0x430] sm:$0xff] %v465_v6  ;;  %v469_v8 = vld [vmem:[%s3808_s4 + $0x880] sm:$0xff]  ;;  %v471_v9 = vld [vmem:[%s3808_s4 + $0x888] sm:$0xff]  ;;  %468 = vst [vmem:[%s3813_s5 + $0x438] sm:$0xff] %v467_v7 }
  0x5d   : > { %470 = vst [vmem:[%s3813_s5 + $0x440] sm:$0xff] %v469_v8  ;;  %472 = vst [vmem:[%s3813_s5 + $0x448] sm:$0xff] %v471_v9  ;;  %v473_v10 = vld [vmem:[%s3808_s4 + $0x8a0] sm:$0xff]  ;;  %v475_v11 = vld [vmem:[%s3808_s4 + $0x8a8] sm:$0xff] }
  0x5e   : > { %v477_v12 = vld [vmem:[%s3808_s4 + $0x8c0] sm:$0xff]  ;;  %474 = vst [vmem:[%s3813_s5 + $0x450] sm:$0xff] %v473_v10  ;;  %476 = vst [vmem:[%s3813_s5 + $0x458] sm:$0xff] %v475_v11  ;;  %v479_v13 = vld [vmem:[%s3808_s4 + $0x8c8] sm:$0xff] }
  0x5f   : > { %478 = vst [vmem:[%s3813_s5 + $0x460] sm:$0xff] %v477_v12  ;;  %v481_v14 = vld [vmem:[%s3808_s4 + $0x8e0] sm:$0xff]  ;;  %v483_v15 = vld [vmem:[%s3808_s4 + $0x8e8] sm:$0xff]  ;;  %480 = vst [vmem:[%s3813_s5 + $0x468] sm:$0xff] %v479_v13 }
  0x60   : > { %482 = vst [vmem:[%s3813_s5 + $0x470] sm:$0xff] %v481_v14  ;;  %484 = vst [vmem:[%s3813_s5 + $0x478] sm:$0xff] %v483_v15  ;;  %v485_v16 = vld [vmem:[%s3808_s4 + $0x900] sm:$0xff]  ;;  %v487_v17 = vld [vmem:[%s3808_s4 + $0x908] sm:$0xff] }
  0x61   : > { %v489_v18 = vld [vmem:[%s3808_s4 + $0x920] sm:$0xff]  ;;  %486 = vst [vmem:[%s3813_s5 + $0x480] sm:$0xff] %v485_v16  ;;  %488 = vst [vmem:[%s3813_s5 + $0x488] sm:$0xff] %v487_v17  ;;  %v491_v19 = vld [vmem:[%s3808_s4 + $0x928] sm:$0xff] }
  0x62   : > { %490 = vst [vmem:[%s3813_s5 + $0x490] sm:$0xff] %v489_v18  ;;  %v493_v20 = vld [vmem:[%s3808_s4 + $0x940] sm:$0xff]  ;;  %v495_v21 = vld [vmem:[%s3808_s4 + $0x948] sm:$0xff]  ;;  %492 = vst [vmem:[%s3813_s5 + $0x498] sm:$0xff] %v491_v19 }
  0x63   : > { %494 = vst [vmem:[%s3813_s5 + $0x4a0] sm:$0xff] %v493_v20  ;;  %496 = vst [vmem:[%s3813_s5 + $0x4a8] sm:$0xff] %v495_v21  ;;  %v497_v22 = vld [vmem:[%s3808_s4 + $0x960] sm:$0xff]  ;;  %v499_v23 = vld [vmem:[%s3808_s4 + $0x968] sm:$0xff] }
  0x64   : > { %v501_v24 = vld [vmem:[%s3808_s4 + $0x980] sm:$0xff]  ;;  %498 = vst [vmem:[%s3813_s5 + $0x4b0] sm:$0xff] %v497_v22  ;;  %500 = vst [vmem:[%s3813_s5 + $0x4b8] sm:$0xff] %v499_v23  ;;  %v503_v25 = vld [vmem:[%s3808_s4 + $0x988] sm:$0xff] }
  0x65   : > { %502 = vst [vmem:[%s3813_s5 + $0x4c0] sm:$0xff] %v501_v24  ;;  %v505_v26 = vld [vmem:[%s3808_s4 + $0x9a0] sm:$0xff]  ;;  %v507_v27 = vld [vmem:[%s3808_s4 + $0x9a8] sm:$0xff]  ;;  %504 = vst [vmem:[%s3813_s5 + $0x4c8] sm:$0xff] %v503_v25 }
  0x66   : > { %506 = vst [vmem:[%s3813_s5 + $0x4d0] sm:$0xff] %v505_v26  ;;  %508 = vst [vmem:[%s3813_s5 + $0x4d8] sm:$0xff] %v507_v27  ;;  %v509_v28 = vld [vmem:[%s3808_s4 + $0x9c0] sm:$0xff]  ;;  %v511_v29 = vld [vmem:[%s3808_s4 + $0x9c8] sm:$0xff] }
  0x67   : > { %v513_v30 = vld [vmem:[%s3808_s4 + $0x9e0] sm:$0xff]  ;;  %510 = vst [vmem:[%s3813_s5 + $0x4e0] sm:$0xff] %v509_v28  ;;  %512 = vst [vmem:[%s3813_s5 + $0x4e8] sm:$0xff] %v511_v29  ;;  %v515_v31 = vld [vmem:[%s3808_s4 + $0x9e8] sm:$0xff] }
  0x68   : > { %514 = vst [vmem:[%s3813_s5 + $0x4f0] sm:$0xff] %v513_v30  ;;  %v517_v32 = vld [vmem:[%s3808_s4 + $0xa00] sm:$0xff]  ;;  %v519_v33 = vld [vmem:[%s3808_s4 + $0xa08] sm:$0xff]  ;;  %516 = vst [vmem:[%s3813_s5 + $0x4f8] sm:$0xff] %v515_v31 }
  0x69   : > { %518 = vst [vmem:[%s3813_s5 + $0x500] sm:$0xff] %v517_v32  ;;  %520 = vst [vmem:[%s3813_s5 + $0x508] sm:$0xff] %v519_v33  ;;  %v521_v34 = vld [vmem:[%s3808_s4 + $0xa20] sm:$0xff]  ;;  %v523_v35 = vld [vmem:[%s3808_s4 + $0xa28] sm:$0xff] }
  0x6a   : > { %v525_v36 = vld [vmem:[%s3808_s4 + $0xa40] sm:$0xff]  ;;  %522 = vst [vmem:[%s3813_s5 + $0x510] sm:$0xff] %v521_v34  ;;  %524 = vst [vmem:[%s3813_s5 + $0x518] sm:$0xff] %v523_v35  ;;  %v527_v37 = vld [vmem:[%s3808_s4 + $0xa48] sm:$0xff] }
  0x6b   : > { %526 = vst [vmem:[%s3813_s5 + $0x520] sm:$0xff] %v525_v36  ;;  %v529_v38 = vld [vmem:[%s3808_s4 + $0xa60] sm:$0xff]  ;;  %v531_v39 = vld [vmem:[%s3808_s4 + $0xa68] sm:$0xff]  ;;  %528 = vst [vmem:[%s3813_s5 + $0x528] sm:$0xff] %v527_v37 }
  0x6c   : > { %530 = vst [vmem:[%s3813_s5 + $0x530] sm:$0xff] %v529_v38  ;;  %532 = vst [vmem:[%s3813_s5 + $0x538] sm:$0xff] %v531_v39  ;;  %v533_v40 = vld [vmem:[%s3808_s4 + $0xa80] sm:$0xff]  ;;  %v535_v41 = vld [vmem:[%s3808_s4 + $0xa88] sm:$0xff] }
  0x6d   : > { %v537_v42 = vld [vmem:[%s3808_s4 + $0xaa0] sm:$0xff]  ;;  %534 = vst [vmem:[%s3813_s5 + $0x540] sm:$0xff] %v533_v40  ;;  %536 = vst [vmem:[%s3813_s5 + $0x548] sm:$0xff] %v535_v41  ;;  %v539_v43 = vld [vmem:[%s3808_s4 + $0xaa8] sm:$0xff] }
  0x6e   : > { %538 = vst [vmem:[%s3813_s5 + $0x550] sm:$0xff] %v537_v42  ;;  %v541_v44 = vld [vmem:[%s3808_s4 + $0xac0] sm:$0xff]  ;;  %v543_v45 = vld [vmem:[%s3808_s4 + $0xac8] sm:$0xff]  ;;  %540 = vst [vmem:[%s3813_s5 + $0x558] sm:$0xff] %v539_v43 }
  0x6f   : > { %542 = vst [vmem:[%s3813_s5 + $0x560] sm:$0xff] %v541_v44  ;;  %544 = vst [vmem:[%s3813_s5 + $0x568] sm:$0xff] %v543_v45  ;;  %v545_v46 = vld [vmem:[%s3808_s4 + $0xae0] sm:$0xff]  ;;  %v547_v47 = vld [vmem:[%s3808_s4 + $0xae8] sm:$0xff] }
  0x70   : > { %v549_v48 = vld [vmem:[%s3808_s4 + $0xb00] sm:$0xff]  ;;  %546 = vst [vmem:[%s3813_s5 + $0x570] sm:$0xff] %v545_v46  ;;  %548 = vst [vmem:[%s3813_s5 + $0x578] sm:$0xff] %v547_v47  ;;  %v551_v49 = vld [vmem:[%s3808_s4 + $0xb08] sm:$0xff] }
  0x71   : > { %550 = vst [vmem:[%s3813_s5 + $0x580] sm:$0xff] %v549_v48  ;;  %v553_v50 = vld [vmem:[%s3808_s4 + $0xb20] sm:$0xff]  ;;  %v555_v51 = vld [vmem:[%s3808_s4 + $0xb28] sm:$0xff]  ;;  %552 = vst [vmem:[%s3813_s5 + $0x588] sm:$0xff] %v551_v49 }
  0x72   : > { %554 = vst [vmem:[%s3813_s5 + $0x590] sm:$0xff] %v553_v50  ;;  %556 = vst [vmem:[%s3813_s5 + $0x598] sm:$0xff] %v555_v51  ;;  %v557_v52 = vld [vmem:[%s3808_s4 + $0xb40] sm:$0xff]  ;;  %v559_v53 = vld [vmem:[%s3808_s4 + $0xb48] sm:$0xff] }
  0x73   : > { %v561_v54 = vld [vmem:[%s3808_s4 + $0xb60] sm:$0xff]  ;;  %558 = vst [vmem:[%s3813_s5 + $0x5a0] sm:$0xff] %v557_v52  ;;  %560 = vst [vmem:[%s3813_s5 + $0x5a8] sm:$0xff] %v559_v53  ;;  %v563_v55 = vld [vmem:[%s3808_s4 + $0xb68] sm:$0xff] }
  0x74   : > { %562 = vst [vmem:[%s3813_s5 + $0x5b0] sm:$0xff] %v561_v54  ;;  %v565_v56 = vld [vmem:[%s3808_s4 + $0xb80] sm:$0xff]  ;;  %v567_v57 = vld [vmem:[%s3808_s4 + $0xb88] sm:$0xff]  ;;  %564 = vst [vmem:[%s3813_s5 + $0x5b8] sm:$0xff] %v563_v55 }
  0x75   : > { %566 = vst [vmem:[%s3813_s5 + $0x5c0] sm:$0xff] %v565_v56  ;;  %568 = vst [vmem:[%s3813_s5 + $0x5c8] sm:$0xff] %v567_v57  ;;  %v569_v58 = vld [vmem:[%s3808_s4 + $0xba0] sm:$0xff]  ;;  %v571_v59 = vld [vmem:[%s3808_s4 + $0xba8] sm:$0xff] }
  0x76   : > { %v573_v60 = vld [vmem:[%s3808_s4 + $0xbc0] sm:$0xff]  ;;  %570 = vst [vmem:[%s3813_s5 + $0x5d0] sm:$0xff] %v569_v58  ;;  %572 = vst [vmem:[%s3813_s5 + $0x5d8] sm:$0xff] %v571_v59  ;;  %v575_v61 = vld [vmem:[%s3808_s4 + $0xbc8] sm:$0xff] }
  0x77   : > { %574 = vst [vmem:[%s3813_s5 + $0x5e0] sm:$0xff] %v573_v60  ;;  %v577_v62 = vld [vmem:[%s3808_s4 + $0xbe0] sm:$0xff]  ;;  %v579_v63 = vld [vmem:[%s3808_s4 + $0xbe8] sm:$0xff]  ;;  %576 = vst [vmem:[%s3813_s5 + $0x5e8] sm:$0xff] %v575_v61 }
  0x78   : > { %578 = vst [vmem:[%s3813_s5 + $0x5f0] sm:$0xff] %v577_v62  ;;  %580 = vst [vmem:[%s3813_s5 + $0x5f8] sm:$0xff] %v579_v63  ;;  %v581_v0 = vld [vmem:[%s3808_s4 + $0xc00] sm:$0xff]  ;;  %v583_v1 = vld [vmem:[%s3808_s4 + $0xc08] sm:$0xff] }
  0x79   : > { %v585_v2 = vld [vmem:[%s3808_s4 + $0xc20] sm:$0xff]  ;;  %582 = vst [vmem:[%s3813_s5 + $0x600] sm:$0xff] %v581_v0  ;;  %584 = vst [vmem:[%s3813_s5 + $0x608] sm:$0xff] %v583_v1  ;;  %v587_v3 = vld [vmem:[%s3808_s4 + $0xc28] sm:$0xff] }
  0x7a   : > { %586 = vst [vmem:[%s3813_s5 + $0x610] sm:$0xff] %v585_v2  ;;  %v589_v4 = vld [vmem:[%s3808_s4 + $0xc40] sm:$0xff]  ;;  %v591_v5 = vld [vmem:[%s3808_s4 + $0xc48] sm:$0xff]  ;;  %588 = vst [vmem:[%s3813_s5 + $0x618] sm:$0xff] %v587_v3 }
  0x7b   : > { %590 = vst [vmem:[%s3813_s5 + $0x620] sm:$0xff] %v589_v4  ;;  %592 = vst [vmem:[%s3813_s5 + $0x628] sm:$0xff] %v591_v5  ;;  %v593_v6 = vld [vmem:[%s3808_s4 + $0xc60] sm:$0xff]  ;;  %v595_v7 = vld [vmem:[%s3808_s4 + $0xc68] sm:$0xff] }
  0x7c   : > { %v597_v8 = vld [vmem:[%s3808_s4 + $0xc80] sm:$0xff]  ;;  %594 = vst [vmem:[%s3813_s5 + $0x630] sm:$0xff] %v593_v6  ;;  %596 = vst [vmem:[%s3813_s5 + $0x638] sm:$0xff] %v595_v7  ;;  %v599_v9 = vld [vmem:[%s3808_s4 + $0xc88] sm:$0xff] }
  0x7d   : > { %598 = vst [vmem:[%s3813_s5 + $0x640] sm:$0xff] %v597_v8  ;;  %v601_v10 = vld [vmem:[%s3808_s4 + $0xca0] sm:$0xff]  ;;  %v603_v11 = vld [vmem:[%s3808_s4 + $0xca8] sm:$0xff]  ;;  %600 = vst [vmem:[%s3813_s5 + $0x648] sm:$0xff] %v599_v9 }
  0x7e   : > { %602 = vst [vmem:[%s3813_s5 + $0x650] sm:$0xff] %v601_v10  ;;  %604 = vst [vmem:[%s3813_s5 + $0x658] sm:$0xff] %v603_v11  ;;  %v605_v12 = vld [vmem:[%s3808_s4 + $0xcc0] sm:$0xff]  ;;  %v607_v13 = vld [vmem:[%s3808_s4 + $0xcc8] sm:$0xff] }
  0x7f   : > { %v609_v14 = vld [vmem:[%s3808_s4 + $0xce0] sm:$0xff]  ;;  %606 = vst [vmem:[%s3813_s5 + $0x660] sm:$0xff] %v605_v12  ;;  %608 = vst [vmem:[%s3813_s5 + $0x668] sm:$0xff] %v607_v13  ;;  %v611_v15 = vld [vmem:[%s3808_s4 + $0xce8] sm:$0xff] }
  0x80   : > { %610 = vst [vmem:[%s3813_s5 + $0x670] sm:$0xff] %v609_v14  ;;  %v613_v16 = vld [vmem:[%s3808_s4 + $0xd00] sm:$0xff]  ;;  %v615_v17 = vld [vmem:[%s3808_s4 + $0xd08] sm:$0xff]  ;;  %612 = vst [vmem:[%s3813_s5 + $0x678] sm:$0xff] %v611_v15 }
  0x81   : > { %614 = vst [vmem:[%s3813_s5 + $0x680] sm:$0xff] %v613_v16  ;;  %616 = vst [vmem:[%s3813_s5 + $0x688] sm:$0xff] %v615_v17  ;;  %v617_v18 = vld [vmem:[%s3808_s4 + $0xd20] sm:$0xff]  ;;  %v619_v19 = vld [vmem:[%s3808_s4 + $0xd28] sm:$0xff] }
  0x82   : > { %v621_v20 = vld [vmem:[%s3808_s4 + $0xd40] sm:$0xff]  ;;  %618 = vst [vmem:[%s3813_s5 + $0x690] sm:$0xff] %v617_v18  ;;  %620 = vst [vmem:[%s3813_s5 + $0x698] sm:$0xff] %v619_v19  ;;  %v623_v21 = vld [vmem:[%s3808_s4 + $0xd48] sm:$0xff] }
  0x83   : > { %622 = vst [vmem:[%s3813_s5 + $0x6a0] sm:$0xff] %v621_v20  ;;  %v625_v22 = vld [vmem:[%s3808_s4 + $0xd60] sm:$0xff]  ;;  %v627_v23 = vld [vmem:[%s3808_s4 + $0xd68] sm:$0xff]  ;;  %624 = vst [vmem:[%s3813_s5 + $0x6a8] sm:$0xff] %v623_v21 }
  0x84   : > { %626 = vst [vmem:[%s3813_s5 + $0x6b0] sm:$0xff] %v625_v22  ;;  %628 = vst [vmem:[%s3813_s5 + $0x6b8] sm:$0xff] %v627_v23  ;;  %v629_v24 = vld [vmem:[%s3808_s4 + $0xd80] sm:$0xff]  ;;  %v631_v25 = vld [vmem:[%s3808_s4 + $0xd88] sm:$0xff] }
  0x85   : > { %v633_v26 = vld [vmem:[%s3808_s4 + $0xda0] sm:$0xff]  ;;  %630 = vst [vmem:[%s3813_s5 + $0x6c0] sm:$0xff] %v629_v24  ;;  %632 = vst [vmem:[%s3813_s5 + $0x6c8] sm:$0xff] %v631_v25  ;;  %v635_v27 = vld [vmem:[%s3808_s4 + $0xda8] sm:$0xff] }
  0x86   : > { %634 = vst [vmem:[%s3813_s5 + $0x6d0] sm:$0xff] %v633_v26  ;;  %v637_v28 = vld [vmem:[%s3808_s4 + $0xdc0] sm:$0xff]  ;;  %v639_v29 = vld [vmem:[%s3808_s4 + $0xdc8] sm:$0xff]  ;;  %636 = vst [vmem:[%s3813_s5 + $0x6d8] sm:$0xff] %v635_v27 }
  0x87   : > { %638 = vst [vmem:[%s3813_s5 + $0x6e0] sm:$0xff] %v637_v28  ;;  %640 = vst [vmem:[%s3813_s5 + $0x6e8] sm:$0xff] %v639_v29  ;;  %v641_v30 = vld [vmem:[%s3808_s4 + $0xde0] sm:$0xff]  ;;  %v643_v31 = vld [vmem:[%s3808_s4 + $0xde8] sm:$0xff] }
  0x88   : > { %v645_v32 = vld [vmem:[%s3808_s4 + $0xe00] sm:$0xff]  ;;  %642 = vst [vmem:[%s3813_s5 + $0x6f0] sm:$0xff] %v641_v30  ;;  %644 = vst [vmem:[%s3813_s5 + $0x6f8] sm:$0xff] %v643_v31  ;;  %v647_v33 = vld [vmem:[%s3808_s4 + $0xe08] sm:$0xff] }
  0x89   : > { %646 = vst [vmem:[%s3813_s5 + $0x700] sm:$0xff] %v645_v32  ;;  %v649_v34 = vld [vmem:[%s3808_s4 + $0xe20] sm:$0xff]  ;;  %v651_v35 = vld [vmem:[%s3808_s4 + $0xe28] sm:$0xff]  ;;  %648 = vst [vmem:[%s3813_s5 + $0x708] sm:$0xff] %v647_v33 }
  0x8a   : > { %650 = vst [vmem:[%s3813_s5 + $0x710] sm:$0xff] %v649_v34  ;;  %652 = vst [vmem:[%s3813_s5 + $0x718] sm:$0xff] %v651_v35  ;;  %v653_v36 = vld [vmem:[%s3808_s4 + $0xe40] sm:$0xff]  ;;  %v655_v37 = vld [vmem:[%s3808_s4 + $0xe48] sm:$0xff] }
  0x8b   : > { %v657_v38 = vld [vmem:[%s3808_s4 + $0xe60] sm:$0xff]  ;;  %654 = vst [vmem:[%s3813_s5 + $0x720] sm:$0xff] %v653_v36  ;;  %656 = vst [vmem:[%s3813_s5 + $0x728] sm:$0xff] %v655_v37  ;;  %v659_v39 = vld [vmem:[%s3808_s4 + $0xe68] sm:$0xff] }
  0x8c   : > { %658 = vst [vmem:[%s3813_s5 + $0x730] sm:$0xff] %v657_v38  ;;  %v661_v40 = vld [vmem:[%s3808_s4 + $0xe80] sm:$0xff]  ;;  %v663_v41 = vld [vmem:[%s3808_s4 + $0xe88] sm:$0xff]  ;;  %660 = vst [vmem:[%s3813_s5 + $0x738] sm:$0xff] %v659_v39 }
  0x8d   : > { %662 = vst [vmem:[%s3813_s5 + $0x740] sm:$0xff] %v661_v40  ;;  %664 = vst [vmem:[%s3813_s5 + $0x748] sm:$0xff] %v663_v41  ;;  %v665_v42 = vld [vmem:[%s3808_s4 + $0xea0] sm:$0xff]  ;;  %v667_v43 = vld [vmem:[%s3808_s4 + $0xea8] sm:$0xff] }
  0x8e   : > { %v669_v44 = vld [vmem:[%s3808_s4 + $0xec0] sm:$0xff]  ;;  %666 = vst [vmem:[%s3813_s5 + $0x750] sm:$0xff] %v665_v42  ;;  %668 = vst [vmem:[%s3813_s5 + $0x758] sm:$0xff] %v667_v43  ;;  %v671_v45 = vld [vmem:[%s3808_s4 + $0xec8] sm:$0xff] }
  0x8f   : > { %670 = vst [vmem:[%s3813_s5 + $0x760] sm:$0xff] %v669_v44  ;;  %v673_v46 = vld [vmem:[%s3808_s4 + $0xee0] sm:$0xff]  ;;  %v675_v47 = vld [vmem:[%s3808_s4 + $0xee8] sm:$0xff]  ;;  %672 = vst [vmem:[%s3813_s5 + $0x768] sm:$0xff] %v671_v45 }
  0x90   : > { %674 = vst [vmem:[%s3813_s5 + $0x770] sm:$0xff] %v673_v46  ;;  %676 = vst [vmem:[%s3813_s5 + $0x778] sm:$0xff] %v675_v47  ;;  %v677_v48 = vld [vmem:[%s3808_s4 + $0xf00] sm:$0xff]  ;;  %v679_v49 = vld [vmem:[%s3808_s4 + $0xf08] sm:$0xff] }
  0x91   : > { %v681_v50 = vld [vmem:[%s3808_s4 + $0xf20] sm:$0xff]  ;;  %678 = vst [vmem:[%s3813_s5 + $0x780] sm:$0xff] %v677_v48  ;;  %680 = vst [vmem:[%s3813_s5 + $0x788] sm:$0xff] %v679_v49  ;;  %v683_v51 = vld [vmem:[%s3808_s4 + $0xf28] sm:$0xff] }
  0x92   : > { %682 = vst [vmem:[%s3813_s5 + $0x790] sm:$0xff] %v681_v50  ;;  %v685_v52 = vld [vmem:[%s3808_s4 + $0xf40] sm:$0xff]  ;;  %v687_v53 = vld [vmem:[%s3808_s4 + $0xf48] sm:$0xff]  ;;  %684 = vst [vmem:[%s3813_s5 + $0x798] sm:$0xff] %v683_v51 }
  0x93   : > { %686 = vst [vmem:[%s3813_s5 + $0x7a0] sm:$0xff] %v685_v52  ;;  %688 = vst [vmem:[%s3813_s5 + $0x7a8] sm:$0xff] %v687_v53  ;;  %v689_v54 = vld [vmem:[%s3808_s4 + $0xf60] sm:$0xff]  ;;  %v691_v55 = vld [vmem:[%s3808_s4 + $0xf68] sm:$0xff] }
  0x94   : > { %v693_v56 = vld [vmem:[%s3808_s4 + $0xf80] sm:$0xff]  ;;  %690 = vst [vmem:[%s3813_s5 + $0x7b0] sm:$0xff] %v689_v54  ;;  %692 = vst [vmem:[%s3813_s5 + $0x7b8] sm:$0xff] %v691_v55  ;;  %v695_v57 = vld [vmem:[%s3808_s4 + $0xf88] sm:$0xff] }
  0x95   : > { %694 = vst [vmem:[%s3813_s5 + $0x7c0] sm:$0xff] %v693_v56  ;;  %v697_v58 = vld [vmem:[%s3808_s4 + $0xfa0] sm:$0xff]  ;;  %v699_v59 = vld [vmem:[%s3808_s4 + $0xfa8] sm:$0xff]  ;;  %696 = vst [vmem:[%s3813_s5 + $0x7c8] sm:$0xff] %v695_v57 }
  0x96   : > { %698 = vst [vmem:[%s3813_s5 + $0x7d0] sm:$0xff] %v697_v58  ;;  %700 = vst [vmem:[%s3813_s5 + $0x7d8] sm:$0xff] %v699_v59  ;;  %v701_v60 = vld [vmem:[%s3808_s4 + $0xfc0] sm:$0xff]  ;;  %v703_v61 = vld [vmem:[%s3808_s4 + $0xfc8] sm:$0xff] }
  0x97   : > { %v705_v62 = vld [vmem:[%s3808_s4 + $0xfe0] sm:$0xff]  ;;  %702 = vst [vmem:[%s3813_s5 + $0x7e0] sm:$0xff] %v701_v60  ;;  %704 = vst [vmem:[%s3813_s5 + $0x7e8] sm:$0xff] %v703_v61  ;;  %v707_v63 = vld [vmem:[%s3808_s4 + $0xfe8] sm:$0xff] }
  0x98   : > { %706 = vst [vmem:[%s3813_s5 + $0x7f0] sm:$0xff] %v705_v62  ;;  %708 = vst [vmem:[%s3813_s5 + $0x7f8] sm:$0xff] %v707_v63 }
  0x99 PF: > { %p2909_p11 = scmp.ge.s32.totalorder %s3721_s17, 1  ;;  %p721_p12 = scmp.lt.s32.totalorder %s3721_s17, 3 }
  0x9b   : > { %p722_p13 = pnand %p2909_p11, %p721_p12 }
  0x9c   : > { %s4327_s6 = sand.u32 (!%p722_p13), 1, %s3705_s13   ;;  %v1048_v0 = vlaneseq (!%p722_p13)  ;;  %v3723_v1 = vmov (!%p722_p13), 1966171168   ;;  %v4333_v3 = vld [vmem:[%s4699_s0] sm:$0xff] (!%p722_p13)  ;;  %s2912_s11 = sshll.u32 (!%p722_p13), %s3713_s15, 2 }
  0x9d   : > { %725 = sbr.rel (%p722_p13) target bundleno = 652 (0x28c), region = 51  ;;  %s2910_s7 = sshll.u32 (!%p722_p13), %s4327_s6, 11  ;;  %v1046_v2 = vunpack.c.l.s4 (!%p722_p13), %v3723_v1 }
  0x9e   : > { %v4335_v4 = vshrl.u32 (!%p722_p13), %v1048_v0, 7  ;;  %s4337_s10 = scalar_lea.vmem (!%p722_p13), [#allocation2], %s2910_s7  ;;  %p775_p0 = scmp.lt.s32.totalorder (!%p722_p13), %s2912_s11, 7 }
  0x9f   : > { %v3258_v5 = vld [vmem:[%s4337_s10 + $0x4] ss:$16 sps:$4 sm:$0xff] (!%p722_p13)   ;;  %v1047_v6 = vunpack.c.0.s8 (!%p722_p13), %v1046_v2  ;;  %v3260_v7 = vld [vmem:[%s4337_s10 + $0xc] ss:$16 sps:$4 sm:$0xff] (!%p722_p13)   ;;  %v3262_v8 = vld [vmem:[%s4337_s10] ss:$16 sps:$4 sm:$0xff] (!%p722_p13)  }
  0xa0   : > { %2381 = vmatprep.subr.bf16.mxu0 (!%p722_p13), %v3258_v5  ;;  %v3263_v9 = vld [vmem:[%s4337_s10 + $0x8] ss:$16 sps:$4 sm:$0xff] (!%p722_p13)   ;;  %2545 = vmatprep.subr.bf16.mxu1 (!%p722_p13), %v3260_v7  ;;  %v3264_v11 = vld [vmem:[%s4337_s10 + $0x24] ss:$16 sps:$4 sm:$0xff] (!%p722_p13)   ;;  %v3266_v12 = vld [vmem:[%s4337_s10 + $0x2c] ss:$16 sps:$4 sm:$0xff] (!%p722_p13)  }
  0xa1   : > { %v4344_v10 = vsub.s32 (!%p722_p13), %v1047_v6, %v4335_v4  ;;  %2382 = vmatpush1.bf16.msra.mxu0 (!%p722_p13), %v3262_v8  ;;  %2546 = vmatpush1.bf16.msra.mxu1 (!%p722_p13), %v3263_v9  ;;  %v3268_v13 = vld [vmem:[%s4337_s10 + $0x20] ss:$16 sps:$4 sm:$0xff] (!%p722_p13)   ;;  %v3269_v15 = vld [vmem:[%s4337_s10 + $0x28] ss:$16 sps:$4 sm:$0xff] (!%p722_p13)   ;;  %v3270_v16 = vld [vmem:[%s4337_s10 + $0x44] ss:$16 sps:$4 sm:$0xff] (!%p722_p13)  }
  0xa2   : > { %2383 = vmatprep.subr.bf16.mxu0 (!%p722_p13), %v3264_v11  ;;  %2547 = vmatprep.subr.bf16.mxu1 (!%p722_p13), %v3266_v12  ;;  %v3272_v18 = vld [vmem:[%s4337_s10 + $0x4c] ss:$16 sps:$4 sm:$0xff] (!%p722_p13)   ;;  %v3274_v19 = vld [vmem:[%s4337_s10 + $0x40] ss:$16 sps:$4 sm:$0xff] (!%p722_p13)   ;;  %v3275_v20 = vld [vmem:[%s4337_s10 + $0x48] ss:$16 sps:$4 sm:$0xff] (!%p722_p13)  }
  0xa3   : > { %v4351_v14 = vrot.slane (!%p722_p13), %v4333_v3, %v4344_v10  ;;  %v3276_v21 = vld [vmem:[%s4337_s10 + $0x64] ss:$16 sps:$4 sm:$0xff] (!%p722_p13)   ;;  %v3278_v23 = vld [vmem:[%s4337_s10 + $0x6c] ss:$16 sps:$4 sm:$0xff] (!%p722_p13)   ;;  %v3280_v24 = vld [vmem:[%s4337_s10 + $0x60] ss:$16 sps:$4 sm:$0xff] (!%p722_p13)  }
  0xa4   : > { %v3281_v25 = vld [vmem:[%s4337_s10 + $0x68] ss:$16 sps:$4 sm:$0xff]   ;;  %v3282_v26 = vld [vmem:[%s4337_s10 + $0x84] ss:$16 sps:$4 sm:$0xff]   ;;  %v3284_v27 = vld [vmem:[%s4337_s10 + $0x8c] ss:$16 sps:$4 sm:$0xff]  }
  0xa5   : > { %v1059_v17 = vcombine.high %v4351_v14, %v4351_v14  ;;  %2384 = vmatpush1.bf16.msra.mxu0 %v3268_v13  ;;  %2548 = vmatpush1.bf16.msra.mxu1 %v3269_v15  ;;  %v3286_v28 = vld [vmem:[%s4337_s10 + $0x80] ss:$16 sps:$4 sm:$0xff]   ;;  %v3287_v29 = vld [vmem:[%s4337_s10 + $0x88] ss:$16 sps:$4 sm:$0xff]   ;;  %v3288_v30 = vld [vmem:[%s4337_s10 + $0xa4] ss:$16 sps:$4 sm:$0xff]   ;;  %v1044_v13 = vcombine.high %v4333_v3, %v4333_v3 }
  0xa6   : > { %2385 = vmatprep.subr.bf16.mxu0 %v3270_v16  ;;  %2549 = vmatprep.subr.bf16.mxu1 %v3272_v18  ;;  %v3290_v31 = vld [vmem:[%s4337_s10 + $0xac] ss:$16 sps:$4 sm:$0xff]   ;;  %v3292_v32 = vld [vmem:[%s4337_s10 + $0xa0] ss:$16 sps:$4 sm:$0xff]   ;;  %v3293_v33 = vld [vmem:[%s4337_s10 + $0xa8] ss:$16 sps:$4 sm:$0xff]  }
  0xa7   : > { %v4362_v22 = vrot.slane %v1059_v17, %v4344_v10  ;;  %v3294_v34 = vld [vmem:[%s4337_s10 + $0xc4] ss:$16 sps:$4 sm:$0xff]   ;;  %v3296_v35 = vld [vmem:[%s4337_s10 + $0xcc] ss:$16 sps:$4 sm:$0xff]   ;;  %v3298_v36 = vld [vmem:[%s4337_s10 + $0xc0] ss:$16 sps:$4 sm:$0xff]   ;;  %v1058_v17 = vrot.slane %v1044_v13, %v4344_v10 }
  0xa8   : > { %v3299_v37 = vld [vmem:[%s4337_s10 + $0xc8] ss:$16 sps:$4 sm:$0xff]   ;;  %v3300_v38 = vld [vmem:[%s4337_s10 + $0xe4] ss:$16 sps:$4 sm:$0xff]   ;;  %v3302_v39 = vld [vmem:[%s4337_s10 + $0xec] ss:$16 sps:$4 sm:$0xff]  }
  0xa9   : > { %2413 = vmatprep.mubr.bf16.mxu0 %v4362_v22  ;;  %2577 = vmatprep.mubr.bf16.mxu1 %v4362_v22  ;;  %v3304_v40 = vld [vmem:[%s4337_s10 + $0xe0] ss:$16 sps:$4 sm:$0xff]   ;;  %v3305_v41 = vld [vmem:[%s4337_s10 + $0xe8] ss:$16 sps:$4 sm:$0xff]   ;;  %v3306_v42 = vld [vmem:[%s4337_s10 + $0x104] ss:$16 sps:$4 sm:$0xff]  }
  0xaa   : > { %2386 = vmatpush1.bf16.msra.mxu0 %v3274_v19  ;;  %2550 = vmatpush1.bf16.msra.mxu1 %v3275_v20  ;;  %v3308_v43 = vld [vmem:[%s4337_s10 + $0x10c] ss:$16 sps:$4 sm:$0xff]   ;;  %v3310_v44 = vld [vmem:[%s4337_s10 + $0x100] ss:$16 sps:$4 sm:$0xff]   ;;  %v3311_v45 = vld [vmem:[%s4337_s10 + $0x108] ss:$16 sps:$4 sm:$0xff]   ;;  %v4426_v20 = vrot.slane %v4351_v14, %v4344_v10  ;;  %v1091_v14 = vcombine.high %v4362_v22, %v4362_v22 }
  0xab   : > { %2387 = vmatprep.subr.bf16.mxu0 %v3276_v21  ;;  %2551 = vmatprep.subr.bf16.mxu1 %v3278_v23  ;;  %v3312_v46 = vld [vmem:[%s4337_s10 + $0x124] ss:$16 sps:$4 sm:$0xff]   ;;  %v3314_v47 = vld [vmem:[%s4337_s10 + $0x12c] ss:$16 sps:$4 sm:$0xff]   ;;  %v3316_v48 = vld [vmem:[%s4337_s10 + $0x120] ss:$16 sps:$4 sm:$0xff]   ;;  %v1060_v21 = vcombine.high %v1058_v17, %v1058_v17 }
  0xac   : > { %v3317_v49 = vld [vmem:[%s4337_s10 + $0x128] ss:$16 sps:$4 sm:$0xff]   ;;  %v3318_v50 = vld [vmem:[%s4337_s10 + $0x144] ss:$16 sps:$4 sm:$0xff]   ;;  %v3320_v51 = vld [vmem:[%s4337_s10 + $0x14c] ss:$16 sps:$4 sm:$0xff]  }
  0xad   : > { %v3322_v52 = vld [vmem:[%s4337_s10 + $0x140] ss:$16 sps:$4 sm:$0xff]   ;;  %v3323_v53 = vld [vmem:[%s4337_s10 + $0x148] ss:$16 sps:$4 sm:$0xff]   ;;  %v3324_v54 = vld [vmem:[%s4337_s10 + $0x164] ss:$16 sps:$4 sm:$0xff]  }
  0xae   : > { %2388 = vmatpush1.bf16.msra.mxu0 %v3280_v24  ;;  %2552 = vmatpush1.bf16.msra.mxu1 %v3281_v25  ;;  %v3326_v55 = vld [vmem:[%s4337_s10 + $0x16c] ss:$16 sps:$4 sm:$0xff]   ;;  %v3328_v56 = vld [vmem:[%s4337_s10 + $0x160] ss:$16 sps:$4 sm:$0xff]   ;;  %v3329_v57 = vld [vmem:[%s4337_s10 + $0x168] ss:$16 sps:$4 sm:$0xff]   ;;  %v4431_v24 = vrot.slane %v1060_v21, %v4344_v10  ;;  %v4434_v25 = vrot.slane %v1058_v17, %v4344_v10 }
  0xaf   : > { %2389 = vmatprep.subr.bf16.mxu0 %v3282_v26  ;;  %2553 = vmatprep.subr.bf16.mxu1 %v3284_v27  ;;  %v3330_v58 = vld [vmem:[%s4337_s10 + $0x184] ss:$16 sps:$4 sm:$0xff]   ;;  %v3332_v59 = vld [vmem:[%s4337_s10 + $0x18c] ss:$16 sps:$4 sm:$0xff]   ;;  %v3334_v60 = vld [vmem:[%s4337_s10 + $0x180] ss:$16 sps:$4 sm:$0xff]  }
  0xb0   : > { %v3335_v61 = vld [vmem:[%s4337_s10 + $0x188] ss:$16 sps:$4 sm:$0xff]   ;;  %v3336_v62 = vld [vmem:[%s4337_s10 + $0x1a4] ss:$16 sps:$4 sm:$0xff]   ;;  %v3338_v63 = vld [vmem:[%s4337_s10 + $0x1ac] ss:$16 sps:$4 sm:$0xff]  }
  0xb1   : > { %v3340_v0 = vld [vmem:[%s4337_s10 + $0x1a0] ss:$16 sps:$4 sm:$0xff]   ;;  %v3341_v1 = vld [vmem:[%s4337_s10 + $0x1a8] ss:$16 sps:$4 sm:$0xff]   ;;  %v3342_v2 = vld [vmem:[%s4337_s10 + $0x1c4] ss:$16 sps:$4 sm:$0xff]  }
  0xb2   : > { %2390 = vmatpush1.bf16.msra.mxu0 %v3286_v28  ;;  %2554 = vmatpush1.bf16.msra.mxu1 %v3287_v29  ;;  %v3344_v5 = vld [vmem:[%s4337_s10 + $0x1cc] ss:$16 sps:$4 sm:$0xff]   ;;  %v3346_v6 = vld [vmem:[%s4337_s10 + $0x1c0] ss:$16 sps:$4 sm:$0xff]   ;;  %v3347_v7 = vld [vmem:[%s4337_s10 + $0x1c8] ss:$16 sps:$4 sm:$0xff]  }
  0xb3   : > { %2391 = vmatprep.subr.bf16.mxu0 %v3288_v30  ;;  %2555 = vmatprep.subr.bf16.mxu1 %v3290_v31  ;;  %v3348_v8 = vld [vmem:[%s4337_s10 + $0x1e4] ss:$16 sps:$4 sm:$0xff]   ;;  %v3350_v9 = vld [vmem:[%s4337_s10 + $0x1ec] ss:$16 sps:$4 sm:$0xff]   ;;  %v3352_v11 = vld [vmem:[%s4337_s10 + $0x1e0] ss:$16 sps:$4 sm:$0xff]  }
  0xb4   : > { %v3353_v12 = vld [vmem:[%s4337_s10 + $0x1e8] ss:$16 sps:$4 sm:$0xff]   ;;  %v3356_v15 = vld [vmem:[%s4337_s10 + $0x204] ss:$16 sps:$4 sm:$0xff]   ;;  %v3359_v16 = vld [vmem:[%s4337_s10 + $0x20c] ss:$16 sps:$4 sm:$0xff]  }
  0xb5   : > { %v3354_v18 = vld [vmem:[%s4337_s10 + $0x200] ss:$16 sps:$4 sm:$0xff]   ;;  %v3357_v19 = vld [vmem:[%s4337_s10 + $0x208] ss:$16 sps:$4 sm:$0xff]   ;;  %v3362_v3 = vld [vmem:[%s4337_s10 + $0x224] ss:$16 sps:$4 sm:$0xff]  }
  0xb6   : > { %2392 = vmatpush1.bf16.msra.mxu0 %v3292_v32  ;;  %2556 = vmatpush1.bf16.msra.mxu1 %v3293_v33  ;;  %v3365_v23 = vld [vmem:[%s4337_s10 + $0x22c] ss:$16 sps:$4 sm:$0xff]   ;;  %v3360_v26 = vld [vmem:[%s4337_s10 + $0x220] ss:$16 sps:$4 sm:$0xff]   ;;  %v3363_v27 = vld [vmem:[%s4337_s10 + $0x228] ss:$16 sps:$4 sm:$0xff]  }
  0xb7   : > { %2393 = vmatprep.subr.bf16.mxu0 %v3294_v34  ;;  %2557 = vmatprep.subr.bf16.mxu1 %v3296_v35  ;;  %v3368_v28 = vld [vmem:[%s4337_s10 + $0x244] ss:$16 sps:$4 sm:$0xff]   ;;  %v3371_v10 = vld [vmem:[%s4337_s10 + $0x24c] ss:$16 sps:$4 sm:$0xff]   ;;  %v3366_v22 = vld [vmem:[%s4337_s10 + $0x240] ss:$16 sps:$4 sm:$0xff]  }
  0xb8   : > { %v3369_v29 = vld [vmem:[%s4337_s10 + $0x248] ss:$16 sps:$4 sm:$0xff]   ;;  %v3374_v30 = vld [vmem:[%s4337_s10 + $0x264] ss:$16 sps:$4 sm:$0xff]   ;;  %v3377_v31 = vld [vmem:[%s4337_s10 + $0x26c] ss:$16 sps:$4 sm:$0xff]  }
  0xb9   : > { %v3372_v32 = vld [vmem:[%s4337_s10 + $0x260] ss:$16 sps:$4 sm:$0xff]   ;;  %v3375_v33 = vld [vmem:[%s4337_s10 + $0x268] ss:$16 sps:$4 sm:$0xff]   ;;  %v3380_v34 = vld [vmem:[%s4337_s10 + $0x284] ss:$16 sps:$4 sm:$0xff]  }
  0xba   : > { %2394 = vmatpush1.bf16.msra.mxu0 %v3298_v36  ;;  %2558 = vmatpush1.bf16.msra.mxu1 %v3299_v37  ;;  %v3383_v35 = vld [vmem:[%s4337_s10 + $0x28c] ss:$16 sps:$4 sm:$0xff]   ;;  %v3378_v36 = vld [vmem:[%s4337_s10 + $0x280] ss:$16 sps:$4 sm:$0xff]   ;;  %v3381_v37 = vld [vmem:[%s4337_s10 + $0x288] ss:$16 sps:$4 sm:$0xff]  }
  0xbb   : > { %2395 = vmatprep.subr.bf16.mxu0 %v3300_v38  ;;  %2559 = vmatprep.subr.bf16.mxu1 %v3302_v39  ;;  %v3386_v38 = vld [vmem:[%s4337_s10 + $0x2a4] ss:$16 sps:$4 sm:$0xff]   ;;  %v3389_v39 = vld [vmem:[%s4337_s10 + $0x2ac] ss:$16 sps:$4 sm:$0xff]   ;;  %v3441_v17 = vld [vmem:[%s4337_s10 + $0x3c8] ss:$16 sps:$4 sm:$0xff]  }
  0xbc   : > { %v3440_v13 = vld [vmem:[%s4337_s10 + $0x3c4] ss:$16 sps:$4 sm:$0xff]   ;;  %v3444_v21 = vld [vmem:[%s4337_s10 + $0x3e0] ss:$16 sps:$4 sm:$0xff]   ;;  %s4713_s11 = smov (!%p775_p0, %s2912_s11), 7  ;;  %s2911_s23 = sshll.u32 %s4327_s6, 3 }
  0xbd   : > { %s777_s21 = scalar_lea.vmem %s4701_s2, %s4713_s11  ;;  %s3175_s26 = sshll.u32 %s3713_s15, 7 }
  0xbe   : > { %2396 = vmatpush1.bf16.msra.mxu0 %v3304_v40  ;;  %2560 = vmatpush1.bf16.msra.mxu1 %v3305_v41  ;;  %v3384_v40 = vld [vmem:[%s4337_s10 + $0x2a0] ss:$16 sps:$4 sm:$0xff]   ;;  %v3387_v41 = vld [vmem:[%s4337_s10 + $0x2a8] ss:$16 sps:$4 sm:$0xff]   ;;  %s762_s27 = scalar_lea.vmem [#allocation3], %s2911_s23  ;;  %s4650_s4 = scalar_lea.hbm %s4702_s3, %s3175_s26 }
  0xbf   : > { %2397 = vmatprep.subr.bf16.mxu0 %v3306_v42  ;;  %2561 = vmatprep.subr.bf16.mxu1 %v3308_v43  ;;  %v3392_v42 = vld [vmem:[%s4337_s10 + $0x2c4] ss:$16 sps:$4 sm:$0xff]   ;;  %v3395_v43 = vld [vmem:[%s4337_s10 + $0x2cc] ss:$16 sps:$4 sm:$0xff]   ;;  %s2792_s28 = sshll.u32 %s762_s27, 4  ;;  %s2776_s5 = scalar_lea.sflag [#allocation4], %s4327_s6  ;;  %s4652_s28 = int_to_ptr.vmem [resolvable:$true] %s2792_s28 }
  0xc0   : > { %s3643_s7 = scalar_lea.vmem %s4652_s28, 128  ;;  %s3725_s15 = smov [#allocation3]  }
  0xc1   : > { %p3644_p1 = scmp.ne.s32.totalorder %s4652_s28, %s3643_s7  ;;  %s3647_s8 = sshll.u32 %s3725_s15, 4  ;;  %s3648_s8 = int_to_ptr.vmem [resolvable:$false] %s3647_s8 }
  0xc2   : > { %2398 = vmatpush1.bf16.msra.mxu0 %v3310_v44  ;;  %2562 = vmatpush1.bf16.msra.mxu1 %v3311_v45  ;;  %v3390_v44 = vld [vmem:[%s4337_s10 + $0x2c0] ss:$16 sps:$4 sm:$0xff]   ;;  %v3393_v45 = vld [vmem:[%s4337_s10 + $0x2c8] ss:$16 sps:$4 sm:$0xff]   ;;  %s3649_s9 = scalar_lea.vmem %s3648_s8, 256  ;;  %p3650_p4 = scmp.lt.s32.totalorder %s4652_s28, %s3648_s8 }
  0xc3   : > { %2399 = vmatprep.subr.bf16.mxu0 %v3312_v46  ;;  %2563 = vmatprep.subr.bf16.mxu1 %v3314_v47  ;;  %v3398_v46 = vld [vmem:[%s4337_s10 + $0x2e4] ss:$16 sps:$4 sm:$0xff]   ;;  %v3401_v47 = vld [vmem:[%s4337_s10 + $0x2ec] ss:$16 sps:$4 sm:$0xff]   ;;  %p3645_p2 = pnand %p3644_p1, %p3785_p5  ;;  %p3651_p6 = scmp.lt.s32.totalorder %s3649_s9, %s3643_s7 }
  0xc5   : > { %p3646_p3 = pneg %p3645_p2  ;;  %p3652_p7 = por %p3651_p6, %p3650_p4 }
  0xc6   : > { %2400 = vmatpush1.bf16.msra.mxu0 %v3316_v48  ;;  %2564 = vmatpush1.bf16.msra.mxu1 %v3317_v49  ;;  %v3396_v48 = vld [vmem:[%s4337_s10 + $0x2e0] ss:$16 sps:$4 sm:$0xff]   ;;  %v3399_v49 = vld [vmem:[%s4337_s10 + $0x2e8] ss:$16 sps:$4 sm:$0xff]  }
  0xc7   : > { %2401 = vmatprep.subr.bf16.mxu0 %v3318_v50  ;;  %2565 = vmatprep.subr.bf16.mxu1 %v3320_v51  ;;  %v3404_v50 = vld [vmem:[%s4337_s10 + $0x304] ss:$16 sps:$4 sm:$0xff]   ;;  %v3407_v51 = vld [vmem:[%s4337_s10 + $0x30c] ss:$16 sps:$4 sm:$0xff]   ;;  %p3653_p8 = pnand %p3652_p7, %p3646_p3 }
  0xca   : > { %2402 = vmatpush1.bf16.msra.mxu0 %v3322_v52  ;;  %2566 = vmatpush1.bf16.msra.mxu1 %v3323_v53  ;;  %v3402_v52 = vld [vmem:[%s4337_s10 + $0x300] ss:$16 sps:$4 sm:$0xff]   ;;  %v3405_v53 = vld [vmem:[%s4337_s10 + $0x308] ss:$16 sps:$4 sm:$0xff]  }
  0xcb   : > { %2403 = vmatprep.subr.bf16.mxu0 %v3324_v54  ;;  %2567 = vmatprep.subr.bf16.mxu1 %v3326_v55  ;;  %v3410_v54 = vld [vmem:[%s4337_s10 + $0x324] ss:$16 sps:$4 sm:$0xff]   ;;  %v3413_v55 = vld [vmem:[%s4337_s10 + $0x32c] ss:$16 sps:$4 sm:$0xff]  }
  0xce   : > { %2404 = vmatpush1.bf16.msra.mxu0 %v3328_v56  ;;  %2568 = vmatpush1.bf16.msra.mxu1 %v3329_v57  ;;  %v3408_v56 = vld [vmem:[%s4337_s10 + $0x320] ss:$16 sps:$4 sm:$0xff]   ;;  %v3411_v57 = vld [vmem:[%s4337_s10 + $0x328] ss:$16 sps:$4 sm:$0xff]  }
  0xcf   : > { %2405 = vmatprep.subr.bf16.mxu0 %v3330_v58  ;;  %2569 = vmatprep.subr.bf16.mxu1 %v3332_v59  ;;  %v3416_v58 = vld [vmem:[%s4337_s10 + $0x344] ss:$16 sps:$4 sm:$0xff]   ;;  %v3419_v59 = vld [vmem:[%s4337_s10 + $0x34c] ss:$16 sps:$4 sm:$0xff]  }
  0xd2   : > { %2406 = vmatpush1.bf16.msra.mxu0 %v3334_v60  ;;  %2570 = vmatpush1.bf16.msra.mxu1 %v3335_v61  ;;  %v3414_v60 = vld [vmem:[%s4337_s10 + $0x340] ss:$16 sps:$4 sm:$0xff]   ;;  %v3417_v61 = vld [vmem:[%s4337_s10 + $0x348] ss:$16 sps:$4 sm:$0xff]  }
  0xd3   : > { %2407 = vmatprep.subr.bf16.mxu0 %v3336_v62  ;;  %2571 = vmatprep.subr.bf16.mxu1 %v3338_v63  ;;  %v3422_v62 = vld [vmem:[%s4337_s10 + $0x364] ss:$16 sps:$4 sm:$0xff]   ;;  %v3425_v63 = vld [vmem:[%s4337_s10 + $0x36c] ss:$16 sps:$4 sm:$0xff]  }
  0xd6   : > { %2408 = vmatpush1.bf16.msra.mxu0 %v3340_v0  ;;  %2572 = vmatpush1.bf16.msra.mxu1 %v3341_v1  ;;  %v3420_v0 = vld [vmem:[%s4337_s10 + $0x360] ss:$16 sps:$4 sm:$0xff]   ;;  %v3423_v1 = vld [vmem:[%s4337_s10 + $0x368] ss:$16 sps:$4 sm:$0xff]  }
  0xd7   : > { %2409 = vmatprep.subr.bf16.mxu0 %v3342_v2  ;;  %2573 = vmatprep.subr.bf16.mxu1 %v3344_v5  ;;  %v3428_v2 = vld [vmem:[%s4337_s10 + $0x384] ss:$16 sps:$4 sm:$0xff]   ;;  %v3431_v5 = vld [vmem:[%s4337_s10 + $0x38c] ss:$16 sps:$4 sm:$0xff]  }
  0xda   : > { %2410 = vmatpush1.bf16.msra.mxu0 %v3346_v6  ;;  %2574 = vmatpush1.bf16.msra.mxu1 %v3347_v7  ;;  %v3426_v6 = vld [vmem:[%s4337_s10 + $0x380] ss:$16 sps:$4 sm:$0xff]   ;;  %v3429_v7 = vld [vmem:[%s4337_s10 + $0x388] ss:$16 sps:$4 sm:$0xff]  }
  0xdb   : > { %2411 = vmatprep.subr.bf16.mxu0 %v3348_v8  ;;  %2575 = vmatprep.subr.bf16.mxu1 %v3350_v9  ;;  %v3434_v8 = vld [vmem:[%s4337_s10 + $0x3a4] ss:$16 sps:$4 sm:$0xff]   ;;  %v3437_v9 = vld [vmem:[%s4337_s10 + $0x3ac] ss:$16 sps:$4 sm:$0xff]  }
  0xde   : > { %2412 = vmatpush1.bf16.msra.mxu0 %v3352_v11  ;;  %2576 = vmatpush1.bf16.msra.mxu1 %v3353_v12  ;;  %v3432_v11 = vld [vmem:[%s4337_s10 + $0x3a0] ss:$16 sps:$4 sm:$0xff]   ;;  %v3435_v12 = vld [vmem:[%s4337_s10 + $0x3a8] ss:$16 sps:$4 sm:$0xff]  }
  0xdf   : > { %2422 = vmatprep.subr.bf16.mxu0 %v3356_v15  ;;  %2586 = vmatprep.subr.bf16.mxu1 %v3359_v16  ;;  %v3443_v15 = vld [vmem:[%s4337_s10 + $0x3cc] ss:$16 sps:$4 sm:$0xff]   ;;  %v3438_v16 = vld [vmem:[%s4337_s10 + $0x3c0] ss:$16 sps:$4 sm:$0xff]  }
  0xe1   : > { %2414 = vmatmul.mubr.bf16.vlgmr.msra.gmra.mrb[0].mxu0 %v4426_v20  ;;  %2578 = vmatmul.mubr.bf16.vlgmr.msra.gmra.mrb[0].mxu1 %v4426_v20 }
  0xe2   : > { %2423 = vmatpush1.bf16.msra.mxu0 %v3354_v18  ;;  %2587 = vmatpush1.bf16.msra.mxu1 %v3357_v19  ;;  %v3446_v18 = vld [vmem:[%s4337_s10 + $0x3e4] ss:$16 sps:$4 sm:$0xff]   ;;  %v3449_v19 = vld [vmem:[%s4337_s10 + $0x3ec] ss:$16 sps:$4 sm:$0xff]  }
  0xe3   : > { %2424 = vmatprep.subr.bf16.mxu0 %v3362_v3  ;;  %2588 = vmatprep.subr.bf16.mxu1 %v3365_v23  ;;  %v3447_v3 = vld [vmem:[%s4337_s10 + $0x3e8] ss:$16 sps:$4 sm:$0xff]   ;;  %v3452_v23 = vld [vmem:[%s4337_s10 + $0x404] ss:$16 sps:$4 sm:$0xff]  }
  0xe4   : > { %2454 = vmatprep.mubr.bf16.mxu0 %v1091_v14  ;;  %2618 = vmatprep.mubr.bf16.mxu1 %v1091_v14  ;;  %v3455_v14 = vld [vmem:[%s4337_s10 + $0x40c] ss:$16 sps:$4 sm:$0xff]  }
  0xe6   : > { %2425 = vmatpush1.bf16.msra.mxu0 %v3360_v26  ;;  %2589 = vmatpush1.bf16.msra.mxu1 %v3363_v27  ;;  %v3450_v26 = vld [vmem:[%s4337_s10 + $0x400] ss:$16 sps:$4 sm:$0xff]   ;;  %v3453_v27 = vld [vmem:[%s4337_s10 + $0x408] ss:$16 sps:$4 sm:$0xff]  }
  0xe7   : > { %2426 = vmatprep.subr.bf16.mxu0 %v3368_v28  ;;  %2590 = vmatprep.subr.bf16.mxu1 %v3371_v10  ;;  %v1089_v28 = vcombine.high %v4426_v20, %v4426_v20  ;;  %v3458_v10 = vld [vmem:[%s4337_s10 + $0x424] ss:$16 sps:$4 sm:$0xff]  }
  0xe8   : > { %v3464_v20 = vld [vmem:[%s4337_s10 + $0x444] ss:$16 sps:$4 sm:$0xff]  }
  0xea   : > { %2427 = vmatpush1.bf16.msra.mxu0 %v3366_v22  ;;  %2591 = vmatpush1.bf16.msra.mxu1 %v3369_v29  ;;  %v3461_v22 = vld [vmem:[%s4337_s10 + $0x42c] ss:$16 sps:$4 sm:$0xff]   ;;  %v3456_v29 = vld [vmem:[%s4337_s10 + $0x420] ss:$16 sps:$4 sm:$0xff]  }
  0xeb   : > { %2428 = vmatprep.subr.bf16.mxu0 %v3374_v30  ;;  %2592 = vmatprep.subr.bf16.mxu1 %v3377_v31  ;;  %v3459_v30 = vld [vmem:[%s4337_s10 + $0x428] ss:$16 sps:$4 sm:$0xff]   ;;  %v3467_v31 = vld [vmem:[%s4337_s10 + $0x44c] ss:$16 sps:$4 sm:$0xff]  }
  0xee   : > { %2429 = vmatpush1.bf16.msra.mxu0 %v3372_v32  ;;  %2593 = vmatpush1.bf16.msra.mxu1 %v3375_v33  ;;  %v3462_v32 = vld [vmem:[%s4337_s10 + $0x440] ss:$16 sps:$4 sm:$0xff]   ;;  %v3465_v33 = vld [vmem:[%s4337_s10 + $0x448] ss:$16 sps:$4 sm:$0xff]  }
  0xef   : > { %2430 = vmatprep.subr.bf16.mxu0 %v3380_v34  ;;  %2594 = vmatprep.subr.bf16.mxu1 %v3383_v35  ;;  %v3470_v34 = vld [vmem:[%s4337_s10 + $0x464] ss:$16 sps:$4 sm:$0xff]   ;;  %v3473_v35 = vld [vmem:[%s4337_s10 + $0x46c] ss:$16 sps:$4 sm:$0xff]  }
  0xf2   : > { %2431 = vmatpush1.bf16.msra.mxu0 %v3378_v36  ;;  %2595 = vmatpush1.bf16.msra.mxu1 %v3381_v37  ;;  %v3468_v36 = vld [vmem:[%s4337_s10 + $0x460] ss:$16 sps:$4 sm:$0xff]   ;;  %v3471_v37 = vld [vmem:[%s4337_s10 + $0x468] ss:$16 sps:$4 sm:$0xff]  }
  0xf3   : > { %2432 = vmatprep.subr.bf16.mxu0 %v3386_v38  ;;  %2596 = vmatprep.subr.bf16.mxu1 %v3389_v39  ;;  %v3476_v38 = vld [vmem:[%s4337_s10 + $0x484] ss:$16 sps:$4 sm:$0xff]   ;;  %v3479_v39 = vld [vmem:[%s4337_s10 + $0x48c] ss:$16 sps:$4 sm:$0xff]  }
  0xf6   : > { %2433 = vmatpush1.bf16.msra.mxu0 %v3384_v40  ;;  %2597 = vmatpush1.bf16.msra.mxu1 %v3387_v41  ;;  %v3474_v40 = vld [vmem:[%s4337_s10 + $0x480] ss:$16 sps:$4 sm:$0xff]   ;;  %v3477_v41 = vld [vmem:[%s4337_s10 + $0x488] ss:$16 sps:$4 sm:$0xff]  }
  0xf7   : > { %2434 = vmatprep.subr.bf16.mxu0 %v3392_v42  ;;  %2598 = vmatprep.subr.bf16.mxu1 %v3395_v43  ;;  %v3482_v42 = vld [vmem:[%s4337_s10 + $0x4a4] ss:$16 sps:$4 sm:$0xff]   ;;  %v3485_v43 = vld [vmem:[%s4337_s10 + $0x4ac] ss:$16 sps:$4 sm:$0xff]  }
  0xfa   : > { %2435 = vmatpush1.bf16.msra.mxu0 %v3390_v44  ;;  %2599 = vmatpush1.bf16.msra.mxu1 %v3393_v45  ;;  %v3480_v44 = vld [vmem:[%s4337_s10 + $0x4a0] ss:$16 sps:$4 sm:$0xff]   ;;  %v3483_v45 = vld [vmem:[%s4337_s10 + $0x4a8] ss:$16 sps:$4 sm:$0xff]  }
  0xfb   : > { %2436 = vmatprep.subr.bf16.mxu0 %v3398_v46  ;;  %2600 = vmatprep.subr.bf16.mxu1 %v3401_v47  ;;  %v3488_v46 = vld [vmem:[%s4337_s10 + $0x4c4] ss:$16 sps:$4 sm:$0xff]   ;;  %v3491_v47 = vld [vmem:[%s4337_s10 + $0x4cc] ss:$16 sps:$4 sm:$0xff]  }
  0xfe   : > { %2437 = vmatpush1.bf16.msra.mxu0 %v3396_v48  ;;  %2601 = vmatpush1.bf16.msra.mxu1 %v3399_v49  ;;  %v3486_v48 = vld [vmem:[%s4337_s10 + $0x4c0] ss:$16 sps:$4 sm:$0xff]   ;;  %v3489_v49 = vld [vmem:[%s4337_s10 + $0x4c8] ss:$16 sps:$4 sm:$0xff]  }
  0xff   : > { %2438 = vmatprep.subr.bf16.mxu0 %v3404_v50  ;;  %2602 = vmatprep.subr.bf16.mxu1 %v3407_v51  ;;  %v3494_v50 = vld [vmem:[%s4337_s10 + $0x4e4] ss:$16 sps:$4 sm:$0xff]   ;;  %v3497_v51 = vld [vmem:[%s4337_s10 + $0x4ec] ss:$16 sps:$4 sm:$0xff]  }
 0x102   : > { %2439 = vmatpush1.bf16.msra.mxu0 %v3402_v52  ;;  %2603 = vmatpush1.bf16.msra.mxu1 %v3405_v53  ;;  %v3492_v52 = vld [vmem:[%s4337_s10 + $0x4e0] ss:$16 sps:$4 sm:$0xff]   ;;  %v3495_v53 = vld [vmem:[%s4337_s10 + $0x4e8] ss:$16 sps:$4 sm:$0xff]  }
 0x103   : > { %2440 = vmatprep.subr.bf16.mxu0 %v3410_v54  ;;  %2604 = vmatprep.subr.bf16.mxu1 %v3413_v55  ;;  %v3500_v54 = vld [vmem:[%s4337_s10 + $0x504] ss:$16 sps:$4 sm:$0xff]   ;;  %v3503_v55 = vld [vmem:[%s4337_s10 + $0x50c] ss:$16 sps:$4 sm:$0xff]  }
 0x106   : > { %2441 = vmatpush1.bf16.msra.mxu0 %v3408_v56  ;;  %2605 = vmatpush1.bf16.msra.mxu1 %v3411_v57  ;;  %v3498_v56 = vld [vmem:[%s4337_s10 + $0x500] ss:$16 sps:$4 sm:$0xff]   ;;  %v3501_v57 = vld [vmem:[%s4337_s10 + $0x508] ss:$16 sps:$4 sm:$0xff]  }
 0x107   : > { %2442 = vmatprep.subr.bf16.mxu0 %v3416_v58  ;;  %2606 = vmatprep.subr.bf16.mxu1 %v3419_v59  ;;  %v3506_v58 = vld [vmem:[%s4337_s10 + $0x524] ss:$16 sps:$4 sm:$0xff]   ;;  %v3509_v59 = vld [vmem:[%s4337_s10 + $0x52c] ss:$16 sps:$4 sm:$0xff]  }
 0x10a   : > { %2443 = vmatpush1.bf16.msra.mxu0 %v3414_v60  ;;  %2607 = vmatpush1.bf16.msra.mxu1 %v3417_v61  ;;  %v3504_v60 = vld [vmem:[%s4337_s10 + $0x520] ss:$16 sps:$4 sm:$0xff]   ;;  %v3507_v61 = vld [vmem:[%s4337_s10 + $0x528] ss:$16 sps:$4 sm:$0xff]  }
 0x10b   : > { %2444 = vmatprep.subr.bf16.mxu0 %v3422_v62  ;;  %2608 = vmatprep.subr.bf16.mxu1 %v3425_v63  ;;  %v3512_v62 = vld [vmem:[%s4337_s10 + $0x544] ss:$16 sps:$4 sm:$0xff]   ;;  %v3515_v63 = vld [vmem:[%s4337_s10 + $0x54c] ss:$16 sps:$4 sm:$0xff]  }
 0x10e   : > { %2445 = vmatpush1.bf16.msra.mxu0 %v3420_v0  ;;  %2609 = vmatpush1.bf16.msra.mxu1 %v3423_v1  ;;  %v3510_v0 = vld [vmem:[%s4337_s10 + $0x540] ss:$16 sps:$4 sm:$0xff]   ;;  %v3513_v1 = vld [vmem:[%s4337_s10 + $0x548] ss:$16 sps:$4 sm:$0xff]  }
 0x10f   : > { %2446 = vmatprep.subr.bf16.mxu0 %v3428_v2  ;;  %2610 = vmatprep.subr.bf16.mxu1 %v3431_v5  ;;  %v3518_v2 = vld [vmem:[%s4337_s10 + $0x564] ss:$16 sps:$4 sm:$0xff]   ;;  %v3521_v5 = vld [vmem:[%s4337_s10 + $0x56c] ss:$16 sps:$4 sm:$0xff]  }
 0x112   : > { %2447 = vmatpush1.bf16.msra.mxu0 %v3426_v6  ;;  %2611 = vmatpush1.bf16.msra.mxu1 %v3429_v7  ;;  %v3516_v6 = vld [vmem:[%s4337_s10 + $0x560] ss:$16 sps:$4 sm:$0xff]   ;;  %v3519_v7 = vld [vmem:[%s4337_s10 + $0x568] ss:$16 sps:$4 sm:$0xff]  }
 0x113   : > { %2448 = vmatprep.subr.bf16.mxu0 %v3434_v8  ;;  %2612 = vmatprep.subr.bf16.mxu1 %v3437_v9  ;;  %v3524_v8 = vld [vmem:[%s4337_s10 + $0x584] ss:$16 sps:$4 sm:$0xff]   ;;  %v3527_v9 = vld [vmem:[%s4337_s10 + $0x58c] ss:$16 sps:$4 sm:$0xff]  }
 0x116   : > { %2449 = vmatpush1.bf16.msra.mxu0 %v3432_v11  ;;  %2613 = vmatpush1.bf16.msra.mxu1 %v3435_v12  ;;  %v3522_v11 = vld [vmem:[%s4337_s10 + $0x580] ss:$16 sps:$4 sm:$0xff]   ;;  %v3525_v12 = vld [vmem:[%s4337_s10 + $0x588] ss:$16 sps:$4 sm:$0xff]  }
 0x117   : > { %2450 = vmatprep.subr.bf16.mxu0 %v3440_v13  ;;  %2614 = vmatprep.subr.bf16.mxu1 %v3443_v15  ;;  %v3530_v13 = vld [vmem:[%s4337_s10 + $0x5a4] ss:$16 sps:$4 sm:$0xff]   ;;  %v3533_v15 = vld [vmem:[%s4337_s10 + $0x5ac] ss:$16 sps:$4 sm:$0xff]  }
 0x11a   : > { %2451 = vmatpush1.bf16.msra.mxu0 %v3438_v16  ;;  %2615 = vmatpush1.bf16.msra.mxu1 %v3441_v17  ;;  %v3528_v16 = vld [vmem:[%s4337_s10 + $0x5a0] ss:$16 sps:$4 sm:$0xff]   ;;  %v3531_v17 = vld [vmem:[%s4337_s10 + $0x5a8] ss:$16 sps:$4 sm:$0xff]  }
 0x11b   : > { %2452 = vmatprep.subr.bf16.mxu0 %v3446_v18  ;;  %2616 = vmatprep.subr.bf16.mxu1 %v3449_v19  ;;  %v3536_v18 = vld [vmem:[%s4337_s10 + $0x5c4] ss:$16 sps:$4 sm:$0xff]   ;;  %v3539_v19 = vld [vmem:[%s4337_s10 + $0x5cc] ss:$16 sps:$4 sm:$0xff]  }
 0x11e   : > { %2453 = vmatpush1.bf16.msra.mxu0 %v3444_v21  ;;  %2617 = vmatpush1.bf16.msra.mxu1 %v3447_v3  ;;  %v3534_v21 = vld [vmem:[%s4337_s10 + $0x5c0] ss:$16 sps:$4 sm:$0xff]   ;;  %v3537_v3 = vld [vmem:[%s4337_s10 + $0x5c8] ss:$16 sps:$4 sm:$0xff]  }
 0x11f   : > { %2463 = vmatprep.subr.bf16.mxu0 %v3452_v23  ;;  %2627 = vmatprep.subr.bf16.mxu1 %v3455_v14  ;;  %v3542_v23 = vld [vmem:[%s4337_s10 + $0x5e4] ss:$16 sps:$4 sm:$0xff]   ;;  %v3545_v14 = vld [vmem:[%s4337_s10 + $0x5ec] ss:$16 sps:$4 sm:$0xff]  }
 0x121   : > { %2455 = vmatmul.mubr.bf16.vlgmr.msra.gmra.mrb[0].mxu0 %v1089_v28  ;;  %2619 = vmatmul.mubr.bf16.vlgmr.msra.gmra.mrb[0].mxu1 %v1089_v28  ;;  %v3549_v28 = vld [vmem:[%s4337_s10 + $0x604] ss:$16 sps:$4 sm:$0xff]  }
 0x122   : > { %2464 = vmatpush1.bf16.msra.mxu0 %v3450_v26  ;;  %2628 = vmatpush1.bf16.msra.mxu1 %v3453_v27  ;;  %v3540_v26 = vld [vmem:[%s4337_s10 + $0x5e0] ss:$16 sps:$4 sm:$0xff]   ;;  %v3543_v27 = vld [vmem:[%s4337_s10 + $0x5e8] ss:$16 sps:$4 sm:$0xff]  }
 0x123   : > { %2465 = vmatprep.subr.bf16.mxu0 %v3458_v10  ;;  %2629 = vmatprep.subr.bf16.mxu1 %v3461_v22  ;;  %v3552_v10 = vld [vmem:[%s4337_s10 + $0x60c] ss:$16 sps:$4 sm:$0xff]   ;;  %v3547_v22 = vld [vmem:[%s4337_s10 + $0x600] ss:$16 sps:$4 sm:$0xff]  }
 0x124   : > { %2495 = vmatprep.mubr.bf16.mxu0 %v4431_v24  ;;  %2659 = vmatprep.mubr.bf16.mxu1 %v4431_v24 }
 0x126   : > { %2466 = vmatpush1.bf16.msra.mxu0 %v3456_v29  ;;  %2630 = vmatpush1.bf16.msra.mxu1 %v3459_v30  ;;  %v3550_v29 = vld [vmem:[%s4337_s10 + $0x608] ss:$16 sps:$4 sm:$0xff]   ;;  %v3555_v30 = vld [vmem:[%s4337_s10 + $0x624] ss:$16 sps:$4 sm:$0xff]  }
 0x127   : > { %2467 = vmatprep.subr.bf16.mxu0 %v3464_v20  ;;  %2631 = vmatprep.subr.bf16.mxu1 %v3467_v31  ;;  %v3558_v20 = vld [vmem:[%s4337_s10 + $0x62c] ss:$16 sps:$4 sm:$0xff]   ;;  %v1092_v31 = vcombine.high %v4431_v24, %v4431_v24  ;;  %v3559_v24 = vld [vmem:[%s4337_s10 + $0x640] ss:$16 sps:$4 sm:$0xff]  }
 0x12a   : > { %2468 = vmatpush1.bf16.msra.mxu0 %v3462_v32  ;;  %2632 = vmatpush1.bf16.msra.mxu1 %v3465_v33  ;;  %v3553_v32 = vld [vmem:[%s4337_s10 + $0x620] ss:$16 sps:$4 sm:$0xff]   ;;  %v3556_v33 = vld [vmem:[%s4337_s10 + $0x628] ss:$16 sps:$4 sm:$0xff]  }
 0x12b   : > { %2469 = vmatprep.subr.bf16.mxu0 %v3470_v34  ;;  %2633 = vmatprep.subr.bf16.mxu1 %v3473_v35  ;;  %v3561_v34 = vld [vmem:[%s4337_s10 + $0x644] ss:$16 sps:$4 sm:$0xff]   ;;  %v3564_v35 = vld [vmem:[%s4337_s10 + $0x64c] ss:$16 sps:$4 sm:$0xff]  }
 0x12e   : > { %2470 = vmatpush1.bf16.msra.mxu0 %v3468_v36  ;;  %2634 = vmatpush1.bf16.msra.mxu1 %v3471_v37  ;;  %v3562_v36 = vld [vmem:[%s4337_s10 + $0x648] ss:$16 sps:$4 sm:$0xff]   ;;  %v3567_v37 = vld [vmem:[%s4337_s10 + $0x664] ss:$16 sps:$4 sm:$0xff]  }
 0x12f   : > { %2471 = vmatprep.subr.bf16.mxu0 %v3476_v38  ;;  %2635 = vmatprep.subr.bf16.mxu1 %v3479_v39  ;;  %v3570_v38 = vld [vmem:[%s4337_s10 + $0x66c] ss:$16 sps:$4 sm:$0xff]   ;;  %v3565_v39 = vld [vmem:[%s4337_s10 + $0x660] ss:$16 sps:$4 sm:$0xff]  }
 0x132   : > { %2472 = vmatpush1.bf16.msra.mxu0 %v3474_v40  ;;  %2636 = vmatpush1.bf16.msra.mxu1 %v3477_v41  ;;  %v3568_v40 = vld [vmem:[%s4337_s10 + $0x668] ss:$16 sps:$4 sm:$0xff]   ;;  %v3573_v41 = vld [vmem:[%s4337_s10 + $0x684] ss:$16 sps:$4 sm:$0xff]  }
 0x133   : > { %2473 = vmatprep.subr.bf16.mxu0 %v3482_v42  ;;  %2637 = vmatprep.subr.bf16.mxu1 %v3485_v43  ;;  %v3576_v42 = vld [vmem:[%s4337_s10 + $0x68c] ss:$16 sps:$4 sm:$0xff]   ;;  %v3571_v43 = vld [vmem:[%s4337_s10 + $0x680] ss:$16 sps:$4 sm:$0xff]  }
 0x136   : > { %2474 = vmatpush1.bf16.msra.mxu0 %v3480_v44  ;;  %2638 = vmatpush1.bf16.msra.mxu1 %v3483_v45  ;;  %v3574_v44 = vld [vmem:[%s4337_s10 + $0x688] ss:$16 sps:$4 sm:$0xff]   ;;  %v3579_v45 = vld [vmem:[%s4337_s10 + $0x6a4] ss:$16 sps:$4 sm:$0xff]  }
 0x137   : > { %2475 = vmatprep.subr.bf16.mxu0 %v3488_v46  ;;  %2639 = vmatprep.subr.bf16.mxu1 %v3491_v47  ;;  %v3582_v46 = vld [vmem:[%s4337_s10 + $0x6ac] ss:$16 sps:$4 sm:$0xff]   ;;  %v3577_v47 = vld [vmem:[%s4337_s10 + $0x6a0] ss:$16 sps:$4 sm:$0xff]  }
 0x13a   : > { %2476 = vmatpush1.bf16.msra.mxu0 %v3486_v48  ;;  %2640 = vmatpush1.bf16.msra.mxu1 %v3489_v49  ;;  %v3580_v48 = vld [vmem:[%s4337_s10 + $0x6a8] ss:$16 sps:$4 sm:$0xff]   ;;  %v3585_v49 = vld [vmem:[%s4337_s10 + $0x6c4] ss:$16 sps:$4 sm:$0xff]  }
 0x13b   : > { %2477 = vmatprep.subr.bf16.mxu0 %v3494_v50  ;;  %2641 = vmatprep.subr.bf16.mxu1 %v3497_v51  ;;  %v3588_v50 = vld [vmem:[%s4337_s10 + $0x6cc] ss:$16 sps:$4 sm:$0xff]   ;;  %v3583_v51 = vld [vmem:[%s4337_s10 + $0x6c0] ss:$16 sps:$4 sm:$0xff]  }
 0x13e   : > { %2478 = vmatpush1.bf16.msra.mxu0 %v3492_v52  ;;  %2642 = vmatpush1.bf16.msra.mxu1 %v3495_v53  ;;  %v3586_v52 = vld [vmem:[%s4337_s10 + $0x6c8] ss:$16 sps:$4 sm:$0xff]   ;;  %v3591_v53 = vld [vmem:[%s4337_s10 + $0x6e4] ss:$16 sps:$4 sm:$0xff]  }
 0x13f   : > { %2479 = vmatprep.subr.bf16.mxu0 %v3500_v54  ;;  %2643 = vmatprep.subr.bf16.mxu1 %v3503_v55  ;;  %v3594_v54 = vld [vmem:[%s4337_s10 + $0x6ec] ss:$16 sps:$4 sm:$0xff]   ;;  %v3589_v55 = vld [vmem:[%s4337_s10 + $0x6e0] ss:$16 sps:$4 sm:$0xff]  }
 0x142   : > { %2480 = vmatpush1.bf16.msra.mxu0 %v3498_v56  ;;  %2644 = vmatpush1.bf16.msra.mxu1 %v3501_v57  ;;  %v3592_v56 = vld [vmem:[%s4337_s10 + $0x6e8] ss:$16 sps:$4 sm:$0xff]   ;;  %v3597_v57 = vld [vmem:[%s4337_s10 + $0x704] ss:$16 sps:$4 sm:$0xff]  }
 0x143   : > { %2481 = vmatprep.subr.bf16.mxu0 %v3506_v58  ;;  %2645 = vmatprep.subr.bf16.mxu1 %v3509_v59  ;;  %v3600_v58 = vld [vmem:[%s4337_s10 + $0x70c] ss:$16 sps:$4 sm:$0xff]   ;;  %v3595_v59 = vld [vmem:[%s4337_s10 + $0x700] ss:$16 sps:$4 sm:$0xff]  }
 0x146   : > { %2482 = vmatpush1.bf16.msra.mxu0 %v3504_v60  ;;  %2646 = vmatpush1.bf16.msra.mxu1 %v3507_v61  ;;  %v3598_v60 = vld [vmem:[%s4337_s10 + $0x708] ss:$16 sps:$4 sm:$0xff]   ;;  %v3603_v61 = vld [vmem:[%s4337_s10 + $0x724] ss:$16 sps:$4 sm:$0xff]  }
 0x147   : > { %2483 = vmatprep.subr.bf16.mxu0 %v3512_v62  ;;  %2647 = vmatprep.subr.bf16.mxu1 %v3515_v63  ;;  %v3606_v62 = vld [vmem:[%s4337_s10 + $0x72c] ss:$16 sps:$4 sm:$0xff]   ;;  %v3601_v63 = vld [vmem:[%s4337_s10 + $0x720] ss:$16 sps:$4 sm:$0xff]  }
 0x14a   : > { %2484 = vmatpush1.bf16.msra.mxu0 %v3510_v0  ;;  %2648 = vmatpush1.bf16.msra.mxu1 %v3513_v1  ;;  %v3604_v0 = vld [vmem:[%s4337_s10 + $0x728] ss:$16 sps:$4 sm:$0xff]   ;;  %v3609_v1 = vld [vmem:[%s4337_s10 + $0x744] ss:$16 sps:$4 sm:$0xff]  }
 0x14b   : > { %2485 = vmatprep.subr.bf16.mxu0 %v3518_v2  ;;  %2649 = vmatprep.subr.bf16.mxu1 %v3521_v5  ;;  %v3612_v2 = vld [vmem:[%s4337_s10 + $0x74c] ss:$16 sps:$4 sm:$0xff]   ;;  %v3607_v5 = vld [vmem:[%s4337_s10 + $0x740] ss:$16 sps:$4 sm:$0xff]  }
 0x14e   : > { %2486 = vmatpush1.bf16.msra.mxu0 %v3516_v6  ;;  %2650 = vmatpush1.bf16.msra.mxu1 %v3519_v7  ;;  %v3610_v6 = vld [vmem:[%s4337_s10 + $0x748] ss:$16 sps:$4 sm:$0xff]   ;;  %v3615_v7 = vld [vmem:[%s4337_s10 + $0x764] ss:$16 sps:$4 sm:$0xff]  }
 0x14f   : > { %2487 = vmatprep.subr.bf16.mxu0 %v3524_v8  ;;  %2651 = vmatprep.subr.bf16.mxu1 %v3527_v9  ;;  %v3618_v8 = vld [vmem:[%s4337_s10 + $0x76c] ss:$16 sps:$4 sm:$0xff]   ;;  %v3613_v9 = vld [vmem:[%s4337_s10 + $0x760] ss:$16 sps:$4 sm:$0xff]  }
 0x152   : > { %2488 = vmatpush1.bf16.msra.mxu0 %v3522_v11  ;;  %2652 = vmatpush1.bf16.msra.mxu1 %v3525_v12  ;;  %v3616_v11 = vld [vmem:[%s4337_s10 + $0x768] ss:$16 sps:$4 sm:$0xff]   ;;  %v3621_v12 = vld [vmem:[%s4337_s10 + $0x784] ss:$16 sps:$4 sm:$0xff]  }
 0x153   : > { %2489 = vmatprep.subr.bf16.mxu0 %v3530_v13  ;;  %2653 = vmatprep.subr.bf16.mxu1 %v3533_v15  ;;  %v3624_v13 = vld [vmem:[%s4337_s10 + $0x78c] ss:$16 sps:$4 sm:$0xff]   ;;  %v3619_v15 = vld [vmem:[%s4337_s10 + $0x780] ss:$16 sps:$4 sm:$0xff]  }
 0x156   : > { %2490 = vmatpush1.bf16.msra.mxu0 %v3528_v16  ;;  %2654 = vmatpush1.bf16.msra.mxu1 %v3531_v17  ;;  %v3622_v16 = vld [vmem:[%s4337_s10 + $0x788] ss:$16 sps:$4 sm:$0xff]   ;;  %v3627_v17 = vld [vmem:[%s4337_s10 + $0x7a4] ss:$16 sps:$4 sm:$0xff]  }
 0x157   : > { %2491 = vmatprep.subr.bf16.mxu0 %v3536_v18  ;;  %2655 = vmatprep.subr.bf16.mxu1 %v3539_v19  ;;  %v3630_v18 = vld [vmem:[%s4337_s10 + $0x7ac] ss:$16 sps:$4 sm:$0xff]   ;;  %v3625_v19 = vld [vmem:[%s4337_s10 + $0x7a0] ss:$16 sps:$4 sm:$0xff]  }
 0x15a   : > { %2492 = vmatpush1.bf16.msra.mxu0 %v3534_v21  ;;  %2656 = vmatpush1.bf16.msra.mxu1 %v3537_v3  ;;  %v3628_v21 = vld [vmem:[%s4337_s10 + $0x7a8] ss:$16 sps:$4 sm:$0xff]   ;;  %v3633_v3 = vld [vmem:[%s4337_s10 + $0x7c4] ss:$16 sps:$4 sm:$0xff]  }
 0x15b   : > { %2493 = vmatprep.subr.bf16.mxu0 %v3542_v23  ;;  %2657 = vmatprep.subr.bf16.mxu1 %v3545_v14  ;;  %v3636_v23 = vld [vmem:[%s4337_s10 + $0x7cc] ss:$16 sps:$4 sm:$0xff]   ;;  %v3631_v14 = vld [vmem:[%s4337_s10 + $0x7c0] ss:$16 sps:$4 sm:$0xff]  }
 0x15e   : > { %2494 = vmatpush1.bf16.msra.mxu0 %v3540_v26  ;;  %2658 = vmatpush1.bf16.msra.mxu1 %v3543_v27  ;;  %v3634_v26 = vld [vmem:[%s4337_s10 + $0x7c8] ss:$16 sps:$4 sm:$0xff]   ;;  %v3639_v27 = vld [vmem:[%s4337_s10 + $0x7e4] ss:$16 sps:$4 sm:$0xff]  }
 0x15f   : > { %2504 = vmatprep.subr.bf16.mxu0 %v3549_v28  ;;  %2668 = vmatprep.subr.bf16.mxu1 %v3552_v10  ;;  %v3642_v28 = vld [vmem:[%s4337_s10 + $0x7ec] ss:$16 sps:$4 sm:$0xff]   ;;  %v3637_v10 = vld [vmem:[%s4337_s10 + $0x7e0] ss:$16 sps:$4 sm:$0xff]  }
 0x161   : > { %2496 = vmatmul.mubr.bf16.vlgmr.msra.gmra.mrb[0].mxu0 %v4434_v25  ;;  %2660 = vmatmul.mubr.bf16.vlgmr.msra.gmra.mrb[0].mxu1 %v4434_v25 }
 0x162   : > { %2505 = vmatpush1.bf16.msra.mxu0 %v3547_v22  ;;  %2669 = vmatpush1.bf16.msra.mxu1 %v3550_v29  ;;  %v3640_v22 = vld [vmem:[%s4337_s10 + $0x7e8] ss:$16 sps:$4 sm:$0xff]   ;;  %v1090_v29 = vcombine.high %v4434_v25, %v4434_v25  ;;  %v2753_v25 = vsub.s32 3, %v4335_v4 }
 0x163   : > { %2506 = vmatprep.subr.bf16.mxu0 %v3555_v30  ;;  %2670 = vmatprep.subr.bf16.mxu1 %v3558_v20  ;;  %v2741_v30 = vsub.s32 0, %v4335_v4  ;;  %v2745_v20 = vsub.s32 1, %v4335_v4 }
 0x164   : > { %2536 = vmatprep.mubr.bf16.mxu0 %v1092_v31  ;;  %2700 = vmatprep.mubr.bf16.mxu1 %v1092_v31  ;;  %v2749_v31 = vsub.s32 2, %v4335_v4 }
 0x166   : > { %2507 = vmatpush1.bf16.msra.mxu0 %v3553_v32  ;;  %2671 = vmatpush1.bf16.msra.mxu1 %v3556_v33  ;;  %v2737_v32 = vld [vmem:[%s777_s21] sm:$0xf]  ;;  %v3724_v33 = vmov 1983009808  }
 0x167   : > { %2508 = vmatprep.subr.bf16.mxu0 %v3561_v34  ;;  %2672 = vmatprep.subr.bf16.mxu1 %v3564_v35  ;;  %v2716_v34 = vunpack.c.l.s4 %v3724_v33  ;;  %v2742_v35 = vrot.slane %v2737_v32, %v2741_v30 }
 0x16a   : > { %2509 = vmatpush1.bf16.msra.mxu0 %v3559_v24  ;;  %2673 = vmatpush1.bf16.msra.mxu1 %v3562_v36  ;;  %v2746_v24 = vrot.slane %v2737_v32, %v2745_v20  ;;  %v2750_v36 = vrot.slane %v2737_v32, %v2749_v31 }
 0x16b   : > { %2510 = vmatprep.subr.bf16.mxu0 %v3567_v37  ;;  %2674 = vmatprep.subr.bf16.mxu1 %v3570_v38  ;;  %v2754_v37 = vrot.slane %v2737_v32, %v2753_v25  ;;  %v2717_v38 = vunpack.c.0.s8 %v2716_v34 }
 0x16e   : > { %2511 = vmatpush1.bf16.msra.mxu0 %v3565_v39  ;;  %2675 = vmatpush1.bf16.msra.mxu1 %v3568_v40  ;;  %v2755_v39 = vcombine.low %v2742_v35, %v2746_v24  ;;  %v2756_v40 = vcombine.low %v2750_v36, %v2754_v37 }
 0x16f   : > { %2512 = vmatprep.subr.bf16.mxu0 %v3573_v41  ;;  %2676 = vmatprep.subr.bf16.mxu1 %v3576_v42 }
 0x172   : > { %2513 = vmatpush1.bf16.msra.mxu0 %v3571_v43  ;;  %2677 = vmatpush1.bf16.msra.mxu1 %v3574_v44  ;;  %v2720_v43 = vsub.s32 %v2717_v38, %v4335_v4 }
 0x173   : > { %2514 = vmatprep.subr.bf16.mxu0 %v3579_v45  ;;  %2678 = vmatprep.subr.bf16.mxu1 %v3582_v46 }
 0x176   : > { %2515 = vmatpush1.bf16.msra.mxu0 %v3577_v47  ;;  %2679 = vmatpush1.bf16.msra.mxu1 %v3580_v48 }
 0x177   : > { %2516 = vmatprep.subr.bf16.mxu0 %v3585_v49  ;;  %2680 = vmatprep.subr.bf16.mxu1 %v3588_v50  ;;  %v2763_v50 = vrot.slane %v2755_v39, %v2720_v43 }
 0x17a   : > { %2517 = vmatpush1.bf16.msra.mxu0 %v3583_v51  ;;  %2681 = vmatpush1.bf16.msra.mxu1 %v3586_v52  ;;  %v2770_v51 = vrot.slane %v2756_v40, %v2720_v43 }
 0x17b   : > { %2518 = vmatprep.subr.bf16.mxu0 %v3591_v53  ;;  %2682 = vmatprep.subr.bf16.mxu1 %v3594_v54 }
 0x17e   : > { %2519 = vmatpush1.bf16.msra.mxu0 %v3589_v55  ;;  %2683 = vmatpush1.bf16.msra.mxu1 %v3592_v56 }
 0x17f   : > { %2520 = vmatprep.subr.bf16.mxu0 %v3597_v57  ;;  %2684 = vmatprep.subr.bf16.mxu1 %v3600_v58  ;;  %v2771_v57 = vcombine.low %v2763_v50, %v2770_v51 }
 0x182   : > { %2521 = vmatpush1.bf16.msra.mxu0 %v3595_v59  ;;  %2685 = vmatpush1.bf16.msra.mxu1 %v3598_v60 }
 0x183   : > { %2522 = vmatprep.subr.bf16.mxu0 %v3603_v61  ;;  %2686 = vmatprep.subr.bf16.mxu1 %v3606_v62 }
 0x186   : > { %2523 = vmatpush1.bf16.msra.mxu0 %v3601_v63  ;;  %2687 = vmatpush1.bf16.msra.mxu1 %v3604_v0 }
 0x187   : > { %2524 = vmatprep.subr.bf16.mxu0 %v3609_v1  ;;  %2688 = vmatprep.subr.bf16.mxu1 %v3612_v2 }
 0x18a   : > { %2525 = vmatpush1.bf16.msra.mxu0 %v3607_v5  ;;  %2689 = vmatpush1.bf16.msra.mxu1 %v3610_v6 }
 0x18b   : > { %2526 = vmatprep.subr.bf16.mxu0 %v3615_v7  ;;  %2690 = vmatprep.subr.bf16.mxu1 %v3618_v8 }
 0x18e   : > { %2527 = vmatpush1.bf16.msra.mxu0 %v3613_v9  ;;  %2691 = vmatpush1.bf16.msra.mxu1 %v3616_v11 }
 0x18f   : > { %2528 = vmatprep.subr.bf16.mxu0 %v3621_v12  ;;  %2692 = vmatprep.subr.bf16.mxu1 %v3624_v13 }
 0x192   : > { %2529 = vmatpush1.bf16.msra.mxu0 %v3619_v15  ;;  %2693 = vmatpush1.bf16.msra.mxu1 %v3622_v16 }
 0x193   : > { %2530 = vmatprep.subr.bf16.mxu0 %v3627_v17  ;;  %2694 = vmatprep.subr.bf16.mxu1 %v3630_v18 }
 0x196   : > { %2531 = vmatpush1.bf16.msra.mxu0 %v3625_v19  ;;  %2695 = vmatpush1.bf16.msra.mxu1 %v3628_v21 }
 0x197   : > { %2532 = vmatprep.subr.bf16.mxu0 %v3633_v3  ;;  %2696 = vmatprep.subr.bf16.mxu1 %v3636_v23 }
 0x19a   : > { %2533 = vmatpush1.bf16.msra.mxu0 %v3631_v14  ;;  %2697 = vmatpush1.bf16.msra.mxu1 %v3634_v26 }
 0x19b   : > { %2534 = vmatprep.subr.bf16.mxu0 %v3639_v27  ;;  %2698 = vmatprep.subr.bf16.mxu1 %v3642_v28 }
 0x19e   : > { %2535 = vmatpush1.bf16.msra.mxu0 %v3637_v10  ;;  %2699 = vmatpush1.bf16.msra.mxu1 %v3640_v22 }
 0x1a1   : > { %2537 = vmatmul.mubr.bf16.vlgmr.msra.gmra.mrb[0].mxu0 %v1090_v29  ;;  %2701 = vmatmul.mubr.bf16.vlgmr.msra.gmra.mrb[0].mxu1 %v1090_v29 }
 0x274   : > { %v2538_v41 = vpop.f32.mrb[0].mxu0  ;;  %v2702_v42 = vpop.f32.mrb[0].mxu1 }
 0x275   : > { %v2540_v44 = vpop.f32.mrb[1].mxu0  ;;  %v2704_v45 = vpop.f32.mrb[1].mxu1 }
 0x276   : > { %v2713_v46 = vcombine.low %v2538_v41, %v2540_v44  ;;  %v2714_v47 = vcombine.low %v2702_v42, %v2704_v45  ;;  %v2542_v48 = vpop.f32.mrb[2].mxu0  ;;  %v2706_v49 = vpop.f32.mrb[2].mxu1 }
 0x277   : > { %v2543_v52 = vpop.f32.mrb[3].mxu0  ;;  %v2707_v53 = vpop.f32.mrb[3].mxu1 }
 0x278   : > { %v2721_v54 = vrot.slane %v2713_v46, %v2720_v43  ;;  %v2728_v55 = vrot.slane %v2714_v47, %v2720_v43 }
 0x27a   : > { %v2729_v56 = vcombine.low %v2721_v54, %v2728_v55 }
 0x27c   : > { %v2773_v4 = vadd.f32 %v2771_v57, %v2729_v56 }
 0x27e   : > { %2774 = vst [vmem:[%s762_s27] sm:$0xff] %v2773_v4 }
 0x27f   : > { %3656 = shalt.err (!%p3653_p8)
}
 0x280   : > { %s3657_s6 = scalar_lea.hbm %s4650_s4, 128  ;;  %s3661_s18 = scalar_lea.hbm %s4702_s3, 256 }
 0x281   : > { %p3658_p11 = scmp.ne.s32.totalorder %s4650_s4, %s3657_s6  ;;  %p3662_p0 = scmp.lt.u32.totalorder %s4650_s4, %s4702_s3 }
 0x282   : > { %p3663_p1 = scmp.lt.u32.totalorder %s3661_s18, %s3657_s6  ;;  %p3665_p3 = scmp.lt.u32.totalorder %s3657_s6, %s4650_s4 }
 0x283   : > { %p3659_p12 = pnand %p3658_p11, %p3785_p5 }
 0x284   : > { %p3664_p2 = por %p3663_p1, %p3662_p0 }
 0x285   : > { %p3660_p13 = pneg %p3659_p12 }
 0x286   : > { %p3666_p4 = por %p3665_p3, %p3664_p2 }
 0x288   : > { %p3667_p6 = pnand %p3666_p4, %p3660_p13 }
 0x28a   : > { %3670 = shalt.err (!%p3667_p6)
}
 0x28b   : > { %3200 = dma.vmem_to_hbm [thread:$0]  (%p3785_p5), %s4652_s28, 128, %s4650_s4, %s2776_s5  }
 0x28c PF: > { %s2804_s23 = sand.u32 1, %s3701_s12   ;;  %p3203_p7 = pnand %p2905_p10, %p3796_p9 }
 0x28d   : > { %s2805_s26 = scalar_lea.sflag [#allocation4], %s2804_s23 }
 0x28e   : > { %3696 = dma.done.wait (!%p3203_p7), %s2805_s26, 128  }
 0x28f   : > { %3698 = vsyncadd (!%p3203_p7), %s2805_s26, 4294967168  ;;  %s16_s17 = sadd.s32 1, %s3721_s17   ;;  %s4705_s12 = smov %s3705_s13 }
 0x290   : > { %p13_p8 = scmp.ge.s32.totalorder %s16_s17, 4   ;;  %s4706_s13 = smov %s3709_s14 }
 0x291   : > { %s4707_s14 = smov %s3794_s24  ;;  %s4708_s15 = smov %s3717_s16 }
 0x292   : > { %s4709_s16 = smov %s4711_s20  ;;  %15 = sbr.rel (!%p13_p8) target bundleno = 4 (0x4), region = 109 }
 0x299   :  { %2810 = vsyncpa [#allocation4], 1 }
 0x29a   :  { %2812 = vsyncpa [#allocation4 + $0x1], 1 }

</bundles_post_ra>
